<compile_context>
chip_gen: v7x
topology: tpu7x:2x2x1
jax: 0.10.0
libtpu: 0.0.40
codegen_flags: <defaults>
</compile_context>

<pallas_src>
import functools

import jax
import jax.numpy as jnp
import numpy as np
from jax import lax
from jax.experimental import pallas as pl
from jax.experimental.pallas import tpu as pltpu

LANE = 128  # TPU lane width; channel-pad target.


# ---------------------------------------------------------------------------
# In-kernel helpers
# ---------------------------------------------------------------------------
def _conv3x3(src_ref, w_ref, b_row, *, W, TOP, HW):
    """3x3 SAME conv on a spatially padded, flattened image tile.

    src_ref: (Lpad, Cp) VMEM ref. Rows [TOP, TOP+HW) hold the H*W image pixels
             (row-major); >= W+1 zero rows live above and below.
    w_ref:   (9, Cp, Cp) ref; tap t = ky*3+kx holds w[ky, kx] as (Cin, Cout).
    b_row:   (1, Cp) fp32 bias row.
    Returns a (HW, Cp) fp32 value.
    """
    # Accumulate per horizontal offset dx so the W-boundary fix is two masks
    # on the accumulators instead of six masks on the inputs.
    acc = {-1: None, 0: None, 1: None}
    for ky in range(3):
        for kx in range(3):
            dy, dx = ky - 1, kx - 1
            start = TOP + dy * W + dx
            window = src_ref[start:start + HW, :].astype(jnp.float32)   # (HW, Cp)
            part = jnp.dot(window, w_ref[ky * 3 + kx].astype(jnp.float32),
                           preferred_element_type=jnp.float32)          # (HW, Cp)
            acc[dx] = part if acc[dx] is None else acc[dx] + part

    # Column index within each image row; kills the wrap-around contamination
    # of the flattened +/-1 shifts at the left/right image borders.
    wpos = lax.broadcasted_iota(jnp.int32, (HW, 1), 0) % W
    out = acc[0]
    out = out + jnp.where(wpos != 0, acc[-1], 0.0)
    out = out + jnp.where(wpos != W - 1, acc[1], 0.0)
    return out + b_row


def _rcab_kernel(x_ref, w1_ref, b1_ref, w2_ref, b2_ref,
                 wd1_ref, bd1_ref, wd2_ref, bd2_ref,
                 o_ref, r1pad_ref, *, W, TOP, HW):
    """One full RCAB block for one batch element (padded layout in/out)."""
    cp = o_ref.shape[1]

    # conv1 + ReLU, straight off the padded activation tile resident in VMEM.
    r1 = _conv3x3(x_ref, w1_ref, b1_ref[...], W=W, TOP=TOP, HW=HW)
    r1 = jnp.maximum(r1, 0.0)

    # Stage r1 into a zero-padded VMEM scratch so conv2 can reuse the same
    # shifted-window trick; the intermediate never touches HBM.
    r1pad_ref[:TOP, :] = jnp.zeros((TOP, cp), jnp.float32)
    r1pad_ref[TOP:TOP + HW, :] = r1
    r1pad_ref[TOP + HW:, :] = jnp.zeros((r1pad_ref.shape[0] - TOP - HW, cp),
                                        jnp.float32)

    # conv2 (no activation).
    r = _conv3x3(r1pad_ref, w2_ref, b2_ref[...], W=W, TOP=TOP, HW=HW)

    # Channel attention: global average pool + FC/ReLU + FC/Sigmoid gate.
    y = jnp.mean(r, axis=0, keepdims=True)                               # (1, Cp)
    z = jnp.dot(y, wd1_ref[...], preferred_element_type=jnp.float32) + bd1_ref[...]
    z = jnp.maximum(z, 0.0)                                              # (1, Cr)
    s = jnp.dot(z, wd2_ref[...], preferred_element_type=jnp.float32) + bd2_ref[...]
    s = jax.nn.sigmoid(s)                                                # (1, Cp)

    # RCAB residual; emit the padded canonical layout for the next block.
    x_in = x_ref[TOP:TOP + HW, :].astype(jnp.float32)
    out = x_in + r * s
    o_ref[:TOP, :] = jnp.zeros((TOP, cp), o_ref.dtype)
    o_ref[TOP:TOP + HW, :] = out.astype(o_ref.dtype)
    o_ref[TOP + HW:, :] = jnp.zeros((o_ref.shape[0] - TOP - HW, cp), o_ref.dtype)


def _tail_kernel(h_ref, x_ref, wf_ref, bf_ref, o_ref, *, W, TOP, HW):
    """Tail conv of the group fused with the long residual add."""
    conv = _conv3x3(h_ref, wf_ref, bf_ref[...], W=W, TOP=TOP, HW=HW)
    res = x_ref[TOP:TOP + HW, :].astype(jnp.float32)
    o_ref[...] = (conv + res).astype(o_ref.dtype)


# ---------------------------------------------------------------------------
# pallas_call wrappers
# ---------------------------------------------------------------------------
def _bcast_spec(shape):
    return pl.BlockSpec(shape, lambda n: (0,) * len(shape))


def _pad_conv_w(w, C, Cp):
    # (3, 3, Cin, Cout) -> (9, Cp, Cp) with zero padding of both channel dims.
    return jnp.pad(w, ((0, 0), (0, 0), (0, Cp - C), (0, Cp - C))).reshape(9, Cp, Cp)


def _rcab_pallas(h, blk, *, C, Cp, W, TOP, HW):
    N, Lpad, _ = h.shape
    assert blk["w1"].shape[:2] == (3, 3)
    Cr = blk["wd1"].shape[1]

    w1p = _pad_conv_w(blk["w1"], C, Cp)
    w2p = _pad_conv_w(blk["w2"], C, Cp)
    b1p = jnp.pad(blk["b1"], (0, Cp - C)).reshape(1, Cp)
    b2p = jnp.pad(blk["b2"], (0, Cp - C)).reshape(1, Cp)
    wd1p = jnp.pad(blk["wd1"], ((0, Cp - C), (0, 0)))            # (Cp, Cr)
    bd1r = blk["bd1"].reshape(1, Cr)
    wd2p = jnp.pad(blk["wd2"], ((0, 0), (0, Cp - C)))            # (Cr, Cp)
    bd2p = jnp.pad(blk["bd2"], (0, Cp - C)).reshape(1, Cp)

    kernel = functools.partial(_rcab_kernel, W=W, TOP=TOP, HW=HW)
    act_spec = pl.BlockSpec((pl.Squeezed(), Lpad, Cp), lambda n: (n, 0, 0))

    return pl.pallas_call(
        kernel,
        out_shape=jax.ShapeDtypeStruct((N, Lpad, Cp), h.dtype),
        grid=(N,),
        in_specs=[
            act_spec,
            _bcast_spec((9, Cp, Cp)), _bcast_spec((1, Cp)),
            _bcast_spec((9, Cp, Cp)), _bcast_spec((1, Cp)),
            _bcast_spec((Cp, Cr)), _bcast_spec((1, Cr)),
            _bcast_spec((Cr, Cp)), _bcast_spec((1, Cp)),
        ],
        out_specs=pl.BlockSpec((pl.Squeezed(), Lpad, Cp), lambda n: (n, 0, 0)),
        scratch_shapes=[pltpu.VMEM((Lpad, Cp), jnp.float32)],
        compiler_params=pltpu.CompilerParams(dimension_semantics=("parallel",)),
    )(h, w1p, b1p, w2p, b2p, wd1p, bd1r, wd2p, bd2p)


def _tail_pallas(h, xp, wf, bf, *, C, Cp, W, TOP, HW):
    N, Lpad, _ = h.shape
    wfp = _pad_conv_w(wf, C, Cp)
    bfp = jnp.pad(bf, (0, Cp - C)).reshape(1, Cp)
    kernel = functools.partial(_tail_kernel, W=W, TOP=TOP, HW=HW)
    return pl.pallas_call(
        kernel,
        out_shape=jax.ShapeDtypeStruct((N, HW, Cp), h.dtype),
        grid=(N,),
        in_specs=[
            pl.BlockSpec((pl.Squeezed(), Lpad, Cp), lambda n: (n, 0, 0)),
            pl.BlockSpec((pl.Squeezed(), Lpad, Cp), lambda n: (n, 0, 0)),
            _bcast_spec((9, Cp, Cp)),
            _bcast_spec((1, Cp)),
        ],
        out_specs=pl.BlockSpec((pl.Squeezed(), HW, Cp), lambda n: (n, 0, 0)),
        compiler_params=pltpu.CompilerParams(dimension_semantics=("parallel",)),
    )(h, xp, wfp, bfp)


def residual_group_forward(x_nchw, params):
    """Full ResidualGroup forward. x_nchw: (N, C, H, W) -> (N, C, H, W)."""
    N, C, H, W = x_nchw.shape
    HW = H * W
    Cp = ((C + LANE - 1) // LANE) * LANE           # lane-dense channel padding
    TOP = ((W + 1 + 7) // 8) * 8                   # >= W+1 zero rows, 8-aligned
    Lpad = TOP + HW + TOP

    # NCHW -> flattened NHWC, zero-pad channels to Cp and spatial rows by TOP.
    x_flat = jnp.transpose(x_nchw, (0, 2, 3, 1)).reshape(N, HW, C)
    xp = jnp.pad(x_flat, ((0, 0), (TOP, TOP), (0, Cp - C)))       # (N, Lpad, Cp)

    h = xp
    for blk in params["blocks"]:
        h = _rcab_pallas(h, blk, C=C, Cp=Cp, W=W, TOP=TOP, HW=HW)
    out = _tail_pallas(h, xp, params["wf"], params["bf"],
                       C=C, Cp=Cp, W=W, TOP=TOP, HW=HW)           # (N, HW, Cp)

    out = out[:, :, :C].reshape(N, H, W, C)
    return jnp.transpose(out, (0, 3, 1, 2))


# ---------------------------------------------------------------------------
# Pure-JAX reference (correctness check for the Pallas path)
# ---------------------------------------------------------------------------
def _conv3x3_ref(x_nhwc, w, b):
    y = lax.conv_general_dilated(x_nhwc, w, window_strides=(1, 1), padding="SAME",
                                 dimension_numbers=("NHWC", "HWIO", "NHWC"))
    return y + b


def residual_group_ref(x_nchw, params):
    x = jnp.transpose(x_nchw, (0, 2, 3, 1))
    group_in = x
    for blk in params["blocks"]:
        r = jax.nn.relu(_conv3x3_ref(x, blk["w1"], blk["b1"]))
        r = _conv3x3_ref(r, blk["w2"], blk["b2"])
        y = jnp.mean(r, axis=(1, 2), keepdims=True)               # (N,1,1,C)
        z = jax.nn.relu(jnp.einsum("nhwc,cd->nhwd", y, blk["wd1"]) + blk["bd1"])
        s = jax.nn.sigmoid(jnp.einsum("nhwd,dc->nhwc", z, blk["wd2"]) + blk["bd2"])
        x = x + r * s
    out = _conv3x3_ref(x, params["wf"], params["bf"]) + group_in
    return jnp.transpose(out, (0, 3, 1, 2))


# ---------------------------------------------------------------------------
# Deterministic parameter init (HWIO conv weights, like lax.conv)
# ---------------------------------------------------------------------------
def init_params(key, n_feat, kernel_size, reduction, n_resblocks):
    cr = n_feat // reduction
    blocks = []
    for _ in range(n_resblocks):
        key, *ks = jax.random.split(key, 9)
        fan = kernel_size * kernel_size * n_feat
        blocks.append(dict(
            w1=jax.random.normal(ks[0], (kernel_size, kernel_size, n_feat, n_feat),
                                 jnp.float32) / np.sqrt(fan),
            b1=0.01 * jax.random.normal(ks[1], (n_feat,), jnp.float32),
            w2=jax.random.normal(ks[2], (kernel_size, kernel_size, n_feat, n_feat),
                                 jnp.float32) / np.sqrt(fan),
            b2=0.01 * jax.random.normal(ks[3], (n_feat,), jnp.float32),
            wd1=jax.random.normal(ks[4], (n_feat, cr), jnp.float32) / np.sqrt(n_feat),
            bd1=0.01 * jax.random.normal(ks[5], (cr,), jnp.float32),
            wd2=jax.random.normal(ks[6], (cr, n_feat), jnp.float32) / np.sqrt(cr),
            bd2=0.01 * jax.random.normal(ks[7], (n_feat,), jnp.float32),
        ))
    key, kf1, kf2 = jax.random.split(key, 3)
    fan = kernel_size * kernel_size * n_feat
    return dict(
        blocks=blocks,
        wf=jax.random.normal(kf1, (kernel_size, kernel_size, n_feat, n_feat),
                             jnp.float32) / np.sqrt(fan),
        bf=0.01 * jax.random.normal(kf2, (n_feat,), jnp.float32),
    )


# ---------------------------------------------------------------------------
if __name__ == "__main__":
    N, C, H, W = 2, 8, 16, 16          # n_feat = 8
    kernel_size, reduction, n_resblocks = 3, 4, 2

    key = jax.random.PRNGKey(0)
    key, kx = jax.random.split(key)
    x = jax.random.normal(kx, (N, C, H, W), jnp.float32)
    params = init_params(key, C, kernel_size, reduction, n_resblocks)

    out = jax.jit(residual_group_forward)(x, params)
    out = jax.block_until_ready(out)

    ref = residual_group_ref(x, params)
    assert out.shape == (N, C, H, W)
    np.testing.assert_allclose(np.asarray(out), np.asarray(ref), rtol=1e-4, atol=1e-4)

    print("KERNEL_OK")
</pallas_src>

<mosaic_0001>
module attributes {stable_mosaic.version = 11 : i64} {
  func.func @_tail_kernel(%arg0: i32, %arg1: memref<1x304x128xf32, #tpu.memory_space<vmem>>, %arg2: memref<1x304x128xf32, #tpu.memory_space<vmem>>, %arg3: memref<9x128x128xf32, #tpu.memory_space<vmem>>, %arg4: memref<1x128xf32, #tpu.memory_space<vmem>>, %arg5: memref<1x256x128xf32, #tpu.memory_space<vmem>>) attributes {dimension_semantics = [#tpu.dimension_semantics<parallel>], iteration_bounds = array<i64: 2>, scalar_prefetch = 0 : i64, scratch_operands = 0 : i64, tpu.core_type = #tpu.core_type<tc>, window_params = [{transform_indices = @transform_0, window_bounds = array<i64: 1, 304, 128>}, {transform_indices = @transform_1, window_bounds = array<i64: 1, 304, 128>}, {pipeline_mode = #tpu.pipeline_mode<synchronous>, transform_indices = @transform_2, window_bounds = array<i64: 9, 128, 128>}, {pipeline_mode = #tpu.pipeline_mode<synchronous>, transform_indices = @transform_3, window_bounds = array<i64: 1, 128>}, {transform_indices = @transform_4, window_bounds = array<i64: 1, 256, 128>}]} {
    %c0 = arith.constant 0 : index
    %c0_0 = arith.constant 0 : index
    %0 = vector.load %arg4[%c0, %c0_0] : memref<1x128xf32, #tpu.memory_space<vmem>>, vector<1x128xf32>
    %c0_1 = arith.constant 0 : index
    %c7 = arith.constant 7 : index
    %c0_2 = arith.constant 0 : index
    %1 = vector.load %arg1[%c0_1, %c7, %c0_2] : memref<1x304x128xf32, #tpu.memory_space<vmem>>, vector<1x256x128xf32>
    %2 = vector.shape_cast %1 : vector<1x256x128xf32> to vector<256x128xf32>
    %c0_3 = arith.constant 0 : index
    %c0_4 = arith.constant 0 : index
    %c0_5 = arith.constant 0 : index
    %3 = vector.load %arg3[%c0_3, %c0_4, %c0_5] : memref<9x128x128xf32, #tpu.memory_space<vmem>>, vector<1x128x128xf32>
    %4 = vector.shape_cast %3 : vector<1x128x128xf32> to vector<128x128xf32>
    %cst = arith.constant dense<0.000000e+00> : vector<256x128xf32>
    %5 = tpu.matmul %2, %4, %cst {dimension_numbers = #tpu.dot_dimension_numbers<[1], [0], [0], [1], [0, 0, 1, 1], [], []>} : vector<256x128xf32>, vector<128x128xf32>, vector<256x128xf32> -> vector<256x128xf32>
    %c0_6 = arith.constant 0 : index
    %c8 = arith.constant 8 : index
    %c0_7 = arith.constant 0 : index
    %6 = vector.load %arg1[%c0_6, %c8, %c0_7] : memref<1x304x128xf32, #tpu.memory_space<vmem>>, vector<1x256x128xf32>
    %7 = vector.shape_cast %6 : vector<1x256x128xf32> to vector<256x128xf32>
    %c1 = arith.constant 1 : index
    %c0_8 = arith.constant 0 : index
    %c0_9 = arith.constant 0 : index
    %8 = vector.load %arg3[%c1, %c0_8, %c0_9] : memref<9x128x128xf32, #tpu.memory_space<vmem>>, vector<1x128x128xf32>
    %9 = vector.shape_cast %8 : vector<1x128x128xf32> to vector<128x128xf32>
    %cst_10 = arith.constant dense<0.000000e+00> : vector<256x128xf32>
    %10 = tpu.matmul %7, %9, %cst_10 {dimension_numbers = #tpu.dot_dimension_numbers<[1], [0], [0], [1], [0, 0, 1, 1], [], []>} : vector<256x128xf32>, vector<128x128xf32>, vector<256x128xf32> -> vector<256x128xf32>
    %c0_11 = arith.constant 0 : index
    %c9 = arith.constant 9 : index
    %c0_12 = arith.constant 0 : index
    %11 = vector.load %arg1[%c0_11, %c9, %c0_12] : memref<1x304x128xf32, #tpu.memory_space<vmem>>, vector<1x256x128xf32>
    %12 = vector.shape_cast %11 : vector<1x256x128xf32> to vector<256x128xf32>
    %c2 = arith.constant 2 : index
    %c0_13 = arith.constant 0 : index
    %c0_14 = arith.constant 0 : index
    %13 = vector.load %arg3[%c2, %c0_13, %c0_14] : memref<9x128x128xf32, #tpu.memory_space<vmem>>, vector<1x128x128xf32>
    %14 = vector.shape_cast %13 : vector<1x128x128xf32> to vector<128x128xf32>
    %cst_15 = arith.constant dense<0.000000e+00> : vector<256x128xf32>
    %15 = tpu.matmul %12, %14, %cst_15 {dimension_numbers = #tpu.dot_dimension_numbers<[1], [0], [0], [1], [0, 0, 1, 1], [], []>} : vector<256x128xf32>, vector<128x128xf32>, vector<256x128xf32> -> vector<256x128xf32>
    %c0_16 = arith.constant 0 : index
    %c23 = arith.constant 23 : index
    %c0_17 = arith.constant 0 : index
    %16 = vector.load %arg1[%c0_16, %c23, %c0_17] : memref<1x304x128xf32, #tpu.memory_space<vmem>>, vector<1x256x128xf32>
    %17 = vector.shape_cast %16 : vector<1x256x128xf32> to vector<256x128xf32>
    %c3 = arith.constant 3 : index
    %c0_18 = arith.constant 0 : index
    %c0_19 = arith.constant 0 : index
    %18 = vector.load %arg3[%c3, %c0_18, %c0_19] : memref<9x128x128xf32, #tpu.memory_space<vmem>>, vector<1x128x128xf32>
    %19 = vector.shape_cast %18 : vector<1x128x128xf32> to vector<128x128xf32>
    %cst_20 = arith.constant dense<0.000000e+00> : vector<256x128xf32>
    %20 = tpu.matmul %17, %19, %cst_20 {dimension_numbers = #tpu.dot_dimension_numbers<[1], [0], [0], [1], [0, 0, 1, 1], [], []>} : vector<256x128xf32>, vector<128x128xf32>, vector<256x128xf32> -> vector<256x128xf32>
    %21 = arith.addf %5, %20 : vector<256x128xf32>
    %c0_21 = arith.constant 0 : index
    %c24 = arith.constant 24 : index
    %c0_22 = arith.constant 0 : index
    %22 = vector.load %arg1[%c0_21, %c24, %c0_22] : memref<1x304x128xf32, #tpu.memory_space<vmem>>, vector<1x256x128xf32>
    %23 = vector.shape_cast %22 : vector<1x256x128xf32> to vector<256x128xf32>
    %c4 = arith.constant 4 : index
    %c0_23 = arith.constant 0 : index
    %c0_24 = arith.constant 0 : index
    %24 = vector.load %arg3[%c4, %c0_23, %c0_24] : memref<9x128x128xf32, #tpu.memory_space<vmem>>, vector<1x128x128xf32>
    %25 = vector.shape_cast %24 : vector<1x128x128xf32> to vector<128x128xf32>
    %cst_25 = arith.constant dense<0.000000e+00> : vector<256x128xf32>
    %26 = tpu.matmul %23, %25, %cst_25 {dimension_numbers = #tpu.dot_dimension_numbers<[1], [0], [0], [1], [0, 0, 1, 1], [], []>} : vector<256x128xf32>, vector<128x128xf32>, vector<256x128xf32> -> vector<256x128xf32>
    %27 = arith.addf %10, %26 : vector<256x128xf32>
    %c0_26 = arith.constant 0 : index
    %c25 = arith.constant 25 : index
    %c0_27 = arith.constant 0 : index
    %28 = vector.load %arg1[%c0_26, %c25, %c0_27] : memref<1x304x128xf32, #tpu.memory_space<vmem>>, vector<1x256x128xf32>
    %29 = vector.shape_cast %28 : vector<1x256x128xf32> to vector<256x128xf32>
    %c5 = arith.constant 5 : index
    %c0_28 = arith.constant 0 : index
    %c0_29 = arith.constant 0 : index
    %30 = vector.load %arg3[%c5, %c0_28, %c0_29] : memref<9x128x128xf32, #tpu.memory_space<vmem>>, vector<1x128x128xf32>
    %31 = vector.shape_cast %30 : vector<1x128x128xf32> to vector<128x128xf32>
    %cst_30 = arith.constant dense<0.000000e+00> : vector<256x128xf32>
    %32 = tpu.matmul %29, %31, %cst_30 {dimension_numbers = #tpu.dot_dimension_numbers<[1], [0], [0], [1], [0, 0, 1, 1], [], []>} : vector<256x128xf32>, vector<128x128xf32>, vector<256x128xf32> -> vector<256x128xf32>
    %33 = arith.addf %15, %32 : vector<256x128xf32>
    %c0_31 = arith.constant 0 : index
    %c39 = arith.constant 39 : index
    %c0_32 = arith.constant 0 : index
    %34 = vector.load %arg1[%c0_31, %c39, %c0_32] : memref<1x304x128xf32, #tpu.memory_space<vmem>>, vector<1x256x128xf32>
    %35 = vector.shape_cast %34 : vector<1x256x128xf32> to vector<256x128xf32>
    %c6 = arith.constant 6 : index
    %c0_33 = arith.constant 0 : index
    %c0_34 = arith.constant 0 : index
    %36 = vector.load %arg3[%c6, %c0_33, %c0_34] : memref<9x128x128xf32, #tpu.memory_space<vmem>>, vector<1x128x128xf32>
    %37 = vector.shape_cast %36 : vector<1x128x128xf32> to vector<128x128xf32>
    %cst_35 = arith.constant dense<0.000000e+00> : vector<256x128xf32>
    %38 = tpu.matmul %35, %37, %cst_35 {dimension_numbers = #tpu.dot_dimension_numbers<[1], [0], [0], [1], [0, 0, 1, 1], [], []>} : vector<256x128xf32>, vector<128x128xf32>, vector<256x128xf32> -> vector<256x128xf32>
    %39 = arith.addf %21, %38 : vector<256x128xf32>
    %c0_36 = arith.constant 0 : index
    %c40 = arith.constant 40 : index
    %c0_37 = arith.constant 0 : index
    %40 = vector.load %arg1[%c0_36, %c40, %c0_37] : memref<1x304x128xf32, #tpu.memory_space<vmem>>, vector<1x256x128xf32>
    %41 = vector.shape_cast %40 : vector<1x256x128xf32> to vector<256x128xf32>
    %c7_38 = arith.constant 7 : index
    %c0_39 = arith.constant 0 : index
    %c0_40 = arith.constant 0 : index
    %42 = vector.load %arg3[%c7_38, %c0_39, %c0_40] : memref<9x128x128xf32, #tpu.memory_space<vmem>>, vector<1x128x128xf32>
    %43 = vector.shape_cast %42 : vector<1x128x128xf32> to vector<128x128xf32>
    %cst_41 = arith.constant dense<0.000000e+00> : vector<256x128xf32>
    %44 = tpu.matmul %41, %43, %cst_41 {dimension_numbers = #tpu.dot_dimension_numbers<[1], [0], [0], [1], [0, 0, 1, 1], [], []>} : vector<256x128xf32>, vector<128x128xf32>, vector<256x128xf32> -> vector<256x128xf32>
    %45 = arith.addf %27, %44 : vector<256x128xf32>
    %c0_42 = arith.constant 0 : index
    %c41 = arith.constant 41 : index
    %c0_43 = arith.constant 0 : index
    %46 = vector.load %arg1[%c0_42, %c41, %c0_43] : memref<1x304x128xf32, #tpu.memory_space<vmem>>, vector<1x256x128xf32>
    %47 = vector.shape_cast %46 : vector<1x256x128xf32> to vector<256x128xf32>
    %c8_44 = arith.constant 8 : index
    %c0_45 = arith.constant 0 : index
    %c0_46 = arith.constant 0 : index
    %48 = vector.load %arg3[%c8_44, %c0_45, %c0_46] : memref<9x128x128xf32, #tpu.memory_space<vmem>>, vector<1x128x128xf32>
    %49 = vector.shape_cast %48 : vector<1x128x128xf32> to vector<128x128xf32>
    %cst_47 = arith.constant dense<0.000000e+00> : vector<256x128xf32>
    %50 = tpu.matmul %47, %49, %cst_47 {dimension_numbers = #tpu.dot_dimension_numbers<[1], [0], [0], [1], [0, 0, 1, 1], [], []>} : vector<256x128xf32>, vector<128x128xf32>, vector<256x128xf32> -> vector<256x128xf32>
    %51 = arith.addf %33, %50 : vector<256x128xf32>
    %52 = tpu.iota {dimensions = array<i32: 0>} : vector<256x1xi32>
    %c16_i32 = arith.constant 16 : i32
    %c0_i32 = arith.constant 0 : i32
    %53 = arith.cmpi eq, %c16_i32, %c0_i32 : i32
    %c1_i32 = arith.constant 1 : i32
    %54 = arith.select %53, %c1_i32, %c16_i32 : i32
    %55 = vector.broadcast %54 : i32 to vector<256x1xi32>
    %56 = arith.remsi %52, %55 : vector<256x1xi32>
    %c0_i32_48 = arith.constant 0 : i32
    %57 = vector.broadcast %c0_i32_48 : i32 to vector<256x1xi32>
    %58 = arith.cmpi ne, %56, %57 : vector<256x1xi32>
    %c0_i32_49 = arith.constant 0 : i32
    %59 = vector.broadcast %c0_i32_49 : i32 to vector<256x1xi32>
    %60 = arith.cmpi slt, %56, %59 : vector<256x1xi32>
    %c0_i32_50 = arith.constant 0 : i32
    %61 = arith.cmpi slt, %54, %c0_i32_50 : i32
    %62 = vector.broadcast %61 : i1 to vector<256x1xi1>
    %63 = vector.broadcast %62 : vector<256x1xi1> to vector<256x1xi1>
    %64 = arith.xori %60, %63 : vector<256x1xi1>
    %65 = arith.andi %64, %58 : vector<256x1xi1>
    %66 = vector.broadcast %54 : i32 to vector<256x1xi32>
    %67 = arith.addi %56, %66 : vector<256x1xi32>
    %68 = arith.select %65, %67, %56 : vector<256x1xi1>, vector<256x1xi32>
    %c0_i32_51 = arith.constant 0 : i32
    %69 = vector.broadcast %c0_i32_51 : i32 to vector<256x1xi32>
    %70 = arith.cmpi ne, %68, %69 : vector<256x1xi32>
    %cst_52 = arith.constant 0.000000e+00 : f32
    %71 = vector.shape_cast %70 : vector<256x1xi1> to vector<256x1xi1>
    %72 = vector.broadcast %71 : vector<256x1xi1> to vector<256x128xi1>
    %73 = vector.broadcast %cst_52 : f32 to vector<256x128xf32>
    %74 = arith.select %72, %39, %73 : vector<256x128xi1>, vector<256x128xf32>
    %75 = arith.addf %45, %74 : vector<256x128xf32>
    %c15_i32 = arith.constant 15 : i32
    %76 = vector.broadcast %c15_i32 : i32 to vector<256x1xi32>
    %77 = arith.cmpi ne, %68, %76 : vector<256x1xi32>
    %cst_53 = arith.constant 0.000000e+00 : f32
    %78 = vector.shape_cast %77 : vector<256x1xi1> to vector<256x1xi1>
    %79 = vector.broadcast %78 : vector<256x1xi1> to vector<256x128xi1>
    %80 = vector.broadcast %cst_53 : f32 to vector<256x128xf32>
    %81 = arith.select %79, %51, %80 : vector<256x128xi1>, vector<256x128xf32>
    %82 = arith.addf %75, %81 : vector<256x128xf32>
    %83 = vector.broadcast %0 : vector<1x128xf32> to vector<256x128xf32>
    %84 = arith.addf %82, %83 : vector<256x128xf32>
    %c0_54 = arith.constant 0 : index
    %c24_55 = arith.constant 24 : index
    %c0_56 = arith.constant 0 : index
    %85 = vector.load %arg2[%c0_54, %c24_55, %c0_56] : memref<1x304x128xf32, #tpu.memory_space<vmem>>, vector<1x256x128xf32>
    %86 = vector.shape_cast %85 : vector<1x256x128xf32> to vector<256x128xf32>
    %87 = arith.addf %84, %86 : vector<256x128xf32>
    %c0_57 = arith.constant 0 : index
    %c0_58 = arith.constant 0 : index
    %c0_59 = arith.constant 0 : index
    %88 = vector.load %arg5[%c0_57, %c0_58, %c0_59] : memref<1x256x128xf32, #tpu.memory_space<vmem>>, vector<1x256x128xf32>
    %89 = vector.shape_cast %88 : vector<1x256x128xf32> to vector<256x128xf32>
    %90 = vector.shape_cast %87 : vector<256x128xf32> to vector<1x256x128xf32>
    tpu.vector_store %arg5[%c0_57, %c0_58, %c0_59], %90 {strides = array<i32>} : memref<1x256x128xf32, #tpu.memory_space<vmem>>, vector<1x256x128xf32>,
    return
  }
  func.func @transform_0(%arg0: i32) -> (i32, i32, i32) {
    %c0_i32 = arith.constant 0 : i32
    %c0_i32_0 = arith.constant 0 : i32
    %c0_i32_1 = arith.constant 0 : i32
    return %arg0, %c0_i32, %c0_i32_0 : i32, i32, i32
  }
  func.func @transform_1(%arg0: i32) -> (i32, i32, i32) {
    %c0_i32 = arith.constant 0 : i32
    %c0_i32_0 = arith.constant 0 : i32
    %c0_i32_1 = arith.constant 0 : i32
    return %arg0, %c0_i32, %c0_i32_0 : i32, i32, i32
  }
  func.func @transform_2(%arg0: i32) -> (i32, i32, i32) {
    %c0_i32 = arith.constant 0 : i32
    %c0_i32_0 = arith.constant 0 : i32
    %c0_i32_1 = arith.constant 0 : i32
    %c0_i32_2 = arith.constant 0 : i32
    return %c0_i32, %c0_i32_0, %c0_i32_1 : i32, i32, i32
  }
  func.func @transform_3(%arg0: i32) -> (i32, i32) {
    %c0_i32 = arith.constant 0 : i32
    %c0_i32_0 = arith.constant 0 : i32
    %c0_i32_1 = arith.constant 0 : i32
    return %c0_i32, %c0_i32_0 : i32, i32
  }
  func.func @transform_4(%arg0: i32) -> (i32, i32, i32) {
    %c0_i32 = arith.constant 0 : i32
    %c0_i32_0 = arith.constant 0 : i32
    %c0_i32_1 = arith.constant 0 : i32
    return %arg0, %c0_i32, %c0_i32_0 : i32, i32, i32
  }
}

module attributes {stable_mosaic.version = 11 : i64} {
  func.func @_rcab_kernel(%arg0: i32, %arg1: memref<1x304x128xf32, #tpu.memory_space<vmem>>, %arg2: memref<9x128x128xf32, #tpu.memory_space<vmem>>, %arg3: memref<1x128xf32, #tpu.memory_space<vmem>>, %arg4: memref<9x128x128xf32, #tpu.memory_space<vmem>>, %arg5: memref<1x128xf32, #tpu.memory_space<vmem>>, %arg6: memref<128x2xf32, #tpu.memory_space<vmem>>, %arg7: memref<1x2xf32, #tpu.memory_space<vmem>>, %arg8: memref<2x128xf32, #tpu.memory_space<vmem>>, %arg9: memref<1x128xf32, #tpu.memory_space<vmem>>, %arg10: memref<1x304x128xf32, #tpu.memory_space<vmem>>, %arg11: memref<304x128xf32, #tpu.memory_space<vmem>>) attributes {dimension_semantics = [#tpu.dimension_semantics<parallel>], iteration_bounds = array<i64: 2>, scalar_prefetch = 0 : i64, scratch_operands = 1 : i64, tpu.core_type = #tpu.core_type<tc>, window_params = [{transform_indices = @transform_0, window_bounds = array<i64: 1, 304, 128>}, {pipeline_mode = #tpu.pipeline_mode<synchronous>, transform_indices = @transform_1, window_bounds = array<i64: 9, 128, 128>}, {pipeline_mode = #tpu.pipeline_mode<synchronous>, transform_indices = @transform_2, window_bounds = array<i64: 1, 128>}, {pipeline_mode = #tpu.pipeline_mode<synchronous>, transform_indices = @transform_3, window_bounds = array<i64: 9, 128, 128>}, {pipeline_mode = #tpu.pipeline_mode<synchronous>, transform_indices = @transform_4, window_bounds = array<i64: 1, 128>}, {pipeline_mode = #tpu.pipeline_mode<synchronous>, transform_indices = @transform_5, window_bounds = array<i64: 128, 2>}, {pipeline_mode = #tpu.pipeline_mode<synchronous>, transform_indices = @transform_6, window_bounds = array<i64: 1, 2>}, {pipeline_mode = #tpu.pipeline_mode<synchronous>, transform_indices = @transform_7, window_bounds = array<i64: 2, 128>}, {pipeline_mode = #tpu.pipeline_mode<synchronous>, transform_indices = @transform_8, window_bounds = array<i64: 1, 128>}, {transform_indices = @transform_9, window_bounds = array<i64: 1, 304, 128>}]} {
    %c0 = arith.constant 0 : index
    %c0_0 = arith.constant 0 : index
    %0 = vector.load %arg3[%c0, %c0_0] : memref<1x128xf32, #tpu.memory_space<vmem>>, vector<1x128xf32>
    %c0_1 = arith.constant 0 : index
    %c7 = arith.constant 7 : index
    %c0_2 = arith.constant 0 : index
    %1 = vector.load %arg1[%c0_1, %c7, %c0_2] : memref<1x304x128xf32, #tpu.memory_space<vmem>>, vector<1x256x128xf32>
    %2 = vector.shape_cast %1 : vector<1x256x128xf32> to vector<256x128xf32>
    %c0_3 = arith.constant 0 : index
    %c0_4 = arith.constant 0 : index
    %c0_5 = arith.constant 0 : index
    %3 = vector.load %arg2[%c0_3, %c0_4, %c0_5] : memref<9x128x128xf32, #tpu.memory_space<vmem>>, vector<1x128x128xf32>
    %4 = vector.shape_cast %3 : vector<1x128x128xf32> to vector<128x128xf32>
    %cst = arith.constant dense<0.000000e+00> : vector<256x128xf32>
    %5 = tpu.matmul %2, %4, %cst {dimension_numbers = #tpu.dot_dimension_numbers<[1], [0], [0], [1], [0, 0, 1, 1], [], []>} : vector<256x128xf32>, vector<128x128xf32>, vector<256x128xf32> -> vector<256x128xf32>
    %c0_6 = arith.constant 0 : index
    %c8 = arith.constant 8 : index
    %c0_7 = arith.constant 0 : index
    %6 = vector.load %arg1[%c0_6, %c8, %c0_7] : memref<1x304x128xf32, #tpu.memory_space<vmem>>, vector<1x256x128xf32>
    %7 = vector.shape_cast %6 : vector<1x256x128xf32> to vector<256x128xf32>
    %c1 = arith.constant 1 : index
    %c0_8 = arith.constant 0 : index
    %c0_9 = arith.constant 0 : index
    %8 = vector.load %arg2[%c1, %c0_8, %c0_9] : memref<9x128x128xf32, #tpu.memory_space<vmem>>, vector<1x128x128xf32>
    %9 = vector.shape_cast %8 : vector<1x128x128xf32> to vector<128x128xf32>
    %cst_10 = arith.constant dense<0.000000e+00> : vector<256x128xf32>
    %10 = tpu.matmul %7, %9, %cst_10 {dimension_numbers = #tpu.dot_dimension_numbers<[1], [0], [0], [1], [0, 0, 1, 1], [], []>} : vector<256x128xf32>, vector<128x128xf32>, vector<256x128xf32> -> vector<256x128xf32>
    %c0_11 = arith.constant 0 : index
    %c9 = arith.constant 9 : index
    %c0_12 = arith.constant 0 : index
    %11 = vector.load %arg1[%c0_11, %c9, %c0_12] : memref<1x304x128xf32, #tpu.memory_space<vmem>>, vector<1x256x128xf32>
    %12 = vector.shape_cast %11 : vector<1x256x128xf32> to vector<256x128xf32>
    %c2 = arith.constant 2 : index
    %c0_13 = arith.constant 0 : index
    %c0_14 = arith.constant 0 : index
    %13 = vector.load %arg2[%c2, %c0_13, %c0_14] : memref<9x128x128xf32, #tpu.memory_space<vmem>>, vector<1x128x128xf32>
    %14 = vector.shape_cast %13 : vector<1x128x128xf32> to vector<128x128xf32>
    %cst_15 = arith.constant dense<0.000000e+00> : vector<256x128xf32>
    %15 = tpu.matmul %12, %14, %cst_15 {dimension_numbers = #tpu.dot_dimension_numbers<[1], [0], [0], [1], [0, 0, 1, 1], [], []>} : vector<256x128xf32>, vector<128x128xf32>, vector<256x128xf32> -> vector<256x128xf32>
    %c0_16 = arith.constant 0 : index
    %c23 = arith.constant 23 : index
    %c0_17 = arith.constant 0 : index
    %16 = vector.load %arg1[%c0_16, %c23, %c0_17] : memref<1x304x128xf32, #tpu.memory_space<vmem>>, vector<1x256x128xf32>
    %17 = vector.shape_cast %16 : vector<1x256x128xf32> to vector<256x128xf32>
    %c3 = arith.constant 3 : index
    %c0_18 = arith.constant 0 : index
    %c0_19 = arith.constant 0 : index
    %18 = vector.load %arg2[%c3, %c0_18, %c0_19] : memref<9x128x128xf32, #tpu.memory_space<vmem>>, vector<1x128x128xf32>
    %19 = vector.shape_cast %18 : vector<1x128x128xf32> to vector<128x128xf32>
    %cst_20 = arith.constant dense<0.000000e+00> : vector<256x128xf32>
    %20 = tpu.matmul %17, %19, %cst_20 {dimension_numbers = #tpu.dot_dimension_numbers<[1], [0], [0], [1], [0, 0, 1, 1], [], []>} : vector<256x128xf32>, vector<128x128xf32>, vector<256x128xf32> -> vector<256x128xf32>
    %21 = arith.addf %5, %20 : vector<256x128xf32>
    %c0_21 = arith.constant 0 : index
    %c24 = arith.constant 24 : index
    %c0_22 = arith.constant 0 : index
    %22 = vector.load %arg1[%c0_21, %c24, %c0_22] : memref<1x304x128xf32, #tpu.memory_space<vmem>>, vector<1x256x128xf32>
    %23 = vector.shape_cast %22 : vector<1x256x128xf32> to vector<256x128xf32>
    %c4 = arith.constant 4 : index
    %c0_23 = arith.constant 0 : index
    %c0_24 = arith.constant 0 : index
    %24 = vector.load %arg2[%c4, %c0_23, %c0_24] : memref<9x128x128xf32, #tpu.memory_space<vmem>>, vector<1x128x128xf32>
    %25 = vector.shape_cast %24 : vector<1x128x128xf32> to vector<128x128xf32>
    %cst_25 = arith.constant dense<0.000000e+00> : vector<256x128xf32>
    %26 = tpu.matmul %23, %25, %cst_25 {dimension_numbers = #tpu.dot_dimension_numbers<[1], [0], [0], [1], [0, 0, 1, 1], [], []>} : vector<256x128xf32>, vector<128x128xf32>, vector<256x128xf32> -> vector<256x128xf32>
    %27 = arith.addf %10, %26 : vector<256x128xf32>
    %c0_26 = arith.constant 0 : index
    %c25 = arith.constant 25 : index
    %c0_27 = arith.constant 0 : index
    %28 = vector.load %arg1[%c0_26, %c25, %c0_27] : memref<1x304x128xf32, #tpu.memory_space<vmem>>, vector<1x256x128xf32>
    %29 = vector.shape_cast %28 : vector<1x256x128xf32> to vector<256x128xf32>
    %c5 = arith.constant 5 : index
    %c0_28 = arith.constant 0 : index
    %c0_29 = arith.constant 0 : index
    %30 = vector.load %arg2[%c5, %c0_28, %c0_29] : memref<9x128x128xf32, #tpu.memory_space<vmem>>, vector<1x128x128xf32>
    %31 = vector.shape_cast %30 : vector<1x128x128xf32> to vector<128x128xf32>
    %cst_30 = arith.constant dense<0.000000e+00> : vector<256x128xf32>
    %32 = tpu.matmul %29, %31, %cst_30 {dimension_numbers = #tpu.dot_dimension_numbers<[1], [0], [0], [1], [0, 0, 1, 1], [], []>} : vector<256x128xf32>, vector<128x128xf32>, vector<256x128xf32> -> vector<256x128xf32>
    %33 = arith.addf %15, %32 : vector<256x128xf32>
    %c0_31 = arith.constant 0 : index
    %c39 = arith.constant 39 : index
    %c0_32 = arith.constant 0 : index
    %34 = vector.load %arg1[%c0_31, %c39, %c0_32] : memref<1x304x128xf32, #tpu.memory_space<vmem>>, vector<1x256x128xf32>
    %35 = vector.shape_cast %34 : vector<1x256x128xf32> to vector<256x128xf32>
    %c6 = arith.constant 6 : index
    %c0_33 = arith.constant 0 : index
    %c0_34 = arith.constant 0 : index
    %36 = vector.load %arg2[%c6, %c0_33, %c0_34] : memref<9x128x128xf32, #tpu.memory_space<vmem>>, vector<1x128x128xf32>
    %37 = vector.shape_cast %36 : vector<1x128x128xf32> to vector<128x128xf32>
    %cst_35 = arith.constant dense<0.000000e+00> : vector<256x128xf32>
    %38 = tpu.matmul %35, %37, %cst_35 {dimension_numbers = #tpu.dot_dimension_numbers<[1], [0], [0], [1], [0, 0, 1, 1], [], []>} : vector<256x128xf32>, vector<128x128xf32>, vector<256x128xf32> -> vector<256x128xf32>
    %39 = arith.addf %21, %38 : vector<256x128xf32>
    %c0_36 = arith.constant 0 : index
    %c40 = arith.constant 40 : index
    %c0_37 = arith.constant 0 : index
    %40 = vector.load %arg1[%c0_36, %c40, %c0_37] : memref<1x304x128xf32, #tpu.memory_space<vmem>>, vector<1x256x128xf32>
    %41 = vector.shape_cast %40 : vector<1x256x128xf32> to vector<256x128xf32>
    %c7_38 = arith.constant 7 : index
    %c0_39 = arith.constant 0 : index
    %c0_40 = arith.constant 0 : index
    %42 = vector.load %arg2[%c7_38, %c0_39, %c0_40] : memref<9x128x128xf32, #tpu.memory_space<vmem>>, vector<1x128x128xf32>
    %43 = vector.shape_cast %42 : vector<1x128x128xf32> to vector<128x128xf32>
    %cst_41 = arith.constant dense<0.000000e+00> : vector<256x128xf32>
    %44 = tpu.matmul %41, %43, %cst_41 {dimension_numbers = #tpu.dot_dimension_numbers<[1], [0], [0], [1], [0, 0, 1, 1], [], []>} : vector<256x128xf32>, vector<128x128xf32>, vector<256x128xf32> -> vector<256x128xf32>
    %45 = arith.addf %27, %44 : vector<256x128xf32>
    %c0_42 = arith.constant 0 : index
    %c41 = arith.constant 41 : index
    %c0_43 = arith.constant 0 : index
    %46 = vector.load %arg1[%c0_42, %c41, %c0_43] : memref<1x304x128xf32, #tpu.memory_space<vmem>>, vector<1x256x128xf32>
    %47 = vector.shape_cast %46 : vector<1x256x128xf32> to vector<256x128xf32>
    %c8_44 = arith.constant 8 : index
    %c0_45 = arith.constant 0 : index
    %c0_46 = arith.constant 0 : index
    %48 = vector.load %arg2[%c8_44, %c0_45, %c0_46] : memref<9x128x128xf32, #tpu.memory_space<vmem>>, vector<1x128x128xf32>
    %49 = vector.shape_cast %48 : vector<1x128x128xf32> to vector<128x128xf32>
    %cst_47 = arith.constant dense<0.000000e+00> : vector<256x128xf32>
    %50 = tpu.matmul %47, %49, %cst_47 {dimension_numbers = #tpu.dot_dimension_numbers<[1], [0], [0], [1], [0, 0, 1, 1], [], []>} : vector<256x128xf32>, vector<128x128xf32>, vector<256x128xf32> -> vector<256x128xf32>
    %51 = arith.addf %33, %50 : vector<256x128xf32>
    %52 = tpu.iota {dimensions = array<i32: 0>} : vector<256x1xi32>
    %c16_i32 = arith.constant 16 : i32
    %c0_i32 = arith.constant 0 : i32
    %53 = arith.cmpi eq, %c16_i32, %c0_i32 : i32
    %c1_i32 = arith.constant 1 : i32
    %54 = arith.select %53, %c1_i32, %c16_i32 : i32
    %55 = vector.broadcast %54 : i32 to vector<256x1xi32>
    %56 = arith.remsi %52, %55 : vector<256x1xi32>
    %c0_i32_48 = arith.constant 0 : i32
    %57 = vector.broadcast %c0_i32_48 : i32 to vector<256x1xi32>
    %58 = arith.cmpi ne, %56, %57 : vector<256x1xi32>
    %c0_i32_49 = arith.constant 0 : i32
    %59 = vector.broadcast %c0_i32_49 : i32 to vector<256x1xi32>
    %60 = arith.cmpi slt, %56, %59 : vector<256x1xi32>
    %c0_i32_50 = arith.constant 0 : i32
    %61 = arith.cmpi slt, %54, %c0_i32_50 : i32
    %62 = vector.broadcast %61 : i1 to vector<256x1xi1>
    %63 = vector.broadcast %62 : vector<256x1xi1> to vector<256x1xi1>
    %64 = arith.xori %60, %63 : vector<256x1xi1>
    %65 = arith.andi %64, %58 : vector<256x1xi1>
    %66 = vector.broadcast %54 : i32 to vector<256x1xi32>
    %67 = arith.addi %56, %66 : vector<256x1xi32>
    %68 = arith.select %65, %67, %56 : vector<256x1xi1>, vector<256x1xi32>
    %c0_i32_51 = arith.constant 0 : i32
    %69 = vector.broadcast %c0_i32_51 : i32 to vector<256x1xi32>
    %70 = arith.cmpi ne, %68, %69 : vector<256x1xi32>
    %cst_52 = arith.constant 0.000000e+00 : f32
    %71 = vector.shape_cast %70 : vector<256x1xi1> to vector<256x1xi1>
    %72 = vector.broadcast %71 : vector<256x1xi1> to vector<256x128xi1>
    %73 = vector.broadcast %cst_52 : f32 to vector<256x128xf32>
    %74 = arith.select %72, %39, %73 : vector<256x128xi1>, vector<256x128xf32>
    %75 = arith.addf %45, %74 : vector<256x128xf32>
    %c15_i32 = arith.constant 15 : i32
    %76 = vector.broadcast %c15_i32 : i32 to vector<256x1xi32>
    %77 = arith.cmpi ne, %68, %76 : vector<256x1xi32>
    %cst_53 = arith.constant 0.000000e+00 : f32
    %78 = vector.shape_cast %77 : vector<256x1xi1> to vector<256x1xi1>
    %79 = vector.broadcast %78 : vector<256x1xi1> to vector<256x128xi1>
    %80 = vector.broadcast %cst_53 : f32 to vector<256x128xf32>
    %81 = arith.select %79, %51, %80 : vector<256x128xi1>, vector<256x128xf32>
    %82 = arith.addf %75, %81 : vector<256x128xf32>
    %83 = vector.broadcast %0 : vector<1x128xf32> to vector<256x128xf32>
    %84 = arith.addf %82, %83 : vector<256x128xf32>
    %cst_54 = arith.constant 0.000000e+00 : f32
    %85 = vector.broadcast %cst_54 : f32 to vector<256x128xf32>
    %86 = arith.maximumf %84, %85 : vector<256x128xf32>
    %cst_55 = arith.constant 0.000000e+00 : f32
    %87 = vector.broadcast %cst_55 : f32 to vector<24x128xf32>
    %c0_56 = arith.constant 0 : index
    %c0_57 = arith.constant 0 : index
    %88 = vector.load %arg11[%c0_56, %c0_57] : memref<304x128xf32, #tpu.memory_space<vmem>>, vector<24x128xf32>
    tpu.vector_store %arg11[%c0_56, %c0_57], %87 {strides = array<i32>} : memref<304x128xf32, #tpu.memory_space<vmem>>, vector<24x128xf32>,
    %c24_58 = arith.constant 24 : index
    %c0_59 = arith.constant 0 : index
    %89 = vector.load %arg11[%c24_58, %c0_59] : memref<304x128xf32, #tpu.memory_space<vmem>>, vector<256x128xf32>
    tpu.vector_store %arg11[%c24_58, %c0_59], %86 {strides = array<i32>} : memref<304x128xf32, #tpu.memory_space<vmem>>, vector<256x128xf32>,
    %cst_60 = arith.constant 0.000000e+00 : f32
    %90 = vector.broadcast %cst_60 : f32 to vector<24x128xf32>
    %c280 = arith.constant 280 : index
    %c0_61 = arith.constant 0 : index
    %91 = vector.load %arg11[%c280, %c0_61] : memref<304x128xf32, #tpu.memory_space<vmem>>, vector<24x128xf32>
    tpu.vector_store %arg11[%c280, %c0_61], %90 {strides = array<i32>} : memref<304x128xf32, #tpu.memory_space<vmem>>, vector<24x128xf32>,
    %c0_62 = arith.constant 0 : index
    %c0_63 = arith.constant 0 : index
    %92 = vector.load %arg5[%c0_62, %c0_63] : memref<1x128xf32, #tpu.memory_space<vmem>>, vector<1x128xf32>
    %c7_64 = arith.constant 7 : index
    %c0_65 = arith.constant 0 : index
    %93 = vector.load %arg11[%c7_64, %c0_65] : memref<304x128xf32, #tpu.memory_space<vmem>>, vector<256x128xf32>
    %c0_66 = arith.constant 0 : index
    %c0_67 = arith.constant 0 : index
    %c0_68 = arith.constant 0 : index
    %94 = vector.load %arg4[%c0_66, %c0_67, %c0_68] : memref<9x128x128xf32, #tpu.memory_space<vmem>>, vector<1x128x128xf32>
    %95 = vector.shape_cast %94 : vector<1x128x128xf32> to vector<128x128xf32>
    %cst_69 = arith.constant dense<0.000000e+00> : vector<256x128xf32>
    %96 = tpu.matmul %93, %95, %cst_69 {dimension_numbers = #tpu.dot_dimension_numbers<[1], [0], [0], [1], [0, 0, 1, 1], [], []>} : vector<256x128xf32>, vector<128x128xf32>, vector<256x128xf32> -> vector<256x128xf32>
    %c8_70 = arith.constant 8 : index
    %c0_71 = arith.constant 0 : index
    %97 = vector.load %arg11[%c8_70, %c0_71] : memref<304x128xf32, #tpu.memory_space<vmem>>, vector<256x128xf32>
    %c1_72 = arith.constant 1 : index
    %c0_73 = arith.constant 0 : index
    %c0_74 = arith.constant 0 : index
    %98 = vector.load %arg4[%c1_72, %c0_73, %c0_74] : memref<9x128x128xf32, #tpu.memory_space<vmem>>, vector<1x128x128xf32>
    %99 = vector.shape_cast %98 : vector<1x128x128xf32> to vector<128x128xf32>
    %cst_75 = arith.constant dense<0.000000e+00> : vector<256x128xf32>
    %100 = tpu.matmul %97, %99, %cst_75 {dimension_numbers = #tpu.dot_dimension_numbers<[1], [0], [0], [1], [0, 0, 1, 1], [], []>} : vector<256x128xf32>, vector<128x128xf32>, vector<256x128xf32> -> vector<256x128xf32>
    %c9_76 = arith.constant 9 : index
    %c0_77 = arith.constant 0 : index
    %101 = vector.load %arg11[%c9_76, %c0_77] : memref<304x128xf32, #tpu.memory_space<vmem>>, vector<256x128xf32>
    %c2_78 = arith.constant 2 : index
    %c0_79 = arith.constant 0 : index
    %c0_80 = arith.constant 0 : index
    %102 = vector.load %arg4[%c2_78, %c0_79, %c0_80] : memref<9x128x128xf32, #tpu.memory_space<vmem>>, vector<1x128x128xf32>
    %103 = vector.shape_cast %102 : vector<1x128x128xf32> to vector<128x128xf32>
    %cst_81 = arith.constant dense<0.000000e+00> : vector<256x128xf32>
    %104 = tpu.matmul %101, %103, %cst_81 {dimension_numbers = #tpu.dot_dimension_numbers<[1], [0], [0], [1], [0, 0, 1, 1], [], []>} : vector<256x128xf32>, vector<128x128xf32>, vector<256x128xf32> -> vector<256x128xf32>
    %c23_82 = arith.constant 23 : index
    %c0_83 = arith.constant 0 : index
    %105 = vector.load %arg11[%c23_82, %c0_83] : memref<304x128xf32, #tpu.memory_space<vmem>>, vector<256x128xf32>
    %c3_84 = arith.constant 3 : index
    %c0_85 = arith.constant 0 : index
    %c0_86 = arith.constant 0 : index
    %106 = vector.load %arg4[%c3_84, %c0_85, %c0_86] : memref<9x128x128xf32, #tpu.memory_space<vmem>>, vector<1x128x128xf32>
    %107 = vector.shape_cast %106 : vector<1x128x128xf32> to vector<128x128xf32>
    %cst_87 = arith.constant dense<0.000000e+00> : vector<256x128xf32>
    %108 = tpu.matmul %105, %107, %cst_87 {dimension_numbers = #tpu.dot_dimension_numbers<[1], [0], [0], [1], [0, 0, 1, 1], [], []>} : vector<256x128xf32>, vector<128x128xf32>, vector<256x128xf32> -> vector<256x128xf32>
    %109 = arith.addf %96, %108 : vector<256x128xf32>
    %c24_88 = arith.constant 24 : index
    %c0_89 = arith.constant 0 : index
    %110 = vector.load %arg11[%c24_88, %c0_89] : memref<304x128xf32, #tpu.memory_space<vmem>>, vector<256x128xf32>
    %c4_90 = arith.constant 4 : index
    %c0_91 = arith.constant 0 : index
    %c0_92 = arith.constant 0 : index
    %111 = vector.load %arg4[%c4_90, %c0_91, %c0_92] : memref<9x128x128xf32, #tpu.memory_space<vmem>>, vector<1x128x128xf32>
    %112 = vector.shape_cast %111 : vector<1x128x128xf32> to vector<128x128xf32>
    %cst_93 = arith.constant dense<0.000000e+00> : vector<256x128xf32>
    %113 = tpu.matmul %110, %112, %cst_93 {dimension_numbers = #tpu.dot_dimension_numbers<[1], [0], [0], [1], [0, 0, 1, 1], [], []>} : vector<256x128xf32>, vector<128x128xf32>, vector<256x128xf32> -> vector<256x128xf32>
    %114 = arith.addf %100, %113 : vector<256x128xf32>
    %c25_94 = arith.constant 25 : index
    %c0_95 = arith.constant 0 : index
    %115 = vector.load %arg11[%c25_94, %c0_95] : memref<304x128xf32, #tpu.memory_space<vmem>>, vector<256x128xf32>
    %c5_96 = arith.constant 5 : index
    %c0_97 = arith.constant 0 : index
    %c0_98 = arith.constant 0 : index
    %116 = vector.load %arg4[%c5_96, %c0_97, %c0_98] : memref<9x128x128xf32, #tpu.memory_space<vmem>>, vector<1x128x128xf32>
    %117 = vector.shape_cast %116 : vector<1x128x128xf32> to vector<128x128xf32>
    %cst_99 = arith.constant dense<0.000000e+00> : vector<256x128xf32>
    %118 = tpu.matmul %115, %117, %cst_99 {dimension_numbers = #tpu.dot_dimension_numbers<[1], [0], [0], [1], [0, 0, 1, 1], [], []>} : vector<256x128xf32>, vector<128x128xf32>, vector<256x128xf32> -> vector<256x128xf32>
    %119 = arith.addf %104, %118 : vector<256x128xf32>
    %c39_100 = arith.constant 39 : index
    %c0_101 = arith.constant 0 : index
    %120 = vector.load %arg11[%c39_100, %c0_101] : memref<304x128xf32, #tpu.memory_space<vmem>>, vector<256x128xf32>
    %c6_102 = arith.constant 6 : index
    %c0_103 = arith.constant 0 : index
    %c0_104 = arith.constant 0 : index
    %121 = vector.load %arg4[%c6_102, %c0_103, %c0_104] : memref<9x128x128xf32, #tpu.memory_space<vmem>>, vector<1x128x128xf32>
    %122 = vector.shape_cast %121 : vector<1x128x128xf32> to vector<128x128xf32>
    %cst_105 = arith.constant dense<0.000000e+00> : vector<256x128xf32>
    %123 = tpu.matmul %120, %122, %cst_105 {dimension_numbers = #tpu.dot_dimension_numbers<[1], [0], [0], [1], [0, 0, 1, 1], [], []>} : vector<256x128xf32>, vector<128x128xf32>, vector<256x128xf32> -> vector<256x128xf32>
    %124 = arith.addf %109, %123 : vector<256x128xf32>
    %c40_106 = arith.constant 40 : index
    %c0_107 = arith.constant 0 : index
    %125 = vector.load %arg11[%c40_106, %c0_107] : memref<304x128xf32, #tpu.memory_space<vmem>>, vector<256x128xf32>
    %c7_108 = arith.constant 7 : index
    %c0_109 = arith.constant 0 : index
    %c0_110 = arith.constant 0 : index
    %126 = vector.load %arg4[%c7_108, %c0_109, %c0_110] : memref<9x128x128xf32, #tpu.memory_space<vmem>>, vector<1x128x128xf32>
    %127 = vector.shape_cast %126 : vector<1x128x128xf32> to vector<128x128xf32>
    %cst_111 = arith.constant dense<0.000000e+00> : vector<256x128xf32>
    %128 = tpu.matmul %125, %127, %cst_111 {dimension_numbers = #tpu.dot_dimension_numbers<[1], [0], [0], [1], [0, 0, 1, 1], [], []>} : vector<256x128xf32>, vector<128x128xf32>, vector<256x128xf32> -> vector<256x128xf32>
    %129 = arith.addf %114, %128 : vector<256x128xf32>
    %c41_112 = arith.constant 41 : index
    %c0_113 = arith.constant 0 : index
    %130 = vector.load %arg11[%c41_112, %c0_113] : memref<304x128xf32, #tpu.memory_space<vmem>>, vector<256x128xf32>
    %c8_114 = arith.constant 8 : index
    %c0_115 = arith.constant 0 : index
    %c0_116 = arith.constant 0 : index
    %131 = vector.load %arg4[%c8_114, %c0_115, %c0_116] : memref<9x128x128xf32, #tpu.memory_space<vmem>>, vector<1x128x128xf32>
    %132 = vector.shape_cast %131 : vector<1x128x128xf32> to vector<128x128xf32>
    %cst_117 = arith.constant dense<0.000000e+00> : vector<256x128xf32>
    %133 = tpu.matmul %130, %132, %cst_117 {dimension_numbers = #tpu.dot_dimension_numbers<[1], [0], [0], [1], [0, 0, 1, 1], [], []>} : vector<256x128xf32>, vector<128x128xf32>, vector<256x128xf32> -> vector<256x128xf32>
    %134 = arith.addf %119, %133 : vector<256x128xf32>
    %135 = tpu.iota {dimensions = array<i32: 0>} : vector<256x1xi32>
    %c16_i32_118 = arith.constant 16 : i32
    %c0_i32_119 = arith.constant 0 : i32
    %136 = arith.cmpi eq, %c16_i32_118, %c0_i32_119 : i32
    %c1_i32_120 = arith.constant 1 : i32
    %137 = arith.select %136, %c1_i32_120, %c16_i32_118 : i32
    %138 = vector.broadcast %137 : i32 to vector<256x1xi32>
    %139 = arith.remsi %135, %138 : vector<256x1xi32>
    %c0_i32_121 = arith.constant 0 : i32
    %140 = vector.broadcast %c0_i32_121 : i32 to vector<256x1xi32>
    %141 = arith.cmpi ne, %139, %140 : vector<256x1xi32>
    %c0_i32_122 = arith.constant 0 : i32
    %142 = vector.broadcast %c0_i32_122 : i32 to vector<256x1xi32>
    %143 = arith.cmpi slt, %139, %142 : vector<256x1xi32>
    %c0_i32_123 = arith.constant 0 : i32
    %144 = arith.cmpi slt, %137, %c0_i32_123 : i32
    %145 = vector.broadcast %144 : i1 to vector<256x1xi1>
    %146 = vector.broadcast %145 : vector<256x1xi1> to vector<256x1xi1>
    %147 = arith.xori %143, %146 : vector<256x1xi1>
    %148 = arith.andi %147, %141 : vector<256x1xi1>
    %149 = vector.broadcast %137 : i32 to vector<256x1xi32>
    %150 = arith.addi %139, %149 : vector<256x1xi32>
    %151 = arith.select %148, %150, %139 : vector<256x1xi1>, vector<256x1xi32>
    %c0_i32_124 = arith.constant 0 : i32
    %152 = vector.broadcast %c0_i32_124 : i32 to vector<256x1xi32>
    %153 = arith.cmpi ne, %151, %152 : vector<256x1xi32>
    %cst_125 = arith.constant 0.000000e+00 : f32
    %154 = vector.shape_cast %153 : vector<256x1xi1> to vector<256x1xi1>
    %155 = vector.broadcast %154 : vector<256x1xi1> to vector<256x128xi1>
    %156 = vector.broadcast %cst_125 : f32 to vector<256x128xf32>
    %157 = arith.select %155, %124, %156 : vector<256x128xi1>, vector<256x128xf32>
    %158 = arith.addf %129, %157 : vector<256x128xf32>
    %c15_i32_126 = arith.constant 15 : i32
    %159 = vector.broadcast %c15_i32_126 : i32 to vector<256x1xi32>
    %160 = arith.cmpi ne, %151, %159 : vector<256x1xi32>
    %cst_127 = arith.constant 0.000000e+00 : f32
    %161 = vector.shape_cast %160 : vector<256x1xi1> to vector<256x1xi1>
    %162 = vector.broadcast %161 : vector<256x1xi1> to vector<256x128xi1>
    %163 = vector.broadcast %cst_127 : f32 to vector<256x128xf32>
    %164 = arith.select %162, %134, %163 : vector<256x128xi1>, vector<256x128xf32>
    %165 = arith.addf %158, %164 : vector<256x128xf32>
    %166 = vector.broadcast %92 : vector<1x128xf32> to vector<256x128xf32>
    %167 = arith.addf %165, %166 : vector<256x128xf32>
    %cst_128 = arith.constant dense<0.000000e+00> : vector<128xf32>
    %168 = vector.multi_reduction <add>, %167, %cst_128 [0] : vector<256x128xf32> to vector<128xf32>
    %169 = vector.shape_cast %168 : vector<128xf32> to vector<1x128xf32>
    %cst_129 = arith.constant 2.560000e+02 : f32
    %170 = vector.broadcast %cst_129 : f32 to vector<1x128xf32>
    %171 = arith.divf %169, %170 : vector<1x128xf32>
    %c0_130 = arith.constant 0 : index
    %c0_131 = arith.constant 0 : index
    %172 = vector.load %arg6[%c0_130, %c0_131] : memref<128x2xf32, #tpu.memory_space<vmem>>, vector<128x2xf32>
    %cst_132 = arith.constant dense<0.000000e+00> : vector<1x2xf32>
    %173 = tpu.matmul %171, %172, %cst_132 {dimension_numbers = #tpu.dot_dimension_numbers<[1], [0], [0], [1], [0, 0, 1, 1], [], []>} : vector<1x128xf32>, vector<128x2xf32>, vector<1x2xf32> -> vector<1x2xf32>
    %c0_133 = arith.constant 0 : index
    %c0_134 = arith.constant 0 : index
    %174 = vector.load %arg7[%c0_133, %c0_134] : memref<1x2xf32, #tpu.memory_space<vmem>>, vector<1x2xf32>
    %175 = arith.addf %173, %174 : vector<1x2xf32>
    %cst_135 = arith.constant 0.000000e+00 : f32
    %176 = vector.broadcast %cst_135 : f32 to vector<1x2xf32>
    %177 = arith.maximumf %175, %176 : vector<1x2xf32>
    %c0_136 = arith.constant 0 : index
    %c0_137 = arith.constant 0 : index
    %178 = vector.load %arg8[%c0_136, %c0_137] : memref<2x128xf32, #tpu.memory_space<vmem>>, vector<2x128xf32>
    %cst_138 = arith.constant dense<0.000000e+00> : vector<1x128xf32>
    %179 = tpu.matmul %177, %178, %cst_138 {dimension_numbers = #tpu.dot_dimension_numbers<[1], [0], [0], [1], [0, 0, 1, 1], [], []>} : vector<1x2xf32>, vector<2x128xf32>, vector<1x128xf32> -> vector<1x128xf32>
    %c0_139 = arith.constant 0 : index
    %c0_140 = arith.constant 0 : index
    %180 = vector.load %arg9[%c0_139, %c0_140] : memref<1x128xf32, #tpu.memory_space<vmem>>, vector<1x128xf32>
    %181 = arith.addf %179, %180 : vector<1x128xf32>
    %182 = arith.negf %181 : vector<1x128xf32>
    %183 = math.exp %182 : vector<1x128xf32>
    %cst_141 = arith.constant 1.000000e+00 : f32
    %184 = vector.broadcast %cst_141 : f32 to vector<1x128xf32>
    %185 = arith.addf %184, %183 : vector<1x128xf32>
    %186 = arith.divf %184, %185 : vector<1x128xf32>
    %c0_142 = arith.constant 0 : index
    %c24_143 = arith.constant 24 : index
    %c0_144 = arith.constant 0 : index
    %187 = vector.load %arg1[%c0_142, %c24_143, %c0_144] : memref<1x304x128xf32, #tpu.memory_space<vmem>>, vector<1x256x128xf32>
    %188 = vector.shape_cast %187 : vector<1x256x128xf32> to vector<256x128xf32>
    %189 = vector.broadcast %186 : vector<1x128xf32> to vector<256x128xf32>
    %190 = arith.mulf %167, %189 : vector<256x128xf32>
    %191 = arith.addf %188, %190 : vector<256x128xf32>
    %cst_145 = arith.constant 0.000000e+00 : f32
    %192 = vector.broadcast %cst_145 : f32 to vector<24x128xf32>
    %c0_146 = arith.constant 0 : index
    %c0_147 = arith.constant 0 : index
    %c0_148 = arith.constant 0 : index
    %193 = vector.load %arg10[%c0_146, %c0_147, %c0_148] : memref<1x304x128xf32, #tpu.memory_space<vmem>>, vector<1x24x128xf32>
    %194 = vector.shape_cast %193 : vector<1x24x128xf32> to vector<24x128xf32>
    %195 = vector.shape_cast %192 : vector<24x128xf32> to vector<1x24x128xf32>
    tpu.vector_store %arg10[%c0_146, %c0_147, %c0_148], %195 {strides = array<i32>} : memref<1x304x128xf32, #tpu.memory_space<vmem>>, vector<1x24x128xf32>,
    %c0_149 = arith.constant 0 : index
    %c24_150 = arith.constant 24 : index
    %c0_151 = arith.constant 0 : index
    %196 = vector.load %arg10[%c0_149, %c24_150, %c0_151] : memref<1x304x128xf32, #tpu.memory_space<vmem>>, vector<1x256x128xf32>
    %197 = vector.shape_cast %196 : vector<1x256x128xf32> to vector<256x128xf32>
    %198 = vector.shape_cast %191 : vector<256x128xf32> to vector<1x256x128xf32>
    tpu.vector_store %arg10[%c0_149, %c24_150, %c0_151], %198 {strides = array<i32>} : memref<1x304x128xf32, #tpu.memory_space<vmem>>, vector<1x256x128xf32>,
    %cst_152 = arith.constant 0.000000e+00 : f32
    %199 = vector.broadcast %cst_152 : f32 to vector<24x128xf32>
    %c0_153 = arith.constant 0 : index
    %c280_154 = arith.constant 280 : index
    %c0_155 = arith.constant 0 : index
    %200 = vector.load %arg10[%c0_153, %c280_154, %c0_155] : memref<1x304x128xf32, #tpu.memory_space<vmem>>, vector<1x24x128xf32>
    %201 = vector.shape_cast %200 : vector<1x24x128xf32> to vector<24x128xf32>
    %202 = vector.shape_cast %199 : vector<24x128xf32> to vector<1x24x128xf32>
    tpu.vector_store %arg10[%c0_153, %c280_154, %c0_155], %202 {strides = array<i32>} : memref<1x304x128xf32, #tpu.memory_space<vmem>>, vector<1x24x128xf32>,
    return
  }
  func.func @transform_0(%arg0: i32) -> (i32, i32, i32) {
    %c0_i32 = arith.constant 0 : i32
    %c0_i32_0 = arith.constant 0 : i32
    %c0_i32_1 = arith.constant 0 : i32
    return %arg0, %c0_i32, %c0_i32_0 : i32, i32, i32
  }
  func.func @transform_1(%arg0: i32) -> (i32, i32, i32) {
    %c0_i32 = arith.constant 0 : i32
    %c0_i32_0 = arith.constant 0 : i32
    %c0_i32_1 = arith.constant 0 : i32
    %c0_i32_2 = arith.constant 0 : i32
    return %c0_i32, %c0_i32_0, %c0_i32_1 : i32, i32, i32
  }
  func.func @transform_2(%arg0: i32) -> (i32, i32) {
    %c0_i32 = arith.constant 0 : i32
    %c0_i32_0 = arith.constant 0 : i32
    %c0_i32_1 = arith.constant 0 : i32
    return %c0_i32, %c0_i32_0 : i32, i32
  }
  func.func @transform_3(%arg0: i32) -> (i32, i32, i32) {
    %c0_i32 = arith.constant 0 : i32
    %c0_i32_0 = arith.constant 0 : i32
    %c0_i32_1 = arith.constant 0 : i32
    %c0_i32_2 = arith.constant 0 : i32
    return %c0_i32, %c0_i32_0, %c0_i32_1 : i32, i32, i32
  }
  func.func @transform_4(%arg0: i32) -> (i32, i32) {
    %c0_i32 = arith.constant 0 : i32
    %c0_i32_0 = arith.constant 0 : i32
    %c0_i32_1 = arith.constant 0 : i32
    return %c0_i32, %c0_i32_0 : i32, i32
  }
  func.func @transform_5(%arg0: i32) -> (i32, i32) {
    %c0_i32 = arith.constant 0 : i32
    %c0_i32_0 = arith.constant 0 : i32
    %c0_i32_1 = arith.constant 0 : i32
    return %c0_i32, %c0_i32_0 : i32, i32
  }
  func.func @transform_6(%arg0: i32) -> (i32, i32) {
    %c0_i32 = arith.constant 0 : i32
    %c0_i32_0 = arith.constant 0 : i32
    %c0_i32_1 = arith.constant 0 : i32
    return %c0_i32, %c0_i32_0 : i32, i32
  }
  func.func @transform_7(%arg0: i32) -> (i32, i32) {
    %c0_i32 = arith.constant 0 : i32
    %c0_i32_0 = arith.constant 0 : i32
    %c0_i32_1 = arith.constant 0 : i32
    return %c0_i32, %c0_i32_0 : i32, i32
  }
  func.func @transform_8(%arg0: i32) -> (i32, i32) {
    %c0_i32 = arith.constant 0 : i32
    %c0_i32_0 = arith.constant 0 : i32
    %c0_i32_1 = arith.constant 0 : i32
    return %c0_i32, %c0_i32_0 : i32, i32
  }
  func.func @transform_9(%arg0: i32) -> (i32, i32, i32) {
    %c0_i32 = arith.constant 0 : i32
    %c0_i32_0 = arith.constant 0 : i32
    %c0_i32_1 = arith.constant 0 : i32
    return %arg0, %c0_i32, %c0_i32_0 : i32, i32, i32
  }
}

</mosaic_0001>

<bundles_post_ra>
// kernel: residual_group_forward.5
= control target key start
LH: loop header
LB: loop body
LE: loop exit
PB: predicated region body
PF: predicated region fallthrough
CT: control target
= control target key end

     0   :  { %s5519_s15 = smov 0   ;;  %s7104_s0 = inlined_call_operand.vmem [shape: f32[2,304,128], index: 0, kind: input, shape index: {}]   ;;  %s7105_s1 = inlined_call_operand.vmem [shape: f32[2,304,128], index: 1, kind: input, shape index: {}]   ;;  %s7106_s2 = inlined_call_operand.vmem [shape: f32[9,128,128], index: 2, kind: input, shape index: {}]   ;;  %s7107_s3 = inlined_call_operand.vmem [shape: f32[1,128], index: 3, kind: input, shape index: {}]   ;;  %s7108_s4 = inlined_call_operand.vmem [shape: f32[2,256,128], index: 4, kind: output, shape index: {}]  }
   0x1 LB: > { %s3688_s16 = sadd.s32 4294967295, %s5492_s15   ;;  %p3692_p0 = scmp.ge.s32.totalorder %s5492_s15, 1  ;;  %s5492_s15 = sphi %s5519_s15, %s14_s15  }
   0x2   : > { %p172_p1 = scmp.lt.s32.totalorder %s5492_s15, 3 }
   0x4   : > { %p173_p2 = pnand %p3692_p0, %p172_p1 }
   0x6   : > { %176 = sbr.rel (%p173_p2) target bundleno = 554 (0x22a), region = 36 }
   0xd   : > { %v3729_v0 = vld [vmem:[%s7106_s2 + $0x180] sm:$0xff]  ;;  %v3730_v1 = vld [vmem:[%s7106_s2 + $0x188] sm:$0xff]  ;;  %p203_p3 = scmp.lt.s32.totalorder %s3688_s16, 1  ;;  %v3731_v5 = vld [vmem:[%s7106_s2 + $0x190] sm:$0xff] }
   0xe   : > { %v251_v2 = vld [vmem:[%s7106_s2] sm:$0xff]  ;;  %v4981_v3 = vpack.c.bf16 %v3730_v1, %v3729_v0  ;;  %v252_v4 = vld [vmem:[%s7106_s2 + $0x8] sm:$0xff]  ;;  %v3732_v6 = vld [vmem:[%s7106_s2 + $0x198] sm:$0xff] }
   0xf   : > { %v5545_v7 = vpack.c.bf16 %v252_v4, %v251_v2  ;;  %v4985_v8 = vpack.c.bf16 %v3732_v6, %v3731_v5  ;;  %v253_v9 = vld [vmem:[%s7106_s2 + $0x10] sm:$0xff]  ;;  %v254_v10 = vld [vmem:[%s7106_s2 + $0x18] sm:$0xff]  ;;  %v3733_v11 = vld [vmem:[%s7106_s2 + $0x1a0] sm:$0xff]  ;;  %s7207_s16 = smov (!%p203_p3, %s3688_s16), 1 }
  0x10   : > { %4982 = vmatprep.subr.bf16.mxu1 %v4981_v3  ;;  %v5558_v12 = vpack.c.bf16 %v254_v10, %v253_v9  ;;  %v3734_v13 = vld [vmem:[%s7106_s2 + $0x1a8] sm:$0xff]  ;;  %v255_v14 = vld [vmem:[%s7106_s2 + $0x20] sm:$0xff]  ;;  %s5477_s17 = smul.u32 304, %s7207_s16  ;;  %v3735_v18 = vld [vmem:[%s7106_s2 + $0x1b0] sm:$0xff] }
  0x11   : > { %v256_v15 = vld [vmem:[%s7106_s2 + $0x28] sm:$0xff]  ;;  %5014 = vmatprep.subr.bf16.mxu0 %v5545_v7  ;;  %4984 = vmatpush3.bf16.msra.mxu1 %v4981_v3  ;;  %v4989_v16 = vpack.c.bf16 %v3734_v13, %v3733_v11  ;;  %v3736_v19 = vld [vmem:[%s7106_s2 + $0x1b8] sm:$0xff]  ;;  %v257_v20 = vld [vmem:[%s7106_s2 + $0x30] sm:$0xff] }
  0x12   : > { %5016 = vmatpush3.bf16.msra.mxu0 %v5545_v7  ;;  %4986 = vmatprep.subr.bf16.mxu1 %v4985_v8  ;;  %v5573_v17 = vpack.c.bf16 %v256_v15, %v255_v14  ;;  %v258_v21 = vld [vmem:[%s7106_s2 + $0x38] sm:$0xff]  ;;  %s5592_s28 = scalar_lea.vmem %s7104_s0, %s5477_s17  ;;  %v4993_v22 = vpack.c.bf16 %v3736_v19, %v3735_v18  ;;  %v3737_v24 = vld [vmem:[%s7106_s2 + $0x1c0] sm:$0xff]  ;;  %v3738_v25 = vld [vmem:[%s7106_s2 + $0x1c8] sm:$0xff]  ;;  %s6751_s21 = scalar_lea.vmem %s7105_s1, %s5477_s17 }
  0x13   : > { %5018 = vmatprep.subr.bf16.mxu0 %v5558_v12  ;;  %v5596_v23 = vpack.c.bf16 %v258_v21, %v257_v20  ;;  %v5605_v26 = vld [vmem:[%s5592_s28 + $0x17] sm:$0xff]  ;;  %v259_v27 = vld [vmem:[%s7106_s2 + $0x40] sm:$0xff]  ;;  %v260_v28 = vld [vmem:[%s7106_s2 + $0x48] sm:$0xff]  ;;  %v4997_v30 = vpack.c.bf16 %v3738_v25, %v3737_v24  ;;  %s3828_s17 = sshll.u32 %s7207_s16, 8 }
  0x14   : > { %4293 = vmatprep.mubr.f32.mxu1 %v5605_v26  ;;  %v219_v29 = vld [vmem:[%s5592_s28 + $0x7] sm:$0xff]  ;;  %v5617_v31 = vpack.c.bf16 %v260_v28, %v259_v27  ;;  %v3739_v32 = vld [vmem:[%s7106_s2 + $0x1d0] sm:$0xff]  ;;  %v3740_v33 = vld [vmem:[%s7106_s2 + $0x1d8] sm:$0xff]  ;;  %s6789_s25 = scalar_lea.vmem %s7108_s4, %s3828_s17 }
  0x15   : > { %4988 = vmatpush3.bf16.msra.mxu1 %v4985_v8  ;;  %4373 = vmatprep.mubr.f32.mxu0 %v219_v29  ;;  %v261_v34 = vld [vmem:[%s7106_s2 + $0x50] sm:$0xff]  ;;  %v262_v35 = vld [vmem:[%s7106_s2 + $0x58] sm:$0xff]  ;;  %v5001_v36 = vpack.c.bf16 %v3740_v33, %v3739_v32  ;;  %v3741_v38 = vld [vmem:[%s7106_s2 + $0x1e0] sm:$0xff] }
  0x16   : > { %5020 = vmatpush3.bf16.msra.mxu0 %v5558_v12  ;;  %4990 = vmatprep.subr.bf16.mxu1 %v4989_v16  ;;  %v5633_v37 = vpack.c.bf16 %v262_v35, %v261_v34  ;;  %v3742_v39 = vld [vmem:[%s7106_s2 + $0x1e8] sm:$0xff]  ;;  %v263_v40 = vld [vmem:[%s7106_s2 + $0x60] sm:$0xff]  ;;  %v3743_v44 = vld [vmem:[%s7106_s2 + $0x1f0] sm:$0xff] }
  0x17   : > { %5022 = vmatprep.subr.bf16.mxu0 %v5573_v17  ;;  %v264_v41 = vld [vmem:[%s7106_s2 + $0x68] sm:$0xff]  ;;  %v5005_v42 = vpack.c.bf16 %v3742_v39, %v3741_v38  ;;  %v3744_v45 = vld [vmem:[%s7106_s2 + $0x1f8] sm:$0xff]  ;;  %v265_v46 = vld [vmem:[%s7106_s2 + $0x70] sm:$0xff] }
  0x18   : > { %v5649_v43 = vpack.c.bf16 %v264_v41, %v263_v40  ;;  %v266_v47 = vld [vmem:[%s7106_s2 + $0x78] sm:$0xff]  ;;  %v5009_v48 = vpack.c.bf16 %v3744_v45, %v3743_v44  ;;  %v3761_v50 = vld [vmem:[%s7106_s2 + $0x280] sm:$0xff]  ;;  %v3762_v51 = vld [vmem:[%s7106_s2 + $0x288] sm:$0xff] }
  0x19   : > { %4992 = vmatpush3.bf16.msra.mxu1 %v4989_v16  ;;  %v5665_v49 = vpack.c.bf16 %v266_v47, %v265_v46  ;;  %v5109_v52 = vpack.c.bf16 %v3762_v51, %v3761_v50  ;;  %v3763_v53 = vld [vmem:[%s7106_s2 + $0x290] sm:$0xff]  ;;  %v3764_v54 = vld [vmem:[%s7106_s2 + $0x298] sm:$0xff]  ;;  %v5686_v57 = vld [vmem:[%s5592_s28 + $0x27] sm:$0xff] }
  0x1a   : > { %5024 = vmatpush3.bf16.msra.mxu0 %v5573_v17  ;;  %4994 = vmatprep.subr.bf16.mxu1 %v4993_v22  ;;  %v222_v55 = vld [vmem:[%s5592_s28 + $0x1f] sm:$0xff]  ;;  %v220_v56 = vld [vmem:[%s5592_s28 + $0xf] sm:$0xff]  ;;  %v5113_v58 = vpack.c.bf16 %v3764_v54, %v3763_v53  ;;  %v5700_v62 = vld [vmem:[%s5592_s28 + $0x37] sm:$0xff] }
  0x1b   : > { %5026 = vmatprep.subr.bf16.mxu0 %v5596_v23  ;;  %v3765_v59 = vld [vmem:[%s7106_s2 + $0x2a0] sm:$0xff]  ;;  %v3766_v60 = vld [vmem:[%s7106_s2 + $0x2a8] sm:$0xff]  ;;  %v3767_v0 = vld [vmem:[%s7106_s2 + $0x2b0] sm:$0xff] }
  0x1c   : > { %v5696_v61 = vld [vmem:[%s5592_s28 + $0x2f] sm:$0xff]  ;;  %v5117_v63 = vpack.c.bf16 %v3766_v60, %v3765_v59  ;;  %v3768_v1 = vld [vmem:[%s7106_s2 + $0x2b8] sm:$0xff]  ;;  %v5717_v3 = vld [vmem:[%s5592_s28 + $0x47] sm:$0xff] }
  0x1d   : > { %4996 = vmatpush3.bf16.msra.mxu1 %v4993_v22  ;;  %v5713_v2 = vld [vmem:[%s5592_s28 + $0x3f] sm:$0xff]  ;;  %v5121_v4 = vpack.c.bf16 %v3768_v1, %v3767_v0  ;;  %v3770_v6 = vld [vmem:[%s7106_s2 + $0x2c8] sm:$0xff]  ;;  %v5735_v8 = vld [vmem:[%s5592_s28 + $0x57] sm:$0xff] }
  0x1e   : > { %5028 = vmatpush3.bf16.msra.mxu0 %v5596_v23  ;;  %4998 = vmatprep.subr.bf16.mxu1 %v4997_v30  ;;  %v3769_v5 = vld [vmem:[%s7106_s2 + $0x2c0] sm:$0xff]  ;;  %v3771_v10 = vld [vmem:[%s7106_s2 + $0x2d0] sm:$0xff]  ;;  %v3772_v11 = vld [vmem:[%s7106_s2 + $0x2d8] sm:$0xff] }
  0x1f   : > { %5030 = vmatprep.subr.bf16.mxu0 %v5617_v31  ;;  %v5125_v9 = vpack.c.bf16 %v3770_v6, %v3769_v5  ;;  %v5753_v13 = vld [vmem:[%s5592_s28 + $0x67] sm:$0xff]  ;;  %v5129_v14 = vpack.c.bf16 %v3772_v11, %v3771_v10  ;;  %v5771_v18 = vld [vmem:[%s5592_s28 + $0x77] sm:$0xff]  ;;  %v5785_v22 = vld [vmem:[%s5592_s28 + $0x7f] sm:$0xff] }
  0x20   : > { %v3773_v15 = vld [vmem:[%s7106_s2 + $0x2e0] sm:$0xff]  ;;  %v3774_v16 = vld [vmem:[%s7106_s2 + $0x2e8] sm:$0xff]  ;;  %v3775_v20 = vld [vmem:[%s7106_s2 + $0x2f0] sm:$0xff] }
  0x21   : > { %5000 = vmatpush3.bf16.msra.mxu1 %v4997_v30  ;;  %v5133_v19 = vpack.c.bf16 %v3774_v16, %v3773_v15  ;;  %v3776_v21 = vld [vmem:[%s7106_s2 + $0x2f8] sm:$0xff]  ;;  %v3713_v25 = vld [vmem:[%s7106_s2 + $0x100] sm:$0xff]  ;;  %v5803_v27 = vld [vmem:[%s5592_s28 + $0x8f] sm:$0xff] }
  0x22   : > { %5032 = vmatpush3.bf16.msra.mxu0 %v5617_v31  ;;  %5002 = vmatprep.subr.bf16.mxu1 %v5001_v36  ;;  %v5137_v24 = vpack.c.bf16 %v3776_v21, %v3775_v20  ;;  %v3745_v28 = vld [vmem:[%s7106_s2 + $0x200] sm:$0xff]  ;;  %v3746_v29 = vld [vmem:[%s7106_s2 + $0x208] sm:$0xff]  ;;  %v5813_v30 = vld [vmem:[%s5592_s28 + $0x97] sm:$0xff] }
  0x23   : > { %5034 = vmatprep.subr.bf16.mxu0 %v5633_v37  ;;  %v3715_v33 = vld [vmem:[%s7106_s2 + $0x110] sm:$0xff]  ;;  %v3716_v34 = vld [vmem:[%s7106_s2 + $0x118] sm:$0xff]  ;;  %v5827_v35 = vpack.c.bf16 %v3746_v29, %v3745_v28  ;;  %v5839_v38 = vld [vmem:[%s5592_s28 + $0xa7] sm:$0xff] }
  0x24   : > { %v5842_v39 = vld [vmem:[%s5592_s28 + $0x29] sm:$0xff]  ;;  %v5145_v40 = vpack.c.bf16 %v3716_v34, %v3715_v33  ;;  %v3717_v41 = vld [vmem:[%s7106_s2 + $0x120] sm:$0xff]  ;;  %v5860_v44 = vld [vmem:[%s5592_s28 + $0x31] sm:$0xff] }
  0x25   : > { %5004 = vmatpush3.bf16.msra.mxu1 %v5001_v36  ;;  %v5832_v36 = vld [vmem:[%s5592_s28 + $0x9f] sm:$0xff]  ;;  %v5863_v45 = vld [vmem:[%s5592_s28 + $0xb7] sm:$0xff]  ;;  %v5888_v53 = vld [vmem:[%s5592_s28 + $0x49] sm:$0xff] }
  0x26   : > { %5036 = vmatpush3.bf16.msra.mxu0 %v5633_v37  ;;  %5006 = vmatprep.subr.bf16.mxu1 %v5005_v42  ;;  %7121 = vst [vmem:[#allocation3_spill] sm:$0xff] %v5863_v45  ;;  %v5866_v46 = vld [vmem:[%s5592_s28 + $0x39] sm:$0xff]  ;;  %v5882_v51 = vld [vmem:[%s5592_s28 + $0x41] sm:$0xff]  ;;  %v5904_v59 = vld [vmem:[%s5592_s28 + $0x51] sm:$0xff] }
  0x27   : > { %5038 = vmatprep.subr.bf16.mxu0 %v5649_v43  ;;  %v5878_v50 = vld [vmem:[%s5592_s28 + $0xbf] sm:$0xff]  ;;  %v5907_v60 = vld [vmem:[%s5592_s28 + $0xd7] sm:$0xff]  ;;  %v5932_v10 = vld [vmem:[%s5592_s28 + $0x69] sm:$0xff] }
  0x28   : > { %7122 = vst [vmem:[#allocation4_spill] sm:$0xff] %v5878_v50  ;;  %7125 = vst [vmem:[#allocation7_spill] sm:$0xff] %v5907_v60  ;;  %v3723_v1 = vld [vmem:[%s7106_s2 + $0x150] sm:$0xff]  ;;  %v5922_v5 = vld [vmem:[%s5592_s28 + $0xdf] sm:$0xff] }
  0x29   : > { %5008 = vmatpush3.bf16.msra.mxu1 %v5005_v42  ;;  %v3718_v42 = vld [vmem:[%s7106_s2 + $0x128] sm:$0xff]  ;;  %7126 = vst [vmem:[#allocation8_spill] sm:$0xff] %v5922_v5  ;;  %v5951_v20 = vld [vmem:[%s5592_s28 + $0xf7] sm:$0xff]  ;;  %v5966_v28 = vld [vmem:[%s5592_s28 + $0xff] sm:$0xff] }
  0x2a   : > { %5040 = vmatpush3.bf16.msra.mxu0 %v5649_v43  ;;  %5010 = vmatprep.subr.bf16.mxu1 %v5009_v48  ;;  %v5149_v47 = vpack.c.bf16 %v3718_v42, %v3717_v41  ;;  %v5926_v6 = vld [vmem:[%s5592_s28 + $0x61] sm:$0xff]  ;;  %v5944_v16 = vld [vmem:[%s5592_s28 + $0xef] sm:$0xff]  ;;  %v5954_v21 = vld [vmem:[%s5592_s28 + $0x79] sm:$0xff] }
  0x2b   : > { %5042 = vmatprep.subr.bf16.mxu0 %v5665_v49  ;;  %v3726_v15 = vld [vmem:[%s7106_s2 + $0x168] sm:$0xff]  ;;  %7128 = vst [vmem:[#allocation10_spill] sm:$0xff] %v5944_v16 }
  0x2c   : > { %v5970_v29 = vld [vmem:[%s5592_s28 + $0x81] sm:$0xff]  ;;  %v5976_v33 = vld [vmem:[%s5592_s28 + $0x89] sm:$0xff] }
  0x2d   : > { %5012 = vmatpush3.bf16.msra.mxu1 %v5009_v48  ;;  %v3719_v48 = vld [vmem:[%s7106_s2 + $0x130] sm:$0xff]  ;;  %v3778_v41 = vld [vmem:[%s7106_s2 + $0x308] sm:$0xff] }
  0x2e   : > { %5044 = vmatpush3.bf16.msra.mxu0 %v5665_v49  ;;  %5269 = vmatprep.subr.bf16.mxu1 %v5545_v7  ;;  %v5988_v42 = vld [vmem:[%s5592_s28 + $0x10f] sm:$0xff] }
  0x2f   : > { %5110 = vmatprep.subr.bf16.mxu0 %v5109_v52  ;;  %7130 = vst [vmem:[#allocation12_spill] sm:$0xff] %v5988_v42 }
  0x30   : > { %4294 = vmatmul.mubr.f32.vlgmr.msra.gmra.mrb[0].mxu1 %v222_v55 }
  0x31   : > { %4374 = vmatmul.mubr.f32.vlgmr.msra.gmra.mrb[0].mxu0 %v220_v56  ;;  %5277 = vmatpush3.bf16.msra.mxu1 %v5545_v7  ;;  %v5731_v7 = vld [vmem:[%s5592_s28 + $0x4f] sm:$0xff] }
  0x32   : > { %5112 = vmatpush3.bf16.msra.mxu0 %v5109_v52  ;;  %4296 = vmatprep.mubr.f32.mxu1 %v5686_v57  ;;  %v5885_v52 = vld [vmem:[%s5592_s28 + $0xc7] sm:$0xff] }
  0x33   : > { %4376 = vmatprep.mubr.f32.mxu0 %v5605_v26  ;;  %5114 = vmatprep.subr.bf16.mxu0 %v5113_v58  ;;  %v3714_v26 = vld [vmem:[%s7106_s2 + $0x108] sm:$0xff]  ;;  %7123 = vst [vmem:[#allocation5_spill] sm:$0xff] %v5885_v52 }
  0x34   : > { %4297 = vmatmul.mubr.f32.gmra.mrb[2].mxu1 %v5696_v61  ;;  %5270 = vmatprep.subr.bf16.mxu1 %v5558_v12  ;;  %v5141_v32 = vpack.c.bf16 %v3714_v26, %v3713_v25  ;;  %v3722_v56 = vld [vmem:[%s7106_s2 + $0x148] sm:$0xff]  ;;  %v3727_v25 = vld [vmem:[%s7106_s2 + $0x170] sm:$0xff]  ;;  %v3728_v26 = vld [vmem:[%s7106_s2 + $0x178] sm:$0xff] }
  0x35   : > { %4377 = vmatmul.mubr.f32.gmra.mrb[2].mxu0 %v222_v55  ;;  %4299 = vmatprep.mubr.f32.mxu1 %v5700_v62  ;;  %v3721_v55 = vld [vmem:[%s7106_s2 + $0x140] sm:$0xff]  ;;  %v5169_v34 = vpack.c.bf16 %v3728_v26, %v3727_v25  ;;  %v3751_v25 = vld [vmem:[%s7106_s2 + $0x230] sm:$0xff] }
  0x36   : > { %5116 = vmatpush3.bf16.msra.mxu0 %v5113_v58  ;;  %4379 = vmatprep.mubr.f32.mxu0 %v5686_v57  ;;  %v5900_v58 = vld [vmem:[%s5592_s28 + $0xcf] sm:$0xff]  ;;  %v5157_v0 = vpack.c.bf16 %v3722_v56, %v3721_v55  ;;  %v3748_v55 = vld [vmem:[%s7106_s2 + $0x218] sm:$0xff]  ;;  %v6010_v56 = vld [vmem:[%s5592_s28 + $0xa1] sm:$0xff] }
  0x37   : > { %5118 = vmatprep.subr.bf16.mxu0 %v5117_v63  ;;  %5278 = vmatpush3.bf16.msra.mxu1 %v5558_v12  ;;  %v5749_v12 = vld [vmem:[%s5592_s28 + $0x5f] sm:$0xff]  ;;  %7124 = vst [vmem:[#allocation6_spill] sm:$0xff] %v5900_v58 }
  0x38   : > { %4300 = vmatmul.mubr.f32.gmra.mrb[4].mxu1 %v5713_v2  ;;  %5271 = vmatprep.subr.bf16.mxu1 %v5573_v17  ;;  %v6044_v26 = vld [vmem:[%s5592_s28 + $0xc1] sm:$0xff] }
  0x39   : > { %4380 = vmatmul.mubr.f32.gmra.mrb[4].mxu0 %v5696_v61  ;;  %4302 = vmatprep.mubr.f32.mxu1 %v5717_v3 }
  0x3a   : > { %5120 = vmatpush3.bf16.msra.mxu0 %v5117_v63  ;;  %4382 = vmatprep.mubr.f32.mxu0 %v5700_v62  ;;  %v5910_v63 = vld [vmem:[%s5592_s28 + $0x59] sm:$0xff] }
  0x3b   : > { %5122 = vmatprep.subr.bf16.mxu0 %v5121_v4  ;;  %5279 = vmatpush3.bf16.msra.mxu1 %v5573_v17  ;;  %v5767_v17 = vld [vmem:[%s5592_s28 + $0x6f] sm:$0xff] }
  0x3c   : > { %4303 = vmatmul.mubr.f32.gmra.mrb[6].mxu1 %v5731_v7  ;;  %5272 = vmatprep.subr.bf16.mxu1 %v5596_v23 }
  0x3d   : > { %4383 = vmatmul.mubr.f32.gmra.mrb[6].mxu0 %v5713_v2  ;;  %4305 = vmatprep.mubr.f32.mxu1 %v5735_v8 }
  0x3e   : > { %5124 = vmatpush3.bf16.msra.mxu0 %v5121_v4  ;;  %4385 = vmatprep.mubr.f32.mxu0 %v5717_v3  ;;  %v3724_v4 = vld [vmem:[%s7106_s2 + $0x158] sm:$0xff] }
  0x3f   : > { %5126 = vmatprep.subr.bf16.mxu0 %v5125_v9  ;;  %5280 = vmatpush3.bf16.msra.mxu1 %v5596_v23  ;;  %v5789_v23 = vld [vmem:[%s5592_s28 + $0x87] sm:$0xff]  ;;  %v5161_v11 = vpack.c.bf16 %v3724_v4, %v3723_v1 }
  0x40   : > { %4306 = vmatmul.mubr.f32.gmra.mrb[8].mxu1 %v5749_v12  ;;  %5273 = vmatprep.subr.bf16.mxu1 %v5617_v31  ;;  %v3749_v4 = vld [vmem:[%s7106_s2 + $0x220] sm:$0xff] }
  0x41   : > { %4386 = vmatmul.mubr.f32.gmra.mrb[8].mxu0 %v5731_v7  ;;  %4308 = vmatprep.mubr.f32.mxu1 %v5753_v13 }
  0x42   : > { %5128 = vmatpush3.bf16.msra.mxu0 %v5125_v9  ;;  %4388 = vmatprep.mubr.f32.mxu0 %v5735_v8  ;;  %v5929_v9 = vld [vmem:[%s5592_s28 + $0xe7] sm:$0xff] }
  0x43   : > { %5130 = vmatprep.subr.bf16.mxu0 %v5129_v14  ;;  %5281 = vmatpush3.bf16.msra.mxu1 %v5617_v31  ;;  %v5816_v31 = vld [vmem:[%s5592_s28 + $0x19] sm:$0xff]  ;;  %7127 = vst [vmem:[#allocation9_spill] sm:$0xff] %v5929_v9 }
  0x44   : > { %4309 = vmatmul.mubr.f32.gmra.mrb[10].mxu1 %v5767_v17  ;;  %5274 = vmatprep.subr.bf16.mxu1 %v5633_v37 }
  0x45   : > { %4389 = vmatmul.mubr.f32.gmra.mrb[10].mxu0 %v5749_v12  ;;  %4311 = vmatprep.mubr.f32.mxu1 %v5771_v18 }
  0x46   : > { %5132 = vmatpush3.bf16.msra.mxu0 %v5129_v14  ;;  %4391 = vmatprep.mubr.f32.mxu0 %v5753_v13  ;;  %v3725_v14 = vld [vmem:[%s7106_s2 + $0x160] sm:$0xff] }
  0x47   : > { %5134 = vmatprep.subr.bf16.mxu0 %v5133_v19  ;;  %5282 = vmatpush3.bf16.msra.mxu1 %v5633_v37  ;;  %v5836_v37 = vld [vmem:[%s5592_s28 + $0x21] sm:$0xff] }
  0x48   : > { %4312 = vmatmul.mubr.f32.gmra.mrb[12].mxu1 %v5785_v22  ;;  %5275 = vmatprep.subr.bf16.mxu1 %v5649_v43 }
  0x49   : > { %4392 = vmatmul.mubr.f32.gmra.mrb[12].mxu0 %v5767_v17  ;;  %4314 = vmatprep.mubr.f32.mxu1 %v5789_v23 }
  0x4a   : > { %5136 = vmatpush3.bf16.msra.mxu0 %v5133_v19  ;;  %4394 = vmatprep.mubr.f32.mxu0 %v5771_v18  ;;  %v5948_v19 = vld [vmem:[%s5592_s28 + $0x71] sm:$0xff] }
  0x4b   : > { %5138 = vmatprep.subr.bf16.mxu0 %v5137_v24  ;;  %5283 = vmatpush3.bf16.msra.mxu1 %v5649_v43  ;;  %v5856_v43 = vld [vmem:[%s5592_s28 + $0xaf] sm:$0xff] }
  0x4c   : > { %4315 = vmatmul.mubr.f32.gmra.mrb[14].mxu1 %v5803_v27  ;;  %5276 = vmatprep.subr.bf16.mxu1 %v5665_v49  ;;  %7120 = vst [vmem:[#allocation2_spill] sm:$0xff] %v5856_v43 }
  0x4d   : > { %4395 = vmatmul.mubr.f32.gmra.mrb[14].mxu0 %v5785_v22  ;;  %4317 = vmatprep.mubr.f32.mxu1 %v5813_v30 }
  0x4e   : > { %5140 = vmatpush3.bf16.msra.mxu0 %v5137_v24  ;;  %4613 = vmatprep.mubr.f32.mxu0 %v5816_v31  ;;  %v5165_v24 = vpack.c.bf16 %v3726_v15, %v3725_v14  ;;  %v6028_v14 = vld [vmem:[%s5592_s28 + $0xb1] sm:$0xff]  ;;  %v6031_v15 = vld [vmem:[%s5592_s28 + $0xb9] sm:$0xff] }
  0x4f   : > { %5142 = vmatprep.subr.bf16.mxu0 %v5141_v32  ;;  %5284 = vmatpush3.bf16.msra.mxu1 %v5665_v49  ;;  %v3720_v49 = vld [vmem:[%s7106_s2 + $0x138] sm:$0xff] }
  0x50   : > { %4318 = vmatmul.mubr.f32.gmra.mrb[16].mxu1 %v5832_v36  ;;  %5046 = vmatprep.subr.bf16.mxu1 %v5827_v35  ;;  %v5153_v54 = vpack.c.bf16 %v3720_v49, %v3719_v48  ;;  %v5995_v48 = vld [vmem:[%s5592_s28 + $0x99] sm:$0xff] }
  0x51   : > { %4614 = vmatmul.mubr.f32.vlgmr.msra.gmra.mrb[16].mxu0 %v5836_v37  ;;  %4320 = vmatprep.mubr.f32.mxu1 %v5839_v38 }
  0x52   : > { %4616 = vmatprep.mubr.f32.mxu0 %v5842_v39  ;;  %5144 = vmatpush3.bf16.msra.mxu0 %v5141_v32  ;;  %v5973_v32 = vld [vmem:[%s5592_s28 + $0x107] sm:$0xff] }
  0x53   : > { %5146 = vmatprep.subr.bf16.mxu0 %v5145_v40  ;;  %7129 = vst [vmem:[#allocation11_spill] sm:$0xff] %v5973_v32 }
  0x54   : > { %4321 = vmatmul.mubr.f32.gmra.mrb[18].mxu1 %v5856_v43 }
  0x55   : > { %4617 = vmatmul.mubr.f32.gmra.mrb[18].mxu0 %v5860_v44  ;;  %4323 = vmatprep.mubr.f32.mxu1 %v5863_v45 }
  0x56   : > { %4619 = vmatprep.mubr.f32.mxu0 %v5866_v46  ;;  %5148 = vmatpush3.bf16.msra.mxu0 %v5145_v40  ;;  %v3777_v40 = vld [vmem:[%s7106_s2 + $0x300] sm:$0xff] }
  0x57   : > { %5150 = vmatprep.subr.bf16.mxu0 %v5149_v47  ;;  %v5997_v49 = vpack.c.bf16 %v3778_v41, %v3777_v40  ;;  %v3753_v41 = vld [vmem:[%s7106_s2 + $0x240] sm:$0xff] }
  0x58   : > { %4324 = vmatmul.mubr.f32.gmra.mrb[20].mxu1 %v5878_v50 }
  0x59   : > { %4620 = vmatmul.mubr.f32.gmra.mrb[20].mxu0 %v5882_v51  ;;  %4326 = vmatprep.mubr.f32.mxu1 %v5885_v52 }
  0x5a   : > { %4622 = vmatprep.mubr.f32.mxu0 %v5888_v53  ;;  %5152 = vmatpush3.bf16.msra.mxu0 %v5149_v47  ;;  %v5992_v47 = vld [vmem:[%s5592_s28 + $0x91] sm:$0xff] }
  0x5b   : > { %5154 = vmatprep.subr.bf16.mxu0 %v5153_v54 }
  0x5c   : > { %4327 = vmatmul.mubr.f32.gmra.mrb[22].mxu1 %v5900_v58 }
  0x5d   : > { %4623 = vmatmul.mubr.f32.gmra.mrb[22].mxu0 %v5904_v59  ;;  %4329 = vmatprep.mubr.f32.mxu1 %v5907_v60 }
  0x5e   : > { %4625 = vmatprep.mubr.f32.mxu0 %v5910_v63  ;;  %5156 = vmatpush3.bf16.msra.mxu0 %v5153_v54  ;;  %v3747_v54 = vld [vmem:[%s7106_s2 + $0x210] sm:$0xff] }
  0x5f   : > { %5158 = vmatprep.subr.bf16.mxu0 %v5157_v0  ;;  %v5049_v1 = vpack.c.bf16 %v3748_v55, %v3747_v54  ;;  %v3754_v54 = vld [vmem:[%s7106_s2 + $0x248] sm:$0xff]  ;;  %v6060_v55 = vld [vmem:[%s5592_s28 + $0xd1] sm:$0xff] }
  0x60   : > { %4330 = vmatmul.mubr.f32.gmra.mrb[24].mxu1 %v5922_v5 }
  0x61   : > { %4626 = vmatmul.mubr.f32.gmra.mrb[24].mxu0 %v5926_v6  ;;  %4332 = vmatprep.mubr.f32.mxu1 %v5929_v9 }
  0x62   : > { %4628 = vmatprep.mubr.f32.mxu0 %v5932_v10  ;;  %5160 = vmatpush3.bf16.msra.mxu0 %v5157_v0  ;;  %v6013_v0 = vld [vmem:[%s5592_s28 + $0xa9] sm:$0xff] }
  0x63   : > { %5162 = vmatprep.subr.bf16.mxu0 %v5161_v11 }
  0x64   : > { %4333 = vmatmul.mubr.f32.gmra.mrb[26].mxu1 %v5944_v16 }
  0x65   : > { %4629 = vmatmul.mubr.f32.gmra.mrb[26].mxu0 %v5948_v19  ;;  %4335 = vmatprep.mubr.f32.mxu1 %v5951_v20 }
  0x66   : > { %4631 = vmatprep.mubr.f32.mxu0 %v5954_v21  ;;  %5164 = vmatpush3.bf16.msra.mxu0 %v5161_v11  ;;  %v3750_v11 = vld [vmem:[%s7106_s2 + $0x228] sm:$0xff] }
  0x67   : > { %5166 = vmatprep.subr.bf16.mxu0 %v5165_v24 }
  0x68   : > { %4336 = vmatmul.mubr.f32.gmra.mrb[28].mxu1 %v5966_v28 }
  0x69   : > { %4632 = vmatmul.mubr.f32.gmra.mrb[28].mxu0 %v5970_v29  ;;  %4338 = vmatprep.mubr.f32.mxu1 %v5973_v32  ;;  %v3759_v32 = vld [vmem:[%s7106_s2 + $0x270] sm:$0xff] }
  0x6a   : > { %4634 = vmatprep.mubr.f32.mxu0 %v5976_v33  ;;  %5168 = vmatpush3.bf16.msra.mxu0 %v5165_v24  ;;  %v5053_v24 = vpack.c.bf16 %v3750_v11, %v3749_v4  ;;  %v5061_v4 = vpack.c.bf16 %v3754_v54, %v3753_v41  ;;  %v3755_v11 = vld [vmem:[%s7106_s2 + $0x250] sm:$0xff]  ;;  %v3757_v54 = vld [vmem:[%s7106_s2 + $0x260] sm:$0xff] }
  0x6b   : > { %5170 = vmatprep.subr.bf16.mxu0 %v5169_v34 }
  0x6c   : > { %4339 = vmatmul.mubr.f32.gmra.mrb[30].mxu1 %v5988_v42 }
  0x6d   : > { %4635 = vmatmul.mubr.f32.gmra.mrb[30].mxu0 %v5992_v47  ;;  %4397 = vmatprep.mubr.f32.mxu1 %v5789_v23 }
  0x6e   : > { %4637 = vmatprep.mubr.f32.mxu0 %v5995_v48  ;;  %5172 = vmatpush3.bf16.msra.mxu0 %v5169_v34  ;;  %v6047_v34 = vld [vmem:[%s5592_s28 + $0xc9] sm:$0xff] }
  0x6f   : > { %5174 = vmatprep.subr.bf16.mxu0 %v5997_v49 }
  0x70   : > { %4398 = vmatmul.mubr.f32.vlgmr.msra.gmra.mrb[16].mxu1 %v5803_v27 }
  0x71   : > { %4638 = vmatmul.mubr.f32.gmra.mrb[32].mxu0 %v6010_v56  ;;  %5048 = vmatpush3.bf16.msra.mxu1 %v5827_v35  ;;  %v3752_v35 = vld [vmem:[%s7106_s2 + $0x238] sm:$0xff] }
  0x72   : > { %4400 = vmatprep.mubr.f32.mxu1 %v5813_v30  ;;  %4640 = vmatprep.mubr.f32.mxu0 %v6013_v0  ;;  %v5057_v40 = vpack.c.bf16 %v3752_v35, %v3751_v25  ;;  %v6076_v25 = vld [vmem:[%s5592_s28 + $0xe1] sm:$0xff]  ;;  %v6079_v35 = vld [vmem:[%s5592_s28 + $0xe9] sm:$0xff] }
  0x73   : > { %5050 = vmatprep.subr.bf16.mxu1 %v5049_v1 }
  0x74   : > { %4401 = vmatmul.mubr.f32.gmra.mrb[18].mxu1 %v5832_v36 }
  0x75   : > { %4641 = vmatmul.mubr.f32.gmra.mrb[34].mxu0 %v6028_v14  ;;  %5052 = vmatpush3.bf16.msra.mxu1 %v5049_v1  ;;  %v6063_v1 = vld [vmem:[%s5592_s28 + $0xd9] sm:$0xff] }
  0x76   : > { %4403 = vmatprep.mubr.f32.mxu1 %v5839_v38  ;;  %4643 = vmatprep.mubr.f32.mxu0 %v6031_v15 }
  0x77   : > { %5054 = vmatprep.subr.bf16.mxu1 %v5053_v24 }
  0x78   : > { %4404 = vmatmul.mubr.f32.gmra.mrb[20].mxu1 %v5856_v43  ;;  %v3706_v43 = vld [vmem:[%s7106_s2 + $0xc8] sm:$0xff] }
  0x79   : > { %4644 = vmatmul.mubr.f32.gmra.mrb[36].mxu0 %v6044_v26  ;;  %5056 = vmatpush3.bf16.msra.mxu1 %v5053_v24  ;;  %v3756_v24 = vld [vmem:[%s7106_s2 + $0x258] sm:$0xff] }
  0x7a   : > { %4406 = vmatprep.mubr.f32.mxu1 %v5863_v45  ;;  %4646 = vmatprep.mubr.f32.mxu0 %v6047_v34  ;;  %v5065_v41 = vpack.c.bf16 %v3756_v24, %v3755_v11  ;;  %v6092_v11 = vld [vmem:[%s5592_s28 + $0xf1] sm:$0xff]  ;;  %v6095_v24 = vld [vmem:[%s5592_s28 + $0xf9] sm:$0xff] }
  0x7b   : > { %5058 = vmatprep.subr.bf16.mxu1 %v5057_v40  ;;  %v3704_v45 = vld [vmem:[%s7106_s2 + $0xb8] sm:$0xff] }
  0x7c   : > { %4407 = vmatmul.mubr.f32.gmra.mrb[22].mxu1 %v5878_v50  ;;  %v3702_v50 = vld [vmem:[%s7106_s2 + $0xa8] sm:$0xff] }
  0x7d   : > { %4647 = vmatmul.mubr.f32.gmra.mrb[38].mxu0 %v6060_v55  ;;  %5060 = vmatpush3.bf16.msra.mxu1 %v5057_v40  ;;  %v3758_v40 = vld [vmem:[%s7106_s2 + $0x268] sm:$0xff] }
  0x7e   : > { %4409 = vmatprep.mubr.f32.mxu1 %v5885_v52  ;;  %4649 = vmatprep.mubr.f32.mxu0 %v6063_v1  ;;  %v5069_v42 = vpack.c.bf16 %v3758_v40, %v3757_v54  ;;  %v6108_v54 = vld [vmem:[%s5592_s28 + $0x101] sm:$0xff]  ;;  %v1363_v40 = vld [vmem:[%s5592_s28 + $0x109] sm:$0xff] }
  0x7f   : > { %5062 = vmatprep.subr.bf16.mxu1 %v5061_v4  ;;  %v3701_v52 = vld [vmem:[%s7106_s2 + $0xa0] sm:$0xff] }
  0x80   : > { %4410 = vmatmul.mubr.f32.gmra.mrb[24].mxu1 %v5900_v58  ;;  %v3699_v58 = vld [vmem:[%s7106_s2 + $0x90] sm:$0xff] }
  0x81   : > { %4650 = vmatmul.mubr.f32.gmra.mrb[40].mxu0 %v6076_v25  ;;  %5064 = vmatpush3.bf16.msra.mxu1 %v5061_v4  ;;  %v3760_v4 = vld [vmem:[%s7106_s2 + $0x278] sm:$0xff] }
  0x82   : > { %4412 = vmatprep.mubr.f32.mxu1 %v5907_v60  ;;  %4652 = vmatprep.mubr.f32.mxu0 %v6079_v35  ;;  %v3697_v60 = vld [vmem:[%s7106_s2 + $0x80] sm:$0xff] }
  0x83   : > { %5066 = vmatprep.subr.bf16.mxu1 %v5065_v41 }
  0x84   : > { %4413 = vmatmul.mubr.f32.gmra.mrb[26].mxu1 %v5922_v5  ;;  %v5073_v5 = vpack.c.bf16 %v3760_v4, %v3759_v32  ;;  %v6122_v32 = vld [vmem:[%s5592_s28 + $0x18] sm:$0xff]  ;;  %v316_v4 = vld [vmem:[%s5592_s28 + $0x9] sm:$0xff] }
  0x85   : > { %4653 = vmatmul.mubr.f32.gmra.mrb[42].mxu0 %v6092_v11  ;;  %5068 = vmatpush3.bf16.msra.mxu1 %v5065_v41  ;;  %v3698_v41 = vld [vmem:[%s7106_s2 + $0x88] sm:$0xff] }
  0x86   : > { %4415 = vmatprep.mubr.f32.mxu1 %v5929_v9  ;;  %4655 = vmatprep.mubr.f32.mxu0 %v6095_v24  ;;  %v1364_v9 = vld [vmem:[%s5592_s28 + $0x111] sm:$0xff] }
  0x87   : > { %5070 = vmatprep.subr.bf16.mxu1 %v5069_v42 }
  0x88   : > { %4416 = vmatmul.mubr.f32.gmra.mrb[28].mxu1 %v5944_v16  ;;  %v5077_v16 = vpack.c.bf16 %v3698_v41, %v3697_v60  ;;  %v3780_v60 = vld [vmem:[%s7106_s2 + $0x318] sm:$0xff]  ;;  %v6144_v41 = vld [vmem:[%s5592_s28 + $0x28] sm:$0xff] }
  0x89   : > { %4656 = vmatmul.mubr.f32.gmra.mrb[44].mxu0 %v6108_v54  ;;  %5072 = vmatpush3.bf16.msra.mxu1 %v5069_v42  ;;  %v3700_v42 = vld [vmem:[%s7106_s2 + $0x98] sm:$0xff] }
  0x8a   : > { %4418 = vmatprep.mubr.f32.mxu1 %v5951_v20  ;;  %4658 = vmatprep.mubr.f32.mxu0 %v1363_v40  ;;  %v6133_v20 = vld [vmem:[%s5592_s28 + $0x20] sm:$0xff]  ;;  %v3779_v40 = vld [vmem:[%s7106_s2 + $0x310] sm:$0xff] }
  0x8b   : > { %5074 = vmatprep.subr.bf16.mxu1 %v5073_v5 }
  0x8c   : > { %4419 = vmatmul.mubr.f32.gmra.mrb[30].mxu1 %v5966_v28  ;;  %v317_v28 = vld [vmem:[%s5592_s28 + $0x11] sm:$0xff] }
  0x8d   : > { %4659 = vmatmul.mubr.f32.gmra.mrb[46].mxu0 %v1364_v9  ;;  %5076 = vmatpush3.bf16.msra.mxu1 %v5073_v5  ;;  %v5081_v5 = vpack.c.bf16 %v3700_v42, %v3699_v58  ;;  %v5177_v9 = vpack.c.bf16 %v3780_v60, %v3779_v40  ;;  %v3781_v58 = vld [vmem:[%s7106_s2 + $0x320] sm:$0xff]  ;;  %v3782_v42 = vld [vmem:[%s7106_s2 + $0x328] sm:$0xff]  ;;  %v6165_v40 = vld [vmem:[%s5592_s28 + $0x38] sm:$0xff] }
  0x8e   : > { %4453 = vmatprep.mubr.f32.mxu1 %v6122_v32  ;;  %4693 = vmatprep.mubr.f32.mxu0 %v316_v4  ;;  %v6154_v4 = vld [vmem:[%s5592_s28 + $0x30] sm:$0xff]  ;;  %v5181_v60 = vpack.c.bf16 %v3782_v42, %v3781_v58  ;;  %v3705_v42 = vld [vmem:[%s7106_s2 + $0xc0] sm:$0xff] }
  0x8f   : > { %5078 = vmatprep.subr.bf16.mxu1 %v5077_v16 }
  0x90   : > { %4454 = vmatmul.mubr.f32.vlgmr.msra.gmra.mrb[32].mxu1 %v6133_v20 }
  0x91   : > { %4694 = vmatmul.mubr.f32.vlgmr.msra.gmra.mrb[16].mxu0 %v317_v28  ;;  %5080 = vmatpush3.bf16.msra.mxu1 %v5077_v16  ;;  %v5085_v16 = vpack.c.bf16 %v3702_v50, %v3701_v52  ;;  %v3703_v28 = vld [vmem:[%s7106_s2 + $0xb0] sm:$0xff]  ;;  %v3784_v52 = vld [vmem:[%s7106_s2 + $0x338] sm:$0xff] }
  0x92   : > { %4456 = vmatprep.mubr.f32.mxu1 %v6144_v41  ;;  %4696 = vmatprep.mubr.f32.mxu0 %v5816_v31  ;;  %v6178_v31 = vld [vmem:[%s5592_s28 + $0x40] sm:$0xff]  ;;  %v3783_v50 = vld [vmem:[%s7106_s2 + $0x330] sm:$0xff] }
  0x93   : > { %5176 = vmatpush3.bf16.msra.mxu0 %v5997_v49  ;;  %5082 = vmatprep.subr.bf16.mxu1 %v5081_v5  ;;  %v6188_v49 = vld [vmem:[%s5592_s28 + $0x48] sm:$0xff]  ;;  %v5185_v58 = vpack.c.bf16 %v3784_v52, %v3783_v50  ;;  %v3707_v50 = vld [vmem:[%s7106_s2 + $0xd0] sm:$0xff]  ;;  %v3708_v52 = vld [vmem:[%s7106_s2 + $0xd8] sm:$0xff] }
  0x94   : > { %4457 = vmatmul.mubr.f32.gmra.mrb[34].mxu1 %v6154_v4  ;;  %5178 = vmatprep.subr.bf16.mxu0 %v5177_v9 }
  0x95   : > { %4697 = vmatmul.mubr.f32.gmra.mrb[18].mxu0 %v5836_v37  ;;  %4459 = vmatprep.mubr.f32.mxu1 %v6165_v40  ;;  %v5089_v37 = vpack.c.bf16 %v3704_v45, %v3703_v28  ;;  %v3785_v45 = vld [vmem:[%s7106_s2 + $0x340] sm:$0xff] }
  0x96   : > { %4699 = vmatprep.mubr.f32.mxu0 %v5842_v39  ;;  %5084 = vmatpush3.bf16.msra.mxu1 %v5081_v5  ;;  %v6200_v39 = vld [vmem:[%s5592_s28 + $0x50] sm:$0xff]  ;;  %v3786_v5 = vld [vmem:[%s7106_s2 + $0x348] sm:$0xff] }
  0x97   : > { %5180 = vmatpush3.bf16.msra.mxu0 %v5177_v9  ;;  %5086 = vmatprep.subr.bf16.mxu1 %v5085_v16  ;;  %v6210_v9 = vld [vmem:[%s5592_s28 + $0x58] sm:$0xff]  ;;  %v5189_v28 = vpack.c.bf16 %v3786_v5, %v3785_v45  ;;  %v3709_v45 = vld [vmem:[%s7106_s2 + $0xe0] sm:$0xff]  ;;  %v3710_v5 = vld [vmem:[%s7106_s2 + $0xe8] sm:$0xff] }
  0x98   : > { %4460 = vmatmul.mubr.f32.gmra.mrb[36].mxu1 %v6178_v31  ;;  %5182 = vmatprep.subr.bf16.mxu0 %v5181_v60 }
  0x99   : > { %4700 = vmatmul.mubr.f32.gmra.mrb[20].mxu0 %v5860_v44  ;;  %4462 = vmatprep.mubr.f32.mxu1 %v6188_v49  ;;  %v5093_v44 = vpack.c.bf16 %v3706_v43, %v3705_v42  ;;  %v3787_v43 = vld [vmem:[%s7106_s2 + $0x350] sm:$0xff] }
  0x9a   : > { %4702 = vmatprep.mubr.f32.mxu0 %v5866_v46  ;;  %5088 = vmatpush3.bf16.msra.mxu1 %v5085_v16  ;;  %v6222_v46 = vld [vmem:[%s5592_s28 + $0x60] sm:$0xff]  ;;  %v3788_v16 = vld [vmem:[%s7106_s2 + $0x358] sm:$0xff] }
  0x9b   : > { %5184 = vmatpush3.bf16.msra.mxu0 %v5181_v60  ;;  %5090 = vmatprep.subr.bf16.mxu1 %v5089_v37  ;;  %v6232_v60 = vld [vmem:[%s5592_s28 + $0x68] sm:$0xff]  ;;  %v5193_v42 = vpack.c.bf16 %v3788_v16, %v3787_v43  ;;  %v3711_v43 = vld [vmem:[%s7106_s2 + $0xf0] sm:$0xff]  ;;  %v3712_v16 = vld [vmem:[%s7106_s2 + $0xf8] sm:$0xff] }
  0x9c   : > { %4463 = vmatmul.mubr.f32.gmra.mrb[38].mxu1 %v6200_v39  ;;  %5186 = vmatprep.subr.bf16.mxu0 %v5185_v58 }
  0x9d   : > { %4703 = vmatmul.mubr.f32.gmra.mrb[22].mxu0 %v5882_v51  ;;  %4465 = vmatprep.mubr.f32.mxu1 %v6210_v9  ;;  %v5097_v51 = vpack.c.bf16 %v3708_v52, %v3707_v50  ;;  %v6254_v50 = vld [vmem:[%s5592_s28 + $0x78] sm:$0xff] }
  0x9e   : > { %4705 = vmatprep.mubr.f32.mxu0 %v5888_v53  ;;  %5092 = vmatpush3.bf16.msra.mxu1 %v5089_v37  ;;  %v6244_v53 = vld [vmem:[%s5592_s28 + $0x70] sm:$0xff]  ;;  %v3789_v37 = vld [vmem:[%s7106_s2 + $0x360] sm:$0xff] }
  0x9f   : > { %5188 = vmatpush3.bf16.msra.mxu0 %v5185_v58  ;;  %5094 = vmatprep.subr.bf16.mxu1 %v5093_v44  ;;  %v3790_v58 = vld [vmem:[%s7106_s2 + $0x368] sm:$0xff] }
  0xa0   : > { %4466 = vmatmul.mubr.f32.gmra.mrb[40].mxu1 %v6222_v46  ;;  %5190 = vmatprep.subr.bf16.mxu0 %v5189_v28  ;;  %v5197_v52 = vpack.c.bf16 %v3790_v58, %v3789_v37  ;;  %v3793_v37 = vld [vmem:[%s7106_s2 + $0x380] sm:$0xff]  ;;  %v3794_v58 = vld [vmem:[%s7106_s2 + $0x388] sm:$0xff] }
  0xa1   : > { %4706 = vmatmul.mubr.f32.gmra.mrb[24].mxu0 %v5904_v59  ;;  %4468 = vmatprep.mubr.f32.mxu1 %v6232_v60  ;;  %v5101_v59 = vpack.c.bf16 %v3710_v5, %v3709_v45  ;;  %v6276_v45 = vld [vmem:[%s5592_s28 + $0x88] sm:$0xff] }
  0xa2   : > { %4708 = vmatprep.mubr.f32.mxu0 %v5910_v63  ;;  %5096 = vmatpush3.bf16.msra.mxu1 %v5093_v44  ;;  %v6266_v63 = vld [vmem:[%s5592_s28 + $0x80] sm:$0xff]  ;;  %v3791_v44 = vld [vmem:[%s7106_s2 + $0x370] sm:$0xff] }
  0xa3   : > { %5192 = vmatpush3.bf16.msra.mxu0 %v5189_v28  ;;  %5098 = vmatprep.subr.bf16.mxu1 %v5097_v51  ;;  %v3792_v28 = vld [vmem:[%s7106_s2 + $0x378] sm:$0xff] }
  0xa4   : > { %4469 = vmatmul.mubr.f32.gmra.mrb[42].mxu1 %v6244_v53  ;;  %5194 = vmatprep.subr.bf16.mxu0 %v5193_v42  ;;  %v5201_v5 = vpack.c.bf16 %v3792_v28, %v3791_v44  ;;  %v6308_v44 = vld [vmem:[%s5592_s28 + $0xa0] sm:$0xff]  ;;  %v3811_v28 = vld [vmem:[%s7106_s2 + $0x410] sm:$0xff] }
  0xa5   : > { %4709 = vmatmul.mubr.f32.gmra.mrb[26].mxu0 %v5926_v6  ;;  %4471 = vmatprep.mubr.f32.mxu1 %v6254_v50  ;;  %v5105_v6 = vpack.c.bf16 %v3712_v16, %v3711_v43  ;;  %v6298_v43 = vld [vmem:[%s5592_s28 + $0x98] sm:$0xff] }
  0xa6   : > { %4711 = vmatprep.mubr.f32.mxu0 %v5932_v10  ;;  %5100 = vmatpush3.bf16.msra.mxu1 %v5097_v51  ;;  %v6288_v10 = vld [vmem:[%s5592_s28 + $0x90] sm:$0xff]  ;;  %v3809_v51 = vld [vmem:[%s7106_s2 + $0x400] sm:$0xff] }
  0xa7   : > { %5196 = vmatpush3.bf16.msra.mxu0 %v5193_v42  ;;  %5102 = vmatprep.subr.bf16.mxu1 %v5101_v59  ;;  %v3810_v42 = vld [vmem:[%s7106_s2 + $0x408] sm:$0xff] }
  0xa8   : > { %4472 = vmatmul.mubr.f32.gmra.mrb[44].mxu1 %v6266_v63  ;;  %5198 = vmatprep.subr.bf16.mxu0 %v5197_v52  ;;  %v6303_v16 = vpack.c.bf16 %v3810_v42, %v3809_v51  ;;  %v3799_v42 = vld [vmem:[%s7106_s2 + $0x3b0] sm:$0xff] }
  0xa9   : > { %4712 = vmatmul.mubr.f32.gmra.mrb[28].mxu0 %v5948_v19  ;;  %4474 = vmatprep.mubr.f32.mxu1 %v6276_v45  ;;  %v6300_v19 = vpack.c.bf16 %v3794_v58, %v3793_v37  ;;  %v3797_v37 = vld [vmem:[%s7106_s2 + $0x3a0] sm:$0xff] }
  0xaa   : > { %4714 = vmatprep.mubr.f32.mxu0 %v5954_v21  ;;  %5104 = vmatpush3.bf16.msra.mxu1 %v5101_v59  ;;  %v6312_v21 = vld [vmem:[%s5592_s28 + $0xa8] sm:$0xff]  ;;  %v6330_v59 = vld [vmem:[%s5592_s28 + $0xc0] sm:$0xff] }
  0xab   : > { %5200 = vmatpush3.bf16.msra.mxu0 %v5197_v52  ;;  %5106 = vmatprep.subr.bf16.mxu1 %v5105_v6  ;;  %v3795_v52 = vld [vmem:[%s7106_s2 + $0x390] sm:$0xff]  ;;  %v3813_v58 = vld [vmem:[%s7106_s2 + $0x420] sm:$0xff] }
  0xac   : > { %4475 = vmatmul.mubr.f32.gmra.mrb[46].mxu1 %v6288_v10  ;;  %5202 = vmatprep.subr.bf16.mxu0 %v5201_v5 }
  0xad   : > { %4715 = vmatmul.mubr.f32.gmra.mrb[30].mxu0 %v5970_v29  ;;  %4477 = vmatprep.mubr.f32.mxu1 %v6298_v43  ;;  %v6320_v29 = vld [vmem:[%s5592_s28 + $0xb0] sm:$0xff] }
  0xae   : > { %4717 = vmatprep.mubr.f32.mxu0 %v5976_v33  ;;  %5108 = vmatpush3.bf16.msra.mxu1 %v5105_v6  ;;  %v6324_v33 = vld [vmem:[%s5592_s28 + $0xb8] sm:$0xff] }
  0xaf   : > { %5204 = vmatpush3.bf16.msra.mxu0 %v5201_v5  ;;  %5206 = vmatprep.subr.bf16.mxu1 %v6300_v19 }
  0xb0   : > { %4478 = vmatmul.mubr.f32.gmra.mrb[48].mxu1 %v6308_v44  ;;  %5238 = vmatprep.subr.bf16.mxu0 %v6303_v16 }
  0xb1   : > { %4718 = vmatmul.mubr.f32.gmra.mrb[32].mxu0 %v5992_v47  ;;  %4480 = vmatprep.mubr.f32.mxu1 %v6312_v21  ;;  %v6334_v47 = vld [vmem:[%s5592_s28 + $0xc8] sm:$0xff] }
  0xb2   : > { %4720 = vmatprep.mubr.f32.mxu0 %v5995_v48  ;;  %v6340_v48 = vld [vmem:[%s5592_s28 + $0xd0] sm:$0xff] }
  0xb4   : > { %4481 = vmatmul.mubr.f32.gmra.mrb[50].mxu1 %v6320_v29 }
  0xb5   : > { %4721 = vmatmul.mubr.f32.gmra.mrb[34].mxu0 %v6010_v56  ;;  %4483 = vmatprep.mubr.f32.mxu1 %v6324_v33  ;;  %v6344_v56 = vld [vmem:[%s5592_s28 + $0xd8] sm:$0xff] }
  0xb6   : > { %4723 = vmatprep.mubr.f32.mxu0 %v6013_v0  ;;  %v6350_v0 = vld [vmem:[%s5592_s28 + $0xe0] sm:$0xff] }
  0xb8   : > { %4484 = vmatmul.mubr.f32.gmra.mrb[52].mxu1 %v6330_v59 }
  0xb9   : > { %4724 = vmatmul.mubr.f32.gmra.mrb[36].mxu0 %v6028_v14  ;;  %4486 = vmatprep.mubr.f32.mxu1 %v6334_v47  ;;  %v6354_v14 = vld [vmem:[%s5592_s28 + $0xe8] sm:$0xff] }
  0xba   : > { %4726 = vmatprep.mubr.f32.mxu0 %v6031_v15  ;;  %v6360_v15 = vld [vmem:[%s5592_s28 + $0xf0] sm:$0xff] }
  0xbc   : > { %4487 = vmatmul.mubr.f32.gmra.mrb[54].mxu1 %v6340_v48 }
  0xbd   : > { %4727 = vmatmul.mubr.f32.gmra.mrb[38].mxu0 %v6044_v26  ;;  %4489 = vmatprep.mubr.f32.mxu1 %v6344_v56  ;;  %v6364_v26 = vld [vmem:[%s5592_s28 + $0xf8] sm:$0xff] }
  0xbe   : > { %4729 = vmatprep.mubr.f32.mxu0 %v6047_v34  ;;  %v6370_v34 = vld [vmem:[%s5592_s28 + $0x100] sm:$0xff] }
  0xc0   : > { %4490 = vmatmul.mubr.f32.gmra.mrb[56].mxu1 %v6350_v0 }
  0xc1   : > { %4730 = vmatmul.mubr.f32.gmra.mrb[40].mxu0 %v6060_v55  ;;  %4492 = vmatprep.mubr.f32.mxu1 %v6354_v14  ;;  %v6374_v55 = vld [vmem:[%s5592_s28 + $0x108] sm:$0xff] }
  0xc2   : > { %4732 = vmatprep.mubr.f32.mxu0 %v6063_v1  ;;  %v6380_v1 = vld [vmem:[%s5592_s28 + $0x110] sm:$0xff] }
  0xc4   : > { %4493 = vmatmul.mubr.f32.gmra.mrb[58].mxu1 %v6360_v15 }
  0xc5   : > { %4733 = vmatmul.mubr.f32.gmra.mrb[42].mxu0 %v6076_v25  ;;  %4495 = vmatprep.mubr.f32.mxu1 %v6364_v26  ;;  %v267_v25 = vld [vmem:[%s5592_s28 + $0x8] sm:$0xff] }
  0xc6   : > { %4735 = vmatprep.mubr.f32.mxu0 %v6079_v35  ;;  %v3796_v35 = vld [vmem:[%s7106_s2 + $0x398] sm:$0xff] }
  0xc7   : > { %v5209_v6 = vpack.c.bf16 %v3796_v35, %v3795_v52  ;;  %v3818_v52 = vld [vmem:[%s7106_s2 + $0x448] sm:$0xff] }
  0xc8   : > { %4496 = vmatmul.mubr.f32.gmra.mrb[60].mxu1 %v6370_v34 }
  0xc9   : > { %4736 = vmatmul.mubr.f32.gmra.mrb[44].mxu0 %v6092_v11  ;;  %4498 = vmatprep.mubr.f32.mxu1 %v6374_v55  ;;  %v268_v11 = vld [vmem:[%s5592_s28 + $0x10] sm:$0xff] }
  0xca   : > { %4738 = vmatprep.mubr.f32.mxu0 %v6095_v24  ;;  %v3812_v24 = vld [vmem:[%s7106_s2 + $0x418] sm:$0xff] }
  0xcb   : > { %v5241_v5 = vpack.c.bf16 %v3812_v24, %v3811_v28  ;;  %v3804_v28 = vld [vmem:[%s7106_s2 + $0x3d8] sm:$0xff] }
  0xcc   : > { %4499 = vmatmul.mubr.f32.gmra.mrb[62].mxu1 %v6380_v1  ;;  %v3820_v24 = vld [vmem:[%s7106_s2 + $0x458] sm:$0xff] }
  0xcd   : > { %4739 = vmatmul.mubr.f32.gmra.mrb[46].mxu0 %v6108_v54  ;;  %4533 = vmatprep.mubr.f32.mxu1 %v267_v25  ;;  %v3798_v54 = vld [vmem:[%s7106_s2 + $0x3a8] sm:$0xff] }
  0xce   : > { %4773 = vmatprep.mubr.f32.mxu0 %v5686_v57  ;;  %v3814_v57 = vld [vmem:[%s7106_s2 + $0x428] sm:$0xff]  ;;  %v5213_v51 = vpack.c.bf16 %v3798_v54, %v3797_v37 }
  0xcf   : > { %v3802_v25 = vld [vmem:[%s7106_s2 + $0x3c8] sm:$0xff] }
  0xd0   : > { %4534 = vmatmul.mubr.f32.vlgmr.msra.gmra.mrb[32].mxu1 %v268_v11  ;;  %v3803_v11 = vld [vmem:[%s7106_s2 + $0x3d0] sm:$0xff]  ;;  %v3806_v37 = vld [vmem:[%s7106_s2 + $0x3e8] sm:$0xff] }
  0xd1   : > { %4774 = vmatmul.mubr.f32.vlgmr.msra.gmra.mrb[0].mxu0 %v5696_v61  ;;  %5208 = vmatpush3.bf16.msra.mxu1 %v6300_v19  ;;  %v5245_v61 = vpack.c.bf16 %v3814_v57, %v3813_v58  ;;  %v3800_v19 = vld [vmem:[%s7106_s2 + $0x3b8] sm:$0xff]  ;;  %v3822_v54 = vld [vmem:[%s7106_s2 + $0x468] sm:$0xff]  ;;  %v3807_v57 = vld [vmem:[%s7106_s2 + $0x3f0] sm:$0xff] }
  0xd2   : > { %4536 = vmatprep.mubr.f32.mxu1 %v6122_v32  ;;  %4776 = vmatprep.mubr.f32.mxu0 %v5700_v62  ;;  %v3815_v62 = vld [vmem:[%s7106_s2 + $0x430] sm:$0xff]  ;;  %v3816_v32 = vld [vmem:[%s7106_s2 + $0x438] sm:$0xff] }
  0xd3   : > { %5240 = vmatpush3.bf16.msra.mxu0 %v6303_v16  ;;  %5210 = vmatprep.subr.bf16.mxu1 %v5209_v6  ;;  %v3801_v16 = vld [vmem:[%s7106_s2 + $0x3c0] sm:$0xff] }
  0xd4   : > { %4537 = vmatmul.mubr.f32.gmra.mrb[34].mxu1 %v6133_v20  ;;  %5242 = vmatprep.subr.bf16.mxu0 %v5241_v5  ;;  %v5217_v20 = vpack.c.bf16 %v3800_v19, %v3799_v42  ;;  %v5221_v35 = vpack.c.bf16 %v3802_v25, %v3801_v16  ;;  %v7136_v19 = vld [vmem:[#allocation7_spill] sm:$0xff]  ;;  %v1859_v16 = vld [vmem:[%s5592_s28 + $0xff] sm:$0xff] }
  0xd5   : > { %4777 = vmatmul.mubr.f32.gmra.mrb[2].mxu0 %v5713_v2  ;;  %4539 = vmatprep.mubr.f32.mxu1 %v6144_v41  ;;  %v5249_v2 = vpack.c.bf16 %v3816_v32, %v3815_v62  ;;  %v7137_v62 = vld [vmem:[#allocation8_spill] sm:$0xff]  ;;  %v7138_v32 = vld [vmem:[#allocation9_spill] sm:$0xff] }
  0xd6   : > { %4779 = vmatprep.mubr.f32.mxu0 %v5717_v3  ;;  %5212 = vmatpush3.bf16.msra.mxu1 %v5209_v6  ;;  %v3817_v3 = vld [vmem:[%s7106_s2 + $0x440] sm:$0xff]  ;;  %v5225_v6 = vpack.c.bf16 %v3804_v28, %v3803_v11  ;;  %v7141_v28 = vld [vmem:[#allocation12_spill] sm:$0xff] }
  0xd7   : > { %5244 = vmatpush3.bf16.msra.mxu0 %v5241_v5  ;;  %5214 = vmatprep.subr.bf16.mxu1 %v5213_v51  ;;  %v3805_v5 = vld [vmem:[%s7106_s2 + $0x3e0] sm:$0xff] }
  0xd8   : > { %4540 = vmatmul.mubr.f32.gmra.mrb[36].mxu1 %v6154_v4  ;;  %5246 = vmatprep.subr.bf16.mxu0 %v5245_v61  ;;  %v5229_v58 = vpack.c.bf16 %v3806_v37, %v3805_v5  ;;  %v2445_v5 = vld [vmem:[%s5592_s28 + $0x31] sm:$0xff] }
  0xd9   : > { %4780 = vmatmul.mubr.f32.gmra.mrb[4].mxu0 %v5731_v7  ;;  %4542 = vmatprep.mubr.f32.mxu1 %v6165_v40  ;;  %v5253_v7 = vpack.c.bf16 %v3818_v52, %v3817_v3  ;;  %v7140_v52 = vld [vmem:[#allocation11_spill] sm:$0xff] }
  0xda   : > { %4782 = vmatprep.mubr.f32.mxu0 %v5735_v8  ;;  %5216 = vmatpush3.bf16.msra.mxu1 %v5213_v51  ;;  %v3819_v8 = vld [vmem:[%s7106_s2 + $0x450] sm:$0xff]  ;;  %v3808_v51 = vld [vmem:[%s7106_s2 + $0x3f8] sm:$0xff] }
  0xdb   : > { %5248 = vmatpush3.bf16.msra.mxu0 %v5245_v61  ;;  %5218 = vmatprep.subr.bf16.mxu1 %v5217_v20  ;;  %v3824_v61 = vld [vmem:[%s7106_s2 + $0x478] sm:$0xff]  ;;  %v5233_v42 = vpack.c.bf16 %v3808_v51, %v3807_v57 }
  0xdc   : > { %4543 = vmatmul.mubr.f32.gmra.mrb[38].mxu1 %v6178_v31  ;;  %5250 = vmatprep.subr.bf16.mxu0 %v5249_v2  ;;  %v2449_v51 = vld [vmem:[%s5592_s28 + $0x51] sm:$0xff] }
  0xdd   : > { %4783 = vmatmul.mubr.f32.gmra.mrb[6].mxu0 %v5749_v12  ;;  %4545 = vmatprep.mubr.f32.mxu1 %v6188_v49  ;;  %v5257_v12 = vpack.c.bf16 %v3820_v24, %v3819_v8  ;;  %v1863_v8 = vld [vmem:[%s5592_s28 + $0x11f] sm:$0xff] }
  0xde   : > { %4785 = vmatprep.mubr.f32.mxu0 %v5753_v13  ;;  %5220 = vmatpush3.bf16.msra.mxu1 %v5217_v20  ;;  %v3821_v13 = vld [vmem:[%s7106_s2 + $0x460] sm:$0xff]  ;;  %v1858_v20 = vld [vmem:[%s5592_s28 + $0xf7] sm:$0xff] }
  0xdf   : > { %5252 = vmatpush3.bf16.msra.mxu0 %v5249_v2  ;;  %5222 = vmatprep.subr.bf16.mxu1 %v5221_v35  ;;  %v7139_v2 = vld [vmem:[#allocation10_spill] sm:$0xff] }
  0xe0   : > { %4546 = vmatmul.mubr.f32.gmra.mrb[40].mxu1 %v6200_v39  ;;  %5254 = vmatprep.subr.bf16.mxu0 %v5253_v7 }
  0xe1   : > { %4786 = vmatmul.mubr.f32.gmra.mrb[8].mxu0 %v5767_v17  ;;  %4548 = vmatprep.mubr.f32.mxu1 %v6210_v9  ;;  %v5261_v17 = vpack.c.bf16 %v3822_v54, %v3821_v13  ;;  %v2446_v13 = vld [vmem:[%s5592_s28 + $0x39] sm:$0xff] }
  0xe2   : > { %4788 = vmatprep.mubr.f32.mxu0 %v5771_v18  ;;  %5224 = vmatpush3.bf16.msra.mxu1 %v5221_v35  ;;  %v3823_v18 = vld [vmem:[%s7106_s2 + $0x470] sm:$0xff] }
  0xe3   : > { %5256 = vmatpush3.bf16.msra.mxu0 %v5253_v7  ;;  %5226 = vmatprep.subr.bf16.mxu1 %v5225_v6  ;;  %v1862_v7 = vld [vmem:[%s5592_s28 + $0x117] sm:$0xff] }
  0xe4   : > { %4549 = vmatmul.mubr.f32.gmra.mrb[42].mxu1 %v6222_v46  ;;  %5258 = vmatprep.subr.bf16.mxu0 %v5257_v12 }
  0xe5   : > { %4789 = vmatmul.mubr.f32.gmra.mrb[10].mxu0 %v5785_v22  ;;  %4551 = vmatprep.mubr.f32.mxu1 %v6232_v60  ;;  %v5265_v22 = vpack.c.bf16 %v3824_v61, %v3823_v18  ;;  %v2451_v61 = vld [vmem:[%s5592_s28 + $0x61] sm:$0xff] }
  0xe6   : > { %4791 = vmatprep.mubr.f32.mxu0 %v5789_v23  ;;  %5228 = vmatpush3.bf16.msra.mxu1 %v5225_v6  ;;  %v7131_v23 = vld [vmem:[#allocation2_spill] sm:$0xff]  ;;  %v2444_v6 = vld [vmem:[%s5592_s28 + $0x29] sm:$0xff] }
  0xe7   : > { %5260 = vmatpush3.bf16.msra.mxu0 %v5257_v12  ;;  %5230 = vmatprep.subr.bf16.mxu1 %v5229_v58 }
  0xe8   : > { %4552 = vmatmul.mubr.f32.gmra.mrb[44].mxu1 %v6244_v53  ;;  %5262 = vmatprep.subr.bf16.mxu0 %v5261_v17 }
  0xe9   : > { %4792 = vmatmul.mubr.f32.gmra.mrb[12].mxu0 %v5803_v27  ;;  %4554 = vmatprep.mubr.f32.mxu1 %v6254_v50  ;;  %v7132_v27 = vld [vmem:[#allocation3_spill] sm:$0xff] }
  0xea   : > { %4794 = vmatprep.mubr.f32.mxu0 %v5813_v30  ;;  %5232 = vmatpush3.bf16.msra.mxu1 %v5229_v58  ;;  %v7133_v30 = vld [vmem:[#allocation4_spill] sm:$0xff]  ;;  %v2447_v58 = vld [vmem:[%s5592_s28 + $0x41] sm:$0xff] }
  0xeb   : > { %5264 = vmatpush3.bf16.msra.mxu0 %v5261_v17  ;;  %5234 = vmatprep.subr.bf16.mxu1 %v5233_v42 }
  0xec   : > { %4555 = vmatmul.mubr.f32.gmra.mrb[46].mxu1 %v6266_v63  ;;  %5266 = vmatprep.subr.bf16.mxu0 %v5265_v22 }
  0xed   : > { %4795 = vmatmul.mubr.f32.gmra.mrb[14].mxu0 %v5832_v36  ;;  %4557 = vmatprep.mubr.f32.mxu1 %v6276_v45  ;;  %v7134_v36 = vld [vmem:[#allocation5_spill] sm:$0xff] }
  0xee   : > { %4797 = vmatprep.mubr.f32.mxu0 %v5839_v38  ;;  %5236 = vmatpush3.bf16.msra.mxu1 %v5233_v42  ;;  %v7135_v38 = vld [vmem:[#allocation6_spill] sm:$0xff] }
  0xef   : > { %5268 = vmatpush3.bf16.msra.mxu0 %v5265_v22 }
  0xf0   : > { %4558 = vmatmul.mubr.f32.gmra.mrb[48].mxu1 %v6288_v10 }
  0xf1   : > { %4798 = vmatmul.mubr.f32.gmra.mrb[48].mxu0 %v7131_v23  ;;  %4560 = vmatprep.mubr.f32.mxu1 %v6298_v43 }
  0xf2   : > { %4800 = vmatprep.mubr.f32.mxu0 %v7132_v27  ;;  %v2456_v27 = vld [vmem:[%s5592_s28 + $0x89] sm:$0xff] }
  0xf4   : > { %4561 = vmatmul.mubr.f32.gmra.mrb[50].mxu1 %v6308_v44 }
  0xf5   : > { %4801 = vmatmul.mubr.f32.gmra.mrb[50].mxu0 %v7133_v30  ;;  %4563 = vmatprep.mubr.f32.mxu1 %v6312_v21  ;;  %v2458_v30 = vld [vmem:[%s5592_s28 + $0x99] sm:$0xff] }
  0xf6   : > { %4803 = vmatprep.mubr.f32.mxu0 %v7134_v36 }
  0xf8   : > { %4564 = vmatmul.mubr.f32.gmra.mrb[52].mxu1 %v6320_v29 }
  0xf9   : > { %4804 = vmatmul.mubr.f32.gmra.mrb[52].mxu0 %v7135_v38  ;;  %4566 = vmatprep.mubr.f32.mxu1 %v6324_v33 }
  0xfa   : > { %4806 = vmatprep.mubr.f32.mxu0 %v7136_v19  ;;  %v2474_v19 = vld [vmem:[%s5592_s28 + $0x119] sm:$0xff] }
  0xfc   : > { %4567 = vmatmul.mubr.f32.gmra.mrb[54].mxu1 %v6330_v59 }
  0xfd   : > { %4807 = vmatmul.mubr.f32.gmra.mrb[54].mxu0 %v7137_v62  ;;  %4569 = vmatprep.mubr.f32.mxu1 %v6334_v47  ;;  %v2169_v62 = vld [vmem:[%s5592_s28 + $0x120] sm:$0xff] }
  0xfe   : > { %4809 = vmatprep.mubr.f32.mxu0 %v7138_v32  ;;  %v2475_v32 = vld [vmem:[%s5592_s28 + $0x121] sm:$0xff] }
 0x100   : > { %4570 = vmatmul.mubr.f32.gmra.mrb[56].mxu1 %v6340_v48 }
 0x101   : > { %4810 = vmatmul.mubr.f32.gmra.mrb[56].mxu0 %v7139_v2  ;;  %4572 = vmatprep.mubr.f32.mxu1 %v6344_v56 }
 0x102   : > { %4812 = vmatprep.mubr.f32.mxu0 %v1858_v20 }
 0x103   : > { %v6526_v25 = vpop.f32.mrb[0].mxu1 }
 0x104   : > { %v6528_v3 = vpop.f32.mrb[1].mxu1  ;;  %4573 = vmatmul.mubr.f32.gmra.mrb[58].mxu1 %v6350_v0 }
 0x105   : > { %4813 = vmatmul.mubr.f32.gmra.mrb[58].mxu0 %v1859_v16  ;;  %4575 = vmatprep.mubr.f32.mxu1 %v6354_v14 }
 0x106   : > { %4815 = vmatprep.mubr.f32.mxu0 %v7140_v52 }
 0x107   : > { %v6533_v35 = vpop.f32.mrb[2].mxu1 }
 0x108   : > { %v6536_v11 = vpop.f32.mrb[3].mxu1  ;;  %4576 = vmatmul.mubr.f32.gmra.mrb[60].mxu1 %v6360_v15 }
 0x109   : > { %4816 = vmatmul.mubr.f32.gmra.mrb[60].mxu0 %v7141_v28  ;;  %4578 = vmatprep.mubr.f32.mxu1 %v6364_v26 }
 0x10a   : > { %4818 = vmatprep.mubr.f32.mxu0 %v1862_v7 }
 0x10b   : > { %v6542_v24 = vpop.f32.mrb[4].mxu1 }
 0x10c   : > { %v6545_v12 = vpop.f32.mrb[5].mxu1  ;;  %4579 = vmatmul.mubr.f32.gmra.mrb[62].mxu1 %v6370_v34 }
 0x10d   : > { %4819 = vmatmul.mubr.f32.gmra.mrb[62].mxu0 %v1863_v8  ;;  %4853 = vmatprep.mubr.f32.mxu1 %v6144_v41  ;;  %v2448_v41 = vld [vmem:[%s5592_s28 + $0x49] sm:$0xff] }
 0x10e   : > { %4933 = vmatprep.mubr.f32.mxu0 %v2444_v6 }
 0x10f   : > { %v6550_v37 = vpop.f32.mrb[6].mxu1 }
 0x110   : > { %v6553_v54 = vpop.f32.mrb[7].mxu1  ;;  %4854 = vmatmul.mubr.f32.vlgmr.msra.gmra.mrb[32].mxu1 %v6154_v4 }
 0x111   : > { %4934 = vmatmul.mubr.f32.vlgmr.msra.gmra.mrb[16].mxu0 %v2445_v5  ;;  %4856 = vmatprep.mubr.f32.mxu1 %v6165_v40  ;;  %v2450_v40 = vld [vmem:[%s5592_s28 + $0x59] sm:$0xff] }
 0x112   : > { %4936 = vmatprep.mubr.f32.mxu0 %v2446_v13 }
 0x113   : > { %v6558_v17 = vpop.f32.mrb[8].mxu1 }
 0x114   : > { %v6561_v57 = vpop.f32.mrb[9].mxu1  ;;  %4857 = vmatmul.mubr.f32.gmra.mrb[34].mxu1 %v6178_v31 }
 0x115   : > { %4937 = vmatmul.mubr.f32.gmra.mrb[18].mxu0 %v2447_v58  ;;  %4859 = vmatprep.mubr.f32.mxu1 %v6188_v49  ;;  %v2452_v49 = vld [vmem:[%s5592_s28 + $0x69] sm:$0xff] }
 0x116   : > { %4939 = vmatprep.mubr.f32.mxu0 %v2448_v41 }
 0x117   : > { %v6566_v4 = vpop.f32.mrb[10].mxu1 }
 0x118   : > { %v6569_v18 = vpop.f32.mrb[11].mxu1  ;;  %4860 = vmatmul.mubr.f32.gmra.mrb[36].mxu1 %v6200_v39  ;;  %v2453_v39 = vld [vmem:[%s5592_s28 + $0x71] sm:$0xff] }
 0x119   : > { %4940 = vmatmul.mubr.f32.gmra.mrb[20].mxu0 %v2449_v51  ;;  %4862 = vmatprep.mubr.f32.mxu1 %v6210_v9  ;;  %v2454_v9 = vld [vmem:[%s5592_s28 + $0x79] sm:$0xff] }
 0x11a   : > { %4942 = vmatprep.mubr.f32.mxu0 %v2450_v40 }
 0x11b   : > { %v6574_v31 = vpop.f32.mrb[12].mxu1 }
 0x11c   : > { %v6577_v42 = vpop.f32.mrb[13].mxu1  ;;  %4863 = vmatmul.mubr.f32.gmra.mrb[38].mxu1 %v6222_v46  ;;  %v2455_v46 = vld [vmem:[%s5592_s28 + $0x81] sm:$0xff] }
 0x11d   : > { %4943 = vmatmul.mubr.f32.gmra.mrb[22].mxu0 %v2451_v61  ;;  %4865 = vmatprep.mubr.f32.mxu1 %v6232_v60  ;;  %v2457_v60 = vld [vmem:[%s5592_s28 + $0x91] sm:$0xff] }
 0x11e   : > { %4945 = vmatprep.mubr.f32.mxu0 %v2452_v49 }
 0x11f   : > { %v6582_v22 = vpop.f32.mrb[14].mxu1 }
 0x120   : > { %v6585_v23 = vpop.f32.mrb[15].mxu1  ;;  %4866 = vmatmul.mubr.f32.gmra.mrb[40].mxu1 %v6244_v53  ;;  %v2459_v53 = vld [vmem:[%s5592_s28 + $0xa1] sm:$0xff] }
 0x121   : > { %4946 = vmatmul.mubr.f32.gmra.mrb[24].mxu0 %v2453_v39  ;;  %4868 = vmatprep.mubr.f32.mxu1 %v6254_v50  ;;  %v2460_v50 = vld [vmem:[%s5592_s28 + $0xa9] sm:$0xff] }
 0x122   : > { %4948 = vmatprep.mubr.f32.mxu0 %v2454_v9 }
 0x124   : > { %4869 = vmatmul.mubr.f32.gmra.mrb[42].mxu1 %v6266_v63  ;;  %v2461_v63 = vld [vmem:[%s5592_s28 + $0xb1] sm:$0xff] }
 0x125   : > { %4949 = vmatmul.mubr.f32.gmra.mrb[26].mxu0 %v2455_v46  ;;  %4871 = vmatprep.mubr.f32.mxu1 %v6276_v45  ;;  %v2462_v45 = vld [vmem:[%s5592_s28 + $0xb9] sm:$0xff] }
 0x126   : > { %4951 = vmatprep.mubr.f32.mxu0 %v2456_v27 }
 0x128   : > { %4872 = vmatmul.mubr.f32.gmra.mrb[44].mxu1 %v6288_v10  ;;  %v2463_v10 = vld [vmem:[%s5592_s28 + $0xc1] sm:$0xff] }
 0x129   : > { %4952 = vmatmul.mubr.f32.gmra.mrb[28].mxu0 %v2457_v60  ;;  %4874 = vmatprep.mubr.f32.mxu1 %v6298_v43  ;;  %v2464_v43 = vld [vmem:[%s5592_s28 + $0xc9] sm:$0xff] }
 0x12a   : > { %4954 = vmatprep.mubr.f32.mxu0 %v2458_v30 }
 0x12c   : > { %4875 = vmatmul.mubr.f32.gmra.mrb[46].mxu1 %v6308_v44  ;;  %v2465_v44 = vld [vmem:[%s5592_s28 + $0xd1] sm:$0xff] }
 0x12d   : > { %4955 = vmatmul.mubr.f32.gmra.mrb[30].mxu0 %v2459_v53  ;;  %4877 = vmatprep.mubr.f32.mxu1 %v6312_v21  ;;  %v2466_v21 = vld [vmem:[%s5592_s28 + $0xd9] sm:$0xff] }
 0x12e   : > { %4957 = vmatprep.mubr.f32.mxu0 %v2460_v50 }
 0x130   : > { %4878 = vmatmul.mubr.f32.gmra.mrb[48].mxu1 %v6320_v29  ;;  %v2467_v29 = vld [vmem:[%s5592_s28 + $0xe1] sm:$0xff] }
 0x131   : > { %4958 = vmatmul.mubr.f32.gmra.mrb[32].mxu0 %v2461_v63  ;;  %4880 = vmatprep.mubr.f32.mxu1 %v6324_v33  ;;  %v2468_v33 = vld [vmem:[%s5592_s28 + $0xe9] sm:$0xff] }
 0x132   : > { %4960 = vmatprep.mubr.f32.mxu0 %v2462_v45 }
 0x134   : > { %4881 = vmatmul.mubr.f32.gmra.mrb[50].mxu1 %v6330_v59  ;;  %v2469_v59 = vld [vmem:[%s5592_s28 + $0xf1] sm:$0xff] }
 0x135   : > { %4961 = vmatmul.mubr.f32.gmra.mrb[34].mxu0 %v2463_v10  ;;  %4883 = vmatprep.mubr.f32.mxu1 %v6334_v47  ;;  %v2470_v47 = vld [vmem:[%s5592_s28 + $0xf9] sm:$0xff] }
 0x136   : > { %4963 = vmatprep.mubr.f32.mxu0 %v2464_v43 }
 0x138   : > { %4884 = vmatmul.mubr.f32.gmra.mrb[52].mxu1 %v6340_v48  ;;  %v2471_v48 = vld [vmem:[%s5592_s28 + $0x101] sm:$0xff] }
 0x139   : > { %4964 = vmatmul.mubr.f32.gmra.mrb[36].mxu0 %v2465_v44  ;;  %4886 = vmatprep.mubr.f32.mxu1 %v6344_v56 }
 0x13a   : > { %4966 = vmatprep.mubr.f32.mxu0 %v2466_v21 }
 0x13c   : > { %4887 = vmatmul.mubr.f32.gmra.mrb[54].mxu1 %v6350_v0  ;;  %v2472_v0 = vld [vmem:[%s5592_s28 + $0x109] sm:$0xff] }
 0x13d   : > { %4967 = vmatmul.mubr.f32.gmra.mrb[38].mxu0 %v2467_v29  ;;  %4889 = vmatprep.mubr.f32.mxu1 %v6354_v14  ;;  %v2473_v14 = vld [vmem:[%s5592_s28 + $0x111] sm:$0xff] }
 0x13e   : > { %4969 = vmatprep.mubr.f32.mxu0 %v2468_v33 }
 0x140   : > { %4890 = vmatmul.mubr.f32.gmra.mrb[56].mxu1 %v6360_v15  ;;  %v2168_v15 = vld [vmem:[%s5592_s28 + $0x118] sm:$0xff] }
 0x141   : > { %4970 = vmatmul.mubr.f32.gmra.mrb[40].mxu0 %v2469_v59  ;;  %4892 = vmatprep.mubr.f32.mxu1 %v6364_v26 }
 0x142   : > { %4972 = vmatprep.mubr.f32.mxu0 %v2470_v47 }
 0x143   : > { %v6622_v56 = vpop.f32.mrb[16].mxu1 }
 0x144   : > { %v6625_v36 = vpop.f32.mrb[17].mxu1  ;;  %4893 = vmatmul.mubr.f32.gmra.mrb[58].mxu1 %v6370_v34 }
 0x145   : > { %4973 = vmatmul.mubr.f32.gmra.mrb[42].mxu0 %v2471_v48  ;;  %4895 = vmatprep.mubr.f32.mxu1 %v6374_v55 }
 0x146   : > { %4975 = vmatprep.mubr.f32.mxu0 %v2472_v0 }
 0x147   : > { %v4402_v38 = vpop.f32.mrb[18].mxu1 }
 0x148   : > { %v765_v26 = vpop.f32.mrb[19].mxu1  ;;  %4896 = vmatmul.mubr.f32.gmra.mrb[60].mxu1 %v6380_v1 }
 0x149   : > { %4976 = vmatmul.mubr.f32.gmra.mrb[44].mxu0 %v2473_v14  ;;  %4898 = vmatprep.mubr.f32.mxu1 %v2168_v15 }
 0x14a   : > { %4978 = vmatprep.mubr.f32.mxu0 %v2474_v19 }
 0x14b   : > { %v4405_v20 = vpop.f32.mrb[20].mxu1 }
 0x14c   : > { %v775_v2 = vpop.f32.mrb[21].mxu1  ;;  %4899 = vmatmul.mubr.f32.gmra.mrb[62].mxu1 %v2169_v62 }
 0x14d   : > { %4979 = vmatmul.mubr.f32.gmra.mrb[46].mxu0 %v2475_v32  ;;  %v2750_v32 = vlaneseq }
 0x14f   : > { %v4408_v34 = vpop.f32.mrb[22].mxu1 }
 0x150   : > { %v785_v16 = vpop.f32.mrb[23].mxu1 }
 0x153   : > { %v4411_v55 = vpop.f32.mrb[24].mxu1 }
 0x154   : > { %v795_v52 = vpop.f32.mrb[25].mxu1 }
 0x157   : > { %v4414_v7 = vpop.f32.mrb[26].mxu1 }
 0x158   : > { %v805_v28 = vpop.f32.mrb[27].mxu1 }
 0x15b   : > { %v6635_v8 = vpop.f32.mrb[28].mxu1 }
 0x15c   : > { %v6637_v6 = vpop.f32.mrb[29].mxu1 }
 0x15f   : > { %v6639_v1 = vpop.f32.mrb[30].mxu1 }
 0x160   : > { %v6641_v5 = vpop.f32.mrb[31].mxu1 }
 0x1a4   : > { %v4775_v13 = vpop.f32.mrb[0].mxu0 }
 0x1a5   : > { %v6644_v58 = vadd.f32 %v4775_v13, %v6526_v25  ;;  %v1947_v41 = vpop.f32.mrb[1].mxu0 }
 0x1a6   : > { %v6647_v51 = vadd.f32 %v1947_v41, %v6528_v3 }
 0x1a8   : > { %v4778_v40 = vpop.f32.mrb[2].mxu0 }
 0x1a9   : > { %v6650_v61 = vadd.f32 %v4778_v40, %v6533_v35  ;;  %v1957_v49 = vpop.f32.mrb[3].mxu0  ;;  %v6713_v40 = vshrl.u32 %v2750_v32, 7 }
 0x1aa   : > { %v6653_v39 = vadd.f32 %v1957_v49, %v6536_v11 }
 0x1ac   : > { %v4781_v9 = vpop.f32.mrb[4].mxu0 }
 0x1ad   : > { %v6656_v46 = vadd.f32 %v4781_v9, %v6542_v24  ;;  %v1967_v27 = vpop.f32.mrb[5].mxu0 }
 0x1ae   : > { %v6659_v25 = vadd.f32 %v1967_v27, %v6545_v12 }
 0x1b0   : > { %v4784_v60 = vpop.f32.mrb[6].mxu0 }
 0x1b1   : > { %v6662_v3 = vadd.f32 %v4784_v60, %v6550_v37  ;;  %v1977_v30 = vpop.f32.mrb[7].mxu0 }
 0x1b2   : > { %v6665_v35 = vadd.f32 %v1977_v30, %v6553_v54  ;;  %v2754_v30 = vadd.s32 24, %v6713_v40 }
 0x1b4   : > { %v4787_v53 = vpop.f32.mrb[8].mxu0 }
 0x1b5   : > { %v6668_v11 = vadd.f32 %v4787_v53, %v6558_v17  ;;  %v1987_v50 = vpop.f32.mrb[9].mxu0 }
 0x1b6   : > { %v6671_v24 = vadd.f32 %v1987_v50, %v6561_v57 }
 0x1b8   : > { %v4790_v63 = vpop.f32.mrb[10].mxu0 }
 0x1b9   : > { %v6674_v12 = vadd.f32 %v4790_v63, %v6566_v4  ;;  %v1997_v45 = vpop.f32.mrb[11].mxu0 }
 0x1ba   : > { %v6677_v37 = vadd.f32 %v1997_v45, %v6569_v18 }
 0x1bc   : > { %v4793_v10 = vpop.f32.mrb[12].mxu0 }
 0x1bd   : > { %v6680_v54 = vadd.f32 %v4793_v10, %v6574_v31  ;;  %v2007_v43 = vpop.f32.mrb[13].mxu0 }
 0x1be   : > { %v6683_v17 = vadd.f32 %v2007_v43, %v6577_v42  ;;  %v2808_v43 = vand.u32 15, %v2754_v30 }
 0x1c0   : > { %v4796_v44 = vpop.f32.mrb[14].mxu0  ;;  %vm6769_vm3 = vcmp.ne.s32.totalorder %v2808_v43, 15  ;;  %v2760_v43 = vadd.s32 72, %v6713_v40 }
 0x1c1   : > { %v6686_v57 = vadd.f32 %v4796_v44, %v6582_v22  ;;  %v2017_v21 = vpop.f32.mrb[15].mxu0  ;;  %v2756_v44 = vadd.s32 40, %v6713_v40 }
 0x1c2   : > { %v6689_v4 = vadd.f32 %v2017_v21, %v6585_v23 }
 0x1c3   : > { %v2822_v32 = vand.u32 15, %v2756_v44 }
 0x1c4   : > { %v4799_v29 = vpop.f32.mrb[48].mxu0 }
 0x1c5   : > { %v6692_v18 = vadd.f32 %v4799_v29, %v6622_v56  ;;  %v2027_v33 = vpop.f32.mrb[49].mxu0  ;;  %vm6795_vm5 = vcmp.ne.s32.totalorder %v2822_v32, 15 }
 0x1c6   : > { %v6695_v31 = vadd.f32 %v2027_v33, %v6625_v36 }
 0x1c8   : > { %v4802_v59 = vpop.f32.mrb[50].mxu0 }
 0x1c9   : > { %v6697_v47 = vadd.f32 %v4802_v59, %v4402_v38  ;;  %v2037_v42 = vpop.f32.mrb[51].mxu0 }
 0x1ca   : > { %v6699_v48 = vadd.f32 %v2037_v42, %v765_v26  ;;  %v2757_v42 = vadd.s32 48, %v6713_v40 }
 0x1cc   : > { %v4805_v22 = vpop.f32.mrb[52].mxu0 }
 0x1cd   : > { %v6701_v0 = vadd.f32 %v4805_v22, %v4405_v20  ;;  %v2047_v14 = vpop.f32.mrb[53].mxu0  ;;  %v6760_v22 = vld [vmem:[%s7107_s3] ss:$0 sm:$0xff] }
 0x1ce   : > { %v6703_v23 = vadd.f32 %v2047_v14, %v775_v2 }
 0x1d0   : > { %v4808_v15 = vpop.f32.mrb[54].mxu0 }
 0x1d1   : > { %v6705_v19 = vadd.f32 %v4808_v15, %v4408_v34  ;;  %v2057_v56 = vpop.f32.mrb[55].mxu0  ;;  %v2752_v34 = vadd.s32 8, %v6713_v40 }
 0x1d2   : > { %v6707_v62 = vadd.f32 %v2057_v56, %v785_v16 }
 0x1d4   : > { %v4811_v36 = vpop.f32.mrb[56].mxu0 }
 0x1d5   : > { %v6709_v13 = vadd.f32 %v4811_v36, %v4411_v55  ;;  %v2067_v38 = vpop.f32.mrb[57].mxu0  ;;  %v2787_v55 = vand.u32 15, %v6713_v40 }
 0x1d6   : > { %v6711_v41 = vadd.f32 %v2067_v38, %v795_v52  ;;  %v2753_v52 = vadd.s32 16, %v6713_v40  ;;  %v2758_v38 = vadd.s32 56, %v6713_v40 }
 0x1d7   : > { %vm6733_vm0 = vcmp.ne.s32.totalorder %v2787_v55, 0 }
 0x1d8   : > { %v4814_v26 = vpop.f32.mrb[58].mxu0  ;;  %v2801_v45 = vand.u32 15, %v2753_v52  ;;  %v3263_v59 = vsel %vm6733_vm0, %v6647_v51, 0.0  ;;  %v3525_v52 = vld [vmem:[%s6751_s21 + $0x18] sm:$0xff] }
 0x1d9   : > { %v6715_v20 = vadd.f32 %v4814_v26, %v4414_v7  ;;  %v2077_v2 = vpop.f32.mrb[59].mxu0  ;;  %v2794_v7 = vand.u32 15, %v2752_v34  ;;  %v3526_v26 = vld [vmem:[%s6751_s21 + $0x20] sm:$0xff] }
 0x1da   : > { %v6717_v49 = vadd.f32 %v2077_v2, %v805_v28  ;;  %v2755_v28 = vadd.s32 32, %v6713_v40  ;;  %vm6764_vm2 = vcmp.ne.s32.totalorder %v2801_v45, 0 }
 0x1db   : > { %vm6740_vm1 = vcmp.ne.s32.totalorder %v2794_v7, 15 }
 0x1dc   : > { %v4817_v9 = vpop.f32.mrb[60].mxu0 }
 0x1dd   : > { %v6721_v16 = vadd.f32 %v4817_v9, %v6635_v8  ;;  %v2087_v27 = vpop.f32.mrb[61].mxu0 }
 0x1de   : > { %v6726_v60 = vadd.f32 %v2087_v27, %v6637_v6  ;;  %v2759_v27 = vadd.s32 64, %v6713_v40 }
 0x1e0   : > { %v4820_v53 = vpop.f32.mrb[62].mxu0 }
 0x1e1   : > { %v6731_v50 = vadd.f32 %v4820_v53, %v6639_v1  ;;  %v2097_v8 = vpop.f32.mrb[63].mxu0  ;;  %v2815_v1 = vand.u32 15, %v2755_v28  ;;  %v3265_v53 = vsel %vm6764_vm2, %v6653_v39, 0.0  ;;  %v2763_v39 = vadd.s32 96, %v6713_v40 }
 0x1e2   : > { %v6738_v10 = vadd.f32 %v2097_v8, %v6641_v5  ;;  %v2829_v8 = vand.u32 15, %v2757_v42  ;;  %v2843_v42 = vand.u32 15, %v2759_v27  ;;  %v2850_v27 = vand.u32 15, %v2760_v43 }
 0x1e3   : > { %v4855_v21 = vpop.f32.mrb[32].mxu1  ;;  %vm6775_vm4 = vcmp.ne.s32.totalorder %v2815_v1, 0  ;;  %v2836_v1 = vand.u32 15, %v2758_v38 }
 0x1e4   : > { %v3296_v29 = vadd.f32 %v6644_v58, %v4855_v21  ;;  %v4935_v5 = vpop.f32.mrb[16].mxu0  ;;  %v2253_v33 = vpop.f32.mrb[33].mxu1  ;;  %v3267_v32 = vsel %vm6775_vm4, %v6659_v25, 0.0  ;;  %vm6808_vm6 = vcmp.ne.s32.totalorder %v2829_v8, 0  ;;  %v2762_v25 = vadd.s32 88, %v6713_v40 }
 0x1e5   : > { %v3424_v58 = vsel %vm6740_vm1, %v4935_v5, 0.0  ;;  %v3295_v14 = vadd.f32 %v3263_v59, %v2253_v33  ;;  %v2559_v15 = vpop.f32.mrb[17].mxu0  ;;  %v3528_v5 = vld [vmem:[%s6751_s21 + $0x30] sm:$0xff]  ;;  %vm6816_vm7 = vcmp.ne.s32.totalorder %v2836_v1, 15  ;;  %vm6822_vm8 = vcmp.ne.s32.totalorder %v2843_v42, 0 }
 0x1e6   : > { %v3456_v36 = vadd.f32 %v3424_v58, %v3296_v29  ;;  %v2761_v58 = vadd.s32 80, %v6713_v40  ;;  %vm6838_vm9 = vcmp.ne.s32.totalorder %v2850_v27, 15  ;;  %v3271_v27 = vsel %vm6822_vm8, %v6671_v24, 0.0 }
 0x1e7   : > { %v3455_v2 = vadd.f32 %v3295_v14, %v2559_v15  ;;  %v4858_v34 = vpop.f32.mrb[34].mxu1  ;;  %v3527_v15 = vld [vmem:[%s6751_s21 + $0x28] sm:$0xff] }
 0x1e8   : > { %v3494_v55 = vadd.f32 %v6760_v22, %v3456_v36  ;;  %v3298_v7 = vadd.f32 %v6650_v61, %v4858_v34  ;;  %v4938_v30 = vpop.f32.mrb[18].mxu0  ;;  %v2263_v28 = vpop.f32.mrb[35].mxu1 }
 0x1e9   : > { %v3493_v63 = vadd.f32 %v6760_v22, %v3455_v2  ;;  %v3426_v45 = vsel %vm6769_vm3, %v4938_v30, 0.0  ;;  %v3297_v61 = vadd.f32 %v3265_v53, %v2263_v28  ;;  %v2569_v6 = vpop.f32.mrb[19].mxu0  ;;  %v3530_v30 = vld [vmem:[%s6751_s21 + $0x40] sm:$0xff] }
 0x1ea   : > { %v3558_v44 = vadd.f32 %v3526_v26, %v3494_v55  ;;  %v3458_v21 = vadd.f32 %v3426_v45, %v3298_v7 }
 0x1eb   : > { %v3557_v29 = vadd.f32 %v3525_v52, %v3493_v63  ;;  %v3457_v33 = vadd.f32 %v3297_v61, %v2569_v6  ;;  %v4861_v59 = vpop.f32.mrb[36].mxu1  ;;  %v2857_v63 = vand.u32 15, %v2761_v58  ;;  %v3529_v61 = vld [vmem:[%s6751_s21 + $0x38] sm:$0xff]  ;;  %v2864_v58 = vand.u32 15, %v2762_v25 }
 0x1ec   : > { %3590 = vst [vmem:[%s6789_s25 + $0x8] sm:$0xff] %v3558_v44  ;;  %v3496_v14 = vadd.f32 %v6760_v22, %v3458_v21  ;;  %v3300_v56 = vadd.f32 %v6656_v46, %v4861_v59  ;;  %v4941_v36 = vpop.f32.mrb[20].mxu0  ;;  %v2273_v51 = vpop.f32.mrb[37].mxu1  ;;  %v3269_v21 = vsel %vm6808_vm6, %v6665_v35, 0.0  ;;  %v2764_v35 = vadd.s32 104, %v6713_v40 }
 0x1ed   : > { %3589 = vst [vmem:[%s6789_s25] sm:$0xff] %v3557_v29  ;;  %v3495_v26 = vadd.f32 %v6760_v22, %v3457_v33  ;;  %v3428_v2 = vsel %vm6795_vm5, %v4941_v36, 0.0  ;;  %v3299_v46 = vadd.f32 %v3267_v32, %v2273_v51  ;;  %v2579_v34 = vpop.f32.mrb[21].mxu0  ;;  %vm6844_vm10 = vcmp.ne.s32.totalorder %v2857_v63, 0  ;;  %v3534_v63 = vld [vmem:[%s6751_s21 + $0x60] sm:$0xff] }
 0x1ee   : > { %v3560_v55 = vadd.f32 %v3528_v5, %v3496_v14  ;;  %v3460_v52 = vadd.f32 %v3428_v2, %v3300_v56  ;;  %v2765_v32 = vadd.s32 112, %v6713_v40  ;;  %vm6861_vm11 = vcmp.ne.s32.totalorder %v2864_v58, 15 }
 0x1ef   : > { %v3559_v7 = vadd.f32 %v3527_v15, %v3495_v26  ;;  %v3459_v28 = vadd.f32 %v3299_v46, %v2579_v34  ;;  %v4864_v53 = vpop.f32.mrb[38].mxu1  ;;  %v3532_v15 = vld [vmem:[%s6751_s21 + $0x50] sm:$0xff]  ;;  %v3531_v26 = vld [vmem:[%s6751_s21 + $0x48] sm:$0xff]  ;;  %v2878_v24 = vand.u32 15, %v2764_v35 }
 0x1f0   : > { %3592 = vst [vmem:[%s6789_s25 + $0x18] sm:$0xff] %v3560_v55  ;;  %v3498_v45 = vadd.f32 %v6760_v22, %v3460_v52  ;;  %v3302_v6 = vadd.f32 %v6662_v3, %v4864_v53  ;;  %v4944_v43 = vpop.f32.mrb[22].mxu0  ;;  %v2283_v44 = vpop.f32.mrb[39].mxu1  ;;  %v2871_v55 = vand.u32 15, %v2763_v39 }
 0x1f1   : > { %3591 = vst [vmem:[%s6789_s25 + $0x10] sm:$0xff] %v3559_v7  ;;  %v3497_v1 = vadd.f32 %v6760_v22, %v3459_v28  ;;  %v3430_v29 = vsel %vm6816_vm7, %v4944_v43, 0.0  ;;  %v3301_v5 = vadd.f32 %v3269_v21, %v2283_v44  ;;  %v2589_v33 = vpop.f32.mrb[23].mxu0  ;;  %v2767_v43 = vadd.s32 128, %v6713_v40  ;;  %v3533_v21 = vld [vmem:[%s6751_s21 + $0x58] sm:$0xff] }
 0x1f2   : > { %v3562_v59 = vadd.f32 %v3530_v30, %v3498_v45  ;;  %v3462_v42 = vadd.f32 %v3430_v29, %v3302_v6  ;;  %v2885_v6 = vand.u32 15, %v2765_v32  ;;  %vm6874_vm12 = vcmp.ne.s32.totalorder %v2871_v55, 0 }
 0x1f3   : > { %v3561_v14 = vadd.f32 %v3529_v61, %v3497_v1  ;;  %v3461_v56 = vadd.f32 %v3301_v5, %v2589_v33  ;;  %v4867_v36 = vpop.f32.mrb[40].mxu1  ;;  %v3273_v5 = vsel %vm6844_vm10, %v6677_v37, 0.0  ;;  %vm6882_vm13 = vcmp.ne.s32.totalorder %v2878_v24, 15 }
 0x1f4   : > { %3594 = vst [vmem:[%s6789_s25 + $0x28] sm:$0xff] %v3562_v59  ;;  %v3500_v38 = vadd.f32 %v6760_v22, %v3462_v42  ;;  %v3304_v2 = vadd.f32 %v6668_v11, %v4867_v36  ;;  %v4947_v46 = vpop.f32.mrb[24].mxu0  ;;  %v2293_v34 = vpop.f32.mrb[41].mxu1  ;;  %v2766_v11 = vadd.s32 120, %v6713_v40  ;;  %v2768_v37 = vadd.s32 136, %v6713_v40  ;;  %v3536_v36 = vld [vmem:[%s6751_s21 + $0x70] sm:$0xff] }
 0x1f5   : > { %3593 = vst [vmem:[%s6789_s25 + $0x20] sm:$0xff] %v3561_v14  ;;  %v3499_v52 = vadd.f32 %v6760_v22, %v3461_v56  ;;  %v3432_v9 = vsel %vm6838_vm9, %v4947_v46, 0.0  ;;  %v3303_v25 = vadd.f32 %v3271_v27, %v2293_v34  ;;  %v2599_v7 = vpop.f32.mrb[25].mxu0  ;;  %vm6888_vm14 = vcmp.ne.s32.totalorder %v2885_v6, 0  ;;  %v3535_v46 = vld [vmem:[%s6751_s21 + $0x68] sm:$0xff] }
 0x1f6   : > { %v3564_v30 = vadd.f32 %v3532_v15, %v3500_v38  ;;  %v3464_v28 = vadd.f32 %v3432_v9, %v3304_v2  ;;  %v2892_v58 = vand.u32 15, %v2766_v11  ;;  %v2769_v9 = vadd.s32 144, %v6713_v40 }
 0x1f7   : > { %v3563_v8 = vadd.f32 %v3531_v26, %v3499_v52  ;;  %v3463_v45 = vadd.f32 %v3303_v25, %v2599_v7  ;;  %v4870_v61 = vpop.f32.mrb[42].mxu1  ;;  %v2899_v26 = vand.u32 15, %v2767_v43  ;;  %v3275_v52 = vsel %vm6874_vm12, %v6683_v17, 0.0 }
 0x1f8   : > { %3596 = vst [vmem:[%s6789_s25 + $0x38] sm:$0xff] %v3564_v30  ;;  %v3502_v44 = vadd.f32 %v6760_v22, %v3464_v28  ;;  %v3306_v39 = vadd.f32 %v6674_v12, %v4870_v61  ;;  %v4950_v1 = vpop.f32.mrb[26].mxu0  ;;  %v2303_v29 = vpop.f32.mrb[43].mxu1  ;;  %vm6904_vm15 = vcmp.ne.s32.totalorder %v2892_v58, 15  ;;  %v2906_v24 = vand.u32 15, %v2768_v37  ;;  %v3540_v37 = vld [vmem:[%s6751_s21 + $0x90] sm:$0xff] }
 0x1f9   : > { %3595 = vst [vmem:[%s6789_s25 + $0x30] sm:$0xff] %v3563_v8  ;;  %v3501_v3 = vadd.f32 %v6760_v22, %v3463_v45  ;;  %v3434_v59 = vsel %vm6861_vm11, %v4950_v1, 0.0  ;;  %v3305_v12 = vadd.f32 %v3273_v5, %v2303_v29  ;;  %v2609_v42 = vpop.f32.mrb[27].mxu0  ;;  %v2770_v17 = vadd.s32 152, %v6713_v40 }
 0x1fa   : > { %v3566_v35 = vadd.f32 %v3534_v63, %v3502_v44  ;;  %v3466_v14 = vadd.f32 %v3434_v59, %v3306_v39  ;;  %v3538_v63 = vld [vmem:[%s6751_s21 + $0x80] sm:$0xff]  ;;  %vm6910_vm0 = vcmp.ne.s32.totalorder %v2899_v26, 0  ;;  %v2771_v43 = vadd.s32 160, %v6713_v40  ;;  %v3539_v26 = vld [vmem:[%s6751_s21 + $0x88] sm:$0xff] }
 0x1fb   : > { %v3565_v56 = vadd.f32 %v3533_v21, %v3501_v3  ;;  %v3465_v51 = vadd.f32 %v3305_v12, %v2609_v42  ;;  %v4873_v32 = vpop.f32.mrb[44].mxu1  ;;  %v3537_v21 = vld [vmem:[%s6751_s21 + $0x78] sm:$0xff]  ;;  %v3277_v5 = vsel %vm6888_vm14, %v6689_v4, 0.0  ;;  %v2913_v33 = vand.u32 15, %v2769_v9 }
 0x1fc   : > { %3598 = vst [vmem:[%s6789_s25 + $0x48] sm:$0xff] %v3566_v35  ;;  %v3504_v2 = vadd.f32 %v6760_v22, %v3466_v14  ;;  %v3308_v34 = vadd.f32 %v6680_v54, %v4873_v32  ;;  %v4953_v27 = vpop.f32.mrb[28].mxu0  ;;  %v2313_v55 = vpop.f32.mrb[45].mxu1  ;;  %vm6927_vm1 = vcmp.ne.s32.totalorder %v2906_v24, 15  ;;  %v2920_v4 = vand.u32 15, %v2770_v17 }
 0x1fd   : > { %3597 = vst [vmem:[%s6789_s25 + $0x40] sm:$0xff] %v3565_v56  ;;  %v3503_v25 = vadd.f32 %v6760_v22, %v3465_v51  ;;  %v3436_v7 = vsel %vm6882_vm13, %v4953_v27, 0.0  ;;  %v3307_v11 = vadd.f32 %v3275_v52, %v2313_v55  ;;  %v2619_v30 = vpop.f32.mrb[29].mxu0  ;;  %v2927_v51 = vand.u32 15, %v2771_v43 }
 0x1fe   : > { %v3568_v28 = vadd.f32 %v3536_v36, %v3504_v2  ;;  %v3468_v53 = vadd.f32 %v3436_v7, %v3308_v34  ;;  %v2773_v32 = vadd.s32 176, %v6713_v40  ;;  %v3279_v27 = vsel %vm6910_vm0, %v6695_v31, 0.0 }
 0x1ff   : > { %v3567_v8 = vadd.f32 %v3535_v46, %v3503_v25  ;;  %v3467_v45 = vadd.f32 %v3307_v11, %v2619_v30  ;;  %v4876_v61 = vpop.f32.mrb[46].mxu1  ;;  %vm6940_vm2 = vcmp.ne.s32.totalorder %v2913_v33, 0  ;;  %vm6948_vm3 = vcmp.ne.s32.totalorder %v2920_v4, 15 }
 0x200   : > { %3600 = vst [vmem:[%s6789_s25 + $0x58] sm:$0xff] %v3568_v28  ;;  %v3506_v44 = vadd.f32 %v6760_v22, %v3468_v53  ;;  %v3310_v39 = vadd.f32 %v6686_v57, %v4876_v61  ;;  %v4956_v1 = vpop.f32.mrb[30].mxu0  ;;  %v2323_v29 = vpop.f32.mrb[47].mxu1  ;;  %v2772_v57 = vadd.s32 168, %v6713_v40  ;;  %v2774_v31 = vadd.s32 184, %v6713_v40  ;;  %v3542_v53 = vld [vmem:[%s6751_s21 + $0xa0] sm:$0xff] }
 0x201   : > { %3599 = vst [vmem:[%s6789_s25 + $0x50] sm:$0xff] %v3567_v8  ;;  %v3505_v3 = vadd.f32 %v6760_v22, %v3467_v45  ;;  %v3438_v59 = vsel %vm6904_vm15, %v4956_v1, 0.0  ;;  %v3309_v12 = vadd.f32 %v3277_v5, %v2323_v29  ;;  %v2629_v42 = vpop.f32.mrb[31].mxu0  ;;  %vm6954_vm4 = vcmp.ne.s32.totalorder %v2927_v51, 0  ;;  %v3541_v61 = vld [vmem:[%s6751_s21 + $0x98] sm:$0xff] }
 0x202   : > { %v3570_v58 = vadd.f32 %v3538_v63, %v3506_v44  ;;  %v3470_v35 = vadd.f32 %v3438_v59, %v3310_v39  ;;  %v2934_v7 = vand.u32 15, %v2772_v57  ;;  %v2941_v63 = vand.u32 15, %v2773_v32  ;;  %v3544_v57 = vld [vmem:[%s6751_s21 + $0xb0] sm:$0xff] }
 0x203   : > { %v3569_v15 = vadd.f32 %v3537_v21, %v3505_v3  ;;  %v3469_v56 = vadd.f32 %v3309_v12, %v2629_v42  ;;  %v4879_v36 = vpop.f32.mrb[48].mxu1  ;;  %v3281_v21 = vsel %vm6940_vm2, %v6699_v48, 0.0  ;;  %v2775_v39 = vadd.s32 192, %v6713_v40 }
 0x204   : > { %3602 = vst [vmem:[%s6789_s25 + $0x68] sm:$0xff] %v3570_v58  ;;  %v3508_v38 = vadd.f32 %v6760_v22, %v3470_v35  ;;  %v3312_v2 = vadd.f32 %v6692_v18, %v4879_v36  ;;  %v4959_v46 = vpop.f32.mrb[32].mxu0  ;;  %v2333_v34 = vpop.f32.mrb[49].mxu1  ;;  %vm6970_vm5 = vcmp.ne.s32.totalorder %v2934_v7, 15  ;;  %v2948_v12 = vand.u32 15, %v2774_v31  ;;  %v3545_v31 = vld [vmem:[%s6751_s21 + $0xb8] sm:$0xff] }
 0x205   : > { %3601 = vst [vmem:[%s6789_s25 + $0x60] sm:$0xff] %v3569_v15  ;;  %v3507_v52 = vadd.f32 %v6760_v22, %v3469_v56  ;;  %v3440_v9 = vsel %vm6927_vm1, %v4959_v46, 0.0  ;;  %v3311_v18 = vadd.f32 %v3279_v27, %v2333_v34  ;;  %v2639_v25 = vpop.f32.mrb[33].mxu0  ;;  %v2776_v48 = vadd.s32 200, %v6713_v40 }
 0x206   : > { %v3572_v11 = vadd.f32 %v3540_v37, %v3508_v38  ;;  %v3472_v30 = vadd.f32 %v3440_v9, %v3312_v2  ;;  %vm6976_vm6 = vcmp.ne.s32.totalorder %v2941_v63, 0  ;;  %v2777_v4 = vadd.s32 208, %v6713_v40  ;;  %v3543_v37 = vld [vmem:[%s6751_s21 + $0xa8] sm:$0xff] }
 0x207   : > { %v3571_v28 = vadd.f32 %v3539_v26, %v3507_v52  ;;  %v3471_v24 = vadd.f32 %v3311_v18, %v2639_v25  ;;  %v4882_v17 = vpop.f32.mrb[50].mxu1  ;;  %v3283_v32 = vsel %vm6954_vm4, %v6703_v23, 0.0  ;;  %v2955_v38 = vand.u32 15, %v2775_v39  ;;  %v3546_v18 = vld [vmem:[%s6751_s21 + $0xc0] sm:$0xff] }
 0x208   : > { %3604 = vst [vmem:[%s6789_s25 + $0x78] sm:$0xff] %v3572_v11  ;;  %v3510_v45 = vadd.f32 %v6760_v22, %v3472_v30  ;;  %v3314_v6 = vadd.f32 %v6697_v47, %v4882_v17  ;;  %v4962_v43 = vpop.f32.mrb[34].mxu0  ;;  %v2343_v44 = vpop.f32.mrb[51].mxu1  ;;  %vm6993_vm7 = vcmp.ne.s32.totalorder %v2948_v12, 15  ;;  %v2962_v23 = vand.u32 15, %v2776_v48 }
 0x209   : > { %3603 = vst [vmem:[%s6789_s25 + $0x70] sm:$0xff] %v3571_v28  ;;  %v3509_v1 = vadd.f32 %v6760_v22, %v3471_v24  ;;  %v3442_v29 = vsel %vm6948_vm3, %v4962_v43, 0.0  ;;  %v3313_v5 = vadd.f32 %v3281_v21, %v2343_v44  ;;  %v2649_v33 = vpop.f32.mrb[35].mxu0  ;;  %v2969_v11 = vand.u32 15, %v2777_v4 }
 0x20a   : > { %v3574_v3 = vadd.f32 %v3542_v53, %v3510_v45  ;;  %v3474_v59 = vadd.f32 %v3442_v29, %v3314_v6  ;;  %v2779_v30 = vadd.s32 224, %v6713_v40  ;;  %v3285_v17 = vsel %vm6976_vm6, %v6707_v62, 0.0 }
 0x20b   : > { %v3573_v42 = vadd.f32 %v3541_v61, %v3509_v1  ;;  %v3473_v58 = vadd.f32 %v3313_v5, %v2649_v33  ;;  %v4885_v35 = vpop.f32.mrb[52].mxu1  ;;  %vm7006_vm8 = vcmp.ne.s32.totalorder %v2955_v38, 0  ;;  %vm7014_vm9 = vcmp.ne.s32.totalorder %v2962_v23, 15  ;;  %v3548_v1 = vld [vmem:[%s6751_s21 + $0xd0] sm:$0xff]  ;;  %v3553_v33 = vld [vmem:[%s6751_s21 + $0xf8] sm:$0xff] }
 0x20c   : > { %3606 = vst [vmem:[%s6789_s25 + $0x88] sm:$0xff] %v3574_v3  ;;  %v3512_v15 = vadd.f32 %v6760_v22, %v3474_v59  ;;  %v3316_v56 = vadd.f32 %v6701_v0, %v4885_v35  ;;  %v4965_v36 = vpop.f32.mrb[36].mxu0  ;;  %v2353_v51 = vpop.f32.mrb[53].mxu1  ;;  %v2778_v0 = vadd.s32 216, %v6713_v40  ;;  %v2780_v62 = vadd.s32 232, %v6713_v40  ;;  %v3547_v59 = vld [vmem:[%s6751_s21 + $0xc8] sm:$0xff] }
 0x20d   : > { %3605 = vst [vmem:[%s6789_s25 + $0x80] sm:$0xff] %v3573_v42  ;;  %v3511_v26 = vadd.f32 %v6760_v22, %v3473_v58  ;;  %v3444_v2 = vsel %vm6970_vm5, %v4965_v36, 0.0  ;;  %v3315_v46 = vadd.f32 %v3283_v32, %v2353_v51  ;;  %v2659_v34 = vpop.f32.mrb[37].mxu0  ;;  %vm7020_vm10 = vcmp.ne.s32.totalorder %v2969_v11, 0  ;;  %v3550_v32 = vld [vmem:[%s6751_s21 + $0xe0] sm:$0xff] }
 0x20e   : > { %v3576_v27 = vadd.f32 %v3544_v57, %v3512_v15  ;;  %v3476_v55 = vadd.f32 %v3444_v2, %v3316_v56  ;;  %v2976_v6 = vand.u32 15, %v2778_v0  ;;  %v2983_v47 = vand.u32 15, %v2779_v30 }
 0x20f   : > { %v3575_v9 = vadd.f32 %v3543_v37, %v3511_v26  ;;  %v3475_v25 = vadd.f32 %v3315_v46, %v2659_v34  ;;  %v4888_v7 = vpop.f32.mrb[54].mxu1  ;;  %v3287_v57 = vsel %vm7006_vm8, %v6711_v41, 0.0  ;;  %v2781_v58 = vadd.s32 240, %v6713_v40  ;;  %v3549_v46 = vld [vmem:[%s6751_s21 + $0xd8] sm:$0xff] }
 0x210   : > { %3608 = vst [vmem:[%s6789_s25 + $0x98] sm:$0xff] %v3576_v27  ;;  %v3514_v54 = vadd.f32 %v6760_v22, %v3476_v55  ;;  %v3318_v28 = vadd.f32 %v6705_v19, %v4888_v7  ;;  %v4968_v53 = vpop.f32.mrb[38].mxu0  ;;  %v2363_v24 = vpop.f32.mrb[55].mxu1  ;;  %vm7036_vm11 = vcmp.ne.s32.totalorder %v2976_v6, 15  ;;  %v2990_v41 = vand.u32 15, %v2780_v62 }
 0x211   : > { %3607 = vst [vmem:[%s6789_s25 + $0x90] sm:$0xff] %v3575_v9  ;;  %v3513_v63 = vadd.f32 %v6760_v22, %v3475_v25  ;;  %v3446_v45 = vsel %vm6993_vm7, %v4968_v53, 0.0  ;;  %v3317_v19 = vadd.f32 %v3285_v17, %v2363_v24  ;;  %v2669_v61 = vpop.f32.mrb[39].mxu0  ;;  %v2782_v36 = vadd.s32 248, %v6713_v40  ;;  %v3551_v24 = vld [vmem:[%s6751_s21 + $0xe8] sm:$0xff] }
 0x212   : > { %v3578_v43 = vadd.f32 %v3546_v18, %v3514_v54  ;;  %v3478_v44 = vadd.f32 %v3446_v45, %v3318_v28  ;;  %v3289_v55 = vsel %vm7020_vm10, %v6717_v49, 0.0  ;;  %vm7049_vm12 = vcmp.ne.s32.totalorder %v2983_v47, 0  ;;  %v3552_v54 = vld [vmem:[%s6751_s21 + $0xf0] sm:$0xff] }
 0x213   : > { %v3577_v39 = vadd.f32 %v3545_v31, %v3513_v63  ;;  %v3477_v29 = vadd.f32 %v3317_v19, %v2669_v61  ;;  %v4891_v5 = vpop.f32.mrb[56].mxu1  ;;  %v2997_v18 = vand.u32 15, %v2781_v58  ;;  %vm7057_vm13 = vcmp.ne.s32.totalorder %v2990_v41, 15 }
 0x214   : > { %3610 = vst [vmem:[%s6789_s25 + $0xa8] sm:$0xff] %v3578_v43  ;;  %v3516_v3 = vadd.f32 %v6760_v22, %v3478_v44  ;;  %v3320_v12 = vadd.f32 %v6709_v13, %v4891_v5  ;;  %v4971_v48 = vpop.f32.mrb[40].mxu0  ;;  %v2373_v42 = vpop.f32.mrb[57].mxu1  ;;  %v3004_v11 = vand.u32 15, %v2782_v36  ;;  %v3291_v45 = vsel %vm7049_vm12, %v6726_v60, 0.0 }
 0x215   : > { %3609 = vst [vmem:[%s6789_s25 + $0xa0] sm:$0xff] %v3577_v39  ;;  %v3515_v35 = vadd.f32 %v6760_v22, %v3477_v29  ;;  %v3448_v14 = vsel %vm7014_vm9, %v4971_v48, 0.0  ;;  %v3319_v4 = vadd.f32 %v3287_v57, %v2373_v42  ;;  %v2679_v15 = vpop.f32.mrb[41].mxu0  ;;  %vm7073_vm14 = vcmp.ne.s32.totalorder %v2997_v18, 0  ;;  %v3554_v39 = vld [vmem:[%s6751_s21 + $0x100] sm:$0xff] }
 0x216   : > { %v3580_v37 = vadd.f32 %v3548_v1, %v3516_v3  ;;  %v3480_v56 = vadd.f32 %v3448_v14, %v3320_v12  ;;  %vm7077_vm15 = vcmp.ne.s32.totalorder %v3004_v11, 15  ;;  %v3293_v12 = vsel %vm7073_vm14, %v6738_v10, 0.0 }
 0x217   : > { %v3579_v51 = vadd.f32 %v3547_v59, %v3515_v35  ;;  %v3479_v38 = vadd.f32 %v3319_v4, %v2679_v15  ;;  %v4894_v26 = vpop.f32.mrb[58].mxu1  ;;  %v3556_v4 = vld [vmem:[%s6751_s21 + $0x110] sm:$0xff] }
 0x218   : > { %3612 = vst [vmem:[%s6789_s25 + $0xb8] sm:$0xff] %v3580_v37  ;;  %v3518_v2 = vadd.f32 %v6760_v22, %v3480_v56  ;;  %v3322_v34 = vadd.f32 %v6715_v20, %v4894_v26  ;;  %v4974_v0 = vpop.f32.mrb[42].mxu0  ;;  %v2383_v27 = vpop.f32.mrb[59].mxu1  ;;  %v3555_v37 = vld [vmem:[%s6751_s21 + $0x108] sm:$0xff] }
 0x219   : > { %3611 = vst [vmem:[%s6789_s25 + $0xb0] sm:$0xff] %v3579_v51  ;;  %v3517_v52 = vadd.f32 %v6760_v22, %v3479_v38  ;;  %v3450_v23 = vsel %vm7036_vm11, %v4974_v0, 0.0  ;;  %v3321_v20 = vadd.f32 %v3289_v55, %v2383_v27  ;;  %v2689_v9 = vpop.f32.mrb[43].mxu0 }
 0x21a   : > { %v3582_v25 = vadd.f32 %v3550_v32, %v3518_v2  ;;  %v3482_v7 = vadd.f32 %v3450_v23, %v3322_v34 }
 0x21b   : > { %v3581_v30 = vadd.f32 %v3549_v46, %v3517_v52  ;;  %v3481_v31 = vadd.f32 %v3321_v20, %v2689_v9  ;;  %v4897_v28 = vpop.f32.mrb[60].mxu1 }
 0x21c   : > { %3614 = vst [vmem:[%s6789_s25 + $0xc8] sm:$0xff] %v3582_v25  ;;  %v3520_v53 = vadd.f32 %v6760_v22, %v3482_v7  ;;  %v3324_v17 = vadd.f32 %v6721_v16, %v4897_v28  ;;  %v4977_v8 = vpop.f32.mrb[44].mxu0  ;;  %v2393_v63 = vpop.f32.mrb[61].mxu1 }
 0x21d   : > { %3613 = vst [vmem:[%s6789_s25 + $0xc0] sm:$0xff] %v3581_v30  ;;  %v3519_v19 = vadd.f32 %v6760_v22, %v3481_v31  ;;  %v3452_v61 = vsel %vm7057_vm13, %v4977_v8, 0.0  ;;  %v3323_v6 = vadd.f32 %v3291_v45, %v2393_v63  ;;  %v2699_v43 = vpop.f32.mrb[45].mxu0 }
 0x21e   : > { %v3584_v16 = vadd.f32 %v3552_v54, %v3520_v53  ;;  %v3484_v21 = vadd.f32 %v3452_v61, %v3324_v17 }
 0x21f   : > { %v3583_v60 = vadd.f32 %v3551_v24, %v3519_v19  ;;  %v3483_v1 = vadd.f32 %v3323_v6, %v2699_v43  ;;  %v4900_v29 = vpop.f32.mrb[62].mxu1 }
 0x220   : > { %3616 = vst [vmem:[%s6789_s25 + $0xd8] sm:$0xff] %v3584_v16  ;;  %v3522_v5 = vadd.f32 %v6760_v22, %v3484_v21  ;;  %v3326_v47 = vadd.f32 %v6731_v50, %v4900_v29  ;;  %v4980_v3 = vpop.f32.mrb[46].mxu0  ;;  %v2403_v59 = vpop.f32.mrb[63].mxu1 }
 0x221   : > { %3615 = vst [vmem:[%s6789_s25 + $0xd0] sm:$0xff] %v3583_v60  ;;  %v3521_v48 = vadd.f32 %v6760_v22, %v3483_v1  ;;  %v3454_v42 = vsel %vm7077_vm15, %v4980_v3, 0.0  ;;  %v3325_v57 = vadd.f32 %v3293_v12, %v2403_v59  ;;  %v2709_v58 = vpop.f32.mrb[47].mxu0 }
 0x222   : > { %v3586_v35 = vadd.f32 %v3554_v39, %v3522_v5  ;;  %v3486_v50 = vadd.f32 %v3454_v42, %v3326_v47 }
 0x223   : > { %v3585_v14 = vadd.f32 %v3553_v33, %v3521_v48  ;;  %v3485_v15 = vadd.f32 %v3325_v57, %v2709_v58 }
 0x224   : > { %3618 = vst [vmem:[%s6789_s25 + $0xe8] sm:$0xff] %v3586_v35  ;;  %v3524_v13 = vadd.f32 %v6760_v22, %v3486_v50 }
 0x225   : > { %3617 = vst [vmem:[%s6789_s25 + $0xe0] sm:$0xff] %v3585_v14  ;;  %v3523_v10 = vadd.f32 %v6760_v22, %v3485_v15 }
 0x226   : > { %v3588_v56 = vadd.f32 %v3556_v4, %v3524_v13 }
 0x227   : > { %v3587_v41 = vadd.f32 %v3555_v37, %v3523_v10 }
 0x228   : > { %3620 = vst [vmem:[%s6789_s25 + $0xf8] sm:$0xff] %v3588_v56 }
 0x229   : > { %3619 = vst [vmem:[%s6789_s25 + $0xf0] sm:$0xff] %v3587_v41 }
 0x22a PF: > { %s14_s15 = sadd.s32 1, %s5492_s15  }
 0x22b   : > { %p11_p4 = scmp.ge.s32.totalorder %s14_s15, 4  }
 0x22d   :  { %13 = sbr.rel (!%p11_p4) target bundleno = 1 (0x1), region = 77 }

// kernel: residual_group_forward.3
= control target key start
LH: loop header
LB: loop body
LE: loop exit
PB: predicated region body
PF: predicated region fallthrough
CT: control target
= control target key end

     0   :  { %s10509_s30 = smov 0   ;;  %s13558_s0 = inlined_call_operand.vmem [shape: f32[2,304,128], index: 0, kind: input, shape index: {}]   ;;  %s13559_s1 = inlined_call_operand.vmem [shape: f32[9,128,128], index: 1, kind: input, shape index: {}]   ;;  %s13560_s2 = inlined_call_operand.vmem [shape: f32[1,128], index: 2, kind: input, shape index: {}]   ;;  %s13561_s3 = inlined_call_operand.vmem [shape: f32[9,128,128], index: 3, kind: input, shape index: {}]   ;;  %s13562_s4 = inlined_call_operand.vmem [shape: f32[1,128], index: 4, kind: input, shape index: {}]   ;;  %s13563_s5 = inlined_call_operand.vmem [shape: f32[128,2], index: 5, kind: input, shape index: {}]   ;;  %s13564_s6 = inlined_call_operand.vmem [shape: f32[1,2], index: 6, kind: input, shape index: {}]   ;;  %s13565_s7 = inlined_call_operand.vmem [shape: f32[2,128], index: 7, kind: input, shape index: {}]   ;;  %s13566_s8 = inlined_call_operand.vmem [shape: f32[1,128], index: 8, kind: input, shape index: {}]   ;;  %s13567_s9 = inlined_call_operand.vmem [shape: f32[2,304,128], index: 9, kind: output, shape index: {}]  }
   0x1 LB: > { %s6814_s10 = sadd.s32 4294967295, %s10454_s30   ;;  %p6818_p0 = scmp.ge.s32.totalorder %s10454_s30, 1  ;;  %s10454_s30 = sphi %s10509_s30, %s19_s30  }
   0x2   : > { %p287_p1 = scmp.lt.s32.totalorder %s10454_s30, 3 }
   0x4   : > { %p288_p2 = pnand %p6818_p0, %p287_p1 }
   0x6   : > { %291 = sbr.rel (%p288_p2) target bundleno = 1699 (0x6a3), region = 56 }
   0xd   : > { %v6853_v0 = vld [vmem:[%s13559_s1 + $0x180] sm:$0xff]  ;;  %v6854_v1 = vld [vmem:[%s13559_s1 + $0x188] sm:$0xff]  ;;  %v6855_v2 = vld [vmem:[%s13559_s1 + $0x190] sm:$0xff]  ;;  %p323_p3 = scmp.lt.s32.totalorder %s6814_s10, 1 }
   0xe   : > { %v9447_v3 = vpack.c.bf16 %v6854_v1, %v6853_v0  ;;  %v6856_v4 = vld [vmem:[%s13559_s1 + $0x198] sm:$0xff]  ;;  %v6857_v6 = vld [vmem:[%s13559_s1 + $0x1a0] sm:$0xff]  ;;  %v6858_v7 = vld [vmem:[%s13559_s1 + $0x1a8] sm:$0xff] }
   0xf   : > { %v9451_v5 = vpack.c.bf16 %v6856_v4, %v6855_v2  ;;  %s13918_s10 = smov (!%p323_p3, %s6814_s10), 1  ;;  %v9455_v8 = vpack.c.bf16 %v6858_v7, %v6857_v6  ;;  %v6859_v9 = vld [vmem:[%s13559_s1 + $0x1b0] sm:$0xff]  ;;  %v6860_v10 = vld [vmem:[%s13559_s1 + $0x1b8] sm:$0xff]  ;;  %v6861_v13 = vld [vmem:[%s13559_s1 + $0x1c0] sm:$0xff] }
  0x10   : > { %9448 = vmatprep.subr.bf16.mxu0 %v9447_v3  ;;  %s10431_s23 = smul.u32 304, %s13918_s10  ;;  %v9459_v12 = vpack.c.bf16 %v6860_v10, %v6859_v9  ;;  %v6862_v14 = vld [vmem:[%s13559_s1 + $0x1c8] sm:$0xff]  ;;  %v6869_v16 = vld [vmem:[%s13559_s1 + $0x200] sm:$0xff]  ;;  %v6863_v18 = vld [vmem:[%s13559_s1 + $0x1d0] sm:$0xff] }
  0x11   : > { %9450 = vmatpush3.bf16.msra.mxu0 %v9447_v3  ;;  %v9463_v15 = vpack.c.bf16 %v6862_v14, %v6861_v13  ;;  %v6870_v17 = vld [vmem:[%s13559_s1 + $0x208] sm:$0xff]  ;;  %v6864_v19 = vld [vmem:[%s13559_s1 + $0x1d8] sm:$0xff]  ;;  %v6871_v21 = vld [vmem:[%s13559_s1 + $0x210] sm:$0xff] }
  0x12   : > { %9452 = vmatprep.subr.bf16.mxu0 %v9451_v5  ;;  %s10549_s11 = scalar_lea.vmem %s13558_s0, %s10431_s23  ;;  %v9511_v20 = vpack.c.bf16 %v6870_v17, %v6869_v16  ;;  %v6872_v22 = vld [vmem:[%s13559_s1 + $0x218] sm:$0xff]  ;;  %v6873_v24 = vld [vmem:[%s13559_s1 + $0x220] sm:$0xff]  ;;  %v9467_v25 = vpack.c.bf16 %v6864_v19, %v6863_v18  ;;  %v6874_v26 = vld [vmem:[%s13559_s1 + $0x228] sm:$0xff]  ;;  %s11710_s28 = scalar_lea.vmem %s13567_s9, %s10431_s23 }
  0x13   : > { %v10552_v11 = vld [vmem:[%s10549_s11 + $0x17] sm:$0xff]  ;;  %v9515_v23 = vpack.c.bf16 %v6872_v22, %v6871_v21  ;;  %v6865_v27 = vld [vmem:[%s13559_s1 + $0x1e0] sm:$0xff]  ;;  %v6866_v28 = vld [vmem:[%s13559_s1 + $0x1e8] sm:$0xff]  ;;  %v9519_v29 = vpack.c.bf16 %v6874_v26, %v6873_v24 }
  0x14   : > { %7999 = vmatprep.mubr.f32.mxu0 %v10552_v11  ;;  %9512 = vmatprep.subr.bf16.mxu1 %v9511_v20  ;;  %v6875_v30 = vld [vmem:[%s13559_s1 + $0x230] sm:$0xff]  ;;  %v6876_v31 = vld [vmem:[%s13559_s1 + $0x238] sm:$0xff]  ;;  %v9471_v32 = vpack.c.bf16 %v6866_v28, %v6865_v27  ;;  %v6877_v36 = vld [vmem:[%s13559_s1 + $0x240] sm:$0xff] }
  0x15   : > { %9454 = vmatpush3.bf16.msra.mxu0 %v9451_v5  ;;  %9514 = vmatpush3.bf16.msra.mxu1 %v9511_v20  ;;  %v6867_v33 = vld [vmem:[%s13559_s1 + $0x1f0] sm:$0xff]  ;;  %v6868_v34 = vld [vmem:[%s13559_s1 + $0x1f8] sm:$0xff]  ;;  %v9523_v35 = vpack.c.bf16 %v6876_v31, %v6875_v30  ;;  %v6878_v37 = vld [vmem:[%s13559_s1 + $0x248] sm:$0xff] }
  0x16   : > { %9456 = vmatprep.subr.bf16.mxu0 %v9455_v8  ;;  %9516 = vmatprep.subr.bf16.mxu1 %v9515_v23  ;;  %v9475_v38 = vpack.c.bf16 %v6868_v34, %v6867_v33  ;;  %v366_v39 = vld [vmem:[%s13559_s1] sm:$0xff]  ;;  %v367_v40 = vld [vmem:[%s13559_s1 + $0x8] sm:$0xff]  ;;  %v9527_v41 = vpack.c.bf16 %v6878_v37, %v6877_v36  ;;  %v10616_v42 = vld [vmem:[%s10549_s11 + $0x18] sm:$0xff] }
  0x17   : > { %v6879_v43 = vld [vmem:[%s13559_s1 + $0x250] sm:$0xff]  ;;  %v6880_v44 = vld [vmem:[%s13559_s1 + $0x258] sm:$0xff]  ;;  %8159 = vmatprep.mubr.f32.mxu1 %v10616_v42  ;;  %v9479_v45 = vpack.c.bf16 %v367_v40, %v366_v39  ;;  %v6881_v49 = vld [vmem:[%s13559_s1 + $0x260] sm:$0xff] }
  0x18   : > { %v368_v46 = vld [vmem:[%s13559_s1 + $0x10] sm:$0xff]  ;;  %v369_v47 = vld [vmem:[%s13559_s1 + $0x18] sm:$0xff]  ;;  %v9531_v48 = vpack.c.bf16 %v6880_v44, %v6879_v43  ;;  %v6882_v50 = vld [vmem:[%s13559_s1 + $0x268] sm:$0xff] }
  0x19   : > { %9458 = vmatpush3.bf16.msra.mxu0 %v9455_v8  ;;  %9518 = vmatpush3.bf16.msra.mxu1 %v9515_v23  ;;  %v10638_v51 = vld [vmem:[%s10549_s11 + $0x1f] sm:$0xff]  ;;  %v10641_v52 = vld [vmem:[%s10549_s11 + $0x27] sm:$0xff]  ;;  %v9483_v53 = vpack.c.bf16 %v369_v47, %v368_v46  ;;  %v9535_v56 = vpack.c.bf16 %v6882_v50, %v6881_v49  ;;  %v6883_v57 = vld [vmem:[%s13559_s1 + $0x270] sm:$0xff] }
  0x1a   : > { %9460 = vmatprep.subr.bf16.mxu0 %v9459_v12  ;;  %9520 = vmatprep.subr.bf16.mxu1 %v9519_v29  ;;  %v370_v54 = vld [vmem:[%s13559_s1 + $0x20] sm:$0xff]  ;;  %v371_v55 = vld [vmem:[%s13559_s1 + $0x28] sm:$0xff]  ;;  %v6884_v58 = vld [vmem:[%s13559_s1 + $0x278] sm:$0xff] }
  0x1b   : > { %v10658_v59 = vld [vmem:[%s10549_s11 + $0x2f] sm:$0xff]  ;;  %v10661_v60 = vld [vmem:[%s10549_s11 + $0x37] sm:$0xff]  ;;  %v9487_v61 = vpack.c.bf16 %v371_v55, %v370_v54  ;;  %v9539_v0 = vpack.c.bf16 %v6884_v58, %v6883_v57  ;;  %v6821_v1 = vld [vmem:[%s13559_s1 + $0x80] sm:$0xff] }
  0x1c   : > { %v372_v62 = vld [vmem:[%s13559_s1 + $0x30] sm:$0xff]  ;;  %v373_v63 = vld [vmem:[%s13559_s1 + $0x38] sm:$0xff]  ;;  %v6822_v2 = vld [vmem:[%s13559_s1 + $0x88] sm:$0xff] }
  0x1d   : > { %9462 = vmatpush3.bf16.msra.mxu0 %v9459_v12  ;;  %9522 = vmatpush3.bf16.msra.mxu1 %v9519_v29  ;;  %v10678_v3 = vld [vmem:[%s10549_s11 + $0x3f] sm:$0xff]  ;;  %v10681_v4 = vld [vmem:[%s10549_s11 + $0x47] sm:$0xff]  ;;  %v9491_v5 = vpack.c.bf16 %v373_v63, %v372_v62  ;;  %v9543_v8 = vpack.c.bf16 %v6822_v2, %v6821_v1  ;;  %v10692_v9 = vld [vmem:[%s10549_s11 + $0x4f] sm:$0xff] }
  0x1e   : > { %9464 = vmatprep.subr.bf16.mxu0 %v9463_v15  ;;  %9524 = vmatprep.subr.bf16.mxu1 %v9523_v35  ;;  %v374_v6 = vld [vmem:[%s13559_s1 + $0x40] sm:$0xff]  ;;  %v375_v7 = vld [vmem:[%s13559_s1 + $0x48] sm:$0xff]  ;;  %v6823_v10 = vld [vmem:[%s13559_s1 + $0x90] sm:$0xff] }
  0x1f   : > { %v6824_v12 = vld [vmem:[%s13559_s1 + $0x98] sm:$0xff]  ;;  %v9495_v14 = vpack.c.bf16 %v375_v7, %v374_v6  ;;  %v10710_v17 = vld [vmem:[%s10549_s11 + $0x20] sm:$0xff]  ;;  %v10714_v18 = vld [vmem:[%s10549_s11 + $0x28] sm:$0xff] }
  0x20   : > { %v10701_v13 = vld [vmem:[%s10549_s11 + $0x57] sm:$0xff]  ;;  %v9547_v19 = vpack.c.bf16 %v6824_v12, %v6823_v10  ;;  %v10718_v20 = vld [vmem:[%s10549_s11 + $0x5f] sm:$0xff]  ;;  %v6826_v22 = vld [vmem:[%s13559_s1 + $0xa8] sm:$0xff] }
  0x21   : > { %9466 = vmatpush3.bf16.msra.mxu0 %v9463_v15  ;;  %9526 = vmatpush3.bf16.msra.mxu1 %v9523_v35  ;;  %v376_v15 = vld [vmem:[%s13559_s1 + $0x50] sm:$0xff]  ;;  %v377_v16 = vld [vmem:[%s13559_s1 + $0x58] sm:$0xff]  ;;  %v6825_v21 = vld [vmem:[%s13559_s1 + $0xa0] sm:$0xff] }
  0x22   : > { %9468 = vmatprep.subr.bf16.mxu0 %v9467_v25  ;;  %9528 = vmatprep.subr.bf16.mxu1 %v9527_v41  ;;  %v10727_v23 = vld [vmem:[%s10549_s11 + $0x67] sm:$0xff]  ;;  %v9499_v24 = vpack.c.bf16 %v377_v16, %v376_v15  ;;  %v10738_v27 = vld [vmem:[%s10549_s11 + $0x30] sm:$0xff]  ;;  %v10742_v28 = vld [vmem:[%s10549_s11 + $0x38] sm:$0xff]  ;;  %v9551_v29 = vpack.c.bf16 %v6826_v22, %v6825_v21 }
  0x23   : > { %v379_v26 = vld [vmem:[%s13559_s1 + $0x68] sm:$0xff]  ;;  %v6827_v31 = vld [vmem:[%s13559_s1 + $0xb0] sm:$0xff]  ;;  %v381_v36 = vld [vmem:[%s13559_s1 + $0x78] sm:$0xff] }
  0x24   : > { %v10746_v30 = vld [vmem:[%s10549_s11 + $0x6f] sm:$0xff]  ;;  %v10755_v33 = vld [vmem:[%s10549_s11 + $0x77] sm:$0xff]  ;;  %v10766_v37 = vld [vmem:[%s10549_s11 + $0x40] sm:$0xff] }
  0x25   : > { %9470 = vmatpush3.bf16.msra.mxu0 %v9467_v25  ;;  %9530 = vmatpush3.bf16.msra.mxu1 %v9527_v41  ;;  %v378_v25 = vld [vmem:[%s13559_s1 + $0x60] sm:$0xff]  ;;  %v380_v35 = vld [vmem:[%s13559_s1 + $0x70] sm:$0xff]  ;;  %v6830_v43 = vld [vmem:[%s13559_s1 + $0xc8] sm:$0xff] }
  0x26   : > { %9472 = vmatprep.subr.bf16.mxu0 %v9471_v32  ;;  %9532 = vmatprep.subr.bf16.mxu1 %v9531_v48  ;;  %v9503_v34 = vpack.c.bf16 %v379_v26, %v378_v25  ;;  %v10774_v40 = vld [vmem:[%s10549_s11 + $0x7f] sm:$0xff]  ;;  %v10783_v44 = vld [vmem:[%s10549_s11 + $0x87] sm:$0xff]  ;;  %v6831_v54 = vld [vmem:[%s13559_s1 + $0xd0] sm:$0xff] }
  0x27   : > { %v6829_v41 = vld [vmem:[%s13559_s1 + $0xc0] sm:$0xff]  ;;  %v6886_v47 = vld [vmem:[%s13559_s1 + $0x288] sm:$0xff]  ;;  %v10798_v49 = vld [vmem:[%s10549_s11 + $0x58] sm:$0xff] }
  0x28   : > { %v6885_v46 = vld [vmem:[%s13559_s1 + $0x280] sm:$0xff]  ;;  %v9559_v50 = vpack.c.bf16 %v6830_v43, %v6829_v41  ;;  %v6832_v55 = vld [vmem:[%s13559_s1 + $0xd8] sm:$0xff]  ;;  %v6834_v1 = vld [vmem:[%s13559_s1 + $0xe8] sm:$0xff] }
  0x29   : > { %9474 = vmatpush3.bf16.msra.mxu0 %v9471_v32  ;;  %9534 = vmatpush3.bf16.msra.mxu1 %v9531_v48  ;;  %v6828_v32 = vld [vmem:[%s13559_s1 + $0xb8] sm:$0xff]  ;;  %v10794_v48 = vld [vmem:[%s10549_s11 + $0x50] sm:$0xff]  ;;  %v10813_v57 = vpack.c.bf16 %v6886_v47, %v6885_v46  ;;  %v10818_v58 = vld [vmem:[%s10549_s11 + $0x60] sm:$0xff]  ;;  %v9563_v62 = vpack.c.bf16 %v6832_v55, %v6831_v54 }
  0x2a   : > { %9476 = vmatprep.subr.bf16.mxu0 %v9475_v38  ;;  %9536 = vmatprep.subr.bf16.mxu1 %v9535_v56  ;;  %v9555_v39 = vpack.c.bf16 %v6828_v32, %v6827_v31  ;;  %v10826_v63 = vld [vmem:[%s10549_s11 + $0x9f] sm:$0xff]  ;;  %v10835_v2 = vld [vmem:[%s10549_s11 + $0xa7] sm:$0xff]  ;;  %v6835_v10 = vld [vmem:[%s13559_s1 + $0xf0] sm:$0xff] }
  0x2b   : > { %v10845_v6 = vld [vmem:[%s10549_s11 + $0x78] sm:$0xff]  ;;  %v10863_v15 = vld [vmem:[%s10549_s11 + $0x80] sm:$0xff]  ;;  %v10867_v16 = vld [vmem:[%s10549_s11 + $0x88] sm:$0xff] }
  0x2c   : > { %v6836_v12 = vld [vmem:[%s13559_s1 + $0xf8] sm:$0xff]  ;;  %v6917_v22 = vld [vmem:[%s13559_s1 + $0x380] sm:$0xff]  ;;  %v10885_v26 = vld [vmem:[%s10549_s11 + $0x90] sm:$0xff] }
  0x2d   : > { %9478 = vmatpush3.bf16.msra.mxu0 %v9475_v38  ;;  %9538 = vmatpush3.bf16.msra.mxu1 %v9535_v56  ;;  %v10770_v38 = vld [vmem:[%s10549_s11 + $0x48] sm:$0xff]  ;;  %v10811_v56 = vld [vmem:[%s10549_s11 + $0x97] sm:$0xff]  ;;  %v10871_v21 = vld [vmem:[%s10549_s11 + $0xbf] sm:$0xff] }
  0x2e   : > { %9480 = vmatprep.subr.bf16.mxu0 %v9479_v45  ;;  %9540 = vmatprep.subr.bf16.mxu1 %v9539_v0  ;;  %v10880_v25 = vld [vmem:[%s10549_s11 + $0xc7] sm:$0xff]  ;;  %v10895_v32 = vld [vmem:[%s10549_s11 + $0xcf] sm:$0xff]  ;;  %v10931_v47 = vld [vmem:[%s10549_s11 + $0xf7] sm:$0xff] }
  0x2f   : > { %v10915_v41 = vld [vmem:[%s10549_s11 + $0xe7] sm:$0xff]  ;;  %v10920_v43 = vld [vmem:[%s10549_s11 + $0xb0] sm:$0xff]  ;;  %v10944_v55 = vld [vmem:[%s10549_s11 + $0xff] sm:$0xff] }
  0x30   : > { %8000 = vmatmul.mubr.f32.vlgmr.msra.gmra.mrb[0].mxu0 %v10638_v51  ;;  %v10928_v46 = vld [vmem:[%s10549_s11 + $0xef] sm:$0xff]  ;;  %13670 = vst [vmem:[#allocation3_spill] sm:$0xff] %v10944_v55 }
  0x31   : > { %9482 = vmatpush3.bf16.msra.mxu0 %v9479_v45  ;;  %8002 = vmatprep.mubr.f32.mxu0 %v10641_v52  ;;  %v9507_v45 = vpack.c.bf16 %v381_v36, %v380_v35  ;;  %v10903_v35 = vld [vmem:[%s10549_s11 + $0xa0] sm:$0xff]  ;;  %v10907_v36 = vld [vmem:[%s10549_s11 + $0xa8] sm:$0xff] }
  0x32   : > { %9484 = vmatprep.subr.bf16.mxu0 %v9483_v53  ;;  %9542 = vmatpush3.bf16.msra.mxu1 %v9539_v0  ;;  %v6833_v0 = vld [vmem:[%s13559_s1 + $0xe0] sm:$0xff]  ;;  %v10940_v54 = vld [vmem:[%s10549_s11 + $0xc8] sm:$0xff] }
  0x33   : > { %9544 = vmatprep.subr.bf16.mxu1 %v9543_v8  ;;  %v9567_v7 = vpack.c.bf16 %v6834_v1, %v6833_v0  ;;  %v10950_v0 = vld [vmem:[%s10549_s11 + $0xd0] sm:$0xff]  ;;  %v10954_v1 = vld [vmem:[%s10549_s11 + $0xd8] sm:$0xff] }
  0x34   : > { %8003 = vmatmul.mubr.f32.gmra.mrb[2].mxu0 %v10658_v59  ;;  %13671 = vst [vmem:[#allocation4_spill] sm:$0xff] %v10950_v0  ;;  %13672 = vst [vmem:[#allocation5_spill] sm:$0xff] %v10954_v1 }
  0x35   : > { %8005 = vmatprep.mubr.f32.mxu0 %v10661_v60  ;;  %9486 = vmatpush3.bf16.msra.mxu0 %v9483_v53  ;;  %v10802_v53 = vld [vmem:[%s10549_s11 + $0x8f] sm:$0xff] }
  0x36   : > { %9488 = vmatprep.subr.bf16.mxu0 %v9487_v61  ;;  %8160 = vmatmul.mubr.f32.vlgmr.msra.gmra.mrb[0].mxu1 %v10710_v17 }
  0x37   : > { %8162 = vmatprep.mubr.f32.mxu1 %v10714_v18  ;;  %9546 = vmatpush3.bf16.msra.mxu1 %v9543_v8  ;;  %v10849_v8 = vld [vmem:[%s10549_s11 + $0xaf] sm:$0xff] }
  0x38   : > { %8006 = vmatmul.mubr.f32.gmra.mrb[4].mxu0 %v10678_v3  ;;  %9548 = vmatprep.subr.bf16.mxu1 %v9547_v19 }
  0x39   : > { %8008 = vmatprep.mubr.f32.mxu0 %v10681_v4  ;;  %9490 = vmatpush3.bf16.msra.mxu0 %v9487_v61  ;;  %v10822_v61 = vld [vmem:[%s10549_s11 + $0x68] sm:$0xff] }
  0x3a   : > { %9492 = vmatprep.subr.bf16.mxu0 %v9491_v5  ;;  %8163 = vmatmul.mubr.f32.gmra.mrb[2].mxu1 %v10738_v27 }
  0x3b   : > { %8165 = vmatprep.mubr.f32.mxu1 %v10742_v28  ;;  %9550 = vmatpush3.bf16.msra.mxu1 %v9547_v19  ;;  %v9571_v19 = vpack.c.bf16 %v6836_v12, %v6835_v10  ;;  %v334_v10 = vld [vmem:[%s10549_s11 + $0x7] sm:$0xff]  ;;  %v6887_v12 = vld [vmem:[%s13559_s1 + $0x290] sm:$0xff] }
  0x3c   : > { %8009 = vmatmul.mubr.f32.gmra.mrb[6].mxu0 %v10692_v9  ;;  %9552 = vmatprep.subr.bf16.mxu1 %v9551_v29 }
  0x3d   : > { %8011 = vmatprep.mubr.f32.mxu0 %v10701_v13  ;;  %9494 = vmatpush3.bf16.msra.mxu0 %v9491_v5  ;;  %v10841_v5 = vld [vmem:[%s10549_s11 + $0x70] sm:$0xff] }
  0x3e   : > { %9496 = vmatprep.subr.bf16.mxu0 %v9495_v14  ;;  %8166 = vmatmul.mubr.f32.gmra.mrb[4].mxu1 %v10766_v37 }
  0x3f   : > { %8168 = vmatprep.mubr.f32.mxu1 %v10770_v38  ;;  %9554 = vmatpush3.bf16.msra.mxu1 %v9551_v29  ;;  %v10889_v29 = vld [vmem:[%s10549_s11 + $0x98] sm:$0xff] }
  0x40   : > { %8012 = vmatmul.mubr.f32.gmra.mrb[8].mxu0 %v10718_v20  ;;  %9556 = vmatprep.subr.bf16.mxu1 %v9555_v39 }
  0x41   : > { %8014 = vmatprep.mubr.f32.mxu0 %v10727_v23  ;;  %9498 = vmatpush3.bf16.msra.mxu0 %v9495_v14  ;;  %v10858_v14 = vld [vmem:[%s10549_s11 + $0xb7] sm:$0xff] }
  0x42   : > { %9500 = vmatprep.subr.bf16.mxu0 %v9499_v24  ;;  %8169 = vmatmul.mubr.f32.gmra.mrb[6].mxu1 %v10794_v48 }
  0x43   : > { %8171 = vmatprep.mubr.f32.mxu1 %v10798_v49  ;;  %9558 = vmatpush3.bf16.msra.mxu1 %v9555_v39  ;;  %v10912_v39 = vld [vmem:[%s10549_s11 + $0xdf] sm:$0xff] }
  0x44   : > { %8015 = vmatmul.mubr.f32.gmra.mrb[10].mxu0 %v10746_v30  ;;  %9560 = vmatprep.subr.bf16.mxu1 %v9559_v50 }
  0x45   : > { %8017 = vmatprep.mubr.f32.mxu0 %v10755_v33  ;;  %9502 = vmatpush3.bf16.msra.mxu0 %v9499_v24  ;;  %v6918_v24 = vld [vmem:[%s13559_s1 + $0x388] sm:$0xff] }
  0x46   : > { %9504 = vmatprep.subr.bf16.mxu0 %v9503_v34  ;;  %8172 = vmatmul.mubr.f32.gmra.mrb[8].mxu1 %v10818_v58  ;;  %v10891_v31 = vpack.c.bf16 %v6918_v24, %v6917_v22  ;;  %v10967_v22 = vld [vmem:[%s10549_s11 + $0xe0] sm:$0xff]  ;;  %v10970_v24 = vld [vmem:[%s10549_s11 + $0xe8] sm:$0xff] }
  0x47   : > { %8174 = vmatprep.mubr.f32.mxu1 %v10822_v61  ;;  %9562 = vmatpush3.bf16.msra.mxu1 %v9559_v50  ;;  %v10936_v50 = vld [vmem:[%s10549_s11 + $0xc0] sm:$0xff]  ;;  %13673 = vst [vmem:[#allocation6_spill] sm:$0xff] %v10970_v24 }
  0x48   : > { %8018 = vmatmul.mubr.f32.gmra.mrb[12].mxu0 %v10774_v40  ;;  %9564 = vmatprep.subr.bf16.mxu1 %v9563_v62 }
  0x49   : > { %8020 = vmatprep.mubr.f32.mxu0 %v10783_v44  ;;  %9506 = vmatpush3.bf16.msra.mxu0 %v9503_v34  ;;  %v10898_v34 = vld [vmem:[%s10549_s11 + $0xd7] sm:$0xff] }
  0x4a   : > { %9508 = vmatprep.subr.bf16.mxu0 %v9507_v45  ;;  %8175 = vmatmul.mubr.f32.gmra.mrb[10].mxu1 %v10841_v5 }
  0x4b   : > { %8177 = vmatprep.mubr.f32.mxu1 %v10845_v6  ;;  %9566 = vmatpush3.bf16.msra.mxu1 %v9563_v62  ;;  %v480_v62 = vld [vmem:[%s10549_s11 + $0x107] sm:$0xff] }
  0x4c   : > { %8021 = vmatmul.mubr.f32.gmra.mrb[14].mxu0 %v10802_v53  ;;  %9568 = vmatprep.subr.bf16.mxu1 %v9567_v7 }
  0x4d   : > { %8023 = vmatprep.mubr.f32.mxu0 %v10811_v56  ;;  %9510 = vmatpush3.bf16.msra.mxu0 %v9507_v45  ;;  %v10924_v45 = vld [vmem:[%s10549_s11 + $0xb8] sm:$0xff] }
  0x4e   : > { %9576 = vmatprep.subr.bf16.mxu0 %v10813_v57  ;;  %8178 = vmatmul.mubr.f32.gmra.mrb[12].mxu1 %v10863_v15 }
  0x4f   : > { %8180 = vmatprep.mubr.f32.mxu1 %v10867_v16  ;;  %9570 = vmatpush3.bf16.msra.mxu1 %v9567_v7  ;;  %v481_v7 = vld [vmem:[%s10549_s11 + $0x10f] sm:$0xff] }
  0x50   : > { %8024 = vmatmul.mubr.f32.gmra.mrb[16].mxu0 %v10826_v63  ;;  %9572 = vmatprep.subr.bf16.mxu1 %v9571_v19 }
  0x51   : > { %8026 = vmatprep.mubr.f32.mxu0 %v10835_v2 }
  0x52   : > { %8181 = vmatmul.mubr.f32.gmra.mrb[14].mxu1 %v10885_v26 }
  0x53   : > { %8183 = vmatprep.mubr.f32.mxu1 %v10889_v29  ;;  %9574 = vmatpush3.bf16.msra.mxu1 %v9571_v19  ;;  %v6888_v19 = vld [vmem:[%s13559_s1 + $0x298] sm:$0xff] }
  0x54   : > { %8027 = vmatmul.mubr.f32.gmra.mrb[18].mxu0 %v10849_v8  ;;  %9672 = vmatprep.subr.bf16.mxu1 %v10891_v31 }
  0x55   : > { %8029 = vmatprep.mubr.f32.mxu0 %v10858_v14 }
  0x56   : > { %8184 = vmatmul.mubr.f32.gmra.mrb[16].mxu1 %v10903_v35 }
  0x57   : > { %8186 = vmatprep.mubr.f32.mxu1 %v10907_v36 }
  0x58   : > { %8030 = vmatmul.mubr.f32.gmra.mrb[20].mxu0 %v10871_v21 }
  0x59   : > { %8032 = vmatprep.mubr.f32.mxu0 %v10880_v25 }
  0x5a   : > { %8187 = vmatmul.mubr.f32.gmra.mrb[18].mxu1 %v10920_v43 }
  0x5b   : > { %8189 = vmatprep.mubr.f32.mxu1 %v10924_v45 }
  0x5c   : > { %8033 = vmatmul.mubr.f32.gmra.mrb[22].mxu0 %v10895_v32 }
  0x5d   : > { %8035 = vmatprep.mubr.f32.mxu0 %v10898_v34 }
  0x5e   : > { %8190 = vmatmul.mubr.f32.gmra.mrb[20].mxu1 %v10936_v50 }
  0x5f   : > { %8192 = vmatprep.mubr.f32.mxu1 %v10940_v54 }
  0x60   : > { %8036 = vmatmul.mubr.f32.gmra.mrb[24].mxu0 %v10912_v39 }
  0x61   : > { %8038 = vmatprep.mubr.f32.mxu0 %v10915_v41 }
  0x62   : > { %8193 = vmatmul.mubr.f32.gmra.mrb[22].mxu1 %v10950_v0  ;;  %v6889_v0 = vld [vmem:[%s13559_s1 + $0x2a0] sm:$0xff] }
  0x63   : > { %8195 = vmatprep.mubr.f32.mxu1 %v10954_v1  ;;  %v6890_v1 = vld [vmem:[%s13559_s1 + $0x2a8] sm:$0xff] }
  0x64   : > { %8039 = vmatmul.mubr.f32.gmra.mrb[26].mxu0 %v10928_v46 }
  0x65   : > { %8041 = vmatprep.mubr.f32.mxu0 %v10931_v47 }
  0x66   : > { %8196 = vmatmul.mubr.f32.gmra.mrb[24].mxu1 %v10967_v22 }
  0x67   : > { %8198 = vmatprep.mubr.f32.mxu1 %v10970_v24  ;;  %v10998_v24 = vld [vmem:[%s10549_s11 + $0x100] sm:$0xff] }
  0x68   : > { %8042 = vmatmul.mubr.f32.gmra.mrb[28].mxu0 %v10944_v55  ;;  %v9579_v55 = vpack.c.bf16 %v6888_v19, %v6887_v12  ;;  %v9583_v12 = vpack.c.bf16 %v6890_v1, %v6889_v0  ;;  %v6891_v19 = vld [vmem:[%s13559_s1 + $0x2b0] sm:$0xff]  ;;  %v6893_v0 = vld [vmem:[%s13559_s1 + $0x2c0] sm:$0xff]  ;;  %v6894_v1 = vld [vmem:[%s13559_s1 + $0x2c8] sm:$0xff] }
  0x69   : > { %8044 = vmatprep.mubr.f32.mxu0 %v480_v62  ;;  %v335_v62 = vld [vmem:[%s10549_s11 + $0xf] sm:$0xff] }
  0x6c   : > { %8045 = vmatmul.mubr.f32.gmra.mrb[30].mxu0 %v481_v7  ;;  %v10982_v7 = vld [vmem:[%s10549_s11 + $0xf0] sm:$0xff] }
  0x6d   : > { %8079 = vmatprep.mubr.f32.mxu0 %v334_v10  ;;  %v10985_v10 = vld [vmem:[%s10549_s11 + $0xf8] sm:$0xff]  ;;  %8199 = vmatmul.mubr.f32.gmra.mrb[26].mxu1 %v10982_v7 }
  0x6e   : > { %8201 = vmatprep.mubr.f32.mxu1 %v10985_v10 }
  0x70   : > { %8080 = vmatmul.mubr.f32.vlgmr.msra.gmra.mrb[0].mxu0 %v335_v62  ;;  %v6892_v62 = vld [vmem:[%s13559_s1 + $0x2b8] sm:$0xff] }
  0x71   : > { %9578 = vmatpush3.bf16.msra.mxu0 %v10813_v57  ;;  %8082 = vmatprep.mubr.f32.mxu0 %v10552_v11  ;;  %v11002_v11 = vld [vmem:[%s10549_s11 + $0x108] sm:$0xff]  ;;  %v9587_v57 = vpack.c.bf16 %v6892_v62, %v6891_v19  ;;  %v6920_v19 = vld [vmem:[%s13559_s1 + $0x398] sm:$0xff]  ;;  %v9591_v62 = vpack.c.bf16 %v6894_v1, %v6893_v0  ;;  %v6921_v0 = vld [vmem:[%s13559_s1 + $0x3a0] sm:$0xff] }
  0x72   : > { %9580 = vmatprep.subr.bf16.mxu0 %v9579_v55  ;;  %13674 = vst [vmem:[#allocation7_spill] sm:$0xff] %v11002_v11  ;;  %8202 = vmatmul.mubr.f32.gmra.mrb[28].mxu1 %v10998_v24  ;;  %v6922_v1 = vld [vmem:[%s13559_s1 + $0x3a8] sm:$0xff] }
  0x73   : > { %8204 = vmatprep.mubr.f32.mxu1 %v11002_v11 }
  0x74   : > { %8083 = vmatmul.mubr.f32.gmra.mrb[2].mxu0 %v10638_v51  ;;  %v11014_v51 = vld [vmem:[%s10549_s11 + $0x110] sm:$0xff] }
  0x75   : > { %8085 = vmatprep.mubr.f32.mxu0 %v10641_v52  ;;  %9582 = vmatpush3.bf16.msra.mxu0 %v9579_v55  ;;  %13675 = vst [vmem:[#allocation8_spill] sm:$0xff] %v11014_v51  ;;  %v382_v52 = vld [vmem:[%s10549_s11 + $0x8] sm:$0xff]  ;;  %v6919_v55 = vld [vmem:[%s13559_s1 + $0x390] sm:$0xff] }
  0x76   : > { %9584 = vmatprep.subr.bf16.mxu0 %v9583_v12  ;;  %8205 = vmatmul.mubr.f32.gmra.mrb[30].mxu1 %v11014_v51  ;;  %v9675_v11 = vpack.c.bf16 %v6920_v19, %v6919_v55  ;;  %v6924_v55 = vld [vmem:[%s13559_s1 + $0x3b8] sm:$0xff] }
  0x77   : > { %8239 = vmatprep.mubr.f32.mxu1 %v382_v52  ;;  %v6897_v52 = vld [vmem:[%s13559_s1 + $0x2e0] sm:$0xff] }
  0x78   : > { %8086 = vmatmul.mubr.f32.gmra.mrb[4].mxu0 %v10658_v59  ;;  %v6895_v59 = vld [vmem:[%s13559_s1 + $0x2d0] sm:$0xff] }
  0x79   : > { %8088 = vmatprep.mubr.f32.mxu0 %v10661_v60  ;;  %9586 = vmatpush3.bf16.msra.mxu0 %v9583_v12  ;;  %v6896_v60 = vld [vmem:[%s13559_s1 + $0x2d8] sm:$0xff]  ;;  %v383_v12 = vld [vmem:[%s10549_s11 + $0x10] sm:$0xff] }
  0x7a   : > { %9588 = vmatprep.subr.bf16.mxu0 %v9587_v57  ;;  %v9595_v51 = vpack.c.bf16 %v6896_v60, %v6895_v59  ;;  %8240 = vmatmul.mubr.f32.vlgmr.msra.gmra.mrb[0].mxu1 %v383_v12  ;;  %v6928_v59 = vld [vmem:[%s13559_s1 + $0x3d8] sm:$0xff]  ;;  %v6930_v12 = vld [vmem:[%s13559_s1 + $0x3e8] sm:$0xff] }
  0x7b   : > { %8242 = vmatprep.mubr.f32.mxu1 %v10616_v42  ;;  %9674 = vmatpush3.bf16.msra.mxu1 %v10891_v31  ;;  %v6899_v42 = vld [vmem:[%s13559_s1 + $0x2f0] sm:$0xff]  ;;  %v6926_v31 = vld [vmem:[%s13559_s1 + $0x3c8] sm:$0xff] }
  0x7c   : > { %8089 = vmatmul.mubr.f32.gmra.mrb[6].mxu0 %v10678_v3  ;;  %v6898_v3 = vld [vmem:[%s13559_s1 + $0x2e8] sm:$0xff]  ;;  %9676 = vmatprep.subr.bf16.mxu1 %v9675_v11 }
  0x7d   : > { %8091 = vmatprep.mubr.f32.mxu0 %v10681_v4  ;;  %9590 = vmatpush3.bf16.msra.mxu0 %v9587_v57  ;;  %v9679_v4 = vpack.c.bf16 %v6922_v1, %v6921_v0  ;;  %v6923_v57 = vld [vmem:[%s13559_s1 + $0x3b0] sm:$0xff]  ;;  %v9599_v19 = vpack.c.bf16 %v6898_v3, %v6897_v52  ;;  %v6932_v0 = vld [vmem:[%s13559_s1 + $0x3f8] sm:$0xff] }
  0x7e   : > { %9592 = vmatprep.subr.bf16.mxu0 %v9591_v62  ;;  %8243 = vmatmul.mubr.f32.gmra.mrb[2].mxu1 %v10710_v17  ;;  %v6925_v17 = vld [vmem:[%s13559_s1 + $0x3c0] sm:$0xff]  ;;  %v6843_v52 = vld [vmem:[%s13559_s1 + $0x130] sm:$0xff]  ;;  %v6844_v3 = vld [vmem:[%s13559_s1 + $0x138] sm:$0xff] }
  0x7f   : > { %8245 = vmatprep.mubr.f32.mxu1 %v10714_v18  ;;  %9678 = vmatpush3.bf16.msra.mxu1 %v9675_v11  ;;  %v9687_v11 = vpack.c.bf16 %v6926_v31, %v6925_v17  ;;  %v11202_v17 = vld [vmem:[%s10549_s11 + $0x59] sm:$0xff] }
  0x80   : > { %8092 = vmatmul.mubr.f32.gmra.mrb[8].mxu0 %v10692_v9  ;;  %v6900_v9 = vld [vmem:[%s13559_s1 + $0x2f8] sm:$0xff]  ;;  %9680 = vmatprep.subr.bf16.mxu1 %v9679_v4 }
  0x81   : > { %8094 = vmatprep.mubr.f32.mxu0 %v10701_v13  ;;  %9594 = vmatpush3.bf16.msra.mxu0 %v9591_v62  ;;  %v9683_v13 = vpack.c.bf16 %v6924_v55, %v6923_v57  ;;  %v9603_v62 = vpack.c.bf16 %v6900_v9, %v6899_v42  ;;  %v11183_v57 = vld [vmem:[%s10549_s11 + $0x41] sm:$0xff]  ;;  %v11186_v55 = vld [vmem:[%s10549_s11 + $0x49] sm:$0xff] }
  0x82   : > { %9596 = vmatprep.subr.bf16.mxu0 %v9595_v51  ;;  %8246 = vmatmul.mubr.f32.gmra.mrb[4].mxu1 %v10738_v27  ;;  %v6845_v42 = vld [vmem:[%s13559_s1 + $0x140] sm:$0xff]  ;;  %v6846_v9 = vld [vmem:[%s13559_s1 + $0x148] sm:$0xff] }
  0x83   : > { %8248 = vmatprep.mubr.f32.mxu1 %v10742_v28  ;;  %9682 = vmatpush3.bf16.msra.mxu1 %v9679_v4  ;;  %v13679_v4 = vld [vmem:[#allocation6_spill] sm:$0xff]  ;;  %v9623_v31 = vpack.c.bf16 %v6846_v9, %v6845_v42  ;;  %v6912_v42 = vld [vmem:[%s13559_s1 + $0x358] sm:$0xff] }
  0x84   : > { %8095 = vmatmul.mubr.f32.gmra.mrb[10].mxu0 %v10718_v20  ;;  %v6837_v20 = vld [vmem:[%s13559_s1 + $0x100] sm:$0xff]  ;;  %9684 = vmatprep.subr.bf16.mxu1 %v9683_v13 }
  0x85   : > { %8097 = vmatprep.mubr.f32.mxu0 %v10727_v23  ;;  %9598 = vmatpush3.bf16.msra.mxu0 %v9595_v51  ;;  %v6838_v23 = vld [vmem:[%s13559_s1 + $0x108] sm:$0xff]  ;;  %v6927_v51 = vld [vmem:[%s13559_s1 + $0x3d0] sm:$0xff] }
  0x86   : > { %9600 = vmatprep.subr.bf16.mxu0 %v9599_v19  ;;  %v11089_v60 = vpack.c.bf16 %v6838_v23, %v6837_v20  ;;  %8249 = vmatmul.mubr.f32.gmra.mrb[6].mxu1 %v10766_v37  ;;  %v6848_v20 = vld [vmem:[%s13559_s1 + $0x158] sm:$0xff]  ;;  %v11215_v23 = vld [vmem:[%s10549_s11 + $0x61] sm:$0xff] }
  0x87   : > { %8251 = vmatprep.mubr.f32.mxu1 %v10770_v38  ;;  %9686 = vmatpush3.bf16.msra.mxu1 %v9683_v13  ;;  %v11199_v13 = vld [vmem:[%s10549_s11 + $0x51] sm:$0xff] }
  0x88   : > { %8098 = vmatmul.mubr.f32.gmra.mrb[12].mxu0 %v10746_v30  ;;  %9688 = vmatprep.subr.bf16.mxu1 %v9687_v11  ;;  %v9691_v30 = vpack.c.bf16 %v6928_v59, %v6927_v51  ;;  %v6849_v59 = vld [vmem:[%s13559_s1 + $0x160] sm:$0xff] }
  0x89   : > { %8100 = vmatprep.mubr.f32.mxu0 %v10755_v33  ;;  %9602 = vmatpush3.bf16.msra.mxu0 %v9599_v19  ;;  %v6929_v33 = vld [vmem:[%s13559_s1 + $0x3e0] sm:$0xff]  ;;  %v9619_v19 = vpack.c.bf16 %v6844_v3, %v6843_v52  ;;  %v13681_v52 = vld [vmem:[#allocation8_spill] sm:$0xff]  ;;  %v6910_v3 = vld [vmem:[%s13559_s1 + $0x348] sm:$0xff] }
  0x8a   : > { %9604 = vmatprep.subr.bf16.mxu0 %v9603_v62  ;;  %8252 = vmatmul.mubr.f32.gmra.mrb[8].mxu1 %v10794_v48 }
  0x8b   : > { %8254 = vmatprep.mubr.f32.mxu1 %v10798_v49  ;;  %9690 = vmatpush3.bf16.msra.mxu1 %v9687_v11  ;;  %v11218_v11 = vld [vmem:[%s10549_s11 + $0x69] sm:$0xff] }
  0x8c   : > { %8101 = vmatmul.mubr.f32.gmra.mrb[14].mxu0 %v10774_v40  ;;  %9692 = vmatprep.subr.bf16.mxu1 %v9691_v30  ;;  %v9695_v40 = vpack.c.bf16 %v6930_v12, %v6929_v33  ;;  %v6851_v33 = vld [vmem:[%s13559_s1 + $0x170] sm:$0xff]  ;;  %v11247_v12 = vld [vmem:[%s10549_s11 + $0x81] sm:$0xff] }
  0x8d   : > { %8103 = vmatprep.mubr.f32.mxu0 %v10783_v44  ;;  %9606 = vmatpush3.bf16.msra.mxu0 %v9603_v62  ;;  %v6931_v44 = vld [vmem:[%s13559_s1 + $0x3f0] sm:$0xff] }
  0x8e   : > { %9608 = vmatprep.subr.bf16.mxu0 %v11089_v60  ;;  %8255 = vmatmul.mubr.f32.gmra.mrb[10].mxu1 %v10818_v58  ;;  %v6847_v62 = vld [vmem:[%s13559_s1 + $0x150] sm:$0xff] }
  0x8f   : > { %8257 = vmatprep.mubr.f32.mxu1 %v10822_v61  ;;  %9694 = vmatpush3.bf16.msra.mxu1 %v9691_v30  ;;  %v9627_v51 = vpack.c.bf16 %v6848_v20, %v6847_v62  ;;  %v6914_v62 = vld [vmem:[%s13559_s1 + $0x368] sm:$0xff] }
  0x90   : > { %8104 = vmatmul.mubr.f32.gmra.mrb[16].mxu0 %v10802_v53  ;;  %9696 = vmatprep.subr.bf16.mxu1 %v9695_v40  ;;  %v9699_v53 = vpack.c.bf16 %v6932_v0, %v6931_v44  ;;  %v6901_v44 = vld [vmem:[%s13559_s1 + $0x300] sm:$0xff]  ;;  %v11263_v0 = vld [vmem:[%s10549_s11 + $0x91] sm:$0xff] }
  0x91   : > { %8106 = vmatprep.mubr.f32.mxu0 %v10811_v56  ;;  %v11137_v56 = vld [vmem:[%s10549_s11 + $0x19] sm:$0xff] }
  0x92   : > { %8258 = vmatmul.mubr.f32.gmra.mrb[12].mxu1 %v10841_v5 }
  0x93   : > { %8260 = vmatprep.mubr.f32.mxu1 %v10845_v6  ;;  %9698 = vmatpush3.bf16.msra.mxu1 %v9695_v40 }
  0x94   : > { %8107 = vmatmul.mubr.f32.gmra.mrb[18].mxu0 %v10826_v63  ;;  %9700 = vmatprep.subr.bf16.mxu1 %v9699_v53  ;;  %v6839_v63 = vld [vmem:[%s13559_s1 + $0x110] sm:$0xff] }
  0x95   : > { %8109 = vmatprep.mubr.f32.mxu0 %v10835_v2  ;;  %v6840_v2 = vld [vmem:[%s13559_s1 + $0x118] sm:$0xff] }
  0x96   : > { %8261 = vmatmul.mubr.f32.gmra.mrb[14].mxu1 %v10863_v15 }
  0x97   : > { %8263 = vmatprep.mubr.f32.mxu1 %v10867_v16  ;;  %9702 = vmatpush3.bf16.msra.mxu1 %v9699_v53 }
  0x98   : > { %8110 = vmatmul.mubr.f32.gmra.mrb[20].mxu0 %v10849_v8  ;;  %v13676_v8 = vld [vmem:[#allocation3_spill] sm:$0xff] }
  0x99   : > { %8112 = vmatprep.mubr.f32.mxu0 %v10858_v14  ;;  %v11150_v14 = vld [vmem:[%s10549_s11 + $0x21] sm:$0xff] }
  0x9a   : > { %8264 = vmatmul.mubr.f32.gmra.mrb[16].mxu1 %v10885_v26 }
  0x9b   : > { %8266 = vmatprep.mubr.f32.mxu1 %v10889_v29 }
  0x9c   : > { %8113 = vmatmul.mubr.f32.gmra.mrb[22].mxu0 %v10871_v21  ;;  %v11153_v21 = vld [vmem:[%s10549_s11 + $0x29] sm:$0xff] }
  0x9d   : > { %8115 = vmatprep.mubr.f32.mxu0 %v10880_v25  ;;  %v9611_v25 = vpack.c.bf16 %v6840_v2, %v6839_v63  ;;  %v11278_v63 = vld [vmem:[%s10549_s11 + $0xa9] sm:$0xff] }
  0x9e   : > { %8267 = vmatmul.mubr.f32.gmra.mrb[18].mxu1 %v10903_v35  ;;  %v6903_v2 = vld [vmem:[%s13559_s1 + $0x310] sm:$0xff] }
  0x9f   : > { %8269 = vmatprep.mubr.f32.mxu1 %v10907_v36 }
  0xa0   : > { %8116 = vmatmul.mubr.f32.gmra.mrb[24].mxu0 %v10895_v32  ;;  %v13677_v32 = vld [vmem:[#allocation4_spill] sm:$0xff] }
  0xa1   : > { %8118 = vmatprep.mubr.f32.mxu0 %v10898_v34  ;;  %v6841_v34 = vld [vmem:[%s13559_s1 + $0x120] sm:$0xff] }
  0xa2   : > { %8270 = vmatmul.mubr.f32.gmra.mrb[20].mxu1 %v10920_v43 }
  0xa3   : > { %8272 = vmatprep.mubr.f32.mxu1 %v10924_v45 }
  0xa4   : > { %8119 = vmatmul.mubr.f32.gmra.mrb[26].mxu0 %v10912_v39  ;;  %v6842_v39 = vld [vmem:[%s13559_s1 + $0x128] sm:$0xff] }
  0xa5   : > { %8121 = vmatprep.mubr.f32.mxu0 %v10915_v41  ;;  %v13678_v41 = vld [vmem:[#allocation5_spill] sm:$0xff]  ;;  %v9615_v1 = vpack.c.bf16 %v6842_v39, %v6841_v34  ;;  %v6906_v34 = vld [vmem:[%s13559_s1 + $0x328] sm:$0xff] }
  0xa6   : > { %8273 = vmatmul.mubr.f32.gmra.mrb[22].mxu1 %v10936_v50 }
  0xa7   : > { %8275 = vmatprep.mubr.f32.mxu1 %v10940_v54 }
  0xa8   : > { %8122 = vmatmul.mubr.f32.gmra.mrb[28].mxu0 %v10928_v46  ;;  %v11167_v46 = vld [vmem:[%s10549_s11 + $0x31] sm:$0xff] }
  0xa9   : > { %8124 = vmatprep.mubr.f32.mxu0 %v10931_v47  ;;  %v11170_v47 = vld [vmem:[%s10549_s11 + $0x39] sm:$0xff] }
  0xaa   : > { %8276 = vmatmul.mubr.f32.gmra.mrb[24].mxu1 %v13677_v32 }
  0xab   : > { %8278 = vmatprep.mubr.f32.mxu1 %v13678_v41 }
  0xac   : > { %8125 = vmatmul.mubr.f32.gmra.mrb[30].mxu0 %v13676_v8  ;;  %v6904_v8 = vld [vmem:[%s13559_s1 + $0x318] sm:$0xff] }
  0xad   : > { %8319 = vmatprep.mubr.f32.mxu0 %v11137_v56 }
  0xae   : > { %8279 = vmatmul.mubr.f32.gmra.mrb[26].mxu1 %v10967_v22 }
  0xaf   : > { %8281 = vmatprep.mubr.f32.mxu1 %v13679_v4 }
  0xb0   : > { %8320 = vmatmul.mubr.f32.vlgmr.msra.gmra.mrb[32].mxu0 %v11150_v14 }
  0xb1   : > { %9610 = vmatpush3.bf16.msra.mxu0 %v11089_v60  ;;  %8322 = vmatprep.mubr.f32.mxu0 %v11153_v21  ;;  %v11231_v60 = vld [vmem:[%s10549_s11 + $0x71] sm:$0xff] }
  0xb2   : > { %9612 = vmatprep.subr.bf16.mxu0 %v9611_v25  ;;  %8282 = vmatmul.mubr.f32.gmra.mrb[28].mxu1 %v10982_v7 }
  0xb3   : > { %8284 = vmatprep.mubr.f32.mxu1 %v10985_v10 }
  0xb4   : > { %8323 = vmatmul.mubr.f32.gmra.mrb[34].mxu0 %v11167_v46 }
  0xb5   : > { %8325 = vmatprep.mubr.f32.mxu0 %v11170_v47  ;;  %9614 = vmatpush3.bf16.msra.mxu0 %v9611_v25  ;;  %v432_v25 = vld [vmem:[%s10549_s11 + $0x11] sm:$0xff] }
  0xb6   : > { %9616 = vmatprep.subr.bf16.mxu0 %v9615_v1  ;;  %8285 = vmatmul.mubr.f32.gmra.mrb[30].mxu1 %v10998_v24 }
  0xb7   : > { %8559 = vmatprep.mubr.f32.mxu1 %v10714_v18  ;;  %v6850_v18 = vld [vmem:[%s13559_s1 + $0x168] sm:$0xff] }
  0xb8   : > { %8326 = vmatmul.mubr.f32.gmra.mrb[36].mxu0 %v11183_v57  ;;  %v9631_v30 = vpack.c.bf16 %v6850_v18, %v6849_v59  ;;  %v6916_v59 = vld [vmem:[%s13559_s1 + $0x378] sm:$0xff] }
  0xb9   : > { %8328 = vmatprep.mubr.f32.mxu0 %v11186_v55  ;;  %9618 = vmatpush3.bf16.msra.mxu0 %v9615_v1  ;;  %v13680_v1 = vld [vmem:[#allocation7_spill] sm:$0xff] }
  0xba   : > { %9620 = vmatprep.subr.bf16.mxu0 %v9619_v19  ;;  %8560 = vmatmul.mubr.f32.vlgmr.msra.gmra.mrb[0].mxu1 %v10738_v27  ;;  %v11234_v27 = vld [vmem:[%s10549_s11 + $0x79] sm:$0xff] }
  0xbb   : > { %8562 = vmatprep.mubr.f32.mxu1 %v10742_v28  ;;  %v6852_v28 = vld [vmem:[%s13559_s1 + $0x178] sm:$0xff] }
  0xbc   : > { %8329 = vmatmul.mubr.f32.gmra.mrb[38].mxu0 %v11199_v13  ;;  %v9635_v40 = vpack.c.bf16 %v6852_v28, %v6851_v33  ;;  %v6934_v33 = vld [vmem:[%s13559_s1 + $0x408] sm:$0xff] }
  0xbd   : > { %8331 = vmatprep.mubr.f32.mxu0 %v11202_v17  ;;  %9622 = vmatpush3.bf16.msra.mxu0 %v9619_v19  ;;  %v6911_v19 = vld [vmem:[%s13559_s1 + $0x350] sm:$0xff] }
  0xbe   : > { %9624 = vmatprep.subr.bf16.mxu0 %v9623_v31  ;;  %8563 = vmatmul.mubr.f32.gmra.mrb[2].mxu1 %v10766_v37  ;;  %v11250_v37 = vld [vmem:[%s10549_s11 + $0x89] sm:$0xff]  ;;  %v9659_v9 = vpack.c.bf16 %v6912_v42, %v6911_v19  ;;  %v6944_v19 = vld [vmem:[%s13559_s1 + $0x458] sm:$0xff] }
  0xbf   : > { %8565 = vmatprep.mubr.f32.mxu1 %v10770_v38  ;;  %v6902_v38 = vld [vmem:[%s13559_s1 + $0x308] sm:$0xff] }
  0xc0   : > { %8332 = vmatmul.mubr.f32.gmra.mrb[40].mxu0 %v11215_v23  ;;  %v11268_v53 = vpack.c.bf16 %v6902_v38, %v6901_v44  ;;  %v6935_v44 = vld [vmem:[%s13559_s1 + $0x410] sm:$0xff]  ;;  %v6936_v38 = vld [vmem:[%s13559_s1 + $0x418] sm:$0xff] }
  0xc1   : > { %8334 = vmatprep.mubr.f32.mxu0 %v11218_v11  ;;  %9626 = vmatpush3.bf16.msra.mxu0 %v9623_v31  ;;  %v6913_v31 = vld [vmem:[%s13559_s1 + $0x360] sm:$0xff]  ;;  %v1956_v42 = vld [vmem:[%s10549_s11 + $0x6f] sm:$0xff] }
  0xc2   : > { %9628 = vmatprep.subr.bf16.mxu0 %v9627_v51  ;;  %8566 = vmatmul.mubr.f32.gmra.mrb[4].mxu1 %v10794_v48  ;;  %v11266_v48 = vld [vmem:[%s10549_s11 + $0x99] sm:$0xff]  ;;  %v9663_v20 = vpack.c.bf16 %v6914_v62, %v6913_v31 }
  0xc3   : > { %8568 = vmatprep.mubr.f32.mxu1 %v10798_v49  ;;  %v11275_v49 = vld [vmem:[%s10549_s11 + $0xa1] sm:$0xff] }
  0xc4   : > { %8335 = vmatmul.mubr.f32.gmra.mrb[42].mxu0 %v11231_v60  ;;  %v6945_v62 = vld [vmem:[%s13559_s1 + $0x460] sm:$0xff] }
  0xc5   : > { %8337 = vmatprep.mubr.f32.mxu0 %v11234_v27  ;;  %9630 = vmatpush3.bf16.msra.mxu0 %v9627_v51  ;;  %v6915_v51 = vld [vmem:[%s13559_s1 + $0x370] sm:$0xff] }
  0xc6   : > { %9632 = vmatprep.subr.bf16.mxu0 %v9631_v30  ;;  %8569 = vmatmul.mubr.f32.gmra.mrb[6].mxu1 %v10818_v58  ;;  %v11286_v58 = vld [vmem:[%s10549_s11 + $0xb1] sm:$0xff]  ;;  %v9667_v18 = vpack.c.bf16 %v6916_v59, %v6915_v51  ;;  %v1958_v51 = vld [vmem:[%s10549_s11 + $0x7f] sm:$0xff]  ;;  %v1959_v59 = vld [vmem:[%s10549_s11 + $0x87] sm:$0xff] }
  0xc7   : > { %8571 = vmatprep.mubr.f32.mxu1 %v10822_v61  ;;  %v11289_v61 = vld [vmem:[%s10549_s11 + $0xb9] sm:$0xff] }
  0xc8   : > { %8338 = vmatmul.mubr.f32.gmra.mrb[44].mxu0 %v11247_v12 }
  0xc9   : > { %8340 = vmatprep.mubr.f32.mxu0 %v11250_v37  ;;  %9634 = vmatpush3.bf16.msra.mxu0 %v9631_v30  ;;  %v6933_v30 = vld [vmem:[%s13559_s1 + $0x400] sm:$0xff] }
  0xca   : > { %9636 = vmatprep.subr.bf16.mxu0 %v9635_v40  ;;  %8572 = vmatmul.mubr.f32.gmra.mrb[8].mxu1 %v10841_v5  ;;  %v11296_v5 = vld [vmem:[%s10549_s11 + $0xc1] sm:$0xff]  ;;  %v9703_v28 = vpack.c.bf16 %v6934_v33, %v6933_v30  ;;  %v6947_v30 = vld [vmem:[%s13559_s1 + $0x470] sm:$0xff]  ;;  %v6948_v33 = vld [vmem:[%s13559_s1 + $0x478] sm:$0xff] }
  0xcb   : > { %8574 = vmatprep.mubr.f32.mxu1 %v10845_v6  ;;  %v11299_v6 = vld [vmem:[%s10549_s11 + $0xc9] sm:$0xff] }
  0xcc   : > { %8341 = vmatmul.mubr.f32.gmra.mrb[46].mxu0 %v11263_v0 }
  0xcd   : > { %8343 = vmatprep.mubr.f32.mxu0 %v11266_v48  ;;  %9638 = vmatpush3.bf16.msra.mxu0 %v9635_v40  ;;  %v1947_v40 = vld [vmem:[%s10549_s11 + $0x27] sm:$0xff] }
  0xce   : > { %9640 = vmatprep.subr.bf16.mxu0 %v11268_v53  ;;  %8575 = vmatmul.mubr.f32.gmra.mrb[10].mxu1 %v10863_v15  ;;  %v11306_v15 = vld [vmem:[%s10549_s11 + $0xd1] sm:$0xff] }
  0xcf   : > { %8577 = vmatprep.mubr.f32.mxu1 %v10867_v16  ;;  %v11309_v16 = vld [vmem:[%s10549_s11 + $0xd9] sm:$0xff] }
  0xd0   : > { %8344 = vmatmul.mubr.f32.gmra.mrb[48].mxu0 %v11275_v49 }
  0xd1   : > { %8346 = vmatprep.mubr.f32.mxu0 %v11278_v63 }
  0xd2   : > { %8578 = vmatmul.mubr.f32.gmra.mrb[12].mxu1 %v10885_v26  ;;  %v11316_v26 = vld [vmem:[%s10549_s11 + $0xe1] sm:$0xff] }
  0xd3   : > { %8580 = vmatprep.mubr.f32.mxu1 %v10889_v29  ;;  %v11319_v29 = vld [vmem:[%s10549_s11 + $0xe9] sm:$0xff] }
  0xd4   : > { %8347 = vmatmul.mubr.f32.gmra.mrb[50].mxu0 %v11286_v58 }
  0xd5   : > { %8349 = vmatprep.mubr.f32.mxu0 %v11289_v61 }
  0xd6   : > { %8581 = vmatmul.mubr.f32.gmra.mrb[14].mxu1 %v10903_v35  ;;  %v11326_v35 = vld [vmem:[%s10549_s11 + $0xf1] sm:$0xff] }
  0xd7   : > { %8583 = vmatprep.mubr.f32.mxu1 %v10907_v36  ;;  %v11329_v36 = vld [vmem:[%s10549_s11 + $0xf9] sm:$0xff] }
  0xd8   : > { %8350 = vmatmul.mubr.f32.gmra.mrb[52].mxu0 %v11296_v5 }
  0xd9   : > { %8352 = vmatprep.mubr.f32.mxu0 %v11299_v6 }
  0xda   : > { %8584 = vmatmul.mubr.f32.gmra.mrb[16].mxu1 %v10920_v43  ;;  %v11336_v43 = vld [vmem:[%s10549_s11 + $0x101] sm:$0xff] }
  0xdb   : > { %8586 = vmatprep.mubr.f32.mxu1 %v10924_v45  ;;  %v11339_v45 = vld [vmem:[%s10549_s11 + $0x109] sm:$0xff] }
  0xdc   : > { %8353 = vmatmul.mubr.f32.gmra.mrb[54].mxu0 %v11306_v15 }
  0xdd   : > { %8355 = vmatprep.mubr.f32.mxu0 %v11309_v16 }
  0xde   : > { %8587 = vmatmul.mubr.f32.gmra.mrb[18].mxu1 %v10936_v50  ;;  %v11346_v50 = vld [vmem:[%s10549_s11 + $0x111] sm:$0xff] }
  0xdf   : > { %8589 = vmatprep.mubr.f32.mxu1 %v10940_v54  ;;  %v431_v54 = vld [vmem:[%s10549_s11 + $0x9] sm:$0xff] }
  0xe0   : > { %8356 = vmatmul.mubr.f32.gmra.mrb[56].mxu0 %v11316_v26 }
  0xe1   : > { %8358 = vmatprep.mubr.f32.mxu0 %v11319_v29 }
  0xe2   : > { %8590 = vmatmul.mubr.f32.gmra.mrb[20].mxu1 %v13677_v32  ;;  %v9643_v32 = vpack.c.bf16 %v6904_v8, %v6903_v2  ;;  %v9707_v2 = vpack.c.bf16 %v6936_v38, %v6935_v44  ;;  %v6937_v8 = vld [vmem:[%s13559_s1 + $0x420] sm:$0xff]  ;;  %v9731_v44 = vpack.c.bf16 %v6948_v33, %v6947_v30 }
  0xe3   : > { %8592 = vmatprep.mubr.f32.mxu1 %v13678_v41  ;;  %v6908_v41 = vld [vmem:[%s13559_s1 + $0x338] sm:$0xff] }
  0xe4   : > { %8359 = vmatmul.mubr.f32.gmra.mrb[58].mxu0 %v11326_v35  ;;  %v1962_v38 = vld [vmem:[%s10549_s11 + $0x9f] sm:$0xff] }
  0xe5   : > { %8361 = vmatprep.mubr.f32.mxu0 %v11329_v36 }
  0xe6   : > { %8593 = vmatmul.mubr.f32.gmra.mrb[22].mxu1 %v10967_v22  ;;  %v6905_v22 = vld [vmem:[%s13559_s1 + $0x320] sm:$0xff] }
  0xe7   : > { %8595 = vmatprep.mubr.f32.mxu1 %v13679_v4  ;;  %v9647_v39 = vpack.c.bf16 %v6906_v34, %v6905_v22  ;;  %v2284_v4 = vld [vmem:[%s10549_s11 + $0x120] sm:$0xff] }
  0xe8   : > { %8362 = vmatmul.mubr.f32.gmra.mrb[60].mxu0 %v11336_v43  ;;  %v1951_v22 = vld [vmem:[%s10549_s11 + $0x47] sm:$0xff] }
  0xe9   : > { %8364 = vmatprep.mubr.f32.mxu0 %v11339_v45 }
  0xea   : > { %8596 = vmatmul.mubr.f32.gmra.mrb[24].mxu1 %v10982_v7  ;;  %v6907_v7 = vld [vmem:[%s13559_s1 + $0x330] sm:$0xff] }
  0xeb   : > { %8598 = vmatprep.mubr.f32.mxu1 %v10985_v10  ;;  %v2283_v10 = vld [vmem:[%s10549_s11 + $0x118] sm:$0xff] }
  0xec   : > { %8365 = vmatmul.mubr.f32.gmra.mrb[62].mxu0 %v11346_v50 }
  0xed   : > { %8399 = vmatprep.mubr.f32.mxu0 %v431_v54  ;;  %v1949_v54 = vld [vmem:[%s10549_s11 + $0x37] sm:$0xff] }
  0xee   : > { %8599 = vmatmul.mubr.f32.gmra.mrb[26].mxu1 %v10998_v24  ;;  %v6909_v24 = vld [vmem:[%s13559_s1 + $0x340] sm:$0xff] }
  0xef   : > { %8601 = vmatprep.mubr.f32.mxu1 %v13680_v1  ;;  %v1953_v1 = vld [vmem:[%s10549_s11 + $0x57] sm:$0xff] }
  0xf0   : > { %8400 = vmatmul.mubr.f32.vlgmr.msra.gmra.mrb[32].mxu0 %v432_v25  ;;  %v6938_v25 = vld [vmem:[%s13559_s1 + $0x428] sm:$0xff] }
  0xf1   : > { %9642 = vmatpush3.bf16.msra.mxu0 %v11268_v53  ;;  %8402 = vmatprep.mubr.f32.mxu0 %v11137_v56  ;;  %v9651_v56 = vpack.c.bf16 %v6908_v41, %v6907_v7  ;;  %v1948_v53 = vld [vmem:[%s10549_s11 + $0x2f] sm:$0xff]  ;;  %v9711_v34 = vpack.c.bf16 %v6938_v25, %v6937_v8  ;;  %v6940_v7 = vld [vmem:[%s13559_s1 + $0x438] sm:$0xff]  ;;  %v1967_v25 = vld [vmem:[%s10549_s11 + $0xc7] sm:$0xff] }
  0xf2   : > { %9644 = vmatprep.subr.bf16.mxu0 %v9643_v32  ;;  %8602 = vmatmul.mubr.f32.gmra.mrb[28].mxu1 %v13681_v52  ;;  %v1952_v41 = vld [vmem:[%s10549_s11 + $0x4f] sm:$0xff]  ;;  %v1966_v8 = vld [vmem:[%s10549_s11 + $0xbf] sm:$0xff] }
  0xf3   : > { %8604 = vmatprep.mubr.f32.mxu1 %v2283_v10  ;;  %v6942_v52 = vld [vmem:[%s13559_s1 + $0x448] sm:$0xff] }
  0xf4   : > { %8403 = vmatmul.mubr.f32.gmra.mrb[34].mxu0 %v11150_v14  ;;  %v9655_v14 = vpack.c.bf16 %v6910_v3, %v6909_v24  ;;  %v1954_v24 = vld [vmem:[%s10549_s11 + $0x5f] sm:$0xff]  ;;  %v1955_v3 = vld [vmem:[%s10549_s11 + $0x67] sm:$0xff] }
  0xf5   : > { %8405 = vmatprep.mubr.f32.mxu0 %v11153_v21  ;;  %9646 = vmatpush3.bf16.msra.mxu0 %v9643_v32  ;;  %v1950_v32 = vld [vmem:[%s10549_s11 + $0x3f] sm:$0xff] }
  0xf6   : > { %9648 = vmatprep.subr.bf16.mxu0 %v9647_v39  ;;  %8605 = vmatmul.mubr.f32.gmra.mrb[30].mxu1 %v2284_v4 }
  0xf8   : > { %8406 = vmatmul.mubr.f32.gmra.mrb[36].mxu0 %v11167_v46 }
  0xf9   : > { %8408 = vmatprep.mubr.f32.mxu0 %v11170_v47  ;;  %9650 = vmatpush3.bf16.msra.mxu0 %v9647_v39  ;;  %v6939_v39 = vld [vmem:[%s13559_s1 + $0x430] sm:$0xff] }
  0xfa   : > { %9652 = vmatprep.subr.bf16.mxu0 %v9651_v56  ;;  %v9715_v10 = vpack.c.bf16 %v6940_v7, %v6939_v39  ;;  %v1971_v39 = vld [vmem:[%s10549_s11 + $0xe7] sm:$0xff]  ;;  %v1972_v7 = vld [vmem:[%s10549_s11 + $0xef] sm:$0xff] }
  0xfc   : > { %8409 = vmatmul.mubr.f32.gmra.mrb[38].mxu0 %v11183_v57 }
  0xfd   : > { %8411 = vmatprep.mubr.f32.mxu0 %v11186_v55  ;;  %9654 = vmatpush3.bf16.msra.mxu0 %v9651_v56  ;;  %v6941_v56 = vld [vmem:[%s13559_s1 + $0x440] sm:$0xff] }
  0xfe   : > { %9656 = vmatprep.subr.bf16.mxu0 %v9655_v14  ;;  %v9719_v4 = vpack.c.bf16 %v6942_v52, %v6941_v56  ;;  %v1976_v56 = vld [vmem:[%s10549_s11 + $0x10f] sm:$0xff]  ;;  %v1977_v52 = vld [vmem:[%s10549_s11 + $0x117] sm:$0xff] }
 0x100   : > { %8412 = vmatmul.mubr.f32.gmra.mrb[40].mxu0 %v11199_v13 }
 0x101   : > { %8414 = vmatprep.mubr.f32.mxu0 %v11202_v17  ;;  %9658 = vmatpush3.bf16.msra.mxu0 %v9655_v14  ;;  %v6943_v14 = vld [vmem:[%s13559_s1 + $0x450] sm:$0xff] }
 0x102   : > { %9660 = vmatprep.subr.bf16.mxu0 %v9659_v9  ;;  %v9723_v31 = vpack.c.bf16 %v6944_v19, %v6943_v14  ;;  %v7014_v14 = vld [vmem:[%s13561_s3 + $0x280] sm:$0xff]  ;;  %v7015_v19 = vld [vmem:[%s13561_s3 + $0x288] sm:$0xff] }
 0x104   : > { %8415 = vmatmul.mubr.f32.gmra.mrb[42].mxu0 %v11215_v23 }
 0x105   : > { %8417 = vmatprep.mubr.f32.mxu0 %v11218_v11  ;;  %9662 = vmatpush3.bf16.msra.mxu0 %v9659_v9  ;;  %v1957_v9 = vld [vmem:[%s10549_s11 + $0x77] sm:$0xff] }
 0x106   : > { %9664 = vmatprep.subr.bf16.mxu0 %v9663_v20 }
 0x108   : > { %8418 = vmatmul.mubr.f32.gmra.mrb[44].mxu0 %v11231_v60 }
 0x109   : > { %8420 = vmatprep.mubr.f32.mxu0 %v11234_v27  ;;  %9666 = vmatpush3.bf16.msra.mxu0 %v9663_v20  ;;  %v6946_v20 = vld [vmem:[%s13559_s1 + $0x468] sm:$0xff] }
 0x10a   : > { %9668 = vmatprep.subr.bf16.mxu0 %v9667_v18 }
 0x10c   : > { %8421 = vmatmul.mubr.f32.gmra.mrb[46].mxu0 %v11247_v12 }
 0x10d   : > { %8423 = vmatprep.mubr.f32.mxu0 %v11250_v37  ;;  %9670 = vmatpush3.bf16.msra.mxu0 %v9667_v18  ;;  %v9727_v18 = vpack.c.bf16 %v6946_v20, %v6945_v62  ;;  %v6990_v62 = vld [vmem:[%s13561_s3 + $0x1c0] sm:$0xff]  ;;  %v6991_v20 = vld [vmem:[%s13561_s3 + $0x1c8] sm:$0xff] }
 0x10e   : > { %9704 = vmatprep.subr.bf16.mxu0 %v9703_v28 }
 0x110   : > { %8424 = vmatmul.mubr.f32.gmra.mrb[48].mxu0 %v11263_v0 }
 0x111   : > { %8426 = vmatprep.mubr.f32.mxu0 %v11266_v48 }
 0x114   : > { %8427 = vmatmul.mubr.f32.gmra.mrb[50].mxu0 %v11275_v49 }
 0x115   : > { %8429 = vmatprep.mubr.f32.mxu0 %v11278_v63 }
 0x118   : > { %8430 = vmatmul.mubr.f32.gmra.mrb[52].mxu0 %v11286_v58 }
 0x119   : > { %8432 = vmatprep.mubr.f32.mxu0 %v11289_v61 }
 0x11c   : > { %8433 = vmatmul.mubr.f32.gmra.mrb[54].mxu0 %v11296_v5 }
 0x11d   : > { %8435 = vmatprep.mubr.f32.mxu0 %v11299_v6 }
 0x120   : > { %8436 = vmatmul.mubr.f32.gmra.mrb[56].mxu0 %v11306_v15 }
 0x121   : > { %8438 = vmatprep.mubr.f32.mxu0 %v11309_v16 }
 0x124   : > { %8439 = vmatmul.mubr.f32.gmra.mrb[58].mxu0 %v11316_v26 }
 0x125   : > { %8441 = vmatprep.mubr.f32.mxu0 %v11319_v29 }
 0x128   : > { %8442 = vmatmul.mubr.f32.gmra.mrb[60].mxu0 %v11326_v35 }
 0x129   : > { %8444 = vmatprep.mubr.f32.mxu0 %v11329_v36 }
 0x12c   : > { %8445 = vmatmul.mubr.f32.gmra.mrb[62].mxu0 %v11336_v43 }
 0x12d   : > { %8479 = vmatprep.mubr.f32.mxu0 %v1947_v40  ;;  %v1961_v40 = vld [vmem:[%s10549_s11 + $0x97] sm:$0xff] }
 0x130   : > { %8480 = vmatmul.mubr.f32.vlgmr.msra.gmra.mrb[0].mxu0 %v1948_v53  ;;  %v1963_v53 = vld [vmem:[%s10549_s11 + $0xa7] sm:$0xff] }
 0x131   : > { %9706 = vmatpush3.bf16.msra.mxu0 %v9703_v28  ;;  %8482 = vmatprep.mubr.f32.mxu0 %v1949_v54  ;;  %v1960_v28 = vld [vmem:[%s10549_s11 + $0x8f] sm:$0xff] }
 0x132   : > { %9708 = vmatprep.subr.bf16.mxu0 %v9707_v2  ;;  %v1964_v54 = vld [vmem:[%s10549_s11 + $0xaf] sm:$0xff] }
 0x134   : > { %8483 = vmatmul.mubr.f32.gmra.mrb[2].mxu0 %v1950_v32  ;;  %v1968_v32 = vld [vmem:[%s10549_s11 + $0xcf] sm:$0xff] }
 0x135   : > { %8485 = vmatprep.mubr.f32.mxu0 %v1951_v22  ;;  %9710 = vmatpush3.bf16.msra.mxu0 %v9707_v2  ;;  %v1965_v2 = vld [vmem:[%s10549_s11 + $0xb7] sm:$0xff] }
 0x136   : > { %9712 = vmatprep.subr.bf16.mxu0 %v9711_v34  ;;  %v1969_v22 = vld [vmem:[%s10549_s11 + $0xd7] sm:$0xff] }
 0x138   : > { %8486 = vmatmul.mubr.f32.gmra.mrb[4].mxu0 %v1952_v41  ;;  %v1973_v41 = vld [vmem:[%s10549_s11 + $0xf7] sm:$0xff] }
 0x139   : > { %8488 = vmatprep.mubr.f32.mxu0 %v1953_v1  ;;  %9714 = vmatpush3.bf16.msra.mxu0 %v9711_v34  ;;  %v1970_v34 = vld [vmem:[%s10549_s11 + $0xdf] sm:$0xff] }
 0x13a   : > { %9716 = vmatprep.subr.bf16.mxu0 %v9715_v10  ;;  %v1974_v1 = vld [vmem:[%s10549_s11 + $0xff] sm:$0xff] }
 0x13c   : > { %8489 = vmatmul.mubr.f32.gmra.mrb[6].mxu0 %v1954_v24  ;;  %v1978_v24 = vld [vmem:[%s10549_s11 + $0x11f] sm:$0xff] }
 0x13d   : > { %8491 = vmatprep.mubr.f32.mxu0 %v1955_v3  ;;  %9718 = vmatpush3.bf16.msra.mxu0 %v9715_v10  ;;  %v1975_v10 = vld [vmem:[%s10549_s11 + $0x107] sm:$0xff] }
 0x13e   : > { %9720 = vmatprep.subr.bf16.mxu0 %v9719_v4 }
 0x140   : > { %8492 = vmatmul.mubr.f32.gmra.mrb[8].mxu0 %v1956_v42 }
 0x141   : > { %8494 = vmatprep.mubr.f32.mxu0 %v1957_v9  ;;  %9722 = vmatpush3.bf16.msra.mxu0 %v9719_v4  ;;  %v9863_v9 = vpack.c.bf16 %v7015_v19, %v7014_v14 }
 0x142   : > { %9724 = vmatprep.subr.bf16.mxu0 %v9723_v31 }
 0x144   : > { %8495 = vmatmul.mubr.f32.gmra.mrb[10].mxu0 %v1958_v51  ;;  %v9751_v51 = vpack.c.bf16 %v6991_v20, %v6990_v62  ;;  %v7029_v62 = vld [vmem:[%s13561_s3 + $0x2f8] sm:$0xff] }
 0x145   : > { %8497 = vmatprep.mubr.f32.mxu0 %v1959_v59  ;;  %9726 = vmatpush3.bf16.msra.mxu0 %v9723_v31  ;;  %v7016_v59 = vld [vmem:[%s13561_s3 + $0x290] sm:$0xff] }
 0x146   : > { %9728 = vmatprep.subr.bf16.mxu0 %v9727_v18 }
 0x148   : > { %8498 = vmatmul.mubr.f32.gmra.mrb[12].mxu0 %v1960_v28 }
 0x149   : > { %8500 = vmatprep.mubr.f32.mxu0 %v1961_v40  ;;  %9730 = vmatpush3.bf16.msra.mxu0 %v9727_v18  ;;  %v7017_v18 = vld [vmem:[%s13561_s3 + $0x298] sm:$0xff]  ;;  %v7018_v40 = vld [vmem:[%s13561_s3 + $0x2a0] sm:$0xff] }
 0x14a   : > { %9732 = vmatprep.subr.bf16.mxu0 %v9731_v44  ;;  %v9867_v33 = vpack.c.bf16 %v7017_v18, %v7016_v59  ;;  %v3744_v59 = vld [vmem:[%s13561_s3 + $0x8] sm:$0xff] }
 0x14c   : > { %8501 = vmatmul.mubr.f32.gmra.mrb[14].mxu0 %v1962_v38 }
 0x14d   : > { %8503 = vmatprep.mubr.f32.mxu0 %v1963_v53  ;;  %9734 = vmatpush3.bf16.msra.mxu0 %v9731_v44  ;;  %v7019_v44 = vld [vmem:[%s13561_s3 + $0x2a8] sm:$0xff] }
 0x14e   : > { %9864 = vmatprep.subr.bf16.mxu0 %v9863_v9  ;;  %v9871_v53 = vpack.c.bf16 %v7019_v44, %v7018_v40  ;;  %v6967_v40 = vld [vmem:[%s13561_s3 + $0x108] sm:$0xff]  ;;  %v2865_v44 = vlaneseq }
 0x150   : > { %8504 = vmatmul.mubr.f32.gmra.mrb[16].mxu0 %v1964_v54 }
 0x151   : > { %8506 = vmatprep.mubr.f32.mxu0 %v1965_v2  ;;  %v6992_v2 = vld [vmem:[%s13561_s3 + $0x1d0] sm:$0xff] }
 0x154   : > { %8507 = vmatmul.mubr.f32.gmra.mrb[18].mxu0 %v1966_v8  ;;  %v6993_v8 = vld [vmem:[%s13561_s3 + $0x1d8] sm:$0xff] }
 0x155   : > { %8509 = vmatprep.mubr.f32.mxu0 %v1967_v25  ;;  %v9755_v25 = vpack.c.bf16 %v6993_v8, %v6992_v2  ;;  %v11736_v2 = vshrl.u32 %v2865_v44, 7 }
 0x157   : > { %13682 = vst [vmem:[#allocation3_spill] sm:$0xff] %v11736_v2  ;;  %v2902_v8 = vand.u32 15, %v11736_v2 }
 0x158   : > { %8510 = vmatmul.mubr.f32.gmra.mrb[20].mxu0 %v1968_v32  ;;  %v7020_v32 = vld [vmem:[%s13561_s3 + $0x2b0] sm:$0xff] }
 0x159   : > { %8512 = vmatprep.mubr.f32.mxu0 %v1969_v22  ;;  %v7021_v22 = vld [vmem:[%s13561_s3 + $0x2b8] sm:$0xff]  ;;  %vm11740_vm0 = vcmp.ne.s32.totalorder %v2902_v8, 0 }
 0x15c   : > { %8513 = vmatmul.mubr.f32.gmra.mrb[22].mxu0 %v1970_v34 }
 0x15d   : > { %8515 = vmatprep.mubr.f32.mxu0 %v1971_v39  ;;  %v9875_v39 = vpack.c.bf16 %v7021_v22, %v7020_v32  ;;  %v13683_v32 = vmov 0 }
 0x15e   : > { %v13684_v32 = vsel %vm11740_vm0, 4294967295, %v13683_v32 }
 0x15f   : > { %13685 = vst [vmem:[#allocation4_spill] sm:$0xff] %v13684_v32 }
 0x160   : > { %8516 = vmatmul.mubr.f32.gmra.mrb[24].mxu0 %v1972_v7 }
 0x161   : > { %8518 = vmatprep.mubr.f32.mxu0 %v1973_v41  ;;  %v7022_v41 = vld [vmem:[%s13561_s3 + $0x2c0] sm:$0xff] }
 0x164   : > { %8519 = vmatmul.mubr.f32.gmra.mrb[26].mxu0 %v1974_v1  ;;  %v7023_v1 = vld [vmem:[%s13561_s3 + $0x2c8] sm:$0xff] }
 0x165   : > { %8521 = vmatprep.mubr.f32.mxu0 %v1975_v10 }
 0x168   : > { %8522 = vmatmul.mubr.f32.gmra.mrb[28].mxu0 %v1976_v56  ;;  %v9879_v56 = vpack.c.bf16 %v7023_v1, %v7022_v41 }
 0x169   : > { %8524 = vmatprep.mubr.f32.mxu0 %v1977_v52 }
 0x16c   : > { %8525 = vmatmul.mubr.f32.gmra.mrb[30].mxu0 %v1978_v24  ;;  %v7024_v24 = vld [vmem:[%s13561_s3 + $0x2d0] sm:$0xff] }
 0x16d   : > { %8639 = vmatprep.mubr.f32.mxu0 %v11153_v21 }
 0x170   : > { %8640 = vmatmul.mubr.f32.vlgmr.msra.gmra.mrb[32].mxu0 %v11167_v46 }
 0x171   : > { %8642 = vmatprep.mubr.f32.mxu0 %v11170_v47  ;;  %9866 = vmatpush3.bf16.msra.mxu0 %v9863_v9  ;;  %v7028_v9 = vld [vmem:[%s13561_s3 + $0x2f0] sm:$0xff] }
 0x172   : > { %9868 = vmatprep.subr.bf16.mxu0 %v9867_v33  ;;  %v9891_v20 = vpack.c.bf16 %v7029_v62, %v7028_v9 }
 0x174   : > { %8643 = vmatmul.mubr.f32.gmra.mrb[34].mxu0 %v11183_v57 }
 0x175   : > { %8645 = vmatprep.mubr.f32.mxu0 %v11186_v55  ;;  %v6982_v55 = vld [vmem:[%s13561_s3 + $0x180] sm:$0xff]  ;;  %9870 = vmatpush3.bf16.msra.mxu0 %v9867_v33 }
 0x176   : > { %9872 = vmatprep.subr.bf16.mxu0 %v9871_v53  ;;  %v6966_v33 = vld [vmem:[%s13561_s3 + $0x100] sm:$0xff] }
 0x178   : > { %8646 = vmatmul.mubr.f32.gmra.mrb[36].mxu0 %v11199_v13  ;;  %v6983_v13 = vld [vmem:[%s13561_s3 + $0x188] sm:$0xff] }
 0x179   : > { %8648 = vmatprep.mubr.f32.mxu0 %v11202_v17  ;;  %v9735_v17 = vpack.c.bf16 %v6983_v13, %v6982_v55  ;;  %9874 = vmatpush3.bf16.msra.mxu0 %v9871_v53  ;;  %v7025_v55 = vld [vmem:[%s13561_s3 + $0x2d8] sm:$0xff]  ;;  %v11733_v53 = vpack.c.bf16 %v6967_v40, %v6966_v33 }
 0x17a   : > { %9876 = vmatprep.subr.bf16.mxu0 %v9875_v39 }
 0x17b   : > { %9736 = vmatprep.subr.bf16.mxu1 %v9735_v17 }
 0x17c   : > { %8649 = vmatmul.mubr.f32.gmra.mrb[38].mxu0 %v11215_v23  ;;  %9738 = vmatpush3.bf16.msra.mxu1 %v9735_v17  ;;  %v6994_v17 = vld [vmem:[%s13561_s3 + $0x1e0] sm:$0xff] }
 0x17d   : > { %8651 = vmatprep.mubr.f32.mxu0 %v11218_v11  ;;  %9878 = vmatpush3.bf16.msra.mxu0 %v9875_v39  ;;  %v2870_v39 = vadd.s32 32, %v11736_v2 }
 0x17e   : > { %9880 = vmatprep.subr.bf16.mxu0 %v9879_v56 }
 0x180   : > { %8652 = vmatmul.mubr.f32.gmra.mrb[40].mxu0 %v11231_v60 }
 0x181   : > { %8654 = vmatprep.mubr.f32.mxu0 %v11234_v27  ;;  %9882 = vmatpush3.bf16.msra.mxu0 %v9879_v56 }
 0x184   : > { %8655 = vmatmul.mubr.f32.gmra.mrb[42].mxu0 %v11247_v12  ;;  %v6984_v12 = vld [vmem:[%s13561_s3 + $0x190] sm:$0xff] }
 0x185   : > { %8657 = vmatprep.mubr.f32.mxu0 %v11250_v37  ;;  %v6985_v37 = vld [vmem:[%s13561_s3 + $0x198] sm:$0xff] }
 0x188   : > { %8658 = vmatmul.mubr.f32.gmra.mrb[44].mxu0 %v11263_v0  ;;  %v9739_v0 = vpack.c.bf16 %v6985_v37, %v6984_v12  ;;  %v6995_v12 = vld [vmem:[%s13561_s3 + $0x1e8] sm:$0xff]  ;;  %v9883_v37 = vpack.c.bf16 %v7025_v55, %v7024_v24 }
 0x189   : > { %8660 = vmatprep.mubr.f32.mxu0 %v11266_v48 }
 0x18a   : > { %9740 = vmatprep.subr.bf16.mxu1 %v9739_v0  ;;  %9884 = vmatprep.subr.bf16.mxu0 %v9883_v37 }
 0x18b   : > { %9742 = vmatpush3.bf16.msra.mxu1 %v9739_v0  ;;  %9886 = vmatpush3.bf16.msra.mxu0 %v9883_v37  ;;  %v2872_v37 = vadd.s32 48, %v11736_v2 }
 0x18c   : > { %8661 = vmatmul.mubr.f32.gmra.mrb[46].mxu0 %v11275_v49 }
 0x18d   : > { %8663 = vmatprep.mubr.f32.mxu0 %v11278_v63  ;;  %v11532_v21 = vpop.f32.mrb[0].mxu1 }
 0x18e   : > { %v11534_v46 = vpop.f32.mrb[1].mxu1 }
 0x190   : > { %8664 = vmatmul.mubr.f32.gmra.mrb[48].mxu0 %v11286_v58  ;;  %v2589_v58 = vld [vmem:[%s10549_s11 + $0x119] sm:$0xff] }
 0x191   : > { %8666 = vmatprep.mubr.f32.mxu0 %v11289_v61  ;;  %v11538_v47 = vpop.f32.mrb[2].mxu1 }
 0x192   : > { %v11540_v57 = vpop.f32.mrb[3].mxu1 }
 0x194   : > { %8667 = vmatmul.mubr.f32.gmra.mrb[50].mxu0 %v11296_v5  ;;  %v6986_v5 = vld [vmem:[%s13561_s3 + $0x1a0] sm:$0xff] }
 0x195   : > { %8669 = vmatprep.mubr.f32.mxu0 %v11299_v6  ;;  %v11550_v23 = vpop.f32.mrb[4].mxu1  ;;  %v6987_v6 = vld [vmem:[%s13561_s3 + $0x1a8] sm:$0xff] }
 0x196   : > { %v11552_v11 = vpop.f32.mrb[5].mxu1 }
 0x198   : > { %8670 = vmatmul.mubr.f32.gmra.mrb[52].mxu0 %v11306_v15  ;;  %v9743_v15 = vpack.c.bf16 %v6987_v6, %v6986_v5  ;;  %v10456_v5 = vmov 0.0   ;;  %v7026_v6 = vld [vmem:[%s13561_s3 + $0x2e0] sm:$0xff] }
 0x199   : > { %8672 = vmatprep.mubr.f32.mxu0 %v11309_v16  ;;  %v11556_v60 = vpop.f32.mrb[6].mxu1  ;;  %v2590_v16 = vld [vmem:[%s10549_s11 + $0x121] sm:$0xff]  ;;  %3674 = vst [vmem:[#allocation2 + $0x10] sm:$0xff] %v10456_v5  ;;  %3672 = vst [vmem:[#allocation2] sm:$0xff] %v10456_v5 }
 0x19a   : > { %v11558_v27 = vpop.f32.mrb[7].mxu1  ;;  %9744 = vmatprep.subr.bf16.mxu1 %v9743_v15  ;;  %3673 = vst [vmem:[#allocation2 + $0x8] sm:$0xff] %v10456_v5  ;;  %3707 = vst [vmem:[#allocation2 + $0x118] sm:$0xff] %v10456_v5 }
 0x19b   : > { %9746 = vmatpush3.bf16.msra.mxu1 %v9743_v15  ;;  %3708 = vst [vmem:[#allocation2 + $0x120] sm:$0xff] %v10456_v5  ;;  %3709 = vst [vmem:[#allocation2 + $0x128] sm:$0xff] %v10456_v5  ;;  %v7027_v15 = vld [vmem:[%s13561_s3 + $0x2e8] sm:$0xff] }
 0x19c   : > { %8673 = vmatmul.mubr.f32.gmra.mrb[54].mxu0 %v11316_v26  ;;  %6721 = vst [vmem:[%s11710_s28] sm:$0xff] %v10456_v5  ;;  %6722 = vst [vmem:[%s11710_s28 + $0x8] sm:$0xff] %v10456_v5 }
 0x19d   : > { %8675 = vmatprep.mubr.f32.mxu0 %v11319_v29  ;;  %v11568_v48 = vpop.f32.mrb[8].mxu1  ;;  %6723 = vst [vmem:[%s11710_s28 + $0x10] sm:$0xff] %v10456_v5  ;;  %6756 = vst [vmem:[%s11710_s28 + $0x118] sm:$0xff] %v10456_v5 }
 0x19e   : > { %v11570_v49 = vpop.f32.mrb[9].mxu1  ;;  %6757 = vst [vmem:[%s11710_s28 + $0x120] sm:$0xff] %v10456_v5  ;;  %6758 = vst [vmem:[%s11710_s28 + $0x128] sm:$0xff] %v10456_v5 }
 0x1a0   : > { %8676 = vmatmul.mubr.f32.gmra.mrb[56].mxu0 %v11326_v35 }
 0x1a1   : > { %8678 = vmatprep.mubr.f32.mxu0 %v11329_v36  ;;  %v11574_v63 = vpop.f32.mrb[10].mxu1 }
 0x1a2   : > { %v11577_v61 = vpop.f32.mrb[11].mxu1 }
 0x1a4   : > { %8679 = vmatmul.mubr.f32.gmra.mrb[58].mxu0 %v11336_v43  ;;  %v6988_v43 = vld [vmem:[%s13561_s3 + $0x1b0] sm:$0xff] }
 0x1a5   : > { %8681 = vmatprep.mubr.f32.mxu0 %v11339_v45  ;;  %v11587_v26 = vpop.f32.mrb[12].mxu1  ;;  %v6989_v45 = vld [vmem:[%s13561_s3 + $0x1b8] sm:$0xff] }
 0x1a6   : > { %v11589_v29 = vpop.f32.mrb[13].mxu1 }
 0x1a8   : > { %8682 = vmatmul.mubr.f32.gmra.mrb[60].mxu0 %v11346_v50  ;;  %v9747_v50 = vpack.c.bf16 %v6989_v45, %v6988_v43  ;;  %v6996_v43 = vld [vmem:[%s13561_s3 + $0x1f0] sm:$0xff]  ;;  %v6997_v45 = vld [vmem:[%s13561_s3 + $0x1f8] sm:$0xff] }
 0x1a9   : > { %8684 = vmatprep.mubr.f32.mxu0 %v2589_v58  ;;  %v11591_v35 = vpop.f32.mrb[14].mxu1  ;;  %v9759_v58 = vpack.c.bf16 %v6995_v12, %v6994_v17  ;;  %v9763_v19 = vpack.c.bf16 %v6997_v45, %v6996_v43  ;;  %v13686_v17 = vmov 0  ;;  %v2930_v12 = vand.u32 15, %v2870_v39 }
 0x1aa   : > { %v11593_v36 = vpop.f32.mrb[15].mxu1  ;;  %9748 = vmatprep.subr.bf16.mxu1 %v9747_v50  ;;  %v2944_v43 = vand.u32 15, %v2872_v37  ;;  %v2874_v45 = vadd.s32 64, %v11736_v2 }
 0x1ab   : > { %9750 = vmatpush3.bf16.msra.mxu1 %v9747_v50  ;;  %v9887_v50 = vpack.c.bf16 %v7027_v15, %v7026_v6  ;;  %vm11766_vm2 = vcmp.ne.s32.totalorder %v2930_v12, 0  ;;  %v2880_v12 = vadd.s32 112, %v11736_v2 }
 0x1ac   : > { %8685 = vmatmul.mubr.f32.gmra.mrb[62].mxu0 %v2590_v16  ;;  %9752 = vmatprep.subr.bf16.mxu1 %v9751_v51  ;;  %vm11779_vm3 = vcmp.ne.s32.totalorder %v2944_v43, 0 }
 0x1ad   : > { %v11601_v3 = vpop.f32.mrb[16].mxu1  ;;  %9888 = vmatprep.subr.bf16.mxu0 %v9887_v50  ;;  %v3000_v43 = vand.u32 15, %v2880_v12 }
 0x1ae   : > { %v11603_v4 = vpop.f32.mrb[17].mxu1  ;;  %9890 = vmatpush3.bf16.msra.mxu0 %v9887_v50 }
 0x1af   : > { %9754 = vmatpush3.bf16.msra.mxu1 %v9751_v51  ;;  %9892 = vmatprep.subr.bf16.mxu0 %v9891_v20  ;;  %v3743_v51 = vld [vmem:[%s13561_s3] sm:$0xff]  ;;  %vm11831_vm7 = vcmp.ne.s32.totalorder %v3000_v43, 0 }
 0x1b0   : > { %9756 = vmatprep.subr.bf16.mxu1 %v9755_v25  ;;  %v11724_v18 = vpack.c.bf16 %v3744_v59, %v3743_v51  ;;  %v2876_v51 = vadd.s32 80, %v11736_v2 }
 0x1b1   : > { %v11611_v42 = vpop.f32.mrb[18].mxu1 }
 0x1b2   : > { %v11613_v31 = vpop.f32.mrb[19].mxu1  ;;  %9894 = vmatpush3.bf16.msra.mxu0 %v9891_v20  ;;  %v2958_v20 = vand.u32 15, %v2874_v45  ;;  %v2972_v8 = vand.u32 15, %v2876_v51  ;;  %v2882_v45 = vadd.s32 128, %v11736_v2 }
 0x1b3   : > { %9758 = vmatpush3.bf16.msra.mxu1 %v9755_v25  ;;  %9896 = vmatprep.subr.bf16.mxu0 %v11733_v53  ;;  %v2868_v25 = vadd.s32 16, %v11736_v2 }
 0x1b4   : > { %9760 = vmatprep.subr.bf16.mxu1 %v9759_v58  ;;  %vm11792_vm4 = vcmp.ne.s32.totalorder %v2958_v20, 0  ;;  %vm11805_vm5 = vcmp.ne.s32.totalorder %v2972_v8, 0  ;;  %v3014_v51 = vand.u32 15, %v2882_v45 }
 0x1b5   : > { %v11627_v30 = vpop.f32.mrb[20].mxu1  ;;  %v2916_v22 = vand.u32 15, %v2868_v25  ;;  %v2878_v25 = vadd.s32 96, %v11736_v2 }
 0x1b6   : > { %v11629_v28 = vpop.f32.mrb[21].mxu1  ;;  %vm11844_vm8 = vcmp.ne.s32.totalorder %v3014_v51, 0  ;;  %v2890_v51 = vadd.s32 192, %v11736_v2 }
 0x1b7   : > { %9762 = vmatpush3.bf16.msra.mxu1 %v9759_v58  ;;  %vm11753_vm1 = vcmp.ne.s32.totalorder %v2916_v22, 0 }
 0x1b8   : > { %9764 = vmatprep.subr.bf16.mxu1 %v9763_v19  ;;  %v13687_v17 = vsel %vm11753_vm1, 4294967295, %v13686_v17 }
 0x1b9   : > { %v11637_v38 = vpop.f32.mrb[22].mxu1  ;;  %13688 = vst [vmem:[#allocation5_spill] sm:$0xff] %v13687_v17 }
 0x1ba   : > { %v11639_v54 = vpop.f32.mrb[23].mxu1 }
 0x1bb   : > { %9766 = vmatpush3.bf16.msra.mxu1 %v9763_v19 }
 0x1bc   : > { %9768 = vmatprep.subr.bf16.mxu1 %v11724_v18 }
 0x1bd   : > { %v11653_v34 = vpop.f32.mrb[24].mxu1 }
 0x1be   : > { %v11655_v7 = vpop.f32.mrb[25].mxu1 }
 0x1c1   : > { %v11663_v10 = vpop.f32.mrb[26].mxu1 }
 0x1c2   : > { %v11665_v52 = vpop.f32.mrb[27].mxu1 }
 0x1c5   : > { %v11673_v13 = vpop.f32.mrb[28].mxu1 }
 0x1c6   : > { %v11681_v0 = vpop.f32.mrb[29].mxu1 }
 0x1c9   : > { %v11689_v16 = vpop.f32.mrb[30].mxu1 }
 0x1ca   : > { %v11697_v14 = vpop.f32.mrb[31].mxu1 }
 0x203   : > { %v8481_v41 = vpop.f32.mrb[0].mxu0 }
 0x204   : > { %v11746_v1 = vadd.f32 %v11532_v21, %v8481_v41  ;;  %v2062_v56 = vpop.f32.mrb[1].mxu0 }
 0x205   : > { %v3378_v24 = vsel %vm11740_vm0, %v2062_v56, 0.0 }
 0x206   : > { %v11751_v55 = vadd.f32 %v3378_v24, %v11534_v46  ;;  %v13689_v46 = vmov 0  ;;  %v2986_v24 = vand.u32 15, %v2878_v25 }
 0x207   : > { %v8484_v58 = vpop.f32.mrb[2].mxu0  ;;  %v13690_v46 = vsel %vm11766_vm2, 4294967295, %v13689_v46 }
 0x208   : > { %v11759_v5 = vadd.f32 %v11538_v47, %v8484_v58  ;;  %v2072_v21 = vpop.f32.mrb[3].mxu0  ;;  %13691 = vst [vmem:[#allocation6_spill] sm:$0xff] %v13690_v46  ;;  %vm11818_vm6 = vcmp.ne.s32.totalorder %v2986_v24, 0 }
 0x209   : > { %v3380_v6 = vsel %vm11753_vm1, %v2072_v21, 0.0 }
 0x20a   : > { %v11764_v15 = vadd.f32 %v3380_v6, %v11540_v57  ;;  %v13692_v57 = vmov 0 }
 0x20b   : > { %v8487_v50 = vpop.f32.mrb[4].mxu0  ;;  %v13693_v57 = vsel %vm11779_vm3, 4294967295, %v13692_v57 }
 0x20c   : > { %v11772_v19 = vadd.f32 %v11550_v23, %v8487_v50  ;;  %v2082_v47 = vpop.f32.mrb[5].mxu0  ;;  %13694 = vst [vmem:[#allocation7_spill] sm:$0xff] %v13693_v57 }
 0x20d   : > { %v3382_v9 = vsel %vm11766_vm2, %v2082_v47, 0.0 }
 0x20e   : > { %v11777_v62 = vadd.f32 %v3382_v9, %v11552_v11  ;;  %v13695_v11 = vmov 0 }
 0x20f   : > { %v8490_v59 = vpop.f32.mrb[6].mxu0  ;;  %v13696_v11 = vsel %vm11792_vm4, 4294967295, %v13695_v11 }
 0x210   : > { %v11785_v33 = vadd.f32 %v11556_v60, %v8490_v59  ;;  %v2092_v23 = vpop.f32.mrb[7].mxu0  ;;  %13697 = vst [vmem:[#allocation8_spill] sm:$0xff] %v13696_v11  ;;  %v2884_v59 = vadd.s32 144, %v11736_v2 }
 0x211   : > { %v3384_v40 = vsel %vm11779_vm3, %v2092_v23, 0.0 }
 0x212   : > { %v11790_v44 = vadd.f32 %v3384_v40, %v11558_v27  ;;  %v13698_v27 = vmov 0 }
 0x213   : > { %v8493_v22 = vpop.f32.mrb[8].mxu0  ;;  %v13699_v27 = vsel %vm11805_vm5, 4294967295, %v13698_v27 }
 0x214   : > { %v11798_v39 = vadd.f32 %v11568_v48, %v8493_v22  ;;  %v2102_v60 = vpop.f32.mrb[9].mxu0  ;;  %13700 = vst [vmem:[#allocation9_spill] sm:$0xff] %v13699_v27  ;;  %v3028_v22 = vand.u32 15, %v2884_v59 }
 0x215   : > { %v3386_v41 = vsel %vm11792_vm4, %v2102_v60, 0.0  ;;  %v2886_v60 = vadd.s32 160, %v11736_v2 }
 0x216   : > { %v11803_v56 = vadd.f32 %v3386_v41, %v11570_v49  ;;  %v13701_v49 = vmov 0  ;;  %vm11857_vm9 = vcmp.ne.s32.totalorder %v3028_v22, 0  ;;  %v3070_v22 = vand.u32 15, %v2890_v51 }
 0x217   : > { %v8496_v37 = vpop.f32.mrb[10].mxu0  ;;  %v13702_v49 = vsel %vm11818_vm6, 4294967295, %v13701_v49 }
 0x218   : > { %v11811_v58 = vadd.f32 %v11574_v63, %v8496_v37  ;;  %v2112_v48 = vpop.f32.mrb[11].mxu0  ;;  %13703 = vst [vmem:[#allocation10_spill] sm:$0xff] %v13702_v49  ;;  %vm11896_vm12 = vcmp.ne.s32.totalorder %v3070_v22, 0 }
 0x219   : > { %v3388_v21 = vsel %vm11805_vm5, %v2112_v48, 0.0  ;;  %v3042_v48 = vand.u32 15, %v2886_v60  ;;  %v2892_v60 = vadd.s32 208, %v11736_v2 }
 0x21a   : > { %v11816_v6 = vadd.f32 %v3388_v21, %v11577_v61  ;;  %v13704_v61 = vmov 0  ;;  %v2888_v21 = vadd.s32 176, %v11736_v2 }
 0x21b   : > { %v8499_v50 = vpop.f32.mrb[12].mxu0  ;;  %v13705_v61 = vsel %vm11831_vm7, 4294967295, %v13704_v61  ;;  %vm11870_vm10 = vcmp.ne.s32.totalorder %v3042_v48, 0 }
 0x21c   : > { %v11824_v47 = vadd.f32 %v11587_v26, %v8499_v50  ;;  %v2122_v63 = vpop.f32.mrb[13].mxu0  ;;  %13706 = vst [vmem:[#allocation11_spill] sm:$0xff] %v13705_v61  ;;  %v6970_v61 = vld [vmem:[%s13561_s3 + $0x120] sm:$0xff] }
 0x21d   : > { %v3390_v9 = vsel %vm11818_vm6, %v2122_v63, 0.0 }
 0x21e   : > { %v11829_v20 = vadd.f32 %v3390_v9, %v11589_v29  ;;  %v13707_v29 = vmov 0  ;;  %v3056_v9 = vand.u32 15, %v2888_v21  ;;  %v3084_v21 = vand.u32 15, %v2892_v60 }
 0x21f   : > { %v8502_v23 = vpop.f32.mrb[14].mxu0  ;;  %v13708_v29 = vsel %vm11844_vm8, 4294967295, %v13707_v29 }
 0x220   : > { %v11837_v40 = vadd.f32 %v11591_v35, %v8502_v23  ;;  %v2132_v26 = vpop.f32.mrb[15].mxu0  ;;  %13709 = vst [vmem:[#allocation12_spill] sm:$0xff] %v13708_v29  ;;  %vm11883_vm11 = vcmp.ne.s32.totalorder %v3056_v9, 0  ;;  %vm11909_vm13 = vcmp.ne.s32.totalorder %v3084_v21, 0 }
 0x221   : > { %v3392_v8 = vsel %vm11831_vm7, %v2132_v26, 0.0 }
 0x222   : > { %v11842_v25 = vadd.f32 %v3392_v8, %v11593_v36  ;;  %v13710_v36 = vmov 0 }
 0x223   : > { %v8505_v41 = vpop.f32.mrb[16].mxu0  ;;  %v13711_v36 = vsel %vm11857_vm9, 4294967295, %v13710_v36 }
 0x224   : > { %v11850_v24 = vadd.f32 %v11601_v3, %v8505_v41  ;;  %v2142_v35 = vpop.f32.mrb[17].mxu0  ;;  %13712 = vst [vmem:[#allocation13_spill] sm:$0xff] %v13711_v36 }
 0x225   : > { %v3394_v12 = vsel %vm11844_vm8, %v2142_v35, 0.0 }
 0x226   : > { %v11855_v37 = vadd.f32 %v3394_v12, %v11603_v4  ;;  %v13713_v4 = vmov 0 }
 0x227   : > { %v8508_v43 = vpop.f32.mrb[18].mxu0  ;;  %v13714_v4 = vsel %vm11870_vm10, 4294967295, %v13713_v4 }
 0x228   : > { %v11863_v45 = vadd.f32 %v11611_v42, %v8508_v43  ;;  %v2152_v3 = vpop.f32.mrb[19].mxu0  ;;  %13715 = vst [vmem:[#allocation14_spill] sm:$0xff] %v13714_v4  ;;  %v2894_v43 = vadd.s32 224, %v11736_v2 }
 0x229   : > { %v3396_v50 = vsel %vm11857_vm9, %v2152_v3, 0.0 }
 0x22a   : > { %v11868_v63 = vadd.f32 %v3396_v50, %v11613_v31  ;;  %v13716_v31 = vmov 0 }
 0x22b   : > { %v8511_v59 = vpop.f32.mrb[20].mxu0  ;;  %v13717_v31 = vsel %vm11883_vm11, 4294967295, %v13716_v31 }
 0x22c   : > { %v11876_v23 = vadd.f32 %v11627_v30, %v8511_v59  ;;  %v2162_v42 = vpop.f32.mrb[21].mxu0  ;;  %13718 = vst [vmem:[#allocation15_spill] sm:$0xff] %v13717_v31  ;;  %v3098_v59 = vand.u32 15, %v2894_v43 }
 0x22d   : > { %v3398_v26 = vsel %vm11870_vm10, %v2162_v42, 0.0  ;;  %v2896_v42 = vadd.s32 240, %v11736_v2 }
 0x22e   : > { %v11881_v8 = vadd.f32 %v3398_v26, %v11629_v28  ;;  %v13719_v28 = vmov 0  ;;  %vm11923_vm14 = vcmp.ne.s32.totalorder %v3098_v59, 0 }
 0x22f   : > { %v8514_v41 = vpop.f32.mrb[22].mxu0  ;;  %v13720_v28 = vsel %vm11896_vm12, 4294967295, %v13719_v28 }
 0x230   : > { %v11889_v35 = vadd.f32 %v11637_v38, %v8514_v41  ;;  %v2172_v30 = vpop.f32.mrb[23].mxu0  ;;  %13721 = vst [vmem:[#allocation16_spill] sm:$0xff] %v13720_v28  ;;  %v2867_v41 = vadd.s32 8, %v11736_v2 }
 0x231   : > { %v3400_v12 = vsel %vm11883_vm11, %v2172_v30, 0.0  ;;  %v13725_v30 = vmov 0 }
 0x232   : > { %v11894_v48 = vadd.f32 %v3400_v12, %v11639_v54  ;;  %v13722_v54 = vmov 0  ;;  %v13726_v30 = vsel %vm11923_vm14, 4294967295, %v13725_v30  ;;  %v3112_v12 = vand.u32 15, %v2896_v42 }
 0x233   : > { %v8517_v3 = vpop.f32.mrb[24].mxu0  ;;  %v13723_v54 = vsel %vm11909_vm13, 4294967295, %v13722_v54  ;;  %13727 = vst [vmem:[#allocation18_spill] sm:$0xff] %v13726_v30 }
 0x234   : > { %v11902_v50 = vadd.f32 %v11653_v34, %v8517_v3  ;;  %v2182_v38 = vpop.f32.mrb[25].mxu0  ;;  %13724 = vst [vmem:[#allocation17_spill] sm:$0xff] %v13723_v54  ;;  %vm11936_vm15 = vcmp.ne.s32.totalorder %v3112_v12, 0 }
 0x235   : > { %v3402_v9 = vsel %vm11896_vm12, %v2182_v38, 0.0  ;;  %v2909_v38 = vand.u32 15, %v2867_v41  ;;  %v13731_v41 = vmov 0 }
 0x236   : > { %v11907_v51 = vadd.f32 %v3402_v9, %v11655_v7  ;;  %v2869_v9 = vadd.s32 24, %v11736_v2 }
 0x237   : > { %v8520_v26 = vpop.f32.mrb[26].mxu0 }
 0x238   : > { %v11915_v22 = vadd.f32 %v11663_v10, %v8520_v26  ;;  %v2192_v34 = vpop.f32.mrb[27].mxu0 }
 0x239   : > { %v3404_v60 = vsel %vm11909_vm13, %v2192_v34, 0.0  ;;  %v2871_v34 = vadd.s32 40, %v11736_v2 }
 0x23a   : > { %v11921_v7 = vadd.f32 %v3404_v60, %v11665_v52  ;;  %v13728_v52 = vmov 0 }
 0x23b   : > { %v8523_v21 = vpop.f32.mrb[28].mxu0  ;;  %v13729_v52 = vsel %vm11936_vm15, 4294967295, %v13728_v52 }
 0x23c   : > { %v11928_v43 = vadd.f32 %v11673_v13, %v8523_v21  ;;  %v2202_v10 = vpop.f32.mrb[29].mxu0  ;;  %13730 = vst [vmem:[#allocation19_spill] sm:$0xff] %v13729_v52 }
 0x23d   : > { %v3406_v3 = vsel %vm11923_vm14, %v2202_v10, 0.0  ;;  %vm11946_vm14 = vcmp.ne.s32.totalorder %v2909_v38, 15  ;;  %v2873_v38 = vadd.s32 56, %v11736_v2 }
 0x23e   : > { %v11934_v26 = vadd.f32 %v3406_v3, %v11681_v0  ;;  %v13732_v41 = vsel %vm11946_vm14, 4294967295, %v13731_v41  ;;  %v2923_v0 = vand.u32 15, %v2869_v9 }
 0x23f   : > { %v8526_v59 = vpop.f32.mrb[30].mxu0  ;;  %13733 = vst [vmem:[#allocation20_spill] sm:$0xff] %v13732_v41 }
 0x240   : > { %v11941_v42 = vadd.f32 %v11689_v16, %v8526_v59  ;;  %v2212_v13 = vpop.f32.mrb[31].mxu0  ;;  %v11956_v16 = vld [vmem:[%s13560_s2] ss:$0 sm:$0xff]  ;;  %v2937_v59 = vand.u32 15, %v2871_v34  ;;  %v13737_v34 = vmov 0 }
 0x241   : > { %v3408_v60 = vsel %vm11936_vm15, %v2212_v13, 0.0  ;;  %vm11963_vm15 = vcmp.ne.s32.totalorder %v2923_v0, 15 }
 0x242   : > { %v11951_v12 = vadd.f32 %v3408_v60, %v11697_v14  ;;  %v13734_v14 = vmov 0  ;;  %vm11971_vm13 = vcmp.ne.s32.totalorder %v2937_v59, 15 }
 0x243   : > { %v8641_v21 = vpop.f32.mrb[32].mxu0  ;;  %v13735_v14 = vsel %vm11963_vm15, 4294967295, %v13734_v14  ;;  %v13738_v34 = vsel %vm11971_vm13, 4294967295, %v13737_v34 }
 0x244   : > { %v3539_v10 = vsel %vm11946_vm14, %v8641_v21, 0.0  ;;  %v2674_v3 = vpop.f32.mrb[33].mxu0  ;;  %13736 = vst [vmem:[#allocation21_spill] sm:$0xff] %v13735_v14  ;;  %13739 = vst [vmem:[#allocation22_spill] sm:$0xff] %v13738_v34 }
 0x245   : > { %v3571_v13 = vadd.f32 %v3539_v10, %v11746_v1  ;;  %v3570_v9 = vadd.f32 %v11751_v55, %v2674_v3  ;;  %v2951_v1 = vand.u32 15, %v2873_v38  ;;  %v2875_v55 = vadd.s32 72, %v11736_v2 }
 0x246   : > { %v13740_v38 = vmov 0 }
 0x247   : > { %v3609_v60 = vadd.f32 %v11956_v16, %v3571_v13  ;;  %v3608_v52 = vadd.f32 %v11956_v16, %v3570_v9  ;;  %v8644_v30 = vpop.f32.mrb[34].mxu0  ;;  %vm11982_vm12 = vcmp.ne.s32.totalorder %v2951_v1, 15  ;;  %v3745_v1 = vld [vmem:[%s13561_s3 + $0x10] sm:$0xff] }
 0x248   : > { %v3541_v21 = vsel %vm11963_vm15, %v8644_v30, 0.0  ;;  %v2684_v54 = vpop.f32.mrb[35].mxu0  ;;  %v13741_v38 = vsel %vm11982_vm12, 4294967295, %v13740_v38 }
 0x249   : > { %v3641_v0 = vmax.f32 %v3609_v60, 0.0  ;;  %v3640_v10 = vmax.f32 %v3608_v52, 0.0  ;;  %v3573_v3 = vadd.f32 %v3541_v21, %v11759_v5  ;;  %v3572_v13 = vadd.f32 %v11764_v15, %v2684_v54  ;;  %13742 = vst [vmem:[#allocation23_spill] sm:$0xff] %v13741_v38 }
 0x24a   : > { %v2965_v52 = vand.u32 15, %v2875_v55  ;;  %v2877_v5 = vadd.s32 88, %v11736_v2  ;;  %v3746_v55 = vld [vmem:[%s13561_s3 + $0x18] sm:$0xff] }
 0x24b   : > { %3676 = vst [vmem:[#allocation2 + $0x20] sm:$0xff] %v3641_v0  ;;  %3675 = vst [vmem:[#allocation2 + $0x18] sm:$0xff] %v3640_v10  ;;  %v3611_v9 = vadd.f32 %v11956_v16, %v3573_v3  ;;  %v3610_v30 = vadd.f32 %v11956_v16, %v3572_v13  ;;  %v8647_v28 = vpop.f32.mrb[36].mxu0  ;;  %v2879_v13 = vadd.s32 104, %v11736_v2 }
 0x24c   : > { %v3543_v59 = vsel %vm11971_vm13, %v8647_v28, 0.0  ;;  %v2694_v31 = vpop.f32.mrb[37].mxu0  ;;  %vm11999_vm11 = vcmp.ne.s32.totalorder %v2965_v52, 15 }
 0x24d   : > { %v3643_v60 = vmax.f32 %v3611_v9, 0.0  ;;  %v3642_v15 = vmax.f32 %v3610_v30, 0.0  ;;  %v3575_v54 = vadd.f32 %v3543_v59, %v11772_v19  ;;  %v3574_v21 = vadd.f32 %v11777_v62, %v2694_v31 }
 0x24e   : > { %v13743_v62 = vmov 0  ;;  %v2979_v31 = vand.u32 15, %v2877_v5 }
 0x24f   : > { %3678 = vst [vmem:[#allocation2 + $0x30] sm:$0xff] %v3643_v60  ;;  %3677 = vst [vmem:[#allocation2 + $0x28] sm:$0xff] %v3642_v15  ;;  %v3613_v0 = vadd.f32 %v11956_v16, %v3575_v54  ;;  %v3612_v28 = vadd.f32 %v11956_v16, %v3574_v21  ;;  %v8650_v10 = vpop.f32.mrb[38].mxu0  ;;  %v13744_v62 = vsel %vm11999_vm11, 4294967295, %v13743_v62  ;;  %v3747_v15 = vld [vmem:[%s13561_s3 + $0x20] sm:$0xff] }
 0x250   : > { %v3545_v19 = vsel %vm11982_vm12, %v8650_v10, 0.0  ;;  %v2704_v3 = vpop.f32.mrb[39].mxu0  ;;  %13745 = vst [vmem:[#allocation24_spill] sm:$0xff] %v13744_v62  ;;  %v9771_v10 = vpack.c.bf16 %v3746_v55, %v3745_v1  ;;  %v6969_v1 = vld [vmem:[%s13561_s3 + $0x118] sm:$0xff]  ;;  %vm12031_vm10 = vcmp.ne.s32.totalorder %v2979_v31, 15 }
 0x251   : > { %v3645_v9 = vmax.f32 %v3613_v0, 0.0  ;;  %v3644_v30 = vmax.f32 %v3612_v28, 0.0  ;;  %v3577_v59 = vadd.f32 %v3545_v19, %v11785_v33  ;;  %v3576_v60 = vadd.f32 %v11790_v44, %v2704_v3  ;;  %v3748_v44 = vld [vmem:[%s13561_s3 + $0x28] sm:$0xff]  ;;  %v6968_v28 = vld [vmem:[%s13561_s3 + $0x110] sm:$0xff]  ;;  %v3750_v31 = vld [vmem:[%s13561_s3 + $0x38] sm:$0xff] }
 0x252   : > { %v12009_v54 = vld [vmem:[#allocation2 + $0x17] sm:$0xff]  ;;  %v12013_v52 = vld [vmem:[#allocation2 + $0x1f] sm:$0xff]  ;;  %v13746_v3 = vmov 0 }
 0x253   : > { %v12011_v21 = vld [vmem:[#allocation2 + $0x19] sm:$0xff]  ;;  %3680 = vst [vmem:[#allocation2 + $0x40] sm:$0xff] %v3645_v9  ;;  %3679 = vst [vmem:[#allocation2 + $0x38] sm:$0xff] %v3644_v30  ;;  %v3615_v5 = vadd.f32 %v11956_v16, %v3577_v59  ;;  %v3614_v0 = vadd.f32 %v11956_v16, %v3576_v60  ;;  %v8653_v33 = vpop.f32.mrb[40].mxu0  ;;  %8719 = vmatprep.mubr.f32.mxu1 %v12009_v54  ;;  %v13747_v3 = vsel %vm12031_vm10, 4294967295, %v13746_v3  ;;  %v2993_v9 = vand.u32 15, %v2879_v13 }
 0x254   : > { %9039 = vmatprep.mubr.f32.mxu0 %v12011_v21  ;;  %v3547_v55 = vsel %vm11999_vm11, %v8653_v33, 0.0  ;;  %v2714_v19 = vpop.f32.mrb[41].mxu0  ;;  %8720 = vmatmul.mubr.f32.vlgmr.msra.gmra.mrb[32].mxu1 %v12013_v52  ;;  %13748 = vst [vmem:[#allocation25_spill] sm:$0xff] %v13747_v3  ;;  %v2881_v30 = vadd.s32 120, %v11736_v2  ;;  %v3749_v33 = vld [vmem:[%s13561_s3 + $0x30] sm:$0xff] }
 0x255   : > { %v3647_v59 = vmax.f32 %v3615_v5, 0.0  ;;  %v3646_v60 = vmax.f32 %v3614_v0, 0.0  ;;  %v3579_v4 = vadd.f32 %v3547_v55, %v11798_v39  ;;  %v3578_v36 = vadd.f32 %v11803_v56, %v2714_v19  ;;  %9770 = vmatpush3.bf16.msra.mxu1 %v11724_v18 }
 0x256   : > { %v12045_v29 = vld [vmem:[#allocation2 + $0x27] sm:$0xff]  ;;  %v12049_v5 = vld [vmem:[#allocation2 + $0x2f] sm:$0xff]  ;;  %9772 = vmatprep.subr.bf16.mxu1 %v9771_v10  ;;  %v9775_v39 = vpack.c.bf16 %v3748_v44, %v3747_v15  ;;  %v9899_v0 = vpack.c.bf16 %v6969_v1, %v6968_v28  ;;  %vm12067_vm9 = vcmp.ne.s32.totalorder %v2993_v9, 15  ;;  %v3007_v28 = vand.u32 15, %v2881_v30 }
 0x257   : > { %v12047_v13 = vld [vmem:[#allocation2 + $0x21] sm:$0xff]  ;;  %3682 = vst [vmem:[#allocation2 + $0x50] sm:$0xff] %v3647_v59  ;;  %3681 = vst [vmem:[#allocation2 + $0x48] sm:$0xff] %v3646_v60  ;;  %v3617_v18 = vadd.f32 %v11956_v16, %v3579_v4  ;;  %v3616_v56 = vadd.f32 %v11956_v16, %v3578_v36  ;;  %v8656_v55 = vpop.f32.mrb[42].mxu0  ;;  %8722 = vmatprep.mubr.f32.mxu1 %v12045_v29  ;;  %v12055_v19 = vld [vmem:[#allocation2 + $0x29] sm:$0xff]  ;;  %v13749_v36 = vmov 0 }
 0x258   : > { %9040 = vmatmul.mubr.f32.vlgmr.msra.gmra.mrb[64].mxu0 %v12047_v13  ;;  %v6971_v15 = vld [vmem:[%s13561_s3 + $0x128] sm:$0xff]  ;;  %v3549_v4 = vsel %vm12031_vm10, %v8656_v55, 0.0  ;;  %v2724_v44 = vpop.f32.mrb[43].mxu0  ;;  %8723 = vmatmul.mubr.f32.gmra.mrb[34].mxu1 %v12049_v5  ;;  %v13750_v36 = vsel %vm12067_vm9, 4294967295, %v13749_v36  ;;  %v2883_v1 = vadd.s32 136, %v11736_v2  ;;  %v3751_v55 = vld [vmem:[%s13561_s3 + $0x40] sm:$0xff] }
 0x259   : > { %9042 = vmatprep.mubr.f32.mxu0 %v12055_v19  ;;  %13751 = vst [vmem:[#allocation26_spill] sm:$0xff] %v13750_v36  ;;  %v3649_v59 = vmax.f32 %v3617_v18, 0.0  ;;  %v3648_v60 = vmax.f32 %v3616_v56, 0.0  ;;  %v3581_v49 = vadd.f32 %v3549_v4, %v11811_v58  ;;  %v3580_v27 = vadd.f32 %v11816_v6, %v2724_v44  ;;  %9774 = vmatpush3.bf16.msra.mxu1 %v9771_v10  ;;  %v3752_v9 = vld [vmem:[%s13561_s3 + $0x48] sm:$0xff]  ;;  %v6972_v44 = vld [vmem:[%s13561_s3 + $0x130] sm:$0xff] }
 0x25a   : > { %9898 = vmatpush3.bf16.msra.mxu0 %v11733_v53  ;;  %v12081_v30 = vld [vmem:[#allocation2 + $0x37] sm:$0xff]  ;;  %v12085_v18 = vld [vmem:[#allocation2 + $0x3f] sm:$0xff]  ;;  %9776 = vmatprep.subr.bf16.mxu1 %v9775_v39  ;;  %v9779_v58 = vpack.c.bf16 %v3750_v31, %v3749_v33  ;;  %v9903_v6 = vpack.c.bf16 %v6971_v15, %v6970_v61  ;;  %vm12103_vm8 = vcmp.ne.s32.totalorder %v3007_v28, 15  ;;  %v3021_v31 = vand.u32 15, %v2883_v1 }
 0x25b   : > { %v12083_v3 = vld [vmem:[#allocation2 + $0x31] sm:$0xff]  ;;  %9900 = vmatprep.subr.bf16.mxu0 %v9899_v0  ;;  %3684 = vst [vmem:[#allocation2 + $0x60] sm:$0xff] %v3649_v59  ;;  %3683 = vst [vmem:[#allocation2 + $0x58] sm:$0xff] %v3648_v60  ;;  %v3619_v10 = vadd.f32 %v11956_v16, %v3581_v49  ;;  %v3618_v56 = vadd.f32 %v11956_v16, %v3580_v27  ;;  %v8659_v4 = vpop.f32.mrb[44].mxu0  ;;  %8725 = vmatprep.mubr.f32.mxu1 %v12081_v30  ;;  %v12091_v53 = vld [vmem:[#allocation2 + $0x39] sm:$0xff]  ;;  %v13752_v27 = vmov 0 }
 0x25c   : > { %9043 = vmatmul.mubr.f32.gmra.mrb[66].mxu0 %v12083_v3  ;;  %v6973_v61 = vld [vmem:[%s13561_s3 + $0x138] sm:$0xff]  ;;  %v3551_v49 = vsel %vm12067_vm9, %v8659_v4, 0.0  ;;  %v2734_v33 = vpop.f32.mrb[45].mxu0  ;;  %8726 = vmatmul.mubr.f32.gmra.mrb[36].mxu1 %v12085_v18  ;;  %v13753_v27 = vsel %vm12103_vm8, 4294967295, %v13752_v27  ;;  %v2885_v15 = vadd.s32 152, %v11736_v2  ;;  %v3753_v4 = vld [vmem:[%s13561_s3 + $0x50] sm:$0xff] }
 0x25d   : > { %9045 = vmatprep.mubr.f32.mxu0 %v12091_v53  ;;  %13754 = vst [vmem:[#allocation27_spill] sm:$0xff] %v13753_v27  ;;  %v3651_v59 = vmax.f32 %v3619_v10, 0.0  ;;  %v3650_v60 = vmax.f32 %v3618_v56, 0.0  ;;  %v3583_v62 = vadd.f32 %v3551_v49, %v11824_v47  ;;  %v3582_v11 = vadd.f32 %v11829_v20, %v2734_v33  ;;  %9778 = vmatpush3.bf16.msra.mxu1 %v9775_v39  ;;  %v3754_v28 = vld [vmem:[%s13561_s3 + $0x58] sm:$0xff]  ;;  %v6974_v33 = vld [vmem:[%s13561_s3 + $0x140] sm:$0xff] }
 0x25e   : > { %9902 = vmatpush3.bf16.msra.mxu0 %v9899_v0  ;;  %v12116_v36 = vld [vmem:[#allocation2 + $0x47] sm:$0xff]  ;;  %v12120_v10 = vld [vmem:[#allocation2 + $0x4f] sm:$0xff]  ;;  %9780 = vmatprep.subr.bf16.mxu1 %v9779_v58  ;;  %v9783_v47 = vpack.c.bf16 %v3752_v9, %v3751_v55  ;;  %v9907_v20 = vpack.c.bf16 %v6973_v61, %v6972_v44  ;;  %vm12138_vm7 = vcmp.ne.s32.totalorder %v3021_v31, 15  ;;  %v3035_v44 = vand.u32 15, %v2885_v15 }
 0x25f   : > { %v12118_v1 = vld [vmem:[#allocation2 + $0x41] sm:$0xff]  ;;  %9904 = vmatprep.subr.bf16.mxu0 %v9903_v6  ;;  %3686 = vst [vmem:[#allocation2 + $0x70] sm:$0xff] %v3651_v59  ;;  %3685 = vst [vmem:[#allocation2 + $0x68] sm:$0xff] %v3650_v60  ;;  %v3621_v39 = vadd.f32 %v11956_v16, %v3583_v62  ;;  %v3620_v56 = vadd.f32 %v11956_v16, %v3582_v11  ;;  %v8662_v49 = vpop.f32.mrb[46].mxu0  ;;  %8728 = vmatprep.mubr.f32.mxu1 %v12116_v36  ;;  %v12126_v0 = vld [vmem:[#allocation2 + $0x49] sm:$0xff]  ;;  %v13755_v11 = vmov 0 }
 0x260   : > { %9046 = vmatmul.mubr.f32.gmra.mrb[68].mxu0 %v12118_v1  ;;  %v6975_v55 = vld [vmem:[%s13561_s3 + $0x148] sm:$0xff]  ;;  %v3553_v62 = vsel %vm12103_vm8, %v8662_v49, 0.0  ;;  %v2744_v9 = vpop.f32.mrb[47].mxu0  ;;  %8729 = vmatmul.mubr.f32.gmra.mrb[38].mxu1 %v12120_v10  ;;  %v13756_v11 = vsel %vm12138_vm7, 4294967295, %v13755_v11  ;;  %v2887_v61 = vadd.s32 168, %v11736_v2  ;;  %v3755_v49 = vld [vmem:[%s13561_s3 + $0x60] sm:$0xff] }
 0x261   : > { %9048 = vmatprep.mubr.f32.mxu0 %v12126_v0  ;;  %13757 = vst [vmem:[#allocation28_spill] sm:$0xff] %v13756_v11  ;;  %v3653_v59 = vmax.f32 %v3621_v39, 0.0  ;;  %v3652_v60 = vmax.f32 %v3620_v56, 0.0  ;;  %v3585_v38 = vadd.f32 %v3553_v62, %v11837_v40  ;;  %v3584_v57 = vadd.f32 %v11842_v25, %v2744_v9  ;;  %9782 = vmatpush3.bf16.msra.mxu1 %v9779_v58  ;;  %v3756_v31 = vld [vmem:[%s13561_s3 + $0x68] sm:$0xff]  ;;  %v6976_v9 = vld [vmem:[%s13561_s3 + $0x150] sm:$0xff] }
 0x262   : > { %9906 = vmatpush3.bf16.msra.mxu0 %v9903_v6  ;;  %v12151_v27 = vld [vmem:[#allocation2 + $0x57] sm:$0xff]  ;;  %v12155_v39 = vld [vmem:[#allocation2 + $0x5f] sm:$0xff]  ;;  %9784 = vmatprep.subr.bf16.mxu1 %v9783_v47  ;;  %v9787_v40 = vpack.c.bf16 %v3754_v28, %v3753_v4  ;;  %v9911_v25 = vpack.c.bf16 %v6975_v55, %v6974_v33  ;;  %vm12173_vm8 = vcmp.ne.s32.totalorder %v3035_v44, 15  ;;  %v3049_v33 = vand.u32 15, %v2887_v61 }
 0x263   : > { %v12153_v15 = vld [vmem:[#allocation2 + $0x51] sm:$0xff]  ;;  %9908 = vmatprep.subr.bf16.mxu0 %v9907_v20  ;;  %3688 = vst [vmem:[#allocation2 + $0x80] sm:$0xff] %v3653_v59  ;;  %3687 = vst [vmem:[#allocation2 + $0x78] sm:$0xff] %v3652_v60  ;;  %v3623_v58 = vadd.f32 %v11956_v16, %v3585_v38  ;;  %v3622_v6 = vadd.f32 %v11956_v16, %v3584_v57  ;;  %v8665_v56 = vpop.f32.mrb[48].mxu0  ;;  %8731 = vmatprep.mubr.f32.mxu1 %v12151_v27  ;;  %v12161_v62 = vld [vmem:[#allocation2 + $0x59] sm:$0xff]  ;;  %v13758_v57 = vmov 0 }
 0x264   : > { %9049 = vmatmul.mubr.f32.gmra.mrb[70].mxu0 %v12153_v15  ;;  %v6977_v4 = vld [vmem:[%s13561_s3 + $0x158] sm:$0xff]  ;;  %v3555_v38 = vsel %vm12138_vm7, %v8665_v56, 0.0  ;;  %v2754_v28 = vpop.f32.mrb[49].mxu0  ;;  %8732 = vmatmul.mubr.f32.gmra.mrb[40].mxu1 %v12155_v39  ;;  %v13759_v57 = vsel %vm12173_vm8, 4294967295, %v13758_v57  ;;  %v2889_v55 = vadd.s32 184, %v11736_v2  ;;  %v3757_v56 = vld [vmem:[%s13561_s3 + $0x70] sm:$0xff] }
 0x265   : > { %9051 = vmatprep.mubr.f32.mxu0 %v12161_v62  ;;  %13760 = vst [vmem:[#allocation29_spill] sm:$0xff] %v13759_v57  ;;  %v3655_v59 = vmax.f32 %v3623_v58, 0.0  ;;  %v3654_v60 = vmax.f32 %v3622_v6, 0.0  ;;  %v3587_v34 = vadd.f32 %v3555_v38, %v11850_v24  ;;  %v3586_v46 = vadd.f32 %v11855_v37, %v2754_v28  ;;  %9786 = vmatpush3.bf16.msra.mxu1 %v9783_v47  ;;  %v3758_v44 = vld [vmem:[%s13561_s3 + $0x78] sm:$0xff]  ;;  %v6978_v28 = vld [vmem:[%s13561_s3 + $0x160] sm:$0xff] }
 0x266   : > { %9910 = vmatpush3.bf16.msra.mxu0 %v9907_v20  ;;  %v12186_v11 = vld [vmem:[#allocation2 + $0x67] sm:$0xff]  ;;  %v12190_v58 = vld [vmem:[#allocation2 + $0x6f] sm:$0xff]  ;;  %9788 = vmatprep.subr.bf16.mxu1 %v9787_v40  ;;  %v9791_v24 = vpack.c.bf16 %v3756_v31, %v3755_v49  ;;  %v9915_v37 = vpack.c.bf16 %v6977_v4, %v6976_v9  ;;  %vm12208_vm7 = vcmp.ne.s32.totalorder %v3049_v33, 15  ;;  %v3063_v9 = vand.u32 15, %v2889_v55  ;;  %v6981_v33 = vld [vmem:[%s13561_s3 + $0x178] sm:$0xff] }
 0x267   : > { %v12188_v61 = vld [vmem:[#allocation2 + $0x61] sm:$0xff]  ;;  %9912 = vmatprep.subr.bf16.mxu0 %v9911_v25  ;;  %3690 = vst [vmem:[#allocation2 + $0x90] sm:$0xff] %v3655_v59  ;;  %3689 = vst [vmem:[#allocation2 + $0x88] sm:$0xff] %v3654_v60  ;;  %v3625_v47 = vadd.f32 %v11956_v16, %v3587_v34  ;;  %v3624_v20 = vadd.f32 %v11956_v16, %v3586_v46  ;;  %v8668_v6 = vpop.f32.mrb[50].mxu0  ;;  %8734 = vmatprep.mubr.f32.mxu1 %v12186_v11  ;;  %v12196_v38 = vld [vmem:[#allocation2 + $0x69] sm:$0xff]  ;;  %v13761_v46 = vmov 0 }
 0x268   : > { %9052 = vmatmul.mubr.f32.gmra.mrb[72].mxu0 %v12188_v61  ;;  %v6979_v49 = vld [vmem:[%s13561_s3 + $0x168] sm:$0xff]  ;;  %v3557_v34 = vsel %vm12173_vm8, %v8668_v6, 0.0  ;;  %v2764_v31 = vpop.f32.mrb[51].mxu0  ;;  %8735 = vmatmul.mubr.f32.gmra.mrb[42].mxu1 %v12190_v58  ;;  %v13762_v46 = vsel %vm12208_vm7, 4294967295, %v13761_v46  ;;  %v2891_v4 = vadd.s32 200, %v11736_v2  ;;  %v6980_v6 = vld [vmem:[%s13561_s3 + $0x170] sm:$0xff] }
 0x269   : > { %9054 = vmatprep.mubr.f32.mxu0 %v12196_v38  ;;  %13763 = vst [vmem:[#allocation30_spill] sm:$0xff] %v13762_v46  ;;  %v3657_v59 = vmax.f32 %v3625_v47, 0.0  ;;  %v3656_v60 = vmax.f32 %v3624_v20, 0.0  ;;  %v3589_v14 = vadd.f32 %v3557_v34, %v11863_v45  ;;  %v3588_v17 = vadd.f32 %v11868_v63, %v2764_v31  ;;  %9790 = vmatpush3.bf16.msra.mxu1 %v9787_v40  ;;  %v6998_v31 = vld [vmem:[%s13561_s3 + $0x200] sm:$0xff] }
 0x26a   : > { %9914 = vmatpush3.bf16.msra.mxu0 %v9911_v25  ;;  %v12221_v57 = vld [vmem:[#allocation2 + $0x77] sm:$0xff]  ;;  %v12225_v47 = vld [vmem:[#allocation2 + $0x7f] sm:$0xff]  ;;  %9792 = vmatprep.subr.bf16.mxu1 %v9791_v24  ;;  %v9795_v45 = vpack.c.bf16 %v3758_v44, %v3757_v56  ;;  %v9919_v63 = vpack.c.bf16 %v6979_v49, %v6978_v28  ;;  %v6999_v56 = vld [vmem:[%s13561_s3 + $0x208] sm:$0xff]  ;;  %vm12245_vm8 = vcmp.ne.s32.totalorder %v3063_v9, 15  ;;  %v13766_v44 = vmov 0 }
 0x26b   : > { %v12223_v55 = vld [vmem:[#allocation2 + $0x71] sm:$0xff]  ;;  %9916 = vmatprep.subr.bf16.mxu0 %v9915_v37  ;;  %3692 = vst [vmem:[#allocation2 + $0xa0] sm:$0xff] %v3657_v59  ;;  %3691 = vst [vmem:[#allocation2 + $0x98] sm:$0xff] %v3656_v60  ;;  %v3627_v40 = vadd.f32 %v11956_v16, %v3589_v14  ;;  %v12229_v25 = vadd.f32 %v11956_v16, %v3588_v17  ;;  %v8671_v20 = vpop.f32.mrb[52].mxu0  ;;  %8737 = vmatprep.mubr.f32.mxu1 %v12221_v57  ;;  %v12233_v34 = vld [vmem:[#allocation2 + $0x79] sm:$0xff]  ;;  %v13767_v44 = vsel %vm12245_vm8, 4294967295, %v13766_v44 }
 0x26c   : > { %9055 = vmatmul.mubr.f32.gmra.mrb[74].mxu0 %v12223_v55  ;;  %13765 = vst [vmem:[#allocation32_spill] sm:$0xff] %v12233_v34  ;;  %v3559_v14 = vsel %vm12208_vm7, %v8671_v20, 0.0  ;;  %v2774_v17 = vpop.f32.mrb[53].mxu0  ;;  %8738 = vmatmul.mubr.f32.gmra.mrb[44].mxu1 %v12225_v47  ;;  %13768 = vst [vmem:[#allocation33_spill] sm:$0xff] %v13767_v44  ;;  %v3077_v28 = vand.u32 15, %v2891_v4  ;;  %v2893_v49 = vadd.s32 216, %v11736_v2  ;;  %v9923_v4 = vpack.c.bf16 %v6981_v33, %v6980_v6 }
 0x26d   : > { %13764 = vst [vmem:[#allocation31_spill] sm:$0xff] %v12229_v25  ;;  %9057 = vmatprep.mubr.f32.mxu0 %v12233_v34  ;;  %v3659_v59 = vmax.f32 %v3627_v40, 0.0  ;;  %v13619_v60 = vmax.f32 %v12229_v25, 0.0  ;;  %v3591_v41 = vadd.f32 %v3559_v14, %v11876_v23  ;;  %v3590_v46 = vadd.f32 %v11881_v8, %v2774_v17  ;;  %9794 = vmatpush3.bf16.msra.mxu1 %v9791_v24  ;;  %v7062_v6 = vld [vmem:[%s13561_s3 + $0x400] sm:$0xff]  ;;  %v7063_v33 = vld [vmem:[%s13561_s3 + $0x408] sm:$0xff] }
 0x26e   : > { %9918 = vmatpush3.bf16.msra.mxu0 %v9915_v37  ;;  %v12253_v20 = vld [vmem:[#allocation2 + $0x87] sm:$0xff]  ;;  %v12257_v9 = vld [vmem:[#allocation2 + $0x8f] sm:$0xff]  ;;  %9796 = vmatprep.subr.bf16.mxu1 %v9795_v45  ;;  %v12259_v34 = vpack.c.bf16 %v6999_v56, %v6998_v31  ;;  %vm12283_vm7 = vcmp.ne.s32.totalorder %v3077_v28, 15  ;;  %v13771_v40 = vmov 0  ;;  %v3091_v31 = vand.u32 15, %v2893_v49 }
 0x26f   : > { %v12255_v32 = vld [vmem:[#allocation2 + $0x81] sm:$0xff]  ;;  %9920 = vmatprep.subr.bf16.mxu0 %v9919_v63  ;;  %3694 = vst [vmem:[#allocation2 + $0xb0] sm:$0xff] %v3659_v59  ;;  %3693 = vst [vmem:[#allocation2 + $0xa8] sm:$0xff] %v13619_v60  ;;  %v12264_v23 = vadd.f32 %v11956_v16, %v3591_v41  ;;  %v12267_v8 = vadd.f32 %v11956_v16, %v3590_v46  ;;  %v8674_v24 = vpop.f32.mrb[54].mxu0  ;;  %8740 = vmatprep.mubr.f32.mxu1 %v12253_v20  ;;  %v12271_v37 = vld [vmem:[#allocation2 + $0x89] sm:$0xff]  ;;  %v13772_v40 = vsel %vm12283_vm7, 4294967295, %v13771_v40 }
 0x270   : > { %9058 = vmatmul.mubr.f32.gmra.mrb[76].mxu0 %v12255_v32  ;;  %v3561_v41 = vsel %vm12245_vm8, %v8674_v24, 0.0  ;;  %v2784_v46 = vpop.f32.mrb[55].mxu0  ;;  %8741 = vmatmul.mubr.f32.gmra.mrb[46].mxu1 %v12257_v9  ;;  %13773 = vst [vmem:[#allocation36_spill] sm:$0xff] %v13772_v40  ;;  %v2895_v56 = vadd.s32 232, %v11736_v2  ;;  %v12299_v49 = vpack.c.bf16 %v7063_v33, %v7062_v6  ;;  %vm12319_vm8 = vcmp.ne.s32.totalorder %v3091_v31, 15 }
 0x271   : > { %13769 = vst [vmem:[#allocation34_spill] sm:$0xff] %v12264_v23  ;;  %13770 = vst [vmem:[#allocation35_spill] sm:$0xff] %v12267_v8  ;;  %9060 = vmatprep.mubr.f32.mxu0 %v12271_v37  ;;  %v13622_v14 = vmax.f32 %v12264_v23, 0.0  ;;  %v13623_v17 = vmax.f32 %v12267_v8, 0.0  ;;  %v3593_v59 = vadd.f32 %v3561_v41, %v11889_v35  ;;  %v3592_v24 = vadd.f32 %v11894_v48, %v2784_v46 }
 0x272   : > { %9798 = vmatpush3.bf16.msra.mxu1 %v9795_v45  ;;  %9922 = vmatpush3.bf16.msra.mxu0 %v9919_v63  ;;  %v12292_v60 = vld [vmem:[#allocation2 + $0x97] sm:$0xff]  ;;  %v12296_v28 = vld [vmem:[#allocation2 + $0x9f] sm:$0xff]  ;;  %v13776_v41 = vmov 0  ;;  %v3105_v46 = vand.u32 15, %v2895_v56 }
 0x273   : > { %v12294_v44 = vld [vmem:[#allocation2 + $0x91] sm:$0xff]  ;;  %9924 = vmatprep.subr.bf16.mxu0 %v9923_v4  ;;  %9800 = vmatprep.subr.bf16.mxu1 %v12259_v34  ;;  %3696 = vst [vmem:[#allocation2 + $0xc0] sm:$0xff] %v13622_v14  ;;  %3695 = vst [vmem:[#allocation2 + $0xb8] sm:$0xff] %v13623_v17  ;;  %v12306_v35 = vadd.f32 %v11956_v16, %v3593_v59  ;;  %v12309_v48 = vadd.f32 %v11956_v16, %v3592_v24  ;;  %v8677_v45 = vpop.f32.mrb[56].mxu0  ;;  %v12313_v63 = vld [vmem:[#allocation2 + $0x99] sm:$0xff]  ;;  %v13777_v41 = vsel %vm12319_vm8, 4294967295, %v13776_v41 }
 0x274   : > { %8743 = vmatprep.mubr.f32.mxu1 %v12292_v60  ;;  %9061 = vmatmul.mubr.f32.gmra.mrb[78].mxu0 %v12294_v44  ;;  %v3563_v6 = vsel %vm12283_vm7, %v8677_v45, 0.0  ;;  %v2794_v33 = vpop.f32.mrb[57].mxu0  ;;  %13778 = vst [vmem:[#allocation39_spill] sm:$0xff] %v13777_v41  ;;  %v2897_v59 = vadd.s32 248, %v11736_v2  ;;  %vm12353_vm7 = vcmp.ne.s32.totalorder %v3105_v46, 15 }
 0x275   : > { %13774 = vst [vmem:[#allocation37_spill] sm:$0xff] %v12306_v35  ;;  %13775 = vst [vmem:[#allocation38_spill] sm:$0xff] %v12309_v48  ;;  %8744 = vmatmul.mubr.f32.gmra.mrb[48].mxu1 %v12296_v28  ;;  %9063 = vmatprep.mubr.f32.mxu0 %v12313_v63  ;;  %v13627_v24 = vmax.f32 %v12306_v35, 0.0  ;;  %v13628_v14 = vmax.f32 %v12309_v48, 0.0  ;;  %v3595_v17 = vadd.f32 %v3563_v6, %v11902_v50 }
 0x276   : > { %v3594_v45 = vadd.f32 %v11907_v51, %v2794_v33  ;;  %9926 = vmatpush3.bf16.msra.mxu0 %v9923_v4  ;;  %v12328_v40 = vld [vmem:[#allocation2 + $0xa7] sm:$0xff]  ;;  %v12332_v31 = vld [vmem:[#allocation2 + $0xaf] sm:$0xff] }
 0x277   : > { %v12330_v23 = vld [vmem:[#allocation2 + $0xa1] sm:$0xff]  ;;  %9992 = vmatprep.subr.bf16.mxu0 %v12299_v49  ;;  %3698 = vst [vmem:[#allocation2 + $0xd0] sm:$0xff] %v13627_v24  ;;  %3697 = vst [vmem:[#allocation2 + $0xc8] sm:$0xff] %v13628_v14  ;;  %v12340_v56 = vadd.f32 %v11956_v16, %v3595_v17  ;;  %v8680_v51 = vpop.f32.mrb[58].mxu0  ;;  %8746 = vmatprep.mubr.f32.mxu1 %v12328_v40  ;;  %v12347_v4 = vld [vmem:[#allocation2 + $0xa9] sm:$0xff]  ;;  %v13781_v17 = vmov 0 }
 0x278   : > { %v12343_v50 = vadd.f32 %v11956_v16, %v3594_v45  ;;  %9064 = vmatmul.mubr.f32.gmra.mrb[80].mxu0 %v12330_v23  ;;  %v3565_v6 = vsel %vm12319_vm8, %v8680_v51, 0.0  ;;  %v2804_v33 = vpop.f32.mrb[59].mxu0  ;;  %v13782_v17 = vsel %vm12353_vm7, 4294967295, %v13781_v17  ;;  %v3119_v45 = vand.u32 15, %v2897_v59 }
 0x279   : > { %13779 = vst [vmem:[#allocation40_spill] sm:$0xff] %v12340_v56  ;;  %8747 = vmatmul.mubr.f32.gmra.mrb[50].mxu1 %v12332_v31  ;;  %9066 = vmatprep.mubr.f32.mxu0 %v12347_v4  ;;  %13783 = vst [vmem:[#allocation42_spill] sm:$0xff] %v13782_v17  ;;  %v13634_v24 = vmax.f32 %v12340_v56, 0.0  ;;  %v3597_v2 = vadd.f32 %v3565_v6, %v11915_v22  ;;  %v3596_v35 = vadd.f32 %v11921_v7, %v2804_v33 }
 0x27a   : > { %13780 = vst [vmem:[#allocation41_spill] sm:$0xff] %v12343_v50  ;;  %v13635_v14 = vmax.f32 %v12343_v50, 0.0  ;;  %v12361_v41 = vld [vmem:[#allocation2 + $0xb7] sm:$0xff]  ;;  %v12365_v48 = vld [vmem:[#allocation2 + $0xbf] sm:$0xff]  ;;  %vm12385_vm8 = vcmp.ne.s32.totalorder %v3119_v45, 15 }
 0x27b   : > { %v12363_v51 = vld [vmem:[#allocation2 + $0xb1] sm:$0xff]  ;;  %3700 = vst [vmem:[#allocation2 + $0xe0] sm:$0xff] %v13634_v24  ;;  %v12372_v46 = vadd.f32 %v11956_v16, %v3597_v2  ;;  %v12375_v59 = vadd.f32 %v11956_v16, %v3596_v35  ;;  %v8683_v22 = vpop.f32.mrb[60].mxu0  ;;  %8749 = vmatprep.mubr.f32.mxu1 %v12361_v41  ;;  %v12379_v7 = vld [vmem:[#allocation2 + $0xb9] sm:$0xff]  ;;  %v13786_v2 = vmov 0 }
 0x27c   : > { %3699 = vst [vmem:[#allocation2 + $0xd8] sm:$0xff] %v13635_v14  ;;  %9067 = vmatmul.mubr.f32.gmra.mrb[82].mxu0 %v12363_v51  ;;  %v3567_v6 = vsel %vm12353_vm7, %v8683_v22, 0.0  ;;  %v2814_v33 = vpop.f32.mrb[61].mxu0  ;;  %v13787_v2 = vsel %vm12385_vm8, 4294967295, %v13786_v2  ;;  %vm6541_vm7 = vcmask 1041408  }
 0x27d   : > { %13784 = vst [vmem:[#allocation43_spill] sm:$0xff] %v12372_v46  ;;  %13785 = vst [vmem:[#allocation44_spill] sm:$0xff] %v12375_v59  ;;  %8750 = vmatmul.mubr.f32.gmra.mrb[52].mxu1 %v12365_v48  ;;  %9069 = vmatprep.mubr.f32.mxu0 %v12379_v7  ;;  %v13640_v35 = vmax.f32 %v12372_v46, 0.0  ;;  %v13641_v24 = vmax.f32 %v12375_v59, 0.0  ;;  %v3599_v14 = vadd.f32 %v3567_v6, %v11928_v43 }
 0x27e   : > { %13788 = vst [vmem:[#allocation45_spill] sm:$0xff] %v13787_v2  ;;  %v3598_v56 = vadd.f32 %v11934_v26, %v2814_v33  ;;  %v12393_v50 = vld [vmem:[#allocation2 + $0xc7] sm:$0xff]  ;;  %v12397_v17 = vld [vmem:[#allocation2 + $0xcf] sm:$0xff] }
 0x27f   : > { %v12395_v22 = vld [vmem:[#allocation2 + $0xc1] sm:$0xff]  ;;  %3702 = vst [vmem:[#allocation2 + $0xf0] sm:$0xff] %v13640_v35  ;;  %3701 = vst [vmem:[#allocation2 + $0xe8] sm:$0xff] %v13641_v24  ;;  %v12404_v45 = vadd.f32 %v11956_v16, %v3599_v14  ;;  %v8686_v43 = vpop.f32.mrb[62].mxu0  ;;  %8752 = vmatprep.mubr.f32.mxu1 %v12393_v50  ;;  %v12411_v26 = vld [vmem:[#allocation2 + $0xc9] sm:$0xff] }
 0x280   : > { %v12407_v8 = vadd.f32 %v11956_v16, %v3598_v56  ;;  %9070 = vmatmul.mubr.f32.gmra.mrb[84].mxu0 %v12395_v22  ;;  %v3569_v6 = vsel %vm12385_vm8, %v8686_v43, 0.0  ;;  %v2824_v33 = vpop.f32.mrb[63].mxu0  ;;  %vm10458_vm8 = vmmov 0  }
 0x281   : > { %13789 = vst [vmem:[#allocation46_spill] sm:$0xff] %v12404_v45  ;;  %8753 = vmatmul.mubr.f32.gmra.mrb[54].mxu1 %v12397_v17  ;;  %9072 = vmatprep.mubr.f32.mxu0 %v12411_v26  ;;  %v13646_v14 = vmax.f32 %v12404_v45, 0.0  ;;  %v3601_v35 = vadd.f32 %v3569_v6, %v11941_v42  ;;  %v3600_v24 = vadd.f32 %v11951_v12, %v2824_v33 }
 0x282   : > { %13790 = vst [vmem:[#allocation47_spill] sm:$0xff] %v12407_v8  ;;  %v13647_v56 = vmax.f32 %v12407_v8, 0.0 }
 0x283   : > { %v12421_v46 = vld [vmem:[#allocation2 + $0xd7] sm:$0xff]  ;;  %v12425_v25 = vld [vmem:[#allocation2 + $0xdf] sm:$0xff]  ;;  %3704 = vst [vmem:[#allocation2 + $0x100] sm:$0xff] %v13646_v14  ;;  %v12432_v43 = vadd.f32 %v11956_v16, %v3601_v35  ;;  %v12435_v2 = vadd.f32 %v11956_v16, %v3600_v24 }
 0x284   : > { %v12423_v59 = vld [vmem:[#allocation2 + $0xd1] sm:$0xff]  ;;  %3703 = vst [vmem:[#allocation2 + $0xf8] sm:$0xff] %v13647_v56  ;;  %8755 = vmatprep.mubr.f32.mxu1 %v12421_v46  ;;  %v12439_v42 = vld [vmem:[#allocation2 + $0xd9] sm:$0xff] }
 0x285   : > { %13791 = vst [vmem:[#allocation48_spill] sm:$0xff] %v12432_v43  ;;  %13792 = vst [vmem:[#allocation49_spill] sm:$0xff] %v12435_v2  ;;  %9073 = vmatmul.mubr.f32.gmra.mrb[86].mxu0 %v12423_v59  ;;  %8756 = vmatmul.mubr.f32.gmra.mrb[56].mxu1 %v12425_v25  ;;  %v13649_v12 = vmax.f32 %v12432_v43, 0.0  ;;  %v13650_v6 = vmax.f32 %v12435_v2, 0.0 }
 0x286   : > { %9075 = vmatprep.mubr.f32.mxu0 %v12439_v42  ;;  %v12445_v33 = vld [vmem:[#allocation2 + $0xe7] sm:$0xff]  ;;  %v12449_v16 = vld [vmem:[#allocation2 + $0xef] sm:$0xff] }
 0x287   : > { %v12447_v35 = vld [vmem:[#allocation2 + $0xe1] sm:$0xff]  ;;  %13794 = vst [vmem:[#allocation51_spill] sm:$0xff] %v12449_v16  ;;  %3706 = vst [vmem:[#allocation2 + $0x110] sm:$0xff] %v13649_v12  ;;  %8758 = vmatprep.mubr.f32.mxu1 %v12445_v33  ;;  %v12457_v24 = vld [vmem:[#allocation2 + $0xe9] sm:$0xff] }
 0x288   : > { %13793 = vst [vmem:[#allocation50_spill] sm:$0xff] %v12447_v35  ;;  %3705 = vst [vmem:[#allocation2 + $0x108] sm:$0xff] %v13650_v6  ;;  %v3711_v6 = vld [vmem:[#allocation2 + $0x7] sm:$0xff] }
 0x289   : > { %9076 = vmatmul.mubr.f32.gmra.mrb[88].mxu0 %v12447_v35  ;;  %13795 = vst [vmem:[#allocation52_spill] sm:$0xff] %v12457_v24  ;;  %8759 = vmatmul.mubr.f32.gmra.mrb[58].mxu1 %v12449_v16  ;;  %v7003_v35 = vld [vmem:[%s13561_s3 + $0x228] sm:$0xff] }
 0x28a   : > { %9078 = vmatprep.mubr.f32.mxu0 %v12457_v24 }
 0x28b   : > { %v12461_v14 = vld [vmem:[#allocation2 + $0xf7] sm:$0xff]  ;;  %v12465_v45 = vld [vmem:[#allocation2 + $0xff] sm:$0xff] }
 0x28c   : > { %13796 = vst [vmem:[#allocation53_spill] sm:$0xff] %v12461_v14  ;;  %v12463_v56 = vld [vmem:[#allocation2 + $0xf1] sm:$0xff]  ;;  %13798 = vst [vmem:[#allocation55_spill] sm:$0xff] %v12465_v45  ;;  %8761 = vmatprep.mubr.f32.mxu1 %v12461_v14  ;;  %v12469_v12 = vld [vmem:[#allocation2 + $0xf9] sm:$0xff] }
 0x28d   : > { %13797 = vst [vmem:[#allocation54_spill] sm:$0xff] %v12463_v56  ;;  %9079 = vmatmul.mubr.f32.gmra.mrb[90].mxu0 %v12463_v56  ;;  %13799 = vst [vmem:[#allocation56_spill] sm:$0xff] %v12469_v12  ;;  %8762 = vmatmul.mubr.f32.gmra.mrb[60].mxu1 %v12465_v45  ;;  %v7000_v56 = vld [vmem:[%s13561_s3 + $0x210] sm:$0xff]  ;;  %v7001_v45 = vld [vmem:[%s13561_s3 + $0x218] sm:$0xff] }
 0x28e   : > { %9081 = vmatprep.mubr.f32.mxu0 %v12469_v12  ;;  %v3712_v12 = vld [vmem:[#allocation2 + $0xf] sm:$0xff] }
 0x28f   : > { %v3857_v43 = vld [vmem:[#allocation2 + $0x107] sm:$0xff]  ;;  %v3858_v8 = vld [vmem:[#allocation2 + $0x10f] sm:$0xff] }
 0x290   : > { %v12473_v2 = vld [vmem:[#allocation2 + $0x101] sm:$0xff]  ;;  %8764 = vmatprep.mubr.f32.mxu1 %v3857_v43  ;;  %v12476_v24 = vld [vmem:[#allocation2 + $0x109] sm:$0xff]  ;;  %v12485_v16 = vld [vmem:[#allocation2 + $0x111] sm:$0xff]  ;;  %v9803_v43 = vpack.c.bf16 %v7001_v45, %v7000_v56 }
 0x291   : > { %13800 = vst [vmem:[#allocation57_spill] sm:$0xff] %v12473_v2  ;;  %9082 = vmatmul.mubr.f32.gmra.mrb[92].mxu0 %v12473_v2  ;;  %8765 = vmatmul.mubr.f32.gmra.mrb[62].mxu1 %v3858_v8  ;;  %v3808_v14 = vld [vmem:[#allocation2 + $0x9] sm:$0xff]  ;;  %13801 = vst [vmem:[#allocation58_spill] sm:$0xff] %v12485_v16  ;;  %v7002_v2 = vld [vmem:[%s13561_s3 + $0x220] sm:$0xff] }
 0x292   : > { %9084 = vmatprep.mubr.f32.mxu0 %v12476_v24  ;;  %8799 = vmatprep.mubr.f32.mxu1 %v3711_v6  ;;  %v7064_v8 = vld [vmem:[%s13561_s3 + $0x410] sm:$0xff]  ;;  %v7065_v45 = vld [vmem:[%s13561_s3 + $0x418] sm:$0xff]  ;;  %v9807_v6 = vpack.c.bf16 %v7003_v35, %v7002_v2 }
 0x293   : > { %v3809_v56 = vld [vmem:[#allocation2 + $0x11] sm:$0xff] }
 0x295   : > { %9085 = vmatmul.mubr.f32.gmra.mrb[94].mxu0 %v12485_v16  ;;  %8800 = vmatmul.mubr.f32.vlgmr.msra.gmra.mrb[32].mxu1 %v3712_v12  ;;  %v7005_v12 = vld [vmem:[%s13561_s3 + $0x238] sm:$0xff]  ;;  %v9995_v16 = vpack.c.bf16 %v7065_v45, %v7064_v8  ;;  %v7011_v45 = vld [vmem:[%s13561_s3 + $0x268] sm:$0xff] }
 0x296   : > { %9119 = vmatprep.mubr.f32.mxu0 %v3808_v14  ;;  %8802 = vmatprep.mubr.f32.mxu1 %v12009_v54  ;;  %v7004_v14 = vld [vmem:[%s13561_s3 + $0x230] sm:$0xff]  ;;  %v7066_v54 = vld [vmem:[%s13561_s3 + $0x420] sm:$0xff] }
 0x297   : > { %9802 = vmatpush3.bf16.msra.mxu1 %v12259_v34  ;;  %v7067_v34 = vld [vmem:[%s13561_s3 + $0x428] sm:$0xff]  ;;  %v9811_v2 = vpack.c.bf16 %v7005_v12, %v7004_v14  ;;  %v7012_v12 = vld [vmem:[%s13561_s3 + $0x270] sm:$0xff] }
 0x298   : > { %9804 = vmatprep.subr.bf16.mxu1 %v9803_v43  ;;  %v9999_v35 = vpack.c.bf16 %v7067_v34, %v7066_v54  ;;  %v7013_v54 = vld [vmem:[%s13561_s3 + $0x278] sm:$0xff]  ;;  %v7075_v34 = vld [vmem:[%s13561_s3 + $0x468] sm:$0xff] }
 0x299   : > { %9120 = vmatmul.mubr.f32.vlgmr.msra.gmra.mrb[64].mxu0 %v3809_v56  ;;  %8803 = vmatmul.mubr.f32.gmra.mrb[34].mxu1 %v12013_v52  ;;  %v7007_v52 = vld [vmem:[%s13561_s3 + $0x248] sm:$0xff] }
 0x29a   : > { %9122 = vmatprep.mubr.f32.mxu0 %v12011_v21  ;;  %8805 = vmatprep.mubr.f32.mxu1 %v12045_v29  ;;  %v7006_v21 = vld [vmem:[%s13561_s3 + $0x240] sm:$0xff]  ;;  %v7068_v29 = vld [vmem:[%s13561_s3 + $0x430] sm:$0xff] }
 0x29b   : > { %9806 = vmatpush3.bf16.msra.mxu1 %v9803_v43  ;;  %9994 = vmatpush3.bf16.msra.mxu0 %v12299_v49  ;;  %v9815_v49 = vpack.c.bf16 %v7007_v52, %v7006_v21  ;;  %v6950_v21 = vld [vmem:[%s13561_s3 + $0x80] sm:$0xff]  ;;  %v6951_v52 = vld [vmem:[%s13561_s3 + $0x88] sm:$0xff] }
 0x29c   : > { %9808 = vmatprep.subr.bf16.mxu1 %v9807_v6  ;;  %9996 = vmatprep.subr.bf16.mxu0 %v9995_v16 }
 0x29d   : > { %9123 = vmatmul.mubr.f32.gmra.mrb[66].mxu0 %v12047_v13  ;;  %8806 = vmatmul.mubr.f32.gmra.mrb[36].mxu1 %v12049_v5  ;;  %v7069_v13 = vld [vmem:[%s13561_s3 + $0x438] sm:$0xff]  ;;  %v7008_v5 = vld [vmem:[%s13561_s3 + $0x250] sm:$0xff] }
 0x29e   : > { %9125 = vmatprep.mubr.f32.mxu0 %v12055_v19  ;;  %8808 = vmatprep.mubr.f32.mxu1 %v12081_v30  ;;  %v7009_v19 = vld [vmem:[%s13561_s3 + $0x258] sm:$0xff]  ;;  %v10003_v43 = vpack.c.bf16 %v7069_v13, %v7068_v29  ;;  %v7070_v30 = vld [vmem:[%s13561_s3 + $0x440] sm:$0xff]  ;;  %v9831_v29 = vpack.c.bf16 %v6951_v52, %v6950_v21  ;;  %v7031_v52 = vld [vmem:[%s13561_s3 + $0x308] sm:$0xff] }
 0x29f   : > { %9810 = vmatpush3.bf16.msra.mxu1 %v9807_v6  ;;  %9998 = vmatpush3.bf16.msra.mxu0 %v9995_v16  ;;  %v7071_v16 = vld [vmem:[%s13561_s3 + $0x448] sm:$0xff]  ;;  %v9819_v8 = vpack.c.bf16 %v7009_v19, %v7008_v5  ;;  %v7073_v6 = vld [vmem:[%s13561_s3 + $0x458] sm:$0xff]  ;;  %v7030_v21 = vld [vmem:[%s13561_s3 + $0x300] sm:$0xff] }
 0x2a0   : > { %9812 = vmatprep.subr.bf16.mxu1 %v9811_v2  ;;  %10000 = vmatprep.subr.bf16.mxu0 %v9999_v35  ;;  %v10007_v56 = vpack.c.bf16 %v7071_v16, %v7070_v30  ;;  %v13802_v13 = vld [vmem:[#allocation32_spill] sm:$0xff]  ;;  %v12652_v5 = vld [vmem:[#allocation2 + $0x28] sm:$0xff]  ;;  %v6956_v30 = vld [vmem:[%s13561_s3 + $0xb0] sm:$0xff] }
 0x2a1   : > { %9126 = vmatmul.mubr.f32.gmra.mrb[68].mxu0 %v12083_v3  ;;  %8809 = vmatmul.mubr.f32.gmra.mrb[38].mxu1 %v12085_v18  ;;  %v7010_v18 = vld [vmem:[%s13561_s3 + $0x260] sm:$0xff]  ;;  %v6957_v16 = vld [vmem:[%s13561_s3 + $0xb8] sm:$0xff] }
 0x2a2   : > { %9128 = vmatprep.mubr.f32.mxu0 %v12091_v53  ;;  %8811 = vmatprep.mubr.f32.mxu1 %v12116_v36  ;;  %v7072_v36 = vld [vmem:[%s13561_s3 + $0x450] sm:$0xff]  ;;  %v9823_v14 = vpack.c.bf16 %v7011_v45, %v7010_v18  ;;  %v12670_v18 = vld [vmem:[#allocation2 + $0x40] sm:$0xff] }
 0x2a3   : > { %9814 = vmatpush3.bf16.msra.mxu1 %v9811_v2  ;;  %10002 = vmatpush3.bf16.msra.mxu0 %v9999_v35  ;;  %v9827_v2 = vpack.c.bf16 %v7013_v54, %v7012_v12  ;;  %v7077_v35 = vld [vmem:[%s13561_s3 + $0x478] sm:$0xff]  ;;  %v6958_v45 = vld [vmem:[%s13561_s3 + $0xc0] sm:$0xff]  ;;  %v6963_v54 = vld [vmem:[%s13561_s3 + $0xe8] sm:$0xff] }
 0x2a4   : > { %9816 = vmatprep.subr.bf16.mxu1 %v9815_v49  ;;  %10004 = vmatprep.subr.bf16.mxu0 %v10003_v43  ;;  %v6962_v12 = vld [vmem:[%s13561_s3 + $0xe0] sm:$0xff] }
 0x2a5   : > { %9129 = vmatmul.mubr.f32.gmra.mrb[70].mxu0 %v12118_v1  ;;  %8812 = vmatmul.mubr.f32.gmra.mrb[40].mxu1 %v12120_v10  ;;  %v10011_v10 = vpack.c.bf16 %v7073_v6, %v7072_v36  ;;  %v12684_v36 = vld [vmem:[#allocation2 + $0x50] sm:$0xff] }
 0x2a6   : > { %9131 = vmatprep.mubr.f32.mxu0 %v12126_v0  ;;  %8814 = vmatprep.mubr.f32.mxu1 %v12151_v27  ;;  %v7074_v27 = vld [vmem:[%s13561_s3 + $0x460] sm:$0xff]  ;;  %v6960_v6 = vld [vmem:[%s13561_s3 + $0xd0] sm:$0xff] }
 0x2a7   : > { %9818 = vmatpush3.bf16.msra.mxu1 %v9815_v49  ;;  %10006 = vmatpush3.bf16.msra.mxu0 %v10003_v43  ;;  %v6955_v49 = vld [vmem:[%s13561_s3 + $0xa8] sm:$0xff]  ;;  %v12656_v43 = vld [vmem:[#allocation2 + $0x30] sm:$0xff] }
 0x2a8   : > { %9820 = vmatprep.subr.bf16.mxu1 %v9819_v8  ;;  %10008 = vmatprep.subr.bf16.mxu0 %v10007_v56 }
 0x2a9   : > { %9132 = vmatmul.mubr.f32.gmra.mrb[72].mxu0 %v12153_v15  ;;  %8815 = vmatmul.mubr.f32.gmra.mrb[42].mxu1 %v12155_v39  ;;  %v10015_v39 = vpack.c.bf16 %v7075_v34, %v7074_v27  ;;  %v12712_v27 = vld [vmem:[#allocation2 + $0x70] sm:$0xff] }
 0x2aa   : > { %9134 = vmatprep.mubr.f32.mxu0 %v12161_v62  ;;  %8817 = vmatprep.mubr.f32.mxu1 %v12186_v11  ;;  %v7076_v11 = vld [vmem:[%s13561_s3 + $0x470] sm:$0xff] }
 0x2ab   : > { %9822 = vmatpush3.bf16.msra.mxu1 %v9819_v8  ;;  %10010 = vmatpush3.bf16.msra.mxu0 %v10007_v56  ;;  %v12666_v8 = vld [vmem:[#allocation2 + $0x38] sm:$0xff]  ;;  %v6959_v56 = vld [vmem:[%s13561_s3 + $0xc8] sm:$0xff]  ;;  %v6964_v34 = vld [vmem:[%s13561_s3 + $0xf0] sm:$0xff] }
 0x2ac   : > { %9824 = vmatprep.subr.bf16.mxu1 %v9823_v14  ;;  %10012 = vmatprep.subr.bf16.mxu0 %v10011_v10 }
 0x2ad   : > { %9135 = vmatmul.mubr.f32.gmra.mrb[74].mxu0 %v12188_v61  ;;  %8818 = vmatmul.mubr.f32.gmra.mrb[44].mxu1 %v12190_v58  ;;  %v10019_v58 = vpack.c.bf16 %v7077_v35, %v7076_v11  ;;  %v12736_v11 = vld [vmem:[#allocation2 + $0x88] sm:$0xff]  ;;  %v12740_v35 = vld [vmem:[#allocation2 + $0x90] sm:$0xff] }
 0x2ae   : > { %9137 = vmatprep.mubr.f32.mxu0 %v12196_v38  ;;  %8820 = vmatprep.mubr.f32.mxu1 %v12221_v57  ;;  %v13803_v57 = vld [vmem:[#allocation50_spill] sm:$0xff] }
 0x2af   : > { %9826 = vmatpush3.bf16.msra.mxu1 %v9823_v14  ;;  %10014 = vmatpush3.bf16.msra.mxu0 %v10011_v10  ;;  %v6961_v14 = vld [vmem:[%s13561_s3 + $0xd8] sm:$0xff]  ;;  %v12698_v10 = vld [vmem:[#allocation2 + $0x60] sm:$0xff] }
 0x2b0   : > { %9828 = vmatprep.subr.bf16.mxu1 %v9827_v2  ;;  %10016 = vmatprep.subr.bf16.mxu0 %v10015_v39 }
 0x2b1   : > { %9138 = vmatmul.mubr.f32.gmra.mrb[76].mxu0 %v12223_v55  ;;  %8821 = vmatmul.mubr.f32.gmra.mrb[46].mxu1 %v12225_v47  ;;  %v13804_v47 = vld [vmem:[#allocation51_spill] sm:$0xff] }
 0x2b2   : > { %9140 = vmatprep.mubr.f32.mxu0 %v13802_v13  ;;  %8823 = vmatprep.mubr.f32.mxu1 %v12253_v20  ;;  %v13806_v20 = vld [vmem:[#allocation53_spill] sm:$0xff] }
 0x2b3   : > { %9830 = vmatpush3.bf16.msra.mxu1 %v9827_v2  ;;  %10018 = vmatpush3.bf16.msra.mxu0 %v10015_v39  ;;  %v6965_v2 = vld [vmem:[%s13561_s3 + $0xf8] sm:$0xff]  ;;  %v12726_v39 = vld [vmem:[#allocation2 + $0x80] sm:$0xff] }
 0x2b4   : > { %9832 = vmatprep.subr.bf16.mxu1 %v9831_v29  ;;  %10020 = vmatprep.subr.bf16.mxu0 %v10019_v58 }
 0x2b5   : > { %9141 = vmatmul.mubr.f32.gmra.mrb[78].mxu0 %v12255_v32  ;;  %8824 = vmatmul.mubr.f32.gmra.mrb[48].mxu1 %v12257_v9  ;;  %v13807_v9 = vld [vmem:[#allocation54_spill] sm:$0xff] }
 0x2b6   : > { %9143 = vmatprep.mubr.f32.mxu0 %v12271_v37  ;;  %8826 = vmatprep.mubr.f32.mxu1 %v12292_v60  ;;  %v13805_v60 = vld [vmem:[#allocation52_spill] sm:$0xff] }
 0x2b7   : > { %10022 = vmatpush3.bf16.msra.mxu0 %v10019_v58 }
 0x2b9   : > { %9144 = vmatmul.mubr.f32.gmra.mrb[80].mxu0 %v12294_v44  ;;  %8827 = vmatmul.mubr.f32.gmra.mrb[50].mxu1 %v12296_v28  ;;  %v13808_v28 = vld [vmem:[#allocation55_spill] sm:$0xff] }
 0x2ba   : > { %9146 = vmatprep.mubr.f32.mxu0 %v12313_v63  ;;  %8829 = vmatprep.mubr.f32.mxu1 %v12328_v40  ;;  %v6952_v40 = vld [vmem:[%s13561_s3 + $0x90] sm:$0xff] }
 0x2bd   : > { %9147 = vmatmul.mubr.f32.gmra.mrb[82].mxu0 %v12330_v23  ;;  %8830 = vmatmul.mubr.f32.gmra.mrb[52].mxu1 %v12332_v31  ;;  %v12642_v31 = vld [vmem:[#allocation2 + $0x20] sm:$0xff] }
 0x2be   : > { %9149 = vmatprep.mubr.f32.mxu0 %v12347_v4  ;;  %8832 = vmatprep.mubr.f32.mxu1 %v12361_v41  ;;  %v12639_v41 = vld [vmem:[#allocation2 + $0x18] sm:$0xff] }
 0x2c1   : > { %9150 = vmatmul.mubr.f32.gmra.mrb[84].mxu0 %v12363_v51  ;;  %8833 = vmatmul.mubr.f32.gmra.mrb[54].mxu1 %v12365_v48  ;;  %v13809_v48 = vld [vmem:[#allocation56_spill] sm:$0xff] }
 0x2c2   : > { %9152 = vmatprep.mubr.f32.mxu0 %v12379_v7  ;;  %8835 = vmatprep.mubr.f32.mxu1 %v12393_v50 }
 0x2c5   : > { %9153 = vmatmul.mubr.f32.gmra.mrb[86].mxu0 %v12395_v22  ;;  %8836 = vmatmul.mubr.f32.gmra.mrb[56].mxu1 %v12397_v17  ;;  %v13810_v17 = vld [vmem:[#allocation57_spill] sm:$0xff] }
 0x2c6   : > { %9155 = vmatprep.mubr.f32.mxu0 %v12411_v26  ;;  %8838 = vmatprep.mubr.f32.mxu1 %v12421_v46  ;;  %v5936_v46 = vld [vmem:[#allocation2 + $0x29] sm:$0xff] }
 0x2c9   : > { %9156 = vmatmul.mubr.f32.gmra.mrb[88].mxu0 %v12423_v59  ;;  %8839 = vmatmul.mubr.f32.gmra.mrb[58].mxu1 %v12425_v25  ;;  %v6953_v25 = vld [vmem:[%s13561_s3 + $0x98] sm:$0xff] }
 0x2ca   : > { %9158 = vmatprep.mubr.f32.mxu0 %v12439_v42  ;;  %8841 = vmatprep.mubr.f32.mxu1 %v12445_v33  ;;  %v9835_v50 = vpack.c.bf16 %v6953_v25, %v6952_v40  ;;  %v6954_v33 = vld [vmem:[%s13561_s3 + $0xa0] sm:$0xff] }
 0x2cb   : > { %v9839_v19 = vpack.c.bf16 %v6955_v49, %v6954_v33 }
 0x2cd   : > { %9159 = vmatmul.mubr.f32.gmra.mrb[90].mxu0 %v13803_v57  ;;  %8842 = vmatmul.mubr.f32.gmra.mrb[60].mxu1 %v13804_v47 }
 0x2ce   : > { %9161 = vmatprep.mubr.f32.mxu0 %v13805_v60  ;;  %8844 = vmatprep.mubr.f32.mxu1 %v13806_v20 }
 0x2d1   : > { %9162 = vmatmul.mubr.f32.gmra.mrb[92].mxu0 %v13807_v9  ;;  %8845 = vmatmul.mubr.f32.gmra.mrb[62].mxu1 %v13808_v28 }
 0x2d2   : > { %9164 = vmatprep.mubr.f32.mxu0 %v13809_v48  ;;  %8879 = vmatprep.mubr.f32.mxu1 %v12639_v41 }
 0x2d5   : > { %9165 = vmatmul.mubr.f32.gmra.mrb[94].mxu0 %v13810_v17  ;;  %8880 = vmatmul.mubr.f32.vlgmr.msra.gmra.mrb[64].mxu1 %v12642_v31 }
 0x2d6   : > { %9359 = vmatprep.mubr.f32.mxu0 %v5936_v46  ;;  %8882 = vmatprep.mubr.f32.mxu1 %v12652_v5 }
 0x2d7   : > { %9834 = vmatpush3.bf16.msra.mxu1 %v9831_v29  ;;  %v12744_v29 = vld [vmem:[#allocation2 + $0x98] sm:$0xff] }
 0x2d8   : > { %9836 = vmatprep.subr.bf16.mxu1 %v9835_v50 }
 0x2d9   : > { %9360 = vmatmul.mubr.f32.vlgmr.msra.gmra.mrb[64].mxu0 %v12083_v3  ;;  %8883 = vmatmul.mubr.f32.gmra.mrb[66].mxu1 %v12656_v43  ;;  %v9843_v3 = vpack.c.bf16 %v6957_v16, %v6956_v30  ;;  %v5966_v16 = vld [vmem:[#allocation2 + $0x119] sm:$0xff] }
 0x2da   : > { %9362 = vmatprep.mubr.f32.mxu0 %v12091_v53  ;;  %8885 = vmatprep.mubr.f32.mxu1 %v12666_v8  ;;  %v12680_v53 = vld [vmem:[#allocation2 + $0x48] sm:$0xff] }
 0x2db   : > { %9838 = vmatpush3.bf16.msra.mxu1 %v9835_v50 }
 0x2dc   : > { %9840 = vmatprep.subr.bf16.mxu1 %v9839_v19 }
 0x2dd   : > { %9363 = vmatmul.mubr.f32.gmra.mrb[66].mxu0 %v12118_v1  ;;  %8886 = vmatmul.mubr.f32.gmra.mrb[68].mxu1 %v12670_v18  ;;  %v9847_v1 = vpack.c.bf16 %v6959_v56, %v6958_v45  ;;  %v5967_v56 = vld [vmem:[#allocation2 + $0x121] sm:$0xff] }
 0x2de   : > { %9365 = vmatprep.mubr.f32.mxu0 %v12126_v0  ;;  %8888 = vmatprep.mubr.f32.mxu1 %v12680_v53  ;;  %v12694_v0 = vld [vmem:[#allocation2 + $0x58] sm:$0xff] }
 0x2df   : > { %9842 = vmatpush3.bf16.msra.mxu1 %v9839_v19 }
 0x2e0   : > { %9844 = vmatprep.subr.bf16.mxu1 %v9843_v3 }
 0x2e1   : > { %9366 = vmatmul.mubr.f32.gmra.mrb[68].mxu0 %v12153_v15  ;;  %8889 = vmatmul.mubr.f32.gmra.mrb[70].mxu1 %v12684_v36  ;;  %v9851_v15 = vpack.c.bf16 %v6961_v14, %v6960_v6  ;;  %v7034_v6 = vld [vmem:[%s13561_s3 + $0x320] sm:$0xff]  ;;  %v7035_v14 = vld [vmem:[%s13561_s3 + $0x328] sm:$0xff] }
 0x2e2   : > { %9368 = vmatprep.mubr.f32.mxu0 %v12161_v62  ;;  %8891 = vmatprep.mubr.f32.mxu1 %v12694_v0  ;;  %v12708_v62 = vld [vmem:[#allocation2 + $0x68] sm:$0xff] }
 0x2e3   : > { %9846 = vmatpush3.bf16.msra.mxu1 %v9843_v3  ;;  %v7033_v3 = vld [vmem:[%s13561_s3 + $0x318] sm:$0xff] }
 0x2e4   : > { %9848 = vmatprep.subr.bf16.mxu1 %v9847_v1 }
 0x2e5   : > { %9369 = vmatmul.mubr.f32.gmra.mrb[70].mxu0 %v12188_v61  ;;  %8892 = vmatmul.mubr.f32.gmra.mrb[72].mxu1 %v12698_v10  ;;  %v9855_v61 = vpack.c.bf16 %v6963_v54, %v6962_v12  ;;  %v7036_v12 = vld [vmem:[%s13561_s3 + $0x330] sm:$0xff]  ;;  %v7037_v54 = vld [vmem:[%s13561_s3 + $0x338] sm:$0xff] }
 0x2e6   : > { %9371 = vmatprep.mubr.f32.mxu0 %v12196_v38  ;;  %8894 = vmatprep.mubr.f32.mxu1 %v12708_v62  ;;  %v12722_v38 = vld [vmem:[#allocation2 + $0x78] sm:$0xff] }
 0x2e7   : > { %9850 = vmatpush3.bf16.msra.mxu1 %v9847_v1 }
 0x2e8   : > { %9852 = vmatprep.subr.bf16.mxu1 %v9851_v15 }
 0x2e9   : > { %9372 = vmatmul.mubr.f32.gmra.mrb[72].mxu0 %v12223_v55  ;;  %8895 = vmatmul.mubr.f32.gmra.mrb[74].mxu1 %v12712_v27  ;;  %v9859_v55 = vpack.c.bf16 %v6965_v2, %v6964_v34  ;;  %v7039_v34 = vld [vmem:[%s13561_s3 + $0x348] sm:$0xff]  ;;  %v7040_v2 = vld [vmem:[%s13561_s3 + $0x350] sm:$0xff] }
 0x2ea   : > { %9374 = vmatprep.mubr.f32.mxu0 %v13802_v13  ;;  %8897 = vmatprep.mubr.f32.mxu1 %v12722_v38  ;;  %v13813_v13 = vld [vmem:[#allocation35_spill] sm:$0xff] }
 0x2eb   : > { %9854 = vmatpush3.bf16.msra.mxu1 %v9851_v15  ;;  %v13814_v47 = vmax.f32 %v13813_v13, 0.0  ;;  %v9935_v15 = vpack.c.bf16 %v7035_v14, %v7034_v6  ;;  %v7045_v13 = vld [vmem:[%s13561_s3 + $0x378] sm:$0xff]  ;;  %v5329_v6 = vld [vmem:[#allocation2 + $0x4f] sm:$0xff]  ;;  %v7054_v14 = vld [vmem:[%s13561_s3 + $0x3c0] sm:$0xff] }
 0x2ec   : > { %9856 = vmatprep.subr.bf16.mxu1 %v9855_v61 }
 0x2ed   : > { %9375 = vmatmul.mubr.f32.gmra.mrb[74].mxu0 %v12255_v32  ;;  %8898 = vmatmul.mubr.f32.gmra.mrb[76].mxu1 %v12726_v39  ;;  %v9927_v32 = vpack.c.bf16 %v7031_v52, %v7030_v21  ;;  %v7042_v52 = vld [vmem:[%s13561_s3 + $0x360] sm:$0xff] }
 0x2ee   : > { %9377 = vmatprep.mubr.f32.mxu0 %v12271_v37  ;;  %8900 = vmatprep.mubr.f32.mxu1 %v12736_v11  ;;  %v12748_v37 = vld [vmem:[#allocation2 + $0xa0] sm:$0xff] }
 0x2ef   : > { %9858 = vmatpush3.bf16.msra.mxu1 %v9855_v61  ;;  %v9939_v61 = vpack.c.bf16 %v7037_v54, %v7036_v12  ;;  %v5330_v12 = vld [vmem:[#allocation2 + $0x57] sm:$0xff] }
 0x2f0   : > { %9860 = vmatprep.subr.bf16.mxu1 %v9859_v55 }
 0x2f1   : > { %9378 = vmatmul.mubr.f32.gmra.mrb[76].mxu0 %v12294_v44  ;;  %8901 = vmatmul.mubr.f32.gmra.mrb[78].mxu1 %v12740_v35  ;;  %v13811_v44 = vld [vmem:[#allocation31_spill] sm:$0xff] }
 0x2f2   : > { %9380 = vmatprep.mubr.f32.mxu0 %v12313_v63  ;;  %8903 = vmatprep.mubr.f32.mxu1 %v12744_v29  ;;  %v13812_v58 = vmax.f32 %v13811_v44, 0.0  ;;  %v12755_v63 = vld [vmem:[#allocation2 + $0xb0] sm:$0xff] }
 0x2f3   : > { %9862 = vmatpush3.bf16.msra.mxu1 %v9859_v55  ;;  %v7041_v55 = vld [vmem:[%s13561_s3 + $0x358] sm:$0xff] }
 0x2f4   : > { %9928 = vmatprep.subr.bf16.mxu1 %v9927_v32  ;;  %v9947_v21 = vpack.c.bf16 %v7041_v55, %v7040_v2  ;;  %v5333_v55 = vld [vmem:[#allocation2 + $0x6f] sm:$0xff] }
 0x2f5   : > { %9381 = vmatmul.mubr.f32.gmra.mrb[78].mxu0 %v12330_v23  ;;  %8904 = vmatmul.mubr.f32.gmra.mrb[80].mxu1 %v12748_v37  ;;  %v13815_v23 = vld [vmem:[#allocation34_spill] sm:$0xff] }
 0x2f6   : > { %9383 = vmatprep.mubr.f32.mxu0 %v12347_v4  ;;  %8906 = vmatprep.mubr.f32.mxu1 %v13812_v58  ;;  %v13816_v20 = vmax.f32 %v13815_v23, 0.0  ;;  %v13817_v4 = vld [vmem:[#allocation38_spill] sm:$0xff]  ;;  %v7044_v58 = vld [vmem:[%s13561_s3 + $0x370] sm:$0xff]  ;;  %v7046_v23 = vld [vmem:[%s13561_s3 + $0x380] sm:$0xff] }
 0x2f7   : > { %v13818_v40 = vmax.f32 %v13817_v4, 0.0 }
 0x2f9   : > { %9384 = vmatmul.mubr.f32.gmra.mrb[80].mxu0 %v12363_v51  ;;  %8907 = vmatmul.mubr.f32.gmra.mrb[82].mxu1 %v12755_v63  ;;  %v13819_v51 = vld [vmem:[#allocation37_spill] sm:$0xff] }
 0x2fa   : > { %9386 = vmatprep.mubr.f32.mxu0 %v12379_v7  ;;  %8909 = vmatprep.mubr.f32.mxu1 %v13814_v47  ;;  %v13820_v25 = vmax.f32 %v13819_v51, 0.0  ;;  %v13821_v7 = vld [vmem:[#allocation41_spill] sm:$0xff]  ;;  %v9955_v47 = vpack.c.bf16 %v7045_v13, %v7044_v58  ;;  %v12868_v51 = vld [vmem:[#allocation2 + $0xb8] sm:$0xff]  ;;  %v7060_v13 = vld [vmem:[%s13561_s3 + $0x3f0] sm:$0xff] }
 0x2fb   : > { %v13822_v28 = vmax.f32 %v13821_v7, 0.0  ;;  %v12874_v7 = vld [vmem:[#allocation2 + $0xc8] sm:$0xff]  ;;  %v5335_v58 = vld [vmem:[#allocation2 + $0x7f] sm:$0xff] }
 0x2fd   : > { %9387 = vmatmul.mubr.f32.gmra.mrb[82].mxu0 %v12395_v22  ;;  %8910 = vmatmul.mubr.f32.gmra.mrb[84].mxu1 %v13816_v20  ;;  %v13823_v22 = vld [vmem:[#allocation40_spill] sm:$0xff]  ;;  %v7047_v20 = vld [vmem:[%s13561_s3 + $0x388] sm:$0xff] }
 0x2fe   : > { %9389 = vmatprep.mubr.f32.mxu0 %v12411_v26  ;;  %8912 = vmatprep.mubr.f32.mxu1 %v13818_v40  ;;  %v13824_v50 = vmax.f32 %v13823_v22, 0.0  ;;  %v13825_v26 = vld [vmem:[#allocation44_spill] sm:$0xff]  ;;  %v9959_v4 = vpack.c.bf16 %v7047_v20, %v7046_v23  ;;  %v12864_v40 = vld [vmem:[#allocation2 + $0xa8] sm:$0xff] }
 0x2ff   : > { %v13826_v46 = vmax.f32 %v13825_v26, 0.0  ;;  %v12880_v22 = vld [vmem:[#allocation2 + $0xd8] sm:$0xff]  ;;  %v12886_v26 = vld [vmem:[#allocation2 + $0xe8] sm:$0xff] }
 0x300   : > { %v5336_v23 = vld [vmem:[#allocation2 + $0x87] sm:$0xff] }
 0x301   : > { %9390 = vmatmul.mubr.f32.gmra.mrb[84].mxu0 %v12423_v59  ;;  %8913 = vmatmul.mubr.f32.gmra.mrb[86].mxu1 %v13820_v25  ;;  %v13827_v59 = vld [vmem:[#allocation43_spill] sm:$0xff]  ;;  %v12871_v25 = vld [vmem:[#allocation2 + $0xc0] sm:$0xff] }
 0x302   : > { %9392 = vmatprep.mubr.f32.mxu0 %v12439_v42  ;;  %8915 = vmatprep.mubr.f32.mxu1 %v13822_v28  ;;  %v13828_v33 = vmax.f32 %v13827_v59, 0.0  ;;  %v13829_v42 = vld [vmem:[#allocation47_spill] sm:$0xff]  ;;  %v12892_v59 = vld [vmem:[#allocation2 + $0xf8] sm:$0xff] }
 0x303   : > { %v13830_v49 = vmax.f32 %v13829_v42, 0.0  ;;  %v12877_v28 = vld [vmem:[#allocation2 + $0xd0] sm:$0xff] }
 0x304   : > { %v7048_v42 = vld [vmem:[%s13561_s3 + $0x390] sm:$0xff] }
 0x305   : > { %9393 = vmatmul.mubr.f32.gmra.mrb[86].mxu0 %v13803_v57  ;;  %8916 = vmatmul.mubr.f32.gmra.mrb[88].mxu1 %v13824_v50  ;;  %v13831_v57 = vld [vmem:[#allocation46_spill] sm:$0xff]  ;;  %v12883_v50 = vld [vmem:[#allocation2 + $0xe0] sm:$0xff] }
 0x306   : > { %9395 = vmatprep.mubr.f32.mxu0 %v13805_v60  ;;  %8918 = vmatprep.mubr.f32.mxu1 %v13826_v46  ;;  %v13832_v19 = vmax.f32 %v13831_v57, 0.0  ;;  %v13833_v60 = vld [vmem:[#allocation49_spill] sm:$0xff]  ;;  %v12889_v46 = vld [vmem:[#allocation2 + $0xf0] sm:$0xff] }
 0x307   : > { %v13834_v30 = vmax.f32 %v13833_v60, 0.0  ;;  %v5324_v57 = vld [vmem:[#allocation2 + $0x27] sm:$0xff]  ;;  %v5325_v60 = vld [vmem:[#allocation2 + $0x2f] sm:$0xff] }
 0x309   : > { %9396 = vmatmul.mubr.f32.gmra.mrb[88].mxu0 %v13807_v9  ;;  %8919 = vmatmul.mubr.f32.gmra.mrb[90].mxu1 %v13828_v33  ;;  %v13835_v9 = vld [vmem:[#allocation58_spill] sm:$0xff]  ;;  %v12895_v33 = vld [vmem:[#allocation2 + $0x100] sm:$0xff] }
 0x30a   : > { %9398 = vmatprep.mubr.f32.mxu0 %v13809_v48  ;;  %8921 = vmatprep.mubr.f32.mxu1 %v13830_v49  ;;  %v7032_v48 = vld [vmem:[%s13561_s3 + $0x310] sm:$0xff]  ;;  %v7049_v49 = vld [vmem:[%s13561_s3 + $0x398] sm:$0xff] }
 0x30b   : > { %v9931_v1 = vpack.c.bf16 %v7033_v3, %v7032_v48  ;;  %v5327_v3 = vld [vmem:[#allocation2 + $0x3f] sm:$0xff] }
 0x30d   : > { %9399 = vmatmul.mubr.f32.gmra.mrb[90].mxu0 %v13810_v17  ;;  %8922 = vmatmul.mubr.f32.gmra.mrb[92].mxu1 %v13832_v19  ;;  %v13836_v17 = vld [vmem:[#allocation48_spill] sm:$0xff]  ;;  %v9963_v19 = vpack.c.bf16 %v7049_v49, %v7048_v42 }
 0x30e   : > { %9401 = vmatprep.mubr.f32.mxu0 %v12476_v24  ;;  %8924 = vmatprep.mubr.f32.mxu1 %v13834_v30  ;;  %v13837_v45 = vmax.f32 %v13836_v17, 0.0  ;;  %v12800_v24 = vld [vmem:[#allocation2 + $0x10] sm:$0xff]  ;;  %v7050_v30 = vld [vmem:[%s13561_s3 + $0x3a0] sm:$0xff] }
 0x30f   : > { %v7052_v17 = vld [vmem:[%s13561_s3 + $0x3b0] sm:$0xff]  ;;  %v5339_v49 = vld [vmem:[#allocation2 + $0x9f] sm:$0xff] }
 0x310   : > { %v5338_v42 = vld [vmem:[#allocation2 + $0x97] sm:$0xff] }
 0x311   : > { %9402 = vmatmul.mubr.f32.gmra.mrb[92].mxu0 %v13835_v9  ;;  %8925 = vmatmul.mubr.f32.gmra.mrb[94].mxu1 %v13837_v45  ;;  %v5326_v9 = vld [vmem:[#allocation2 + $0x37] sm:$0xff] }
 0x312   : > { %9404 = vmatprep.mubr.f32.mxu0 %v5966_v16  ;;  %8959 = vmatprep.mubr.f32.mxu1 %v12800_v24  ;;  %v7051_v16 = vld [vmem:[%s13561_s3 + $0x3a8] sm:$0xff]  ;;  %v7053_v45 = vld [vmem:[%s13561_s3 + $0x3b8] sm:$0xff] }
 0x313   : > { %v9967_v48 = vpack.c.bf16 %v7051_v16, %v7050_v30  ;;  %v5343_v30 = vld [vmem:[#allocation2 + $0xbf] sm:$0xff]  ;;  %v5344_v16 = vld [vmem:[#allocation2 + $0xc7] sm:$0xff] }
 0x315   : > { %9405 = vmatmul.mubr.f32.gmra.mrb[94].mxu0 %v5967_v56  ;;  %8960 = vmatmul.mubr.f32.vlgmr.msra.gmra.mrb[64].mxu1 %v12800_v24  ;;  %v5328_v56 = vld [vmem:[#allocation2 + $0x47] sm:$0xff] }
 0x316   : > { %8962 = vmatprep.mubr.f32.mxu1 %v12639_v41  ;;  %9930 = vmatpush3.bf16.msra.mxu1 %v9927_v32  ;;  %v7038_v41 = vld [vmem:[%s13561_s3 + $0x340] sm:$0xff]  ;;  %v7043_v32 = vld [vmem:[%s13561_s3 + $0x368] sm:$0xff] }
 0x317   : > { %9932 = vmatprep.subr.bf16.mxu1 %v9931_v1  ;;  %v9951_v44 = vpack.c.bf16 %v7043_v32, %v7042_v52  ;;  %v7059_v52 = vld [vmem:[%s13561_s3 + $0x3e8] sm:$0xff]  ;;  %v5334_v32 = vld [vmem:[#allocation2 + $0x77] sm:$0xff]  ;;  %9439 = vmatprep.mubr.msk.f32.mxu0 %vm10458_vm8, %v12800_v24 }
 0x319   : > { %8963 = vmatmul.mubr.f32.gmra.mrb[66].mxu1 %v12642_v31  ;;  %v9943_v31 = vpack.c.bf16 %v7039_v34, %v7038_v41  ;;  %v7056_v41 = vld [vmem:[%s13561_s3 + $0x3d0] sm:$0xff]  ;;  %v7057_v34 = vld [vmem:[%s13561_s3 + $0x3d8] sm:$0xff] }
 0x31a   : > { %8965 = vmatprep.mubr.f32.mxu1 %v12652_v5  ;;  %9934 = vmatpush3.bf16.msra.mxu1 %v9931_v1  ;;  %v9971_v1 = vpack.c.bf16 %v7053_v45, %v7052_v17  ;;  %v9979_v2 = vpack.c.bf16 %v7057_v34, %v7056_v41  ;;  %v5348_v17 = vld [vmem:[#allocation2 + $0xe7] sm:$0xff]  ;;  %v5349_v45 = vld [vmem:[#allocation2 + $0xef] sm:$0xff] }
 0x31b   : > { %9936 = vmatprep.subr.bf16.mxu1 %v9935_v15 }
 0x31d   : > { %8966 = vmatmul.mubr.f32.gmra.mrb[68].mxu1 %v12656_v43 }
 0x31e   : > { %8968 = vmatprep.mubr.f32.mxu1 %v12666_v8  ;;  %9938 = vmatpush3.bf16.msra.mxu1 %v9935_v15  ;;  %v7055_v15 = vld [vmem:[%s13561_s3 + $0x3c8] sm:$0xff] }
 0x31f   : > { %9940 = vmatprep.subr.bf16.mxu1 %v9939_v61  ;;  %v9975_v54 = vpack.c.bf16 %v7055_v15, %v7054_v14  ;;  %v5353_v14 = vld [vmem:[#allocation2 + $0x10f] sm:$0xff]  ;;  %v5354_v15 = vld [vmem:[#allocation2 + $0x117] sm:$0xff] }
 0x321   : > { %8969 = vmatmul.mubr.f32.gmra.mrb[70].mxu1 %v12670_v18 }
 0x322   : > { %8971 = vmatprep.mubr.f32.mxu1 %v12680_v53  ;;  %9942 = vmatpush3.bf16.msra.mxu1 %v9939_v61  ;;  %v5331_v61 = vld [vmem:[#allocation2 + $0x5f] sm:$0xff] }
 0x323   : > { %9944 = vmatprep.subr.bf16.mxu1 %v9943_v31 }
 0x325   : > { %8972 = vmatmul.mubr.f32.gmra.mrb[72].mxu1 %v12684_v36 }
 0x326   : > { %8974 = vmatprep.mubr.f32.mxu1 %v12694_v0  ;;  %9946 = vmatpush3.bf16.msra.mxu1 %v9943_v31  ;;  %v5332_v31 = vld [vmem:[#allocation2 + $0x67] sm:$0xff] }
 0x327   : > { %9948 = vmatprep.subr.bf16.mxu1 %v9947_v21 }
 0x329   : > { %8975 = vmatmul.mubr.f32.gmra.mrb[74].mxu1 %v12698_v10 }
 0x32a   : > { %8977 = vmatprep.mubr.f32.mxu1 %v12708_v62  ;;  %9950 = vmatpush3.bf16.msra.mxu1 %v9947_v21  ;;  %v7058_v21 = vld [vmem:[%s13561_s3 + $0x3e0] sm:$0xff] }
 0x32b   : > { %9952 = vmatprep.subr.bf16.mxu1 %v9951_v44 }
 0x32d   : > { %8978 = vmatmul.mubr.f32.gmra.mrb[76].mxu1 %v12712_v27 }
 0x32e   : > { %8980 = vmatprep.mubr.f32.mxu1 %v12722_v38  ;;  %9954 = vmatpush3.bf16.msra.mxu1 %v9951_v44  ;;  %v9983_v44 = vpack.c.bf16 %v7059_v52, %v7058_v21  ;;  %v6448_v21 = vld [vmem:[%s13563_s5 + $0x8] sm:$0xff]  ;;  %v10457_v52 = vmov 0.0|0.0  }
 0x32f   : > { %9956 = vmatprep.subr.bf16.mxu1 %v9955_v47  ;;  %10023 = vmatprep.subr.bf16.mxu0 %v10457_v52 }
 0x331   : > { %8981 = vmatmul.mubr.f32.gmra.mrb[78].mxu1 %v12726_v39 }
 0x332   : > { %8983 = vmatprep.mubr.f32.mxu1 %v12736_v11  ;;  %9958 = vmatpush3.bf16.msra.mxu1 %v9955_v47  ;;  %v7061_v47 = vld [vmem:[%s13561_s3 + $0x3f8] sm:$0xff] }
 0x333   : > { %9960 = vmatprep.subr.bf16.mxu1 %v9959_v4  ;;  %v9987_v20 = vpack.c.bf16 %v7061_v47, %v7060_v13  ;;  %v6451_v47 = vld [vmem:[%s13563_s5 + $0x20] sm:$0xff] }
 0x335   : > { %8984 = vmatmul.mubr.f32.gmra.mrb[80].mxu1 %v12740_v35 }
 0x336   : > { %8986 = vmatprep.mubr.f32.mxu1 %v12744_v29 }
 0x339   : > { %8987 = vmatmul.mubr.f32.gmra.mrb[82].mxu1 %v12748_v37 }
 0x33a   : > { %8989 = vmatprep.mubr.f32.mxu1 %v12864_v40 }
 0x33d   : > { %8990 = vmatmul.mubr.f32.gmra.mrb[84].mxu1 %v12755_v63 }
 0x33e   : > { %8992 = vmatprep.mubr.f32.mxu1 %v12868_v51 }
 0x341   : > { %8993 = vmatmul.mubr.f32.gmra.mrb[86].mxu1 %v12871_v25 }
 0x342   : > { %8995 = vmatprep.mubr.f32.mxu1 %v12874_v7 }
 0x345   : > { %8996 = vmatmul.mubr.f32.gmra.mrb[88].mxu1 %v12877_v28 }
 0x346   : > { %8998 = vmatprep.mubr.f32.mxu1 %v12880_v22 }
 0x349   : > { %8999 = vmatmul.mubr.f32.gmra.mrb[90].mxu1 %v12883_v50 }
 0x34a   : > { %9001 = vmatprep.mubr.f32.mxu1 %v12886_v26 }
 0x34d   : > { %9002 = vmatmul.mubr.f32.gmra.mrb[92].mxu1 %v12889_v46 }
 0x34e   : > { %9004 = vmatprep.mubr.f32.mxu1 %v12892_v59 }
 0x351   : > { %9005 = vmatmul.mubr.f32.gmra.mrb[94].mxu1 %v12895_v33 }
 0x352   : > { %9199 = vmatprep.mubr.f32.mxu1 %v5324_v57  ;;  %v5340_v57 = vld [vmem:[#allocation2 + $0xa7] sm:$0xff] }
 0x355   : > { %9200 = vmatmul.mubr.f32.vlgmr.msra.gmra.mrb[32].mxu1 %v5325_v60  ;;  %v5342_v60 = vld [vmem:[#allocation2 + $0xb7] sm:$0xff] }
 0x356   : > { %9202 = vmatprep.mubr.f32.mxu1 %v5326_v9  ;;  %9962 = vmatpush3.bf16.msra.mxu1 %v9959_v4  ;;  %v5337_v4 = vld [vmem:[#allocation2 + $0x8f] sm:$0xff] }
 0x357   : > { %9964 = vmatprep.subr.bf16.mxu1 %v9963_v19  ;;  %v5345_v9 = vld [vmem:[#allocation2 + $0xcf] sm:$0xff] }
 0x359   : > { %9203 = vmatmul.mubr.f32.gmra.mrb[34].mxu1 %v5327_v3  ;;  %v5347_v3 = vld [vmem:[#allocation2 + $0xdf] sm:$0xff] }
 0x35a   : > { %9205 = vmatprep.mubr.f32.mxu1 %v5328_v56  ;;  %9966 = vmatpush3.bf16.msra.mxu1 %v9963_v19  ;;  %v5341_v19 = vld [vmem:[#allocation2 + $0xaf] sm:$0xff]  ;;  %v5350_v56 = vld [vmem:[#allocation2 + $0xf7] sm:$0xff] }
 0x35b   : > { %9968 = vmatprep.subr.bf16.mxu1 %v9967_v48 }
 0x35d   : > { %9206 = vmatmul.mubr.f32.gmra.mrb[36].mxu1 %v5329_v6  ;;  %v5352_v6 = vld [vmem:[#allocation2 + $0x107] sm:$0xff] }
 0x35e   : > { %9208 = vmatprep.mubr.f32.mxu1 %v5330_v12  ;;  %9970 = vmatpush3.bf16.msra.mxu1 %v9967_v48  ;;  %v5346_v48 = vld [vmem:[#allocation2 + $0xd7] sm:$0xff]  ;;  %v5355_v12 = vld [vmem:[#allocation2 + $0x11f] sm:$0xff] }
 0x35f   : > { %9972 = vmatprep.subr.bf16.mxu1 %v9971_v1 }
 0x361   : > { %9209 = vmatmul.mubr.f32.gmra.mrb[38].mxu1 %v5331_v61 }
 0x362   : > { %9211 = vmatprep.mubr.f32.mxu1 %v5332_v31  ;;  %9974 = vmatpush3.bf16.msra.mxu1 %v9971_v1  ;;  %v5351_v1 = vld [vmem:[#allocation2 + $0xff] sm:$0xff] }
 0x363   : > { %9976 = vmatprep.subr.bf16.mxu1 %v9975_v54 }
 0x365   : > { %9212 = vmatmul.mubr.f32.gmra.mrb[40].mxu1 %v5333_v55  ;;  %v6447_v55 = vld [vmem:[%s13563_s5] sm:$0xff] }
 0x366   : > { %9214 = vmatprep.mubr.f32.mxu1 %v5334_v32  ;;  %9978 = vmatpush3.bf16.msra.mxu1 %v9975_v54  ;;  %v10024_v32 = vpack.c.bf16 %v6448_v21, %v6447_v55  ;;  %v6462_v55 = vld [vmem:[%s13563_s5 + $0x78] sm:$0xff] }
 0x367   : > { %9980 = vmatprep.subr.bf16.mxu1 %v9979_v2 }
 0x368   : > { %10025 = vmatpush3.bf16.msra.mxu0 %v10024_v32 }
 0x369   : > { %9215 = vmatmul.mubr.f32.gmra.mrb[42].mxu1 %v5335_v58  ;;  %10026 = vmatprep.subr.bf16.mxu0 %v10457_v52  ;;  %v6450_v58 = vld [vmem:[%s13563_s5 + $0x18] sm:$0xff] }
 0x36a   : > { %9217 = vmatprep.mubr.f32.mxu1 %v5336_v23  ;;  %9982 = vmatpush3.bf16.msra.mxu1 %v9979_v2  ;;  %v6452_v23 = vld [vmem:[%s13563_s5 + $0x28] sm:$0xff] }
 0x36b   : > { %9984 = vmatprep.subr.bf16.mxu1 %v9983_v44 }
 0x36d   : > { %9218 = vmatmul.mubr.f32.gmra.mrb[44].mxu1 %v5337_v4  ;;  %v6453_v4 = vld [vmem:[%s13563_s5 + $0x30] sm:$0xff] }
 0x36e   : > { %9220 = vmatprep.mubr.f32.mxu1 %v5338_v42  ;;  %9986 = vmatpush3.bf16.msra.mxu1 %v9983_v44  ;;  %v6449_v44 = vld [vmem:[%s13563_s5 + $0x10] sm:$0xff]  ;;  %v6454_v42 = vld [vmem:[%s13563_s5 + $0x38] sm:$0xff] }
 0x36f   : > { %9988 = vmatprep.subr.bf16.mxu1 %v9987_v20  ;;  %v10027_v13 = vpack.c.bf16 %v6450_v58, %v6449_v44 }
 0x371   : > { %9221 = vmatmul.mubr.f32.gmra.mrb[46].mxu1 %v5339_v49  ;;  %10028 = vmatpush3.bf16.msra.mxu0 %v10027_v13  ;;  %v10033_v49 = vpack.c.bf16 %v6454_v42, %v6453_v4 }
 0x372   : > { %9223 = vmatprep.mubr.f32.mxu1 %v5340_v57  ;;  %9990 = vmatpush3.bf16.msra.mxu1 %v9987_v20  ;;  %v10030_v20 = vpack.c.bf16 %v6452_v23, %v6451_v47  ;;  %v6455_v57 = vld [vmem:[%s13563_s5 + $0x40] sm:$0xff] }
 0x373   : > { %9442 = vmatprep.subr.mxu1 %v12800_v24  ;;  %10029 = vmatprep.subr.bf16.mxu0 %v10457_v52  ;;  %v6535_v47 = vld [vmem:[%s13565_s7] sm:$0x3] }
 0x375   : > { %9224 = vmatmul.mubr.f32.gmra.mrb[48].mxu1 %v5341_v19  ;;  %10031 = vmatpush3.bf16.msra.mxu0 %v10030_v20  ;;  %v6456_v19 = vld [vmem:[%s13563_s5 + $0x48] sm:$0xff] }
 0x376   : > { %9226 = vmatprep.mubr.f32.mxu1 %v5342_v60  ;;  %10032 = vmatprep.subr.bf16.mxu0 %v10457_v52  ;;  %v10036_v60 = vpack.c.bf16 %v6456_v19, %v6455_v57 }
 0x379   : > { %9227 = vmatmul.mubr.f32.gmra.mrb[50].mxu1 %v5343_v30  ;;  %10034 = vmatpush3.bf16.msra.mxu0 %v10033_v49 }
 0x37a   : > { %9229 = vmatprep.mubr.f32.mxu1 %v5344_v16  ;;  %10035 = vmatprep.subr.bf16.mxu0 %v10457_v52 }
 0x37d   : > { %9230 = vmatmul.mubr.f32.gmra.mrb[52].mxu1 %v5345_v9  ;;  %10037 = vmatpush3.bf16.msra.mxu0 %v10036_v60 }
 0x37e   : > { %9232 = vmatprep.mubr.f32.mxu1 %v5346_v48  ;;  %10038 = vmatprep.subr.bf16.mxu0 %v10457_v52 }
 0x381   : > { %9233 = vmatmul.mubr.f32.gmra.mrb[54].mxu1 %v5347_v3 }
 0x382   : > { %9235 = vmatprep.mubr.f32.mxu1 %v5348_v17 }
 0x385   : > { %9236 = vmatmul.mubr.f32.gmra.mrb[56].mxu1 %v5349_v45  ;;  %v6457_v45 = vld [vmem:[%s13563_s5 + $0x50] sm:$0xff] }
 0x386   : > { %9238 = vmatprep.mubr.f32.mxu1 %v5350_v56  ;;  %v6458_v56 = vld [vmem:[%s13563_s5 + $0x58] sm:$0xff] }
 0x389   : > { %9239 = vmatmul.mubr.f32.gmra.mrb[58].mxu1 %v5351_v1 }
 0x38a   : > { %9241 = vmatprep.mubr.f32.mxu1 %v5352_v6  ;;  %v10039_v6 = vpack.c.bf16 %v6458_v56, %v6457_v45 }
 0x38c   : > { %10040 = vmatpush3.bf16.msra.mxu0 %v10039_v6 }
 0x38d   : > { %9242 = vmatmul.mubr.f32.gmra.mrb[60].mxu1 %v5353_v14  ;;  %10041 = vmatprep.subr.bf16.mxu0 %v10457_v52 }
 0x38e   : > { %9244 = vmatprep.mubr.f32.mxu1 %v5354_v15  ;;  %v6459_v15 = vld [vmem:[%s13563_s5 + $0x60] sm:$0xff] }
 0x391   : > { %9245 = vmatmul.mubr.f32.gmra.mrb[62].mxu1 %v5355_v12  ;;  %v6460_v12 = vld [vmem:[%s13563_s5 + $0x68] sm:$0xff] }
 0x392   : > { %9279 = vmatprep.mubr.f32.mxu1 %v12652_v5 }
 0x395   : > { %9280 = vmatmul.mubr.f32.vlgmr.msra.gmra.mrb[64].mxu1 %v12656_v43 }
 0x396   : > { %9282 = vmatprep.mubr.f32.mxu1 %v12666_v8  ;;  %9443 = vmatpush3.msk.msra.mxu1 %vm6541_vm7, %v6535_v47 }
 0x399   : > { %9283 = vmatmul.mubr.f32.gmra.mrb[66].mxu1 %v12670_v18 }
 0x39a   : > { %9285 = vmatprep.mubr.f32.mxu1 %v12680_v53 }
 0x39d   : > { %9286 = vmatmul.mubr.f32.gmra.mrb[68].mxu1 %v12684_v36 }
 0x39e   : > { %9288 = vmatprep.mubr.f32.mxu1 %v12694_v0 }
 0x3a1   : > { %9289 = vmatmul.mubr.f32.gmra.mrb[70].mxu1 %v12698_v10 }
 0x3a2   : > { %9291 = vmatprep.mubr.f32.mxu1 %v12708_v62 }
 0x3a5   : > { %9292 = vmatmul.mubr.f32.gmra.mrb[72].mxu1 %v12712_v27 }
 0x3a6   : > { %9294 = vmatprep.mubr.f32.mxu1 %v12722_v38 }
 0x3a9   : > { %9295 = vmatmul.mubr.f32.gmra.mrb[74].mxu1 %v12726_v39 }
 0x3aa   : > { %9297 = vmatprep.mubr.f32.mxu1 %v12736_v11 }
 0x3ac   : > { %v12954_v5 = vpop.f32.mrb[64].mxu0 }
 0x3ad   : > { %v12956_v43 = vpop.f32.mrb[65].mxu0  ;;  %9298 = vmatmul.mubr.f32.gmra.mrb[76].mxu1 %v12740_v35 }
 0x3ae   : > { %9300 = vmatprep.mubr.f32.mxu1 %v12744_v29 }
 0x3b0   : > { %v12960_v8 = vpop.f32.mrb[66].mxu0 }
 0x3b1   : > { %v12962_v18 = vpop.f32.mrb[67].mxu0  ;;  %9301 = vmatmul.mubr.f32.gmra.mrb[78].mxu1 %v12748_v37 }
 0x3b2   : > { %9303 = vmatprep.mubr.f32.mxu1 %v12864_v40 }
 0x3b4   : > { %v12966_v53 = vpop.f32.mrb[68].mxu0 }
 0x3b5   : > { %v12968_v36 = vpop.f32.mrb[69].mxu0  ;;  %9304 = vmatmul.mubr.f32.gmra.mrb[80].mxu1 %v12755_v63  ;;  %v5658_v63 = vld [vmem:[#allocation2 + $0x108] sm:$0xff] }
 0x3b6   : > { %9306 = vmatprep.mubr.f32.mxu1 %v12868_v51 }
 0x3b8   : > { %v12972_v0 = vpop.f32.mrb[70].mxu0 }
 0x3b9   : > { %v12974_v10 = vpop.f32.mrb[71].mxu0  ;;  %9307 = vmatmul.mubr.f32.gmra.mrb[82].mxu1 %v12871_v25  ;;  %v5659_v25 = vld [vmem:[#allocation2 + $0x110] sm:$0xff] }
 0x3ba   : > { %9309 = vmatprep.mubr.f32.mxu1 %v12874_v7 }
 0x3bc   : > { %v12978_v62 = vpop.f32.mrb[72].mxu0 }
 0x3bd   : > { %v12980_v27 = vpop.f32.mrb[73].mxu0  ;;  %9310 = vmatmul.mubr.f32.gmra.mrb[84].mxu1 %v12877_v28 }
 0x3be   : > { %9312 = vmatprep.mubr.f32.mxu1 %v12880_v22 }
 0x3c0   : > { %v12984_v38 = vpop.f32.mrb[74].mxu0 }
 0x3c1   : > { %v12986_v39 = vpop.f32.mrb[75].mxu0  ;;  %9313 = vmatmul.mubr.f32.gmra.mrb[86].mxu1 %v12883_v50 }
 0x3c2   : > { %9315 = vmatprep.mubr.f32.mxu1 %v12886_v26 }
 0x3c4   : > { %v12990_v11 = vpop.f32.mrb[76].mxu0 }
 0x3c5   : > { %v12992_v35 = vpop.f32.mrb[77].mxu0  ;;  %9316 = vmatmul.mubr.f32.gmra.mrb[88].mxu1 %v12889_v46 }
 0x3c6   : > { %9318 = vmatprep.mubr.f32.mxu1 %v12892_v59 }
 0x3c8   : > { %v12996_v29 = vpop.f32.mrb[78].mxu0 }
 0x3c9   : > { %v12998_v37 = vpop.f32.mrb[79].mxu0  ;;  %9319 = vmatmul.mubr.f32.gmra.mrb[90].mxu1 %v12895_v33 }
 0x3ca   : > { %9321 = vmatprep.mubr.f32.mxu1 %v5658_v63  ;;  %v10042_v63 = vpack.c.bf16 %v6460_v12, %v6459_v15 }
 0x3cc   : > { %v13001_v40 = vpop.f32.mrb[80].mxu0  ;;  %10043 = vmatpush3.bf16.msra.mxu0 %v10042_v63 }
 0x3cd   : > { %v13003_v51 = vpop.f32.mrb[81].mxu0  ;;  %9322 = vmatmul.mubr.f32.gmra.mrb[92].mxu1 %v5659_v25  ;;  %v6461_v25 = vld [vmem:[%s13563_s5 + $0x70] sm:$0xff]  ;;  %10044 = vmatprep.subr.bf16.mxu0 %v10457_v52 }
 0x3ce   : > { %9324 = vmatprep.mubr.f32.mxu1 %v12800_v24  ;;  %v10045_v44 = vpack.c.bf16 %v6462_v55, %v6461_v25 }
 0x3d0   : > { %v13006_v7 = vpop.f32.mrb[82].mxu0  ;;  %10046 = vmatpush3.bf16.msra.mxu0 %v10045_v44 }
 0x3d1   : > { %v13008_v28 = vpop.f32.mrb[83].mxu0  ;;  %9325 = vmatmul.mubr.f32.gmra.mrb[94].mxu1 %v12800_v24 }
 0x3d2   : > { %9444 = vmatprep.mubr.msk.f32.mxu1 %vm10458_vm8, %v12800_v24 }
 0x3d4   : > { %v13011_v22 = vpop.f32.mrb[84].mxu0 }
 0x3d5   : > { %v13013_v50 = vpop.f32.mrb[85].mxu0 }
 0x3d8   : > { %v13015_v26 = vpop.f32.mrb[86].mxu0 }
 0x3d9   : > { %v13017_v46 = vpop.f32.mrb[87].mxu0 }
 0x3dc   : > { %v13019_v59 = vpop.f32.mrb[88].mxu0 }
 0x3dd   : > { %v13021_v33 = vpop.f32.mrb[89].mxu0 }
 0x3de   : > { %13838 = vst [vmem:[#allocation32_spill] sm:$0xff] %v13021_v33 }
 0x3e0   : > { %v13023_v54 = vpop.f32.mrb[90].mxu0 }
 0x3e1   : > { %13839 = vst [vmem:[#allocation50_spill] sm:$0xff] %v13023_v54  ;;  %v13025_v61 = vpop.f32.mrb[91].mxu0 }
 0x3e2   : > { %13840 = vst [vmem:[#allocation51_spill] sm:$0xff] %v13025_v61 }
 0x3e4   : > { %v13027_v41 = vpop.f32.mrb[92].mxu0 }
 0x3e5   : > { %13841 = vst [vmem:[#allocation52_spill] sm:$0xff] %v13027_v41  ;;  %v13029_v34 = vpop.f32.mrb[93].mxu0 }
 0x3e6   : > { %13842 = vst [vmem:[#allocation53_spill] sm:$0xff] %v13029_v34 }
 0x3e8   : > { %v13031_v31 = vpop.f32.mrb[94].mxu0 }
 0x3e9   : > { %13843 = vst [vmem:[#allocation54_spill] sm:$0xff] %v13031_v31  ;;  %v13033_v2 = vpop.f32.mrb[95].mxu0 }
 0x3ea   : > { %13844 = vst [vmem:[#allocation55_spill] sm:$0xff] %v13033_v2 }
 0x428   : > { %v9201_v30 = vpop.f32.mrb[32].mxu1 }
 0x429   : > { %v5439_v16 = vpop.f32.mrb[33].mxu1 }
 0x42a   : > { %v6242_v34 = vsel %vm11740_vm0, %v5439_v16, 0.0 }
 0x42c   : > { %v9204_v9 = vpop.f32.mrb[34].mxu1 }
 0x42d   : > { %v13065_v48 = vpop.f32.mrb[35].mxu1 }
 0x42e   : > { %v6244_v31 = vsel %vm11753_vm1, %v13065_v48, 0.0 }
 0x430   : > { %v13067_v3 = vpop.f32.mrb[36].mxu1 }
 0x431   : > { %v13069_v17 = vpop.f32.mrb[37].mxu1 }
 0x434   : > { %v13077_v1 = vpop.f32.mrb[38].mxu1 }
 0x435   : > { %v13079_v14 = vpop.f32.mrb[39].mxu1 }
 0x438   : > { %v13094_v21 = vpop.f32.mrb[40].mxu1 }
 0x439   : > { %v13097_v32 = vpop.f32.mrb[41].mxu1 }
 0x43c   : > { %v13099_v58 = vpop.f32.mrb[42].mxu1 }
 0x43d   : > { %v13101_v13 = vpop.f32.mrb[43].mxu1 }
 0x440   : > { %v13106_v23 = vpop.f32.mrb[44].mxu1 }
 0x441   : > { %v13108_v20 = vpop.f32.mrb[45].mxu1 }
 0x444   : > { %v13110_v24 = vpop.f32.mrb[46].mxu1 }
 0x445   : > { %v13112_v4 = vpop.f32.mrb[47].mxu1 }
 0x448   : > { %v13114_v52 = vpop.f32.mrb[48].mxu1 }
 0x449   : > { %v13116_v42 = vpop.f32.mrb[49].mxu1 }
 0x44c   : > { %v13118_v49 = vpop.f32.mrb[50].mxu1 }
 0x44d   : > { %v13120_v57 = vpop.f32.mrb[51].mxu1 }
 0x450   : > { %v13122_v19 = vpop.f32.mrb[52].mxu1 }
 0x451   : > { %v13124_v60 = vpop.f32.mrb[53].mxu1 }
 0x454   : > { %v13126_v45 = vpop.f32.mrb[54].mxu1 }
 0x455   : > { %v13128_v56 = vpop.f32.mrb[55].mxu1 }
 0x458   : > { %v13130_v6 = vpop.f32.mrb[56].mxu1 }
 0x459   : > { %v13132_v15 = vpop.f32.mrb[57].mxu1 }
 0x45c   : > { %v13134_v12 = vpop.f32.mrb[58].mxu1 }
 0x45d   : > { %13845 = vst [vmem:[#allocation56_spill] sm:$0xff] %v13134_v12  ;;  %v13136_v63 = vpop.f32.mrb[59].mxu1  ;;  %v6307_v12 = vsel %vm11946_vm14, %v12954_v5, 0.0  ;;  %v6309_v5 = vsel %vm11963_vm15, %v12960_v8, 0.0 }
 0x45e   : > { %13846 = vst [vmem:[#allocation57_spill] sm:$0xff] %v13136_v63 }
 0x460   : > { %v13138_v25 = vpop.f32.mrb[60].mxu1 }
 0x461   : > { %13847 = vst [vmem:[#allocation31_spill] sm:$0xff] %v13138_v25  ;;  %v13140_v55 = vpop.f32.mrb[61].mxu1  ;;  %v13154_v25 = vld [vmem:[%s13562_s4] ss:$0 sm:$0xff] }
 0x462   : > { %13848 = vst [vmem:[#allocation35_spill] sm:$0xff] %v13140_v55 }
 0x464   : > { %v13142_v44 = vpop.f32.mrb[62].mxu1 }
 0x465   : > { %13849 = vst [vmem:[#allocation34_spill] sm:$0xff] %v13142_v44  ;;  %v13144_v47 = vpop.f32.mrb[63].mxu1 }
 0x466   : > { %13850 = vst [vmem:[#allocation38_spill] sm:$0xff] %v13144_v47 }
 0x468   : > { %v9281_v2 = vpop.f32.mrb[64].mxu1 }
 0x469   : > { %v6275_v41 = vadd.f32 %v9281_v2, %v9201_v30  ;;  %v5745_v61 = vpop.f32.mrb[65].mxu1 }
 0x46a   : > { %v6274_v33 = vadd.f32 %v6242_v34, %v5745_v61 }
 0x46b   : > { %v6339_v55 = vadd.f32 %v6307_v12, %v6275_v41 }
 0x46c   : > { %v6338_v44 = vadd.f32 %v6274_v33, %v12956_v43  ;;  %v9284_v47 = vpop.f32.mrb[66].mxu1 }
 0x46d   : > { %v6277_v2 = vadd.f32 %v9284_v47, %v9204_v9  ;;  %v5755_v30 = vpop.f32.mrb[67].mxu1  ;;  %v13164_v54 = vadd.f32 %v13154_v25, %v6339_v55  ;;  %v6246_v9 = vsel %vm11766_vm2, %v13069_v17, 0.0  ;;  %v6311_v55 = vsel %vm11971_vm13, %v12966_v53, 0.0 }
 0x46e   : > { %v13167_v61 = vadd.f32 %v13154_v25, %v6338_v44  ;;  %v6276_v41 = vadd.f32 %v6244_v31, %v5755_v30  ;;  %v6248_v53 = vsel %vm11779_vm3, %v13079_v14, 0.0 }
 0x46f   : > { %v6341_v34 = vadd.f32 %v6309_v5, %v6277_v2 }
 0x470   : > { %v6340_v43 = vadd.f32 %v6276_v41, %v12962_v18  ;;  %v9287_v33 = vpop.f32.mrb[68].mxu1  ;;  %v6408_v44 = vadd.f32 %v13164_v54, %v13167_v61 }
 0x471   : > { %v6279_v48 = vadd.f32 %v9287_v33, %v13067_v3  ;;  %v5765_v63 = vpop.f32.mrb[69].mxu1  ;;  %v13183_v2 = vadd.f32 %v13154_v25, %v6341_v34  ;;  %v6313_v33 = vsel %vm11982_vm12, %v12972_v0, 0.0 }
 0x472   : > { %v13180_v47 = vadd.f32 %v13154_v25, %v6340_v43  ;;  %v6278_v31 = vadd.f32 %v6246_v9, %v5765_v63 }
 0x473   : > { %v6343_v18 = vadd.f32 %v6311_v55, %v6279_v48  ;;  %v6250_v55 = vsel %vm11792_vm4, %v13097_v32, 0.0 }
 0x474   : > { %v6409_v17 = vadd.f32 %v6408_v44, %v13180_v47  ;;  %v6342_v3 = vadd.f32 %v6278_v31, %v12968_v36  ;;  %v9290_v30 = vpop.f32.mrb[70].mxu1  ;;  %v6319_v31 = vsel %vm12067_vm9, %v12990_v11, 0.0 }
 0x475   : > { %v6281_v5 = vadd.f32 %v9290_v30, %v13077_v1  ;;  %v5775_v41 = vpop.f32.mrb[71].mxu1  ;;  %v13199_v36 = vadd.f32 %v13154_v25, %v6343_v18 }
 0x476   : > { %v13195_v12 = vadd.f32 %v13154_v25, %v6342_v3  ;;  %v6410_v34 = vadd.f32 %v6409_v17, %v13183_v2  ;;  %v6280_v9 = vadd.f32 %v6248_v53, %v5775_v41  ;;  %v6315_v17 = vsel %vm11999_vm11, %v12978_v62, 0.0 }
 0x477   : > { %v6345_v48 = vadd.f32 %v6313_v33, %v6281_v5  ;;  %v6252_v41 = vsel %vm11805_vm5, %v13101_v13, 0.0 }
 0x478   : > { %v6411_v63 = vadd.f32 %v6410_v34, %v13195_v12  ;;  %v6344_v14 = vadd.f32 %v6280_v9, %v12974_v10  ;;  %v9293_v1 = vpop.f32.mrb[72].mxu1  ;;  %v6317_v34 = vsel %vm12031_vm10, %v12984_v38, 0.0 }
 0x479   : > { %v6283_v0 = vadd.f32 %v9293_v1, %v13094_v21  ;;  %v5785_v44 = vpop.f32.mrb[73].mxu1  ;;  %v13215_v10 = vadd.f32 %v13154_v25, %v6345_v48 }
 0x47a   : > { %v13211_v3 = vadd.f32 %v13154_v25, %v6344_v14  ;;  %v6412_v18 = vadd.f32 %v6411_v63, %v13199_v36  ;;  %v6282_v30 = vadd.f32 %v6250_v55, %v5785_v44  ;;  %v6254_v55 = vsel %vm11818_vm6, %v13108_v20, 0.0 }
 0x47b   : > { %v6347_v16 = vadd.f32 %v6315_v17, %v6283_v0 }
 0x47c   : > { %v6413_v53 = vadd.f32 %v6412_v18, %v13211_v3  ;;  %v6346_v32 = vadd.f32 %v6282_v30, %v12980_v27  ;;  %v9296_v21 = vpop.f32.mrb[74].mxu1 }
 0x47d   : > { %v6285_v62 = vadd.f32 %v9296_v21, %v13099_v58  ;;  %v5795_v43 = vpop.f32.mrb[75].mxu1  ;;  %v13231_v27 = vadd.f32 %v13154_v25, %v6347_v16 }
 0x47e   : > { %v13227_v9 = vadd.f32 %v13154_v25, %v6346_v32  ;;  %v6414_v48 = vadd.f32 %v6413_v53, %v13215_v10  ;;  %v6284_v63 = vadd.f32 %v6252_v41, %v5795_v43  ;;  %v13865_v32 = vld [vmem:[#allocation11_spill] sm:$0xff] }
 0x47f   : > { %v6349_v14 = vadd.f32 %v6317_v34, %v6285_v62  ;;  %vm13866_vm0 = vnez %v13865_v32  ;;  %v13867_v41 = vld [vmem:[#allocation27_spill] sm:$0xff] }
 0x480   : > { %v6415_v1 = vadd.f32 %v6414_v48, %v13227_v9  ;;  %v6348_v13 = vadd.f32 %v6284_v63, %v12986_v39  ;;  %v9299_v58 = vpop.f32.mrb[76].mxu1  ;;  %v6256_v21 = vsel %vm13866_vm0, %v13112_v4, 0.0  ;;  %vm13868_vm1 = vnez %v13867_v41  ;;  %v13877_v41 = vld [vmem:[#allocation14_spill] sm:$0xff] }
 0x481   : > { %v6287_v38 = vadd.f32 %v9299_v58, %v13106_v23  ;;  %v5805_v0 = vpop.f32.mrb[77].mxu1  ;;  %v13247_v39 = vadd.f32 %v13154_v25, %v6349_v14  ;;  %v6321_v62 = vsel %vm13868_vm1, %v12996_v29, 0.0  ;;  %v13869_v14 = vld [vmem:[#allocation12_spill] sm:$0xff]  ;;  %vm13878_vm6 = vnez %v13877_v41  ;;  %v13891_v41 = vld [vmem:[#allocation17_spill] sm:$0xff] }
 0x482   : > { %v13243_v17 = vadd.f32 %v13154_v25, %v6348_v13  ;;  %v6416_v18 = vadd.f32 %v6415_v1, %v13231_v27  ;;  %v6286_v30 = vadd.f32 %v6254_v55, %v5805_v0  ;;  %vm13870_vm2 = vnez %v13869_v14  ;;  %v13871_v58 = vld [vmem:[#allocation28_spill] sm:$0xff] }
 0x483   : > { %v6351_v16 = vadd.f32 %v6319_v31, %v6287_v38  ;;  %v6258_v1 = vsel %vm13870_vm2, %v13116_v42, 0.0  ;;  %vm13872_vm3 = vnez %v13871_v58  ;;  %vm13892_vm12 = vnez %v13891_v41 }
 0x484   : > { %v6417_v53 = vadd.f32 %v6416_v18, %v13243_v17  ;;  %v6350_v20 = vadd.f32 %v6286_v30, %v12992_v35  ;;  %v9302_v23 = vpop.f32.mrb[78].mxu1  ;;  %v6323_v8 = vsel %vm13872_vm3, %v13001_v40, 0.0  ;;  %v13873_v18 = vld [vmem:[#allocation13_spill] sm:$0xff]  ;;  %vm6537_vm2 = vcmask 15360  }
 0x485   : > { %v6289_v11 = vadd.f32 %v9302_v23, %v13110_v24  ;;  %v5815_v5 = vpop.f32.mrb[79].mxu1  ;;  %v13263_v35 = vadd.f32 %v13154_v25, %v6351_v16  ;;  %vm13874_vm4 = vnez %v13873_v18  ;;  %v13885_v18 = vld [vmem:[#allocation16_spill] sm:$0xff] }
 0x486   : > { %v13259_v43 = vadd.f32 %v13154_v25, %v6350_v20  ;;  %v6418_v33 = vadd.f32 %v6417_v53, %v13247_v39  ;;  %v6288_v34 = vadd.f32 %v6256_v21, %v5815_v5  ;;  %v6260_v30 = vsel %vm13874_vm4, %v13120_v57, 0.0  ;;  %v13875_v53 = vld [vmem:[#allocation29_spill] sm:$0xff] }
 0x487   : > { %v6353_v48 = vadd.f32 %v6321_v62, %v6289_v11  ;;  %vm13876_vm5 = vnez %v13875_v53  ;;  %v6262_v62 = vsel %vm13878_vm6, %v13124_v60, 0.0  ;;  %vm13886_vm10 = vnez %v13885_v18 }
 0x488   : > { %v6419_v63 = vadd.f32 %v6418_v33, %v13259_v43  ;;  %v6352_v4 = vadd.f32 %v6288_v34, %v12998_v37  ;;  %v9305_v24 = vpop.f32.mrb[80].mxu1  ;;  %v6325_v20 = vsel %vm13876_vm5, %v13006_v7, 0.0  ;;  %v13879_v34 = vld [vmem:[#allocation30_spill] sm:$0xff] }
 0x489   : > { %v6291_v29 = vadd.f32 %v9305_v24, %v13114_v52  ;;  %v5825_v13 = vpop.f32.mrb[81].mxu1  ;;  %v13279_v37 = vadd.f32 %v13154_v25, %v6353_v48  ;;  %vm13880_vm7 = vnez %v13879_v34  ;;  %v13894_v34 = vld [vmem:[#allocation50_spill] sm:$0xff] }
 0x48a   : > { %v13275_v55 = vadd.f32 %v13154_v25, %v6352_v4  ;;  %v6420_v38 = vadd.f32 %v6419_v63, %v13263_v35  ;;  %v6290_v0 = vadd.f32 %v6258_v1, %v5825_v13  ;;  %v6327_v48 = vsel %vm13880_vm7, %v13011_v22, 0.0 }
 0x48b   : > { %v6355_v44 = vadd.f32 %v6323_v8, %v6291_v29  ;;  %v13881_v29 = vld [vmem:[#allocation15_spill] sm:$0xff]  ;;  %v13883_v8 = vld [vmem:[#allocation33_spill] sm:$0xff] }
 0x48c   : > { %v6421_v31 = vadd.f32 %v6420_v38, %v13275_v55  ;;  %v6354_v42 = vadd.f32 %v6290_v0, %v13003_v51  ;;  %v9308_v52 = vpop.f32.mrb[82].mxu1  ;;  %vm13882_vm8 = vnez %v13881_v29  ;;  %vm13884_vm9 = vnez %v13883_v8  ;;  %v13898_v8 = vld [vmem:[#allocation35_spill] sm:$0xff] }
 0x48d   : > { %v6293_v40 = vadd.f32 %v9308_v52, %v13118_v49  ;;  %v5835_v16 = vpop.f32.mrb[83].mxu1  ;;  %v13295_v51 = vadd.f32 %v13154_v25, %v6355_v44  ;;  %v6264_v13 = vsel %vm13882_vm8, %v13128_v56, 0.0  ;;  %v6329_v38 = vsel %vm13884_vm9, %v13015_v26, 0.0 }
 0x48e   : > { %v13291_v23 = vadd.f32 %v13154_v25, %v6354_v42  ;;  %v6422_v32 = vadd.f32 %v6421_v31, %v13279_v37  ;;  %v6292_v21 = vadd.f32 %v6260_v30, %v5835_v16  ;;  %v6266_v30 = vsel %vm13886_vm10, %v13132_v15, 0.0  ;;  %v13887_v16 = vld [vmem:[#allocation36_spill] sm:$0xff] }
 0x48f   : > { %v6357_v11 = vadd.f32 %v6325_v20, %v6293_v40  ;;  %vm13888_vm11 = vnez %v13887_v16  ;;  %v13889_v15 = vld [vmem:[#allocation32_spill] sm:$0xff] }
 0x490   : > { %v6423_v5 = vadd.f32 %v6422_v32, %v13291_v23  ;;  %v6356_v57 = vadd.f32 %v6292_v21, %v13008_v28  ;;  %v9311_v49 = vpop.f32.mrb[84].mxu1  ;;  %v6331_v53 = vsel %vm13888_vm11, %v13019_v59, 0.0  ;;  %v13893_v59 = vld [vmem:[#allocation56_spill] sm:$0xff] }
 0x491   : > { %v6295_v7 = vadd.f32 %v9311_v49, %v13122_v19  ;;  %v5845_v33 = vpop.f32.mrb[85].mxu1  ;;  %v13311_v28 = vadd.f32 %v13154_v25, %v6357_v11  ;;  %v13890_v49 = vld [vmem:[#allocation57_spill] sm:$0xff] }
 0x492   : > { %v13307_v63 = vadd.f32 %v13154_v25, %v6356_v57  ;;  %v6424_v4 = vadd.f32 %v6423_v5, %v13295_v51  ;;  %v6294_v24 = vadd.f32 %v6262_v62, %v5845_v33  ;;  %v6268_v62 = vsel %vm13892_vm12, %v13890_v49, 0.0  ;;  %v13909_v49 = vld [vmem:[#allocation34_spill] sm:$0xff] }
 0x493   : > { %v6359_v14 = vadd.f32 %v6327_v48, %v6295_v7  ;;  %v13895_v48 = vld [vmem:[#allocation39_spill] sm:$0xff] }
 0x494   : > { %v6425_v1 = vadd.f32 %v6424_v4, %v13307_v63  ;;  %v6358_v60 = vadd.f32 %v6294_v24, %v13013_v50  ;;  %v9314_v19 = vpop.f32.mrb[86].mxu1  ;;  %vm13896_vm13 = vnez %v13895_v48 }
 0x495   : > { %v6297_v22 = vadd.f32 %v9314_v19, %v13126_v45  ;;  %v5855_v58 = vpop.f32.mrb[87].mxu1  ;;  %v13327_v50 = vadd.f32 %v13154_v25, %v6359_v14  ;;  %v6333_v4 = vsel %vm13896_vm13, %v13894_v34, 0.0 }
 0x496   : > { %v13323_v0 = vadd.f32 %v13154_v25, %v6358_v60  ;;  %v6426_v44 = vadd.f32 %v6425_v1, %v13311_v28  ;;  %v6296_v31 = vadd.f32 %v6264_v13, %v5855_v58  ;;  %v13897_v13 = vld [vmem:[#allocation51_spill] sm:$0xff] }
 0x497   : > { %v6361_v42 = vadd.f32 %v6329_v38, %v6297_v22  ;;  %v13899_v38 = vld [vmem:[#allocation18_spill] sm:$0xff] }
 0x498   : > { %v6427_v52 = vadd.f32 %v6426_v44, %v13323_v0  ;;  %v6360_v56 = vadd.f32 %v6296_v31, %v13017_v46  ;;  %v9317_v45 = vpop.f32.mrb[88].mxu1  ;;  %vm13900_vm14 = vnez %v13899_v38  ;;  %v13901_v31 = vld [vmem:[#allocation31_spill] sm:$0xff] }
 0x499   : > { %v6299_v26 = vadd.f32 %v9317_v45, %v13130_v6  ;;  %v5865_v40 = vpop.f32.mrb[89].mxu1  ;;  %v13343_v46 = vadd.f32 %v13154_v25, %v6361_v42  ;;  %v6270_v44 = vsel %vm13900_vm14, %v13898_v8, 0.0  ;;  %v13903_v45 = vld [vmem:[#allocation42_spill] sm:$0xff] }
 0x49a   : > { %v13339_v20 = vadd.f32 %v13154_v25, %v6360_v56  ;;  %v6428_v32 = vadd.f32 %v6427_v52, %v13327_v50  ;;  %v6298_v21 = vadd.f32 %v6266_v30, %v5865_v40  ;;  %v13902_v56 = vld [vmem:[#allocation52_spill] sm:$0xff]  ;;  %vm13904_vm15 = vnez %v13903_v45 }
 0x49b   : > { %v6363_v11 = vadd.f32 %v6331_v53, %v6299_v26  ;;  %v6335_v18 = vsel %vm13904_vm15, %v13902_v56, 0.0 }
 0x49c   : > { %v6429_v5 = vadd.f32 %v6428_v32, %v13339_v20  ;;  %v6362_v57 = vadd.f32 %v6298_v21, %v13889_v15  ;;  %v9320_v6 = vpop.f32.mrb[90].mxu1  ;;  %v13905_v21 = vld [vmem:[#allocation53_spill] sm:$0xff]  ;;  %v13906_v15 = vld [vmem:[#allocation38_spill] sm:$0xff] }
 0x49d   : > { %v6301_v7 = vadd.f32 %v9320_v6, %v13893_v59  ;;  %v5875_v33 = vpop.f32.mrb[91].mxu1  ;;  %v13359_v19 = vadd.f32 %v13154_v25, %v6363_v11  ;;  %v13910_v59 = vld [vmem:[#allocation54_spill] sm:$0xff] }
 0x49e   : > { %v13355_v24 = vadd.f32 %v13154_v25, %v6362_v57  ;;  %v6430_v14 = vadd.f32 %v6429_v5, %v13343_v46  ;;  %v6300_v1 = vadd.f32 %v6268_v62, %v5875_v33  ;;  %v13907_v57 = vld [vmem:[#allocation19_spill] sm:$0xff] }
 0x49f   : > { %v6365_v60 = vadd.f32 %v6333_v4, %v6301_v7  ;;  %vm13908_vm0 = vnez %v13907_v57  ;;  %v13911_v7 = vld [vmem:[#allocation45_spill] sm:$0xff] }
 0x4a0   : > { %v6431_v29 = vadd.f32 %v6430_v14, %v13355_v24  ;;  %v6364_v22 = vadd.f32 %v6300_v1, %v13897_v13  ;;  %v9323_v58 = vpop.f32.mrb[92].mxu1  ;;  %v6272_v6 = vsel %vm13908_vm0, %v13906_v15, 0.0  ;;  %vm13912_vm1 = vnez %v13911_v7 }
 0x4a1   : > { %v6303_v42 = vadd.f32 %v9323_v58, %v13901_v31  ;;  %v5885_v52 = vpop.f32.mrb[93].mxu1  ;;  %v13375_v53 = vadd.f32 %v13154_v25, %v6365_v60  ;;  %v6337_v33 = vsel %vm13912_vm1, %v13910_v59, 0.0 }
 0x4a2   : > { %v13371_v30 = vadd.f32 %v13154_v25, %v6364_v22  ;;  %v6432_v26 = vadd.f32 %v6431_v29, %v13359_v19  ;;  %v6302_v40 = vadd.f32 %v6270_v44, %v5885_v52  ;;  %v13913_v29 = vld [vmem:[#allocation55_spill] sm:$0xff] }
 0x4a3   : > { %v6367_v16 = vadd.f32 %v6335_v18, %v6303_v42 }
 0x4a4   : > { %v6433_v32 = vadd.f32 %v6432_v26, %v13371_v30  ;;  %v6366_v11 = vadd.f32 %v6302_v40, %v13905_v21  ;;  %v9326_v5 = vpop.f32.mrb[94].mxu1  ;;  %v6463_v40 = vld [vmem:[%s13564_s6] sm:$0x1] }
 0x4a5   : > { %v6305_v41 = vadd.f32 %v9326_v5, %v13909_v49  ;;  %v5895_v62 = vpop.f32.mrb[95].mxu1  ;;  %v13391_v1 = vadd.f32 %v13154_v25, %v6367_v16 }
 0x4a6   : > { %v13387_v34 = vadd.f32 %v13154_v25, %v6366_v11  ;;  %v6434_v48 = vadd.f32 %v6433_v32, %v13375_v53  ;;  %v6304_v4 = vadd.f32 %v6272_v6, %v5895_v62  ;;  %v6536_v11 = vld [vmem:[%s13566_s8] sm:$0x1]  ;;  %v13914_v62 = vld [vmem:[#allocation3_spill] sm:$0xff] }
 0x4a7   : > { %v6369_v14 = vadd.f32 %v6337_v33, %v6305_v41  ;;  %v6655_v59 = vsub.s32 0, %v13914_v62 }
 0x4a8   : > { %v6435_v60 = vadd.f32 %v6434_v48, %v13387_v34  ;;  %v6368_v13 = vadd.f32 %v6304_v4, %v13913_v29 }
 0x4a9   : > { %v13400_v8 = vadd.f32 %v13154_v25, %v6369_v14 }
 0x4aa   : > { %v13396_v22 = vadd.f32 %v13154_v25, %v6368_v13  ;;  %v6436_v58 = vadd.f32 %v6435_v60, %v13391_v1 }
 0x4ac   : > { %v6437_v38 = vadd.f32 %v6436_v58, %v13396_v22 }
 0x4ae   : > { %v6438_v44 = vadd.f32 %v6437_v38, %v13400_v8 }
 0x4b0   : > { %v6439_v31 = vrot.slane %v6438_v44, 4 }
 0x4b2   : > { %v6440_v42 = vadd.f32 %v6439_v31, %v6438_v44  ;;  %v6621_v44 = vld [vmem:[%s10549_s11 + $0x18] sm:$0xff]  ;;  %v6624_v31 = vld [vmem:[%s10549_s11 + $0x30] sm:$0xff] }
 0x4b4   : > { %v6441_v52 = vrot.slane %v6440_v42, 2 }
 0x4b6   : > { %v6442_v56 = vadd.f32 %v6441_v52, %v6440_v42  ;;  %v6628_v52 = vld [vmem:[%s10549_s11 + $0x50] sm:$0xff] }
 0x4b8   : > { %v6443_v45 = vrot.slane %v6442_v56, 1 }
 0x4ba   : > { %v6444_v18 = vadd.f32 %v6443_v45, %v6442_v56 }
 0x4bc   : > { %v6446_v26 = vmul.f32 0.00390625, %v6444_v18  ;;  %v6631_v18 = vld [vmem:[%s10549_s11 + $0x68] sm:$0xff] }
 0x4be   : > { %9440 = vmatmul.mubr.f32.vlgmr.msra.gmra.mrb[96].mxu0 %v6446_v26 }
 0x591   : > { %v6530_v16 = vpop.f32.mrb[96].mxu0 }
 0x592   : > { %v6531_v32 = vadd.f32 %v6530_v16, %v6463_v40  ;;  %v9441_v25 = vpop.f32.mrb[97].mxu0  ;;  %v6633_v40 = vld [vmem:[%s10549_s11 + $0x78] sm:$0xff]  ;;  %v6634_v16 = vld [vmem:[%s10549_s11 + $0x80] sm:$0xff] }
 0x593   : > { %v6636_v25 = vld [vmem:[%s10549_s11 + $0x90] sm:$0xff] }
 0x594   : > { %v6534_v21 = vmax.f32 %v6531_v32, 0.0 }
 0x596   : > { %9445 = vmatmul.mubr.msk.f32.vlgmr.msra.gmra.mrb[96].mxu1 %vm6537_vm2, %v6534_v21  ;;  %v6637_v21 = vld [vmem:[%s10549_s11 + $0x98] sm:$0xff] }
 0x669   : > { %v6611_v5 = vpop.f32.mrb[96].mxu1 }
 0x66a   : > { %v6612_v15 = vadd.f32 %v6611_v5, %v6536_v11  ;;  %v9446_v57 = vpop.f32.mrb[97].mxu1  ;;  %v6639_v5 = vld [vmem:[%s10549_s11 + $0xa8] sm:$0xff] }
 0x66c   : > { %v7081_v6 = vmul.f32 -1.442695, %v6612_v15  ;;  %v6640_v15 = vld [vmem:[%s10549_s11 + $0xb0] sm:$0xff] }
 0x66e   : > { %10443 = vpow2.f32 %v7081_v6 }
 0x678   : > { %v10444_v49 = vpop.eup %10443 }
 0x679   : > { %v6618_v41 = vadd.f32 1.0, %v10444_v49 }
 0x67b   : > { %10445 = vrcp.f32 %v6618_v41  ;;  %v6642_v41 = vld [vmem:[%s10549_s11 + $0xc0] sm:$0xff] }
 0x685   : > { %v10446_v7 = vpop.eup %10445 }
 0x686   : > { %v6656_v33 = vrot.slane %v10446_v7, %v6655_v59 }
 0x688   : > { %v6657_v48 = vmul.f32 %v6656_v33, %v13167_v61  ;;  %v6658_v4 = vmul.f32 %v6656_v33, %v13164_v54  ;;  %v6659_v14 = vmul.f32 %v6656_v33, %v13180_v47  ;;  %v6660_v60 = vmul.f32 %v6656_v33, %v13183_v2 }
 0x689   : > { %v6661_v29 = vmul.f32 %v6656_v33, %v13195_v12  ;;  %v6662_v13 = vmul.f32 %v6656_v33, %v13199_v36  ;;  %v6663_v58 = vmul.f32 %v6656_v33, %v13211_v3  ;;  %v6664_v38 = vmul.f32 %v6656_v33, %v13215_v10  ;;  %v6622_v12 = vld [vmem:[%s10549_s11 + $0x20] sm:$0xff]  ;;  %v6623_v36 = vld [vmem:[%s10549_s11 + $0x28] sm:$0xff] }
 0x68a   : > { %v6665_v61 = vmul.f32 %v6656_v33, %v13227_v9  ;;  %v6666_v54 = vmul.f32 %v6656_v33, %v13231_v27  ;;  %v6667_v47 = vmul.f32 %v6656_v33, %v13243_v17  ;;  %v6668_v2 = vmul.f32 %v6656_v33, %v13247_v39  ;;  %v6625_v27 = vld [vmem:[%s10549_s11 + $0x38] sm:$0xff]  ;;  %v6626_v17 = vld [vmem:[%s10549_s11 + $0x40] sm:$0xff]  ;;  %v6627_v39 = vld [vmem:[%s10549_s11 + $0x48] sm:$0xff] }
 0x68b   : > { %v6669_v3 = vmul.f32 %v6656_v33, %v13259_v43  ;;  %v6670_v10 = vmul.f32 %v6656_v33, %v13263_v35  ;;  %v6671_v42 = vmul.f32 %v6656_v33, %v13275_v55  ;;  %v6672_v9 = vmul.f32 %v6656_v33, %v13279_v37  ;;  %v6629_v55 = vld [vmem:[%s10549_s11 + $0x58] sm:$0xff]  ;;  %v6630_v37 = vld [vmem:[%s10549_s11 + $0x60] sm:$0xff] }
 0x68c   : > { %v13436_v56 = vmul.f32 %v6656_v33, %v13291_v23  ;;  %v13439_v45 = vmul.f32 %v6656_v33, %v13295_v51  ;;  %v13442_v43 = vmul.f32 %v6656_v33, %v13307_v63  ;;  %v13445_v35 = vmul.f32 %v6656_v33, %v13311_v28  ;;  %v6632_v28 = vld [vmem:[%s10549_s11 + $0x70] sm:$0xff] }
 0x68d   : > { %v13451_v26 = vmul.f32 %v6656_v33, %v13323_v0  ;;  %v13454_v23 = vmul.f32 %v6656_v33, %v13327_v50  ;;  %v13457_v51 = vmul.f32 %v6656_v33, %v13339_v20  ;;  %v13460_v63 = vmul.f32 %v6656_v33, %v13343_v46  ;;  %v6635_v46 = vld [vmem:[%s10549_s11 + $0x88] sm:$0xff] }
 0x68e   : > { %v13466_v32 = vmul.f32 %v6656_v33, %v13355_v24  ;;  %v13469_v0 = vmul.f32 %v6656_v33, %v13359_v19  ;;  %v13472_v50 = vmul.f32 %v6656_v33, %v13371_v30  ;;  %v13475_v20 = vmul.f32 %v6656_v33, %v13375_v53  ;;  %v6638_v53 = vld [vmem:[%s10549_s11 + $0xa0] sm:$0xff] }
 0x68f   : > { %v13481_v11 = vmul.f32 %v6656_v33, %v13387_v34  ;;  %v13484_v24 = vmul.f32 %v6656_v33, %v13391_v1  ;;  %v13487_v19 = vmul.f32 %v6656_v33, %v13396_v22  ;;  %v13490_v30 = vmul.f32 %v6656_v33, %v13400_v8  ;;  %v6641_v1 = vld [vmem:[%s10549_s11 + $0xb8] sm:$0xff]  ;;  %v6643_v22 = vld [vmem:[%s10549_s11 + $0xc8] sm:$0xff]  ;;  %v6644_v33 = vld [vmem:[%s10549_s11 + $0xd0] sm:$0xff] }
 0x690   : > { %v6689_v57 = vadd.f32 %v6657_v48, %v6621_v44  ;;  %v6690_v6 = vadd.f32 %v6658_v4, %v6622_v12  ;;  %v6691_v49 = vadd.f32 %v6659_v14, %v6623_v36  ;;  %v6692_v34 = vadd.f32 %v6660_v60, %v6624_v31  ;;  %v6646_v48 = vld [vmem:[%s10549_s11 + $0xe0] sm:$0xff]  ;;  %v6651_v12 = vld [vmem:[%s10549_s11 + $0x108] sm:$0xff]  ;;  %v6652_v36 = vld [vmem:[%s10549_s11 + $0x110] sm:$0xff] }
 0x691   : > { %13915 = vst [vmem:[#allocation37_spill] sm:$0xff] %v13490_v30  ;;  %v6693_v62 = vadd.f32 %v6661_v29, %v6625_v27  ;;  %v6694_v8 = vadd.f32 %v6662_v13, %v6626_v17  ;;  %v6695_v59 = vadd.f32 %v6663_v58, %v6627_v39  ;;  %v6696_v7 = vadd.f32 %v6664_v38, %v6628_v52  ;;  %v6645_v30 = vld [vmem:[%s10549_s11 + $0xd8] sm:$0xff]  ;;  %v6647_v29 = vld [vmem:[%s10549_s11 + $0xe8] sm:$0xff]  ;;  %v6648_v13 = vld [vmem:[%s10549_s11 + $0xf0] sm:$0xff] }
 0x692   : > { %v6697_v4 = vadd.f32 %v6665_v61, %v6629_v55  ;;  %v6698_v14 = vadd.f32 %v6666_v54, %v6630_v37  ;;  %v6699_v60 = vadd.f32 %v6667_v47, %v6631_v18  ;;  %v6700_v44 = vadd.f32 %v6668_v2, %v6632_v28  ;;  %6724 = vst [vmem:[%s11710_s28 + $0x18] sm:$0xff] %v6689_v57  ;;  %v6649_v58 = vld [vmem:[%s10549_s11 + $0xf8] sm:$0xff]  ;;  %v6650_v2 = vld [vmem:[%s10549_s11 + $0x100] sm:$0xff] }
 0x693   : > { %6725 = vst [vmem:[%s11710_s28 + $0x20] sm:$0xff] %v6690_v6  ;;  %6726 = vst [vmem:[%s11710_s28 + $0x28] sm:$0xff] %v6691_v49  ;;  %v6701_v38 = vadd.f32 %v6669_v3, %v6633_v40  ;;  %v6702_v61 = vadd.f32 %v6670_v10, %v6634_v16  ;;  %v6703_v54 = vadd.f32 %v6671_v42, %v6635_v46 }
 0x694   : > { %6727 = vst [vmem:[%s11710_s28 + $0x30] sm:$0xff] %v6692_v34  ;;  %v6704_v47 = vadd.f32 %v6672_v9, %v6636_v25  ;;  %6728 = vst [vmem:[%s11710_s28 + $0x38] sm:$0xff] %v6693_v62  ;;  %v6705_v31 = vadd.f32 %v13436_v56, %v6637_v21  ;;  %v6706_v3 = vadd.f32 %v13439_v45, %v6638_v53 }
 0x695   : > { %6729 = vst [vmem:[%s11710_s28 + $0x40] sm:$0xff] %v6694_v8  ;;  %6730 = vst [vmem:[%s11710_s28 + $0x48] sm:$0xff] %v6695_v59  ;;  %v6707_v10 = vadd.f32 %v13442_v43, %v6639_v5  ;;  %v6708_v42 = vadd.f32 %v13445_v35, %v6640_v15  ;;  %v6709_v9 = vadd.f32 %v13451_v26, %v6641_v1 }
 0x696   : > { %6731 = vst [vmem:[%s11710_s28 + $0x50] sm:$0xff] %v6696_v7  ;;  %6732 = vst [vmem:[%s11710_s28 + $0x58] sm:$0xff] %v6697_v4  ;;  %v6710_v27 = vadd.f32 %v13454_v23, %v6642_v41  ;;  %v6711_v17 = vadd.f32 %v13457_v51, %v6643_v22  ;;  %v6712_v39 = vadd.f32 %v13460_v63, %v6644_v33 }
 0x697   : > { %6733 = vst [vmem:[%s11710_s28 + $0x60] sm:$0xff] %v6698_v14  ;;  %6734 = vst [vmem:[%s11710_s28 + $0x68] sm:$0xff] %v6699_v60  ;;  %v6713_v52 = vadd.f32 %v13466_v32, %v6645_v30  ;;  %v6714_v56 = vadd.f32 %v13469_v0, %v6646_v48  ;;  %v6715_v45 = vadd.f32 %v13472_v50, %v6647_v29 }
 0x698   : > { %6735 = vst [vmem:[%s11710_s28 + $0x70] sm:$0xff] %v6700_v44  ;;  %6736 = vst [vmem:[%s11710_s28 + $0x78] sm:$0xff] %v6701_v38  ;;  %v6716_v43 = vadd.f32 %v13475_v20, %v6648_v13  ;;  %v6717_v35 = vadd.f32 %v13481_v11, %v6649_v58  ;;  %v6718_v55 = vadd.f32 %v13484_v24, %v6650_v2  ;;  %v13916_v18 = vld [vmem:[#allocation37_spill] sm:$0xff] }
 0x699   : > { %6737 = vst [vmem:[%s11710_s28 + $0x80] sm:$0xff] %v6702_v61  ;;  %6738 = vst [vmem:[%s11710_s28 + $0x88] sm:$0xff] %v6703_v54  ;;  %v6719_v37 = vadd.f32 %v13487_v19, %v6651_v12  ;;  %v6720_v26 = vadd.f32 %v13916_v18, %v6652_v36 }
 0x69a   : > { %6739 = vst [vmem:[%s11710_s28 + $0x90] sm:$0xff] %v6704_v47  ;;  %6740 = vst [vmem:[%s11710_s28 + $0x98] sm:$0xff] %v6705_v31 }
 0x69b   : > { %6741 = vst [vmem:[%s11710_s28 + $0xa0] sm:$0xff] %v6706_v3  ;;  %6742 = vst [vmem:[%s11710_s28 + $0xa8] sm:$0xff] %v6707_v10 }
 0x69c   : > { %6743 = vst [vmem:[%s11710_s28 + $0xb0] sm:$0xff] %v6708_v42  ;;  %6744 = vst [vmem:[%s11710_s28 + $0xb8] sm:$0xff] %v6709_v9 }
 0x69d   : > { %6745 = vst [vmem:[%s11710_s28 + $0xc0] sm:$0xff] %v6710_v27  ;;  %6746 = vst [vmem:[%s11710_s28 + $0xc8] sm:$0xff] %v6711_v17 }
 0x69e   : > { %6747 = vst [vmem:[%s11710_s28 + $0xd0] sm:$0xff] %v6712_v39  ;;  %6748 = vst [vmem:[%s11710_s28 + $0xd8] sm:$0xff] %v6713_v52 }
 0x69f   : > { %6749 = vst [vmem:[%s11710_s28 + $0xe0] sm:$0xff] %v6714_v56  ;;  %6750 = vst [vmem:[%s11710_s28 + $0xe8] sm:$0xff] %v6715_v45 }
 0x6a0   : > { %6751 = vst [vmem:[%s11710_s28 + $0xf0] sm:$0xff] %v6716_v43  ;;  %6752 = vst [vmem:[%s11710_s28 + $0xf8] sm:$0xff] %v6717_v35 }
 0x6a1   : > { %6753 = vst [vmem:[%s11710_s28 + $0x100] sm:$0xff] %v6718_v55  ;;  %6754 = vst [vmem:[%s11710_s28 + $0x108] sm:$0xff] %v6719_v37 }
 0x6a2   : > { %6755 = vst [vmem:[%s11710_s28 + $0x110] sm:$0xff] %v6720_v26 }
 0x6a3 PF: > { %s19_s30 = sadd.s32 1, %s10454_s30  }
 0x6a4   : > { %p16_p4 = scmp.ge.s32.totalorder %s19_s30, 4  }
 0x6a6   :  { %18 = sbr.rel (!%p16_p4) target bundleno = 1 (0x1), region = 102 }

</bundles_post_ra>
